<compile_context>
chip_gen: v7x
topology: tpu7x:2x2x1
jax: 0.10.0
libtpu: 0.0.40
codegen_flags: <defaults>
</compile_context>

<pallas_src>
import numpy as np
import jax
import jax.numpy as jnp
from jax.experimental import pallas as pl
from jax.experimental.pallas import tpu as pltpu

CH = 32
CH_2 = CH * 2
HEAD = CH * 6          # final conv feature map must flatten to 192
KER_SI = 5
STRIDE = 2
BN_EPS = 1e-5
N_ACTIONS = 2
OUT_PAD = 128          # head output padded to one full lane group


def _conv_out(n):
    return (n - KER_SI) // STRIDE + 1


# ----------------------------------------------------------------------------
# One-time parameter preparation (BN fold + im2col weight layout + head perm)
# ----------------------------------------------------------------------------
def prepare_params(params, input_hw):
    """Lower PyTorch-style params into fused-kernel form (call once).

    Conv weights become raw im2col matrices (KH*KW*Cin, Cout) bf16 with the eval-mode
    BN scale folded in; conv/BN bias folds into one (1, Cout) f32 row.  The head weight
    columns are permuted from torch's NCHW-flatten order to the kernel's (ow, c) feature
    order and zero-padded to 128 output lanes.
    """
    cur_h, cur_w = input_hw
    prepped = {}
    for li, name in enumerate(("layer1", "layer2", "layer3")):
        wt, b, gamma, beta, mean, var = params[name]
        cout, cin = wt.shape[0], wt.shape[1]
        s = gamma / jnp.sqrt(var + BN_EPS)                       # BN (eval) scale
        w_scaled = wt * s[:, None, None, None]                   # (Cout, Cin, KH, KW)
        wmat = jnp.transpose(w_scaled, (2, 3, 1, 0)).reshape(KER_SI * KER_SI * cin, cout)
        prepped[f"w{li + 1}"] = wmat.astype(jnp.bfloat16)        # rows ordered (kh, kw, ci)
        prepped[f"c{li + 1}"] = (s * (b - mean) + beta).reshape(1, cout).astype(jnp.float32)
        cur_h, cur_w = _conv_out(cur_h), _conv_out(cur_w)

    oh3, ow3 = cur_h, cur_w
    assert oh3 == 1 and ow3 * CH_2 == HEAD, (oh3, ow3)

    # Head: kernel feature lane p = ow*CH_2 + c ; torch flatten column = c*OW3 + ow.
    w_head, b_head = params["head"]                              # (2, HEAD), (2,)
    nout = w_head.shape[0]
    p = jnp.arange(HEAD)
    ow_idx = p // CH_2
    c_idx = p % CH_2
    torch_col = c_idx * ow3 + ow_idx
    wh = w_head.T[torch_col, :]                                  # (HEAD, nout)
    wh_pad = jnp.zeros((HEAD, OUT_PAD), jnp.float32).at[:, :nout].set(wh)
    bh_pad = jnp.zeros((1, OUT_PAD), jnp.float32).at[0, :nout].set(b_head)
    prepped["wh"] = wh_pad.astype(jnp.bfloat16)
    prepped["bh"] = bh_pad
    return prepped


def _row_select(n, h_in, oh):
    """0/1 matrix S (bf16) with (S @ X)[(kh*n + i)*oh + r, :] = X[i*h_in + 2*r + kh, :].

    Built with numpy at trace time (shape-only); replaces strided row reads by one
    tiny MXU matmul per layer.
    """
    rows = KER_SI * n * oh
    s = np.zeros((rows, n * h_in), np.float32)
    r = np.arange(rows)
    kh = r // (n * oh)
    i = (r // oh) % n
    rr = r % oh
    s[r, i * h_in + STRIDE * rr + kh] = 1.0
    return jnp.asarray(s, jnp.bfloat16)


# ----------------------------------------------------------------------------
# The fused Pallas kernel: 3x (conv+bn+relu) + head, activations stay in VMEM
# ----------------------------------------------------------------------------
def _dqn_kernel(x_ref, s1_ref, w1_ref, c1_ref, s2_ref, w2_ref, c2_ref,
                s3_ref, w3_ref, c3_ref, wh_ref, bh_ref, o_ref):

    def conv_layer(x, s_sel, w_mat, bias):
        # x:     (N*H_in, W_in*Cin) bf16, rows (sample, h), lanes (w, ci)
        # s_sel: (KH*N*OH, N*H_in)  bf16 row-selection (handles the H stride)
        # w_mat: (KH*KW*Cin, Cout)  bf16 raw im2col weights (BN scale folded)
        # bias:  (1, Cout)          f32
        n_oh = s_sel.shape[0] // KER_SI                  # N*OH
        cin = w_mat.shape[0] // (KER_SI * KER_SI)
        w_in = x.shape[1] // cin
        ow = _conv_out(w_in)
        kw_cin = KER_SI * cin

        # H-direction gather: one small MXU matmul instead of strided row reads.
        a = jnp.dot(s_sel, x, preferred_element_type=jnp.float32).astype(jnp.bfloat16)

        # W-direction im2col: contiguous lane windows stacked along rows (ow) and
        # lanes (kh)  ->  patches (OW*N*OH, KH*KW*Cin).
        taps = []
        for kh in range(KER_SI):
            a_kh = a[kh * n_oh:(kh + 1) * n_oh, :]
            wins = [a_kh[:, STRIDE * o * cin: STRIDE * o * cin + kw_cin]
                    for o in range(ow)]
            taps.append(jnp.concatenate(wins, axis=0))
        patches = jnp.concatenate(taps, axis=1)

        # One conv GEMM per layer (batch + all 25 taps fused), f32 accumulation.
        acc = jnp.dot(patches, w_mat, preferred_element_type=jnp.float32)
        acc = jnp.maximum(acc + bias, 0.0).astype(jnp.bfloat16)   # (OW*N*OH, Cout)

        # Back to activation-row layout (N*OH, OW*Cout): lanes ordered (ow, co).
        return jnp.concatenate([acc[o * n_oh:(o + 1) * n_oh, :] for o in range(ow)],
                               axis=1)

    x1 = conv_layer(x_ref[...], s1_ref[...], w1_ref[...], c1_ref[...])
    x2 = conv_layer(x1, s2_ref[...], w2_ref[...], c2_ref[...])
    x3 = conv_layer(x2, s3_ref[...], w3_ref[...], c3_ref[...])    # (N, OW3*CH_2)

    # Linear head: weights pre-permuted/padded -> one GEMM + lane-dense 128-wide store.
    q = jnp.dot(x3, wh_ref[...], preferred_element_type=jnp.float32) + bh_ref[...]
    o_ref[...] = q


def _fused_forward(x_rows, s1, s2, s3, p, n_batch):
    args = (x_rows, s1, p["w1"], p["c1"], s2, p["w2"], p["c2"],
            s3, p["w3"], p["c3"], p["wh"], p["bh"])

    # Advisory cost estimate.
    flops = 0
    x_cols = x_rows.shape[1]
    for s, w in ((s1, p["w1"]), (s2, p["w2"]), (s3, p["w3"])):
        kkc, cout = w.shape
        cin = kkc // (KER_SI * KER_SI)
        ow = _conv_out(x_cols // cin)
        n_oh = s.shape[0] // KER_SI
        flops += 2 * s.shape[0] * s.shape[1] * x_cols            # row-gather GEMM
        flops += 2 * (ow * n_oh) * kkc * cout                    # conv GEMM
        x_cols = ow * cout
    flops += 2 * n_batch * HEAD * OUT_PAD                        # head GEMM
    bytes_accessed = sum(int(a.size) * a.dtype.itemsize for a in args)
    bytes_accessed += n_batch * OUT_PAD * 4

    return pl.pallas_call(
        _dqn_kernel,
        out_shape=jax.ShapeDtypeStruct((n_batch, OUT_PAD), jnp.float32),
        grid=(1,),
        in_specs=[pl.BlockSpec(a.shape, lambda i: (0, 0)) for a in args],
        out_specs=pl.BlockSpec((n_batch, OUT_PAD), lambda i: (0, 0)),
        compiler_params=pltpu.CompilerParams(dimension_semantics=("arbitrary",)),
        cost_estimate=pl.CostEstimate(flops=int(flops), transcendentals=0,
                                      bytes_accessed=int(bytes_accessed)),
    )(*args)


@jax.jit
def dqn_forward(prepped, x_nchw):
    n, c, h, w = x_nchw.shape
    # Per-call glue: NCHW -> (N*H, W*C) bf16 rows (channels fastest within lanes).
    x_rows = jnp.transpose(x_nchw, (0, 2, 3, 1)).reshape(n * h, w * c).astype(jnp.bfloat16)
    oh1 = _conv_out(h)
    oh2 = _conv_out(oh1)
    oh3 = _conv_out(oh2)
    s1 = _row_select(n, h, oh1)
    s2 = _row_select(n, oh1, oh2)
    s3 = _row_select(n, oh2, oh3)
    q_pad = _fused_forward(x_rows, s1, s2, s3, prepped, n)
    return q_pad[:, :N_ACTIONS]


# ----------------------------------------------------------------------------
# Deterministic parameter init (shapes per DQN.__init__)
# ----------------------------------------------------------------------------
def init_params(key):
    ks = jax.random.split(key, 16)

    def conv_layer(k0, k1, k2, k3, cin, cout):
        w = 0.05 * jax.random.normal(k0, (cout, cin, KER_SI, KER_SI), jnp.float32)
        b = 0.05 * jax.random.normal(k1, (cout,), jnp.float32)
        gamma = 1.0 + 0.1 * jax.random.normal(k2, (cout,), jnp.float32)
        beta = 0.1 * jax.random.normal(k3, (cout,), jnp.float32)
        mean = jnp.zeros((cout,), jnp.float32)
        var = jnp.ones((cout,), jnp.float32)
        return (w, b, gamma, beta, mean, var)

    return {
        "layer1": conv_layer(ks[0], ks[1], ks[2], ks[3], 3, CH),
        "layer2": conv_layer(ks[4], ks[5], ks[6], ks[7], CH, CH_2),
        "layer3": conv_layer(ks[8], ks[9], ks[10], ks[11], CH_2, CH_2),
        "head": (0.05 * jax.random.normal(ks[12], (N_ACTIONS, HEAD), jnp.float32),
                 0.05 * jax.random.normal(ks[13], (N_ACTIONS,), jnp.float32)),
    }


# ----------------------------------------------------------------------------
# Pure-JAX reference (for correctness check only, f32 end to end)
# ----------------------------------------------------------------------------
def _ref_forward(params, x_nchw):
    def layer(x, w, b, gamma, beta, mean, var):
        y = jax.lax.conv_general_dilated(
            x, w, window_strides=(STRIDE, STRIDE), padding="VALID",
            dimension_numbers=("NCHW", "OIHW", "NCHW"))
        y = y + b[None, :, None, None]
        s = gamma / jnp.sqrt(var + BN_EPS)
        y = s[None, :, None, None] * (y - mean[None, :, None, None]) + beta[None, :, None, None]
        return jnp.maximum(y, 0.0)

    x = layer(x_nchw, *params["layer1"])
    x = layer(x, *params["layer2"])
    x = layer(x, *params["layer3"])
    x = x.reshape(x.shape[0], -1)
    w_head, b_head = params["head"]
    return x @ w_head.T + b_head


if __name__ == "__main__":
    key = jax.random.PRNGKey(0)
    params = init_params(key)

    # Input spatial size chosen so the flattened conv3 output is HEAD = 192:
    # 29 -> 13 -> 5 -> 1 and 45 -> 21 -> 9 -> 3 ; 64 * 1 * 3 = 192.
    x = jax.random.normal(jax.random.PRNGKey(1), (2, 3, 29, 45), jnp.float32)

    prepped = prepare_params(params, (29, 45))   # one-time weight lowering
    out = jax.block_until_ready(dqn_forward(prepped, x))
    ref = jax.block_until_ready(_ref_forward(params, x))

    assert out.shape == (2, N_ACTIONS), out.shape
    # bf16 MXU inputs / bf16 inter-layer activations with f32 accumulation.
    assert jnp.allclose(out, ref, atol=3e-2, rtol=3e-2), (out, ref)
    print("KERNEL_OK")
</pallas_src>

<mosaic_0001>
module attributes {stable_mosaic.version = 11 : i64} {
  func.func @_dqn_kernel(%arg0: i32, %arg1: memref<58x135xbf16, #tpu.memory_space<vmem>>, %arg2: memref<130x58xbf16, #tpu.memory_space<vmem>>, %arg3: memref<75x32xbf16, #tpu.memory_space<vmem>>, %arg4: memref<1x32xf32, #tpu.memory_space<vmem>>, %arg5: memref<50x26xbf16, #tpu.memory_space<vmem>>, %arg6: memref<800x64xbf16, #tpu.memory_space<vmem>>, %arg7: memref<1x64xf32, #tpu.memory_space<vmem>>, %arg8: memref<10x10xbf16, #tpu.memory_space<vmem>>, %arg9: memref<1600x64xbf16, #tpu.memory_space<vmem>>, %arg10: memref<1x64xf32, #tpu.memory_space<vmem>>, %arg11: memref<192x128xbf16, #tpu.memory_space<vmem>>, %arg12: memref<1x128xf32, #tpu.memory_space<vmem>>, %arg13: memref<2x128xf32, #tpu.memory_space<vmem>>) attributes {dimension_semantics = [#tpu.dimension_semantics<arbitrary>], iteration_bounds = array<i64: 1>, scalar_prefetch = 0 : i64, scratch_operands = 0 : i64, tpu.core_type = #tpu.core_type<tc>, window_params = [{pipeline_mode = #tpu.pipeline_mode<synchronous>, transform_indices = @transform_0, window_bounds = array<i64: 58, 135>}, {pipeline_mode = #tpu.pipeline_mode<synchronous>, transform_indices = @transform_1, window_bounds = array<i64: 130, 58>}, {pipeline_mode = #tpu.pipeline_mode<synchronous>, transform_indices = @transform_2, window_bounds = array<i64: 75, 32>}, {pipeline_mode = #tpu.pipeline_mode<synchronous>, transform_indices = @transform_3, window_bounds = array<i64: 1, 32>}, {pipeline_mode = #tpu.pipeline_mode<synchronous>, transform_indices = @transform_4, window_bounds = array<i64: 50, 26>}, {pipeline_mode = #tpu.pipeline_mode<synchronous>, transform_indices = @transform_5, window_bounds = array<i64: 800, 64>}, {pipeline_mode = #tpu.pipeline_mode<synchronous>, transform_indices = @transform_6, window_bounds = array<i64: 1, 64>}, {pipeline_mode = #tpu.pipeline_mode<synchronous>, transform_indices = @transform_7, window_bounds = array<i64: 10, 10>}, {pipeline_mode = #tpu.pipeline_mode<synchronous>, transform_indices = @transform_8, window_bounds = array<i64: 1600, 64>}, {pipeline_mode = #tpu.pipeline_mode<synchronous>, transform_indices = @transform_9, window_bounds = array<i64: 1, 64>}, {pipeline_mode = #tpu.pipeline_mode<synchronous>, transform_indices = @transform_10, window_bounds = array<i64: 192, 128>}, {pipeline_mode = #tpu.pipeline_mode<synchronous>, transform_indices = @transform_11, window_bounds = array<i64: 1, 128>}, {pipeline_mode = #tpu.pipeline_mode<synchronous>, transform_indices = @transform_12, window_bounds = array<i64: 2, 128>}]} {
    %c0 = arith.constant 0 : index
    %c0_0 = arith.constant 0 : index
    %0 = vector.load %arg1[%c0, %c0_0] : memref<58x135xbf16, #tpu.memory_space<vmem>>, vector<58x135xbf16>
    %c0_1 = arith.constant 0 : index
    %c0_2 = arith.constant 0 : index
    %1 = vector.load %arg2[%c0_1, %c0_2] : memref<130x58xbf16, #tpu.memory_space<vmem>>, vector<130x58xbf16>
    %c0_3 = arith.constant 0 : index
    %c0_4 = arith.constant 0 : index
    %2 = vector.load %arg3[%c0_3, %c0_4] : memref<75x32xbf16, #tpu.memory_space<vmem>>, vector<75x32xbf16>
    %c0_5 = arith.constant 0 : index
    %c0_6 = arith.constant 0 : index
    %3 = vector.load %arg4[%c0_5, %c0_6] : memref<1x32xf32, #tpu.memory_space<vmem>>, vector<1x32xf32>
    %cst = arith.constant dense<0.000000e+00> : vector<130x135xf32>
    %4 = tpu.matmul %1, %0, %cst {dimension_numbers = #tpu.dot_dimension_numbers<[1], [0], [0], [1], [0, 0, 1, 1], [], []>} : vector<130x58xbf16>, vector<58x135xbf16>, vector<130x135xf32> -> vector<130x135xf32>
    %5 = arith.truncf %4 : vector<130x135xf32> to vector<130x135xbf16>
    %6 = vector.extract_strided_slice %5 {offsets = [0, 0], sizes = [26, 135], strides = [1, 1]} : vector<130x135xbf16> to vector<26x135xbf16>
    %7 = vector.extract_strided_slice %6 {offsets = [0, 0], sizes = [26, 15], strides = [1, 1]} : vector<26x135xbf16> to vector<26x15xbf16>
    %8 = vector.extract_strided_slice %6 {offsets = [0, 6], sizes = [26, 15], strides = [1, 1]} : vector<26x135xbf16> to vector<26x15xbf16>
    %9 = vector.extract_strided_slice %6 {offsets = [0, 12], sizes = [26, 15], strides = [1, 1]} : vector<26x135xbf16> to vector<26x15xbf16>
    %10 = vector.extract_strided_slice %6 {offsets = [0, 18], sizes = [26, 15], strides = [1, 1]} : vector<26x135xbf16> to vector<26x15xbf16>
    %11 = vector.extract_strided_slice %6 {offsets = [0, 24], sizes = [26, 15], strides = [1, 1]} : vector<26x135xbf16> to vector<26x15xbf16>
    %12 = vector.extract_strided_slice %6 {offsets = [0, 30], sizes = [26, 15], strides = [1, 1]} : vector<26x135xbf16> to vector<26x15xbf16>
    %13 = vector.extract_strided_slice %6 {offsets = [0, 36], sizes = [26, 15], strides = [1, 1]} : vector<26x135xbf16> to vector<26x15xbf16>
    %14 = vector.extract_strided_slice %6 {offsets = [0, 42], sizes = [26, 15], strides = [1, 1]} : vector<26x135xbf16> to vector<26x15xbf16>
    %15 = vector.extract_strided_slice %6 {offsets = [0, 48], sizes = [26, 15], strides = [1, 1]} : vector<26x135xbf16> to vector<26x15xbf16>
    %16 = vector.extract_strided_slice %6 {offsets = [0, 54], sizes = [26, 15], strides = [1, 1]} : vector<26x135xbf16> to vector<26x15xbf16>
    %17 = vector.extract_strided_slice %6 {offsets = [0, 60], sizes = [26, 15], strides = [1, 1]} : vector<26x135xbf16> to vector<26x15xbf16>
    %18 = vector.extract_strided_slice %6 {offsets = [0, 66], sizes = [26, 15], strides = [1, 1]} : vector<26x135xbf16> to vector<26x15xbf16>
    %19 = vector.extract_strided_slice %6 {offsets = [0, 72], sizes = [26, 15], strides = [1, 1]} : vector<26x135xbf16> to vector<26x15xbf16>
    %20 = vector.extract_strided_slice %6 {offsets = [0, 78], sizes = [26, 15], strides = [1, 1]} : vector<26x135xbf16> to vector<26x15xbf16>
    %21 = vector.extract_strided_slice %6 {offsets = [0, 84], sizes = [26, 15], strides = [1, 1]} : vector<26x135xbf16> to vector<26x15xbf16>
    %22 = vector.extract_strided_slice %6 {offsets = [0, 90], sizes = [26, 15], strides = [1, 1]} : vector<26x135xbf16> to vector<26x15xbf16>
    %23 = vector.extract_strided_slice %6 {offsets = [0, 96], sizes = [26, 15], strides = [1, 1]} : vector<26x135xbf16> to vector<26x15xbf16>
    %24 = vector.extract_strided_slice %6 {offsets = [0, 102], sizes = [26, 15], strides = [1, 1]} : vector<26x135xbf16> to vector<26x15xbf16>
    %25 = vector.extract_strided_slice %6 {offsets = [0, 108], sizes = [26, 15], strides = [1, 1]} : vector<26x135xbf16> to vector<26x15xbf16>
    %26 = vector.extract_strided_slice %6 {offsets = [0, 114], sizes = [26, 15], strides = [1, 1]} : vector<26x135xbf16> to vector<26x15xbf16>
    %27 = vector.extract_strided_slice %6 {offsets = [0, 120], sizes = [26, 15], strides = [1, 1]} : vector<26x135xbf16> to vector<26x15xbf16>
    %28 = tpu.concatenate %7, %8, %9, %10, %11, %12, %13, %14, %15, %16, %17, %18, %19, %20, %21, %22 in 0 : vector<26x15xbf16>, vector<26x15xbf16>, vector<26x15xbf16>, vector<26x15xbf16>, vector<26x15xbf16>, vector<26x15xbf16>, vector<26x15xbf16>, vector<26x15xbf16>, vector<26x15xbf16>, vector<26x15xbf16>, vector<26x15xbf16>, vector<26x15xbf16>, vector<26x15xbf16>, vector<26x15xbf16>, vector<26x15xbf16>, vector<26x15xbf16> -> vector<416x15xbf16>
    %29 = tpu.concatenate %23, %24, %25, %26, %27 in 0 : vector<26x15xbf16>, vector<26x15xbf16>, vector<26x15xbf16>, vector<26x15xbf16>, vector<26x15xbf16> -> vector<130x15xbf16>
    %30 = tpu.concatenate %28, %29 in 0 : vector<416x15xbf16>, vector<130x15xbf16> -> vector<546x15xbf16>
    %31 = vector.extract_strided_slice %5 {offsets = [26, 0], sizes = [26, 135], strides = [1, 1]} : vector<130x135xbf16> to vector<26x135xbf16>
    %32 = vector.extract_strided_slice %31 {offsets = [0, 0], sizes = [26, 15], strides = [1, 1]} : vector<26x135xbf16> to vector<26x15xbf16>
    %33 = vector.extract_strided_slice %31 {offsets = [0, 6], sizes = [26, 15], strides = [1, 1]} : vector<26x135xbf16> to vector<26x15xbf16>
    %34 = vector.extract_strided_slice %31 {offsets = [0, 12], sizes = [26, 15], strides = [1, 1]} : vector<26x135xbf16> to vector<26x15xbf16>
    %35 = vector.extract_strided_slice %31 {offsets = [0, 18], sizes = [26, 15], strides = [1, 1]} : vector<26x135xbf16> to vector<26x15xbf16>
    %36 = vector.extract_strided_slice %31 {offsets = [0, 24], sizes = [26, 15], strides = [1, 1]} : vector<26x135xbf16> to vector<26x15xbf16>
    %37 = vector.extract_strided_slice %31 {offsets = [0, 30], sizes = [26, 15], strides = [1, 1]} : vector<26x135xbf16> to vector<26x15xbf16>
    %38 = vector.extract_strided_slice %31 {offsets = [0, 36], sizes = [26, 15], strides = [1, 1]} : vector<26x135xbf16> to vector<26x15xbf16>
    %39 = vector.extract_strided_slice %31 {offsets = [0, 42], sizes = [26, 15], strides = [1, 1]} : vector<26x135xbf16> to vector<26x15xbf16>
    %40 = vector.extract_strided_slice %31 {offsets = [0, 48], sizes = [26, 15], strides = [1, 1]} : vector<26x135xbf16> to vector<26x15xbf16>
    %41 = vector.extract_strided_slice %31 {offsets = [0, 54], sizes = [26, 15], strides = [1, 1]} : vector<26x135xbf16> to vector<26x15xbf16>
    %42 = vector.extract_strided_slice %31 {offsets = [0, 60], sizes = [26, 15], strides = [1, 1]} : vector<26x135xbf16> to vector<26x15xbf16>
    %43 = vector.extract_strided_slice %31 {offsets = [0, 66], sizes = [26, 15], strides = [1, 1]} : vector<26x135xbf16> to vector<26x15xbf16>
    %44 = vector.extract_strided_slice %31 {offsets = [0, 72], sizes = [26, 15], strides = [1, 1]} : vector<26x135xbf16> to vector<26x15xbf16>
    %45 = vector.extract_strided_slice %31 {offsets = [0, 78], sizes = [26, 15], strides = [1, 1]} : vector<26x135xbf16> to vector<26x15xbf16>
    %46 = vector.extract_strided_slice %31 {offsets = [0, 84], sizes = [26, 15], strides = [1, 1]} : vector<26x135xbf16> to vector<26x15xbf16>
    %47 = vector.extract_strided_slice %31 {offsets = [0, 90], sizes = [26, 15], strides = [1, 1]} : vector<26x135xbf16> to vector<26x15xbf16>
    %48 = vector.extract_strided_slice %31 {offsets = [0, 96], sizes = [26, 15], strides = [1, 1]} : vector<26x135xbf16> to vector<26x15xbf16>
    %49 = vector.extract_strided_slice %31 {offsets = [0, 102], sizes = [26, 15], strides = [1, 1]} : vector<26x135xbf16> to vector<26x15xbf16>
    %50 = vector.extract_strided_slice %31 {offsets = [0, 108], sizes = [26, 15], strides = [1, 1]} : vector<26x135xbf16> to vector<26x15xbf16>
    %51 = vector.extract_strided_slice %31 {offsets = [0, 114], sizes = [26, 15], strides = [1, 1]} : vector<26x135xbf16> to vector<26x15xbf16>
    %52 = vector.extract_strided_slice %31 {offsets = [0, 120], sizes = [26, 15], strides = [1, 1]} : vector<26x135xbf16> to vector<26x15xbf16>
    %53 = tpu.concatenate %32, %33, %34, %35, %36, %37, %38, %39, %40, %41, %42, %43, %44, %45, %46, %47 in 0 : vector<26x15xbf16>, vector<26x15xbf16>, vector<26x15xbf16>, vector<26x15xbf16>, vector<26x15xbf16>, vector<26x15xbf16>, vector<26x15xbf16>, vector<26x15xbf16>, vector<26x15xbf16>, vector<26x15xbf16>, vector<26x15xbf16>, vector<26x15xbf16>, vector<26x15xbf16>, vector<26x15xbf16>, vector<26x15xbf16>, vector<26x15xbf16> -> vector<416x15xbf16>
    %54 = tpu.concatenate %48, %49, %50, %51, %52 in 0 : vector<26x15xbf16>, vector<26x15xbf16>, vector<26x15xbf16>, vector<26x15xbf16>, vector<26x15xbf16> -> vector<130x15xbf16>
    %55 = tpu.concatenate %53, %54 in 0 : vector<416x15xbf16>, vector<130x15xbf16> -> vector<546x15xbf16>
    %56 = vector.extract_strided_slice %5 {offsets = [52, 0], sizes = [26, 135], strides = [1, 1]} : vector<130x135xbf16> to vector<26x135xbf16>
    %57 = vector.extract_strided_slice %56 {offsets = [0, 0], sizes = [26, 15], strides = [1, 1]} : vector<26x135xbf16> to vector<26x15xbf16>
    %58 = vector.extract_strided_slice %56 {offsets = [0, 6], sizes = [26, 15], strides = [1, 1]} : vector<26x135xbf16> to vector<26x15xbf16>
    %59 = vector.extract_strided_slice %56 {offsets = [0, 12], sizes = [26, 15], strides = [1, 1]} : vector<26x135xbf16> to vector<26x15xbf16>
    %60 = vector.extract_strided_slice %56 {offsets = [0, 18], sizes = [26, 15], strides = [1, 1]} : vector<26x135xbf16> to vector<26x15xbf16>
    %61 = vector.extract_strided_slice %56 {offsets = [0, 24], sizes = [26, 15], strides = [1, 1]} : vector<26x135xbf16> to vector<26x15xbf16>
    %62 = vector.extract_strided_slice %56 {offsets = [0, 30], sizes = [26, 15], strides = [1, 1]} : vector<26x135xbf16> to vector<26x15xbf16>
    %63 = vector.extract_strided_slice %56 {offsets = [0, 36], sizes = [26, 15], strides = [1, 1]} : vector<26x135xbf16> to vector<26x15xbf16>
    %64 = vector.extract_strided_slice %56 {offsets = [0, 42], sizes = [26, 15], strides = [1, 1]} : vector<26x135xbf16> to vector<26x15xbf16>
    %65 = vector.extract_strided_slice %56 {offsets = [0, 48], sizes = [26, 15], strides = [1, 1]} : vector<26x135xbf16> to vector<26x15xbf16>
    %66 = vector.extract_strided_slice %56 {offsets = [0, 54], sizes = [26, 15], strides = [1, 1]} : vector<26x135xbf16> to vector<26x15xbf16>
    %67 = vector.extract_strided_slice %56 {offsets = [0, 60], sizes = [26, 15], strides = [1, 1]} : vector<26x135xbf16> to vector<26x15xbf16>
    %68 = vector.extract_strided_slice %56 {offsets = [0, 66], sizes = [26, 15], strides = [1, 1]} : vector<26x135xbf16> to vector<26x15xbf16>
    %69 = vector.extract_strided_slice %56 {offsets = [0, 72], sizes = [26, 15], strides = [1, 1]} : vector<26x135xbf16> to vector<26x15xbf16>
    %70 = vector.extract_strided_slice %56 {offsets = [0, 78], sizes = [26, 15], strides = [1, 1]} : vector<26x135xbf16> to vector<26x15xbf16>
    %71 = vector.extract_strided_slice %56 {offsets = [0, 84], sizes = [26, 15], strides = [1, 1]} : vector<26x135xbf16> to vector<26x15xbf16>
    %72 = vector.extract_strided_slice %56 {offsets = [0, 90], sizes = [26, 15], strides = [1, 1]} : vector<26x135xbf16> to vector<26x15xbf16>
    %73 = vector.extract_strided_slice %56 {offsets = [0, 96], sizes = [26, 15], strides = [1, 1]} : vector<26x135xbf16> to vector<26x15xbf16>
    %74 = vector.extract_strided_slice %56 {offsets = [0, 102], sizes = [26, 15], strides = [1, 1]} : vector<26x135xbf16> to vector<26x15xbf16>
    %75 = vector.extract_strided_slice %56 {offsets = [0, 108], sizes = [26, 15], strides = [1, 1]} : vector<26x135xbf16> to vector<26x15xbf16>
    %76 = vector.extract_strided_slice %56 {offsets = [0, 114], sizes = [26, 15], strides = [1, 1]} : vector<26x135xbf16> to vector<26x15xbf16>
    %77 = vector.extract_strided_slice %56 {offsets = [0, 120], sizes = [26, 15], strides = [1, 1]} : vector<26x135xbf16> to vector<26x15xbf16>
    %78 = tpu.concatenate %57, %58, %59, %60, %61, %62, %63, %64, %65, %66, %67, %68, %69, %70, %71, %72 in 0 : vector<26x15xbf16>, vector<26x15xbf16>, vector<26x15xbf16>, vector<26x15xbf16>, vector<26x15xbf16>, vector<26x15xbf16>, vector<26x15xbf16>, vector<26x15xbf16>, vector<26x15xbf16>, vector<26x15xbf16>, vector<26x15xbf16>, vector<26x15xbf16>, vector<26x15xbf16>, vector<26x15xbf16>, vector<26x15xbf16>, vector<26x15xbf16> -> vector<416x15xbf16>
    %79 = tpu.concatenate %73, %74, %75, %76, %77 in 0 : vector<26x15xbf16>, vector<26x15xbf16>, vector<26x15xbf16>, vector<26x15xbf16>, vector<26x15xbf16> -> vector<130x15xbf16>
    %80 = tpu.concatenate %78, %79 in 0 : vector<416x15xbf16>, vector<130x15xbf16> -> vector<546x15xbf16>
    %81 = vector.extract_strided_slice %5 {offsets = [78, 0], sizes = [26, 135], strides = [1, 1]} : vector<130x135xbf16> to vector<26x135xbf16>
    %82 = vector.extract_strided_slice %81 {offsets = [0, 0], sizes = [26, 15], strides = [1, 1]} : vector<26x135xbf16> to vector<26x15xbf16>
    %83 = vector.extract_strided_slice %81 {offsets = [0, 6], sizes = [26, 15], strides = [1, 1]} : vector<26x135xbf16> to vector<26x15xbf16>
    %84 = vector.extract_strided_slice %81 {offsets = [0, 12], sizes = [26, 15], strides = [1, 1]} : vector<26x135xbf16> to vector<26x15xbf16>
    %85 = vector.extract_strided_slice %81 {offsets = [0, 18], sizes = [26, 15], strides = [1, 1]} : vector<26x135xbf16> to vector<26x15xbf16>
    %86 = vector.extract_strided_slice %81 {offsets = [0, 24], sizes = [26, 15], strides = [1, 1]} : vector<26x135xbf16> to vector<26x15xbf16>
    %87 = vector.extract_strided_slice %81 {offsets = [0, 30], sizes = [26, 15], strides = [1, 1]} : vector<26x135xbf16> to vector<26x15xbf16>
    %88 = vector.extract_strided_slice %81 {offsets = [0, 36], sizes = [26, 15], strides = [1, 1]} : vector<26x135xbf16> to vector<26x15xbf16>
    %89 = vector.extract_strided_slice %81 {offsets = [0, 42], sizes = [26, 15], strides = [1, 1]} : vector<26x135xbf16> to vector<26x15xbf16>
    %90 = vector.extract_strided_slice %81 {offsets = [0, 48], sizes = [26, 15], strides = [1, 1]} : vector<26x135xbf16> to vector<26x15xbf16>
    %91 = vector.extract_strided_slice %81 {offsets = [0, 54], sizes = [26, 15], strides = [1, 1]} : vector<26x135xbf16> to vector<26x15xbf16>
    %92 = vector.extract_strided_slice %81 {offsets = [0, 60], sizes = [26, 15], strides = [1, 1]} : vector<26x135xbf16> to vector<26x15xbf16>
    %93 = vector.extract_strided_slice %81 {offsets = [0, 66], sizes = [26, 15], strides = [1, 1]} : vector<26x135xbf16> to vector<26x15xbf16>
    %94 = vector.extract_strided_slice %81 {offsets = [0, 72], sizes = [26, 15], strides = [1, 1]} : vector<26x135xbf16> to vector<26x15xbf16>
    %95 = vector.extract_strided_slice %81 {offsets = [0, 78], sizes = [26, 15], strides = [1, 1]} : vector<26x135xbf16> to vector<26x15xbf16>
    %96 = vector.extract_strided_slice %81 {offsets = [0, 84], sizes = [26, 15], strides = [1, 1]} : vector<26x135xbf16> to vector<26x15xbf16>
    %97 = vector.extract_strided_slice %81 {offsets = [0, 90], sizes = [26, 15], strides = [1, 1]} : vector<26x135xbf16> to vector<26x15xbf16>
    %98 = vector.extract_strided_slice %81 {offsets = [0, 96], sizes = [26, 15], strides = [1, 1]} : vector<26x135xbf16> to vector<26x15xbf16>
    %99 = vector.extract_strided_slice %81 {offsets = [0, 102], sizes = [26, 15], strides = [1, 1]} : vector<26x135xbf16> to vector<26x15xbf16>
    %100 = vector.extract_strided_slice %81 {offsets = [0, 108], sizes = [26, 15], strides = [1, 1]} : vector<26x135xbf16> to vector<26x15xbf16>
    %101 = vector.extract_strided_slice %81 {offsets = [0, 114], sizes = [26, 15], strides = [1, 1]} : vector<26x135xbf16> to vector<26x15xbf16>
    %102 = vector.extract_strided_slice %81 {offsets = [0, 120], sizes = [26, 15], strides = [1, 1]} : vector<26x135xbf16> to vector<26x15xbf16>
    %103 = tpu.concatenate %82, %83, %84, %85, %86, %87, %88, %89, %90, %91, %92, %93, %94, %95, %96, %97 in 0 : vector<26x15xbf16>, vector<26x15xbf16>, vector<26x15xbf16>, vector<26x15xbf16>, vector<26x15xbf16>, vector<26x15xbf16>, vector<26x15xbf16>, vector<26x15xbf16>, vector<26x15xbf16>, vector<26x15xbf16>, vector<26x15xbf16>, vector<26x15xbf16>, vector<26x15xbf16>, vector<26x15xbf16>, vector<26x15xbf16>, vector<26x15xbf16> -> vector<416x15xbf16>
    %104 = tpu.concatenate %98, %99, %100, %101, %102 in 0 : vector<26x15xbf16>, vector<26x15xbf16>, vector<26x15xbf16>, vector<26x15xbf16>, vector<26x15xbf16> -> vector<130x15xbf16>
    %105 = tpu.concatenate %103, %104 in 0 : vector<416x15xbf16>, vector<130x15xbf16> -> vector<546x15xbf16>
    %106 = vector.extract_strided_slice %5 {offsets = [104, 0], sizes = [26, 135], strides = [1, 1]} : vector<130x135xbf16> to vector<26x135xbf16>
    %107 = vector.extract_strided_slice %106 {offsets = [0, 0], sizes = [26, 15], strides = [1, 1]} : vector<26x135xbf16> to vector<26x15xbf16>
    %108 = vector.extract_strided_slice %106 {offsets = [0, 6], sizes = [26, 15], strides = [1, 1]} : vector<26x135xbf16> to vector<26x15xbf16>
    %109 = vector.extract_strided_slice %106 {offsets = [0, 12], sizes = [26, 15], strides = [1, 1]} : vector<26x135xbf16> to vector<26x15xbf16>
    %110 = vector.extract_strided_slice %106 {offsets = [0, 18], sizes = [26, 15], strides = [1, 1]} : vector<26x135xbf16> to vector<26x15xbf16>
    %111 = vector.extract_strided_slice %106 {offsets = [0, 24], sizes = [26, 15], strides = [1, 1]} : vector<26x135xbf16> to vector<26x15xbf16>
    %112 = vector.extract_strided_slice %106 {offsets = [0, 30], sizes = [26, 15], strides = [1, 1]} : vector<26x135xbf16> to vector<26x15xbf16>
    %113 = vector.extract_strided_slice %106 {offsets = [0, 36], sizes = [26, 15], strides = [1, 1]} : vector<26x135xbf16> to vector<26x15xbf16>
    %114 = vector.extract_strided_slice %106 {offsets = [0, 42], sizes = [26, 15], strides = [1, 1]} : vector<26x135xbf16> to vector<26x15xbf16>
    %115 = vector.extract_strided_slice %106 {offsets = [0, 48], sizes = [26, 15], strides = [1, 1]} : vector<26x135xbf16> to vector<26x15xbf16>
    %116 = vector.extract_strided_slice %106 {offsets = [0, 54], sizes = [26, 15], strides = [1, 1]} : vector<26x135xbf16> to vector<26x15xbf16>
    %117 = vector.extract_strided_slice %106 {offsets = [0, 60], sizes = [26, 15], strides = [1, 1]} : vector<26x135xbf16> to vector<26x15xbf16>
    %118 = vector.extract_strided_slice %106 {offsets = [0, 66], sizes = [26, 15], strides = [1, 1]} : vector<26x135xbf16> to vector<26x15xbf16>
    %119 = vector.extract_strided_slice %106 {offsets = [0, 72], sizes = [26, 15], strides = [1, 1]} : vector<26x135xbf16> to vector<26x15xbf16>
    %120 = vector.extract_strided_slice %106 {offsets = [0, 78], sizes = [26, 15], strides = [1, 1]} : vector<26x135xbf16> to vector<26x15xbf16>
    %121 = vector.extract_strided_slice %106 {offsets = [0, 84], sizes = [26, 15], strides = [1, 1]} : vector<26x135xbf16> to vector<26x15xbf16>
    %122 = vector.extract_strided_slice %106 {offsets = [0, 90], sizes = [26, 15], strides = [1, 1]} : vector<26x135xbf16> to vector<26x15xbf16>
    %123 = vector.extract_strided_slice %106 {offsets = [0, 96], sizes = [26, 15], strides = [1, 1]} : vector<26x135xbf16> to vector<26x15xbf16>
    %124 = vector.extract_strided_slice %106 {offsets = [0, 102], sizes = [26, 15], strides = [1, 1]} : vector<26x135xbf16> to vector<26x15xbf16>
    %125 = vector.extract_strided_slice %106 {offsets = [0, 108], sizes = [26, 15], strides = [1, 1]} : vector<26x135xbf16> to vector<26x15xbf16>
    %126 = vector.extract_strided_slice %106 {offsets = [0, 114], sizes = [26, 15], strides = [1, 1]} : vector<26x135xbf16> to vector<26x15xbf16>
    %127 = vector.extract_strided_slice %106 {offsets = [0, 120], sizes = [26, 15], strides = [1, 1]} : vector<26x135xbf16> to vector<26x15xbf16>
    %128 = tpu.concatenate %107, %108, %109, %110, %111, %112, %113, %114, %115, %116, %117, %118, %119, %120, %121, %122 in 0 : vector<26x15xbf16>, vector<26x15xbf16>, vector<26x15xbf16>, vector<26x15xbf16>, vector<26x15xbf16>, vector<26x15xbf16>, vector<26x15xbf16>, vector<26x15xbf16>, vector<26x15xbf16>, vector<26x15xbf16>, vector<26x15xbf16>, vector<26x15xbf16>, vector<26x15xbf16>, vector<26x15xbf16>, vector<26x15xbf16>, vector<26x15xbf16> -> vector<416x15xbf16>
    %129 = tpu.concatenate %123, %124, %125, %126, %127 in 0 : vector<26x15xbf16>, vector<26x15xbf16>, vector<26x15xbf16>, vector<26x15xbf16>, vector<26x15xbf16> -> vector<130x15xbf16>
    %130 = tpu.concatenate %128, %129 in 0 : vector<416x15xbf16>, vector<130x15xbf16> -> vector<546x15xbf16>
    %131 = tpu.concatenate %30, %55, %80, %105, %130 in 1 : vector<546x15xbf16>, vector<546x15xbf16>, vector<546x15xbf16>, vector<546x15xbf16>, vector<546x15xbf16> -> vector<546x75xbf16>
    %cst_7 = arith.constant dense<0.000000e+00> : vector<546x32xf32>
    %132 = tpu.matmul %131, %2, %cst_7 {dimension_numbers = #tpu.dot_dimension_numbers<[1], [0], [0], [1], [0, 0, 1, 1], [], []>} : vector<546x75xbf16>, vector<75x32xbf16>, vector<546x32xf32> -> vector<546x32xf32>
    %133 = vector.broadcast %3 : vector<1x32xf32> to vector<546x32xf32>
    %134 = arith.addf %132, %133 : vector<546x32xf32>
    %cst_8 = arith.constant 0.000000e+00 : f32
    %135 = vector.broadcast %cst_8 : f32 to vector<546x32xf32>
    %136 = arith.maximumf %134, %135 : vector<546x32xf32>
    %137 = arith.truncf %136 : vector<546x32xf32> to vector<546x32xbf16>
    %138 = vector.extract_strided_slice %137 {offsets = [0, 0], sizes = [26, 32], strides = [1, 1]} : vector<546x32xbf16> to vector<26x32xbf16>
    %139 = vector.extract_strided_slice %137 {offsets = [26, 0], sizes = [26, 32], strides = [1, 1]} : vector<546x32xbf16> to vector<26x32xbf16>
    %140 = vector.extract_strided_slice %137 {offsets = [52, 0], sizes = [26, 32], strides = [1, 1]} : vector<546x32xbf16> to vector<26x32xbf16>
    %141 = vector.extract_strided_slice %137 {offsets = [78, 0], sizes = [26, 32], strides = [1, 1]} : vector<546x32xbf16> to vector<26x32xbf16>
    %142 = vector.extract_strided_slice %137 {offsets = [104, 0], sizes = [26, 32], strides = [1, 1]} : vector<546x32xbf16> to vector<26x32xbf16>
    %143 = vector.extract_strided_slice %137 {offsets = [130, 0], sizes = [26, 32], strides = [1, 1]} : vector<546x32xbf16> to vector<26x32xbf16>
    %144 = vector.extract_strided_slice %137 {offsets = [156, 0], sizes = [26, 32], strides = [1, 1]} : vector<546x32xbf16> to vector<26x32xbf16>
    %145 = vector.extract_strided_slice %137 {offsets = [182, 0], sizes = [26, 32], strides = [1, 1]} : vector<546x32xbf16> to vector<26x32xbf16>
    %146 = vector.extract_strided_slice %137 {offsets = [208, 0], sizes = [26, 32], strides = [1, 1]} : vector<546x32xbf16> to vector<26x32xbf16>
    %147 = vector.extract_strided_slice %137 {offsets = [234, 0], sizes = [26, 32], strides = [1, 1]} : vector<546x32xbf16> to vector<26x32xbf16>
    %148 = vector.extract_strided_slice %137 {offsets = [260, 0], sizes = [26, 32], strides = [1, 1]} : vector<546x32xbf16> to vector<26x32xbf16>
    %149 = vector.extract_strided_slice %137 {offsets = [286, 0], sizes = [26, 32], strides = [1, 1]} : vector<546x32xbf16> to vector<26x32xbf16>
    %150 = vector.extract_strided_slice %137 {offsets = [312, 0], sizes = [26, 32], strides = [1, 1]} : vector<546x32xbf16> to vector<26x32xbf16>
    %151 = vector.extract_strided_slice %137 {offsets = [338, 0], sizes = [26, 32], strides = [1, 1]} : vector<546x32xbf16> to vector<26x32xbf16>
    %152 = vector.extract_strided_slice %137 {offsets = [364, 0], sizes = [26, 32], strides = [1, 1]} : vector<546x32xbf16> to vector<26x32xbf16>
    %153 = vector.extract_strided_slice %137 {offsets = [390, 0], sizes = [26, 32], strides = [1, 1]} : vector<546x32xbf16> to vector<26x32xbf16>
    %154 = vector.extract_strided_slice %137 {offsets = [416, 0], sizes = [26, 32], strides = [1, 1]} : vector<546x32xbf16> to vector<26x32xbf16>
    %155 = vector.extract_strided_slice %137 {offsets = [442, 0], sizes = [26, 32], strides = [1, 1]} : vector<546x32xbf16> to vector<26x32xbf16>
    %156 = vector.extract_strided_slice %137 {offsets = [468, 0], sizes = [26, 32], strides = [1, 1]} : vector<546x32xbf16> to vector<26x32xbf16>
    %157 = vector.extract_strided_slice %137 {offsets = [494, 0], sizes = [26, 32], strides = [1, 1]} : vector<546x32xbf16> to vector<26x32xbf16>
    %158 = vector.extract_strided_slice %137 {offsets = [520, 0], sizes = [26, 32], strides = [1, 1]} : vector<546x32xbf16> to vector<26x32xbf16>
    %159 = tpu.concatenate %138, %139, %140, %141, %142, %143, %144, %145, %146, %147, %148, %149, %150, %151, %152, %153 in 1 : vector<26x32xbf16>, vector<26x32xbf16>, vector<26x32xbf16>, vector<26x32xbf16>, vector<26x32xbf16>, vector<26x32xbf16>, vector<26x32xbf16>, vector<26x32xbf16>, vector<26x32xbf16>, vector<26x32xbf16>, vector<26x32xbf16>, vector<26x32xbf16>, vector<26x32xbf16>, vector<26x32xbf16>, vector<26x32xbf16>, vector<26x32xbf16> -> vector<26x512xbf16>
    %160 = tpu.concatenate %154, %155, %156, %157, %158 in 1 : vector<26x32xbf16>, vector<26x32xbf16>, vector<26x32xbf16>, vector<26x32xbf16>, vector<26x32xbf16> -> vector<26x160xbf16>
    %161 = tpu.concatenate %159, %160 in 1 : vector<26x512xbf16>, vector<26x160xbf16> -> vector<26x672xbf16>
    %c0_9 = arith.constant 0 : index
    %c0_10 = arith.constant 0 : index
    %162 = vector.load %arg5[%c0_9, %c0_10] : memref<50x26xbf16, #tpu.memory_space<vmem>>, vector<50x26xbf16>
    %c0_11 = arith.constant 0 : index
    %c0_12 = arith.constant 0 : index
    %163 = vector.load %arg6[%c0_11, %c0_12] : memref<800x64xbf16, #tpu.memory_space<vmem>>, vector<800x64xbf16>
    %c0_13 = arith.constant 0 : index
    %c0_14 = arith.constant 0 : index
    %164 = vector.load %arg7[%c0_13, %c0_14] : memref<1x64xf32, #tpu.memory_space<vmem>>, vector<1x64xf32>
    %cst_15 = arith.constant dense<0.000000e+00> : vector<50x672xf32>
    %165 = tpu.matmul %162, %161, %cst_15 {dimension_numbers = #tpu.dot_dimension_numbers<[1], [0], [0], [1], [0, 0, 1, 1], [], []>} : vector<50x26xbf16>, vector<26x672xbf16>, vector<50x672xf32> -> vector<50x672xf32>
    %166 = arith.truncf %165 : vector<50x672xf32> to vector<50x672xbf16>
    %167 = vector.extract_strided_slice %166 {offsets = [0, 0], sizes = [10, 672], strides = [1, 1]} : vector<50x672xbf16> to vector<10x672xbf16>
    %168 = vector.extract_strided_slice %167 {offsets = [0, 0], sizes = [10, 160], strides = [1, 1]} : vector<10x672xbf16> to vector<10x160xbf16>
    %169 = vector.extract_strided_slice %167 {offsets = [0, 64], sizes = [10, 160], strides = [1, 1]} : vector<10x672xbf16> to vector<10x160xbf16>
    %170 = vector.extract_strided_slice %167 {offsets = [0, 128], sizes = [10, 160], strides = [1, 1]} : vector<10x672xbf16> to vector<10x160xbf16>
    %171 = vector.extract_strided_slice %167 {offsets = [0, 192], sizes = [10, 160], strides = [1, 1]} : vector<10x672xbf16> to vector<10x160xbf16>
    %172 = vector.extract_strided_slice %167 {offsets = [0, 256], sizes = [10, 160], strides = [1, 1]} : vector<10x672xbf16> to vector<10x160xbf16>
    %173 = vector.extract_strided_slice %167 {offsets = [0, 320], sizes = [10, 160], strides = [1, 1]} : vector<10x672xbf16> to vector<10x160xbf16>
    %174 = vector.extract_strided_slice %167 {offsets = [0, 384], sizes = [10, 160], strides = [1, 1]} : vector<10x672xbf16> to vector<10x160xbf16>
    %175 = vector.extract_strided_slice %167 {offsets = [0, 448], sizes = [10, 160], strides = [1, 1]} : vector<10x672xbf16> to vector<10x160xbf16>
    %176 = vector.extract_strided_slice %167 {offsets = [0, 512], sizes = [10, 160], strides = [1, 1]} : vector<10x672xbf16> to vector<10x160xbf16>
    %177 = tpu.concatenate %168, %169, %170, %171, %172, %173, %174, %175, %176 in 0 : vector<10x160xbf16>, vector<10x160xbf16>, vector<10x160xbf16>, vector<10x160xbf16>, vector<10x160xbf16>, vector<10x160xbf16>, vector<10x160xbf16>, vector<10x160xbf16>, vector<10x160xbf16> -> vector<90x160xbf16>
    %178 = vector.extract_strided_slice %166 {offsets = [10, 0], sizes = [10, 672], strides = [1, 1]} : vector<50x672xbf16> to vector<10x672xbf16>
    %179 = vector.extract_strided_slice %178 {offsets = [0, 0], sizes = [10, 160], strides = [1, 1]} : vector<10x672xbf16> to vector<10x160xbf16>
    %180 = vector.extract_strided_slice %178 {offsets = [0, 64], sizes = [10, 160], strides = [1, 1]} : vector<10x672xbf16> to vector<10x160xbf16>
    %181 = vector.extract_strided_slice %178 {offsets = [0, 128], sizes = [10, 160], strides = [1, 1]} : vector<10x672xbf16> to vector<10x160xbf16>
    %182 = vector.extract_strided_slice %178 {offsets = [0, 192], sizes = [10, 160], strides = [1, 1]} : vector<10x672xbf16> to vector<10x160xbf16>
    %183 = vector.extract_strided_slice %178 {offsets = [0, 256], sizes = [10, 160], strides = [1, 1]} : vector<10x672xbf16> to vector<10x160xbf16>
    %184 = vector.extract_strided_slice %178 {offsets = [0, 320], sizes = [10, 160], strides = [1, 1]} : vector<10x672xbf16> to vector<10x160xbf16>
    %185 = vector.extract_strided_slice %178 {offsets = [0, 384], sizes = [10, 160], strides = [1, 1]} : vector<10x672xbf16> to vector<10x160xbf16>
    %186 = vector.extract_strided_slice %178 {offsets = [0, 448], sizes = [10, 160], strides = [1, 1]} : vector<10x672xbf16> to vector<10x160xbf16>
    %187 = vector.extract_strided_slice %178 {offsets = [0, 512], sizes = [10, 160], strides = [1, 1]} : vector<10x672xbf16> to vector<10x160xbf16>
    %188 = tpu.concatenate %179, %180, %181, %182, %183, %184, %185, %186, %187 in 0 : vector<10x160xbf16>, vector<10x160xbf16>, vector<10x160xbf16>, vector<10x160xbf16>, vector<10x160xbf16>, vector<10x160xbf16>, vector<10x160xbf16>, vector<10x160xbf16>, vector<10x160xbf16> -> vector<90x160xbf16>
    %189 = vector.extract_strided_slice %166 {offsets = [20, 0], sizes = [10, 672], strides = [1, 1]} : vector<50x672xbf16> to vector<10x672xbf16>
    %190 = vector.extract_strided_slice %189 {offsets = [0, 0], sizes = [10, 160], strides = [1, 1]} : vector<10x672xbf16> to vector<10x160xbf16>
    %191 = vector.extract_strided_slice %189 {offsets = [0, 64], sizes = [10, 160], strides = [1, 1]} : vector<10x672xbf16> to vector<10x160xbf16>
    %192 = vector.extract_strided_slice %189 {offsets = [0, 128], sizes = [10, 160], strides = [1, 1]} : vector<10x672xbf16> to vector<10x160xbf16>
    %193 = vector.extract_strided_slice %189 {offsets = [0, 192], sizes = [10, 160], strides = [1, 1]} : vector<10x672xbf16> to vector<10x160xbf16>
    %194 = vector.extract_strided_slice %189 {offsets = [0, 256], sizes = [10, 160], strides = [1, 1]} : vector<10x672xbf16> to vector<10x160xbf16>
    %195 = vector.extract_strided_slice %189 {offsets = [0, 320], sizes = [10, 160], strides = [1, 1]} : vector<10x672xbf16> to vector<10x160xbf16>
    %196 = vector.extract_strided_slice %189 {offsets = [0, 384], sizes = [10, 160], strides = [1, 1]} : vector<10x672xbf16> to vector<10x160xbf16>
    %197 = vector.extract_strided_slice %189 {offsets = [0, 448], sizes = [10, 160], strides = [1, 1]} : vector<10x672xbf16> to vector<10x160xbf16>
    %198 = vector.extract_strided_slice %189 {offsets = [0, 512], sizes = [10, 160], strides = [1, 1]} : vector<10x672xbf16> to vector<10x160xbf16>
    %199 = tpu.concatenate %190, %191, %192, %193, %194, %195, %196, %197, %198 in 0 : vector<10x160xbf16>, vector<10x160xbf16>, vector<10x160xbf16>, vector<10x160xbf16>, vector<10x160xbf16>, vector<10x160xbf16>, vector<10x160xbf16>, vector<10x160xbf16>, vector<10x160xbf16> -> vector<90x160xbf16>
    %200 = vector.extract_strided_slice %166 {offsets = [30, 0], sizes = [10, 672], strides = [1, 1]} : vector<50x672xbf16> to vector<10x672xbf16>
    %201 = vector.extract_strided_slice %200 {offsets = [0, 0], sizes = [10, 160], strides = [1, 1]} : vector<10x672xbf16> to vector<10x160xbf16>
    %202 = vector.extract_strided_slice %200 {offsets = [0, 64], sizes = [10, 160], strides = [1, 1]} : vector<10x672xbf16> to vector<10x160xbf16>
    %203 = vector.extract_strided_slice %200 {offsets = [0, 128], sizes = [10, 160], strides = [1, 1]} : vector<10x672xbf16> to vector<10x160xbf16>
    %204 = vector.extract_strided_slice %200 {offsets = [0, 192], sizes = [10, 160], strides = [1, 1]} : vector<10x672xbf16> to vector<10x160xbf16>
    %205 = vector.extract_strided_slice %200 {offsets = [0, 256], sizes = [10, 160], strides = [1, 1]} : vector<10x672xbf16> to vector<10x160xbf16>
    %206 = vector.extract_strided_slice %200 {offsets = [0, 320], sizes = [10, 160], strides = [1, 1]} : vector<10x672xbf16> to vector<10x160xbf16>
    %207 = vector.extract_strided_slice %200 {offsets = [0, 384], sizes = [10, 160], strides = [1, 1]} : vector<10x672xbf16> to vector<10x160xbf16>
    %208 = vector.extract_strided_slice %200 {offsets = [0, 448], sizes = [10, 160], strides = [1, 1]} : vector<10x672xbf16> to vector<10x160xbf16>
    %209 = vector.extract_strided_slice %200 {offsets = [0, 512], sizes = [10, 160], strides = [1, 1]} : vector<10x672xbf16> to vector<10x160xbf16>
    %210 = tpu.concatenate %201, %202, %203, %204, %205, %206, %207, %208, %209 in 0 : vector<10x160xbf16>, vector<10x160xbf16>, vector<10x160xbf16>, vector<10x160xbf16>, vector<10x160xbf16>, vector<10x160xbf16>, vector<10x160xbf16>, vector<10x160xbf16>, vector<10x160xbf16> -> vector<90x160xbf16>
    %211 = vector.extract_strided_slice %166 {offsets = [40, 0], sizes = [10, 672], strides = [1, 1]} : vector<50x672xbf16> to vector<10x672xbf16>
    %212 = vector.extract_strided_slice %211 {offsets = [0, 0], sizes = [10, 160], strides = [1, 1]} : vector<10x672xbf16> to vector<10x160xbf16>
    %213 = vector.extract_strided_slice %211 {offsets = [0, 64], sizes = [10, 160], strides = [1, 1]} : vector<10x672xbf16> to vector<10x160xbf16>
    %214 = vector.extract_strided_slice %211 {offsets = [0, 128], sizes = [10, 160], strides = [1, 1]} : vector<10x672xbf16> to vector<10x160xbf16>
    %215 = vector.extract_strided_slice %211 {offsets = [0, 192], sizes = [10, 160], strides = [1, 1]} : vector<10x672xbf16> to vector<10x160xbf16>
    %216 = vector.extract_strided_slice %211 {offsets = [0, 256], sizes = [10, 160], strides = [1, 1]} : vector<10x672xbf16> to vector<10x160xbf16>
    %217 = vector.extract_strided_slice %211 {offsets = [0, 320], sizes = [10, 160], strides = [1, 1]} : vector<10x672xbf16> to vector<10x160xbf16>
    %218 = vector.extract_strided_slice %211 {offsets = [0, 384], sizes = [10, 160], strides = [1, 1]} : vector<10x672xbf16> to vector<10x160xbf16>
    %219 = vector.extract_strided_slice %211 {offsets = [0, 448], sizes = [10, 160], strides = [1, 1]} : vector<10x672xbf16> to vector<10x160xbf16>
    %220 = vector.extract_strided_slice %211 {offsets = [0, 512], sizes = [10, 160], strides = [1, 1]} : vector<10x672xbf16> to vector<10x160xbf16>
    %221 = tpu.concatenate %212, %213, %214, %215, %216, %217, %218, %219, %220 in 0 : vector<10x160xbf16>, vector<10x160xbf16>, vector<10x160xbf16>, vector<10x160xbf16>, vector<10x160xbf16>, vector<10x160xbf16>, vector<10x160xbf16>, vector<10x160xbf16>, vector<10x160xbf16> -> vector<90x160xbf16>
    %222 = tpu.concatenate %177, %188, %199, %210, %221 in 1 : vector<90x160xbf16>, vector<90x160xbf16>, vector<90x160xbf16>, vector<90x160xbf16>, vector<90x160xbf16> -> vector<90x800xbf16>
    %cst_16 = arith.constant dense<0.000000e+00> : vector<90x64xf32>
    %223 = tpu.matmul %222, %163, %cst_16 {dimension_numbers = #tpu.dot_dimension_numbers<[1], [0], [0], [1], [0, 0, 1, 1], [], []>} : vector<90x800xbf16>, vector<800x64xbf16>, vector<90x64xf32> -> vector<90x64xf32>
    %224 = vector.broadcast %164 : vector<1x64xf32> to vector<90x64xf32>
    %225 = arith.addf %223, %224 : vector<90x64xf32>
    %cst_17 = arith.constant 0.000000e+00 : f32
    %226 = vector.broadcast %cst_17 : f32 to vector<90x64xf32>
    %227 = arith.maximumf %225, %226 : vector<90x64xf32>
    %228 = arith.truncf %227 : vector<90x64xf32> to vector<90x64xbf16>
    %229 = vector.extract_strided_slice %228 {offsets = [0, 0], sizes = [10, 64], strides = [1, 1]} : vector<90x64xbf16> to vector<10x64xbf16>
    %230 = vector.extract_strided_slice %228 {offsets = [10, 0], sizes = [10, 64], strides = [1, 1]} : vector<90x64xbf16> to vector<10x64xbf16>
    %231 = vector.extract_strided_slice %228 {offsets = [20, 0], sizes = [10, 64], strides = [1, 1]} : vector<90x64xbf16> to vector<10x64xbf16>
    %232 = vector.extract_strided_slice %228 {offsets = [30, 0], sizes = [10, 64], strides = [1, 1]} : vector<90x64xbf16> to vector<10x64xbf16>
    %233 = vector.extract_strided_slice %228 {offsets = [40, 0], sizes = [10, 64], strides = [1, 1]} : vector<90x64xbf16> to vector<10x64xbf16>
    %234 = vector.extract_strided_slice %228 {offsets = [50, 0], sizes = [10, 64], strides = [1, 1]} : vector<90x64xbf16> to vector<10x64xbf16>
    %235 = vector.extract_strided_slice %228 {offsets = [60, 0], sizes = [10, 64], strides = [1, 1]} : vector<90x64xbf16> to vector<10x64xbf16>
    %236 = vector.extract_strided_slice %228 {offsets = [70, 0], sizes = [10, 64], strides = [1, 1]} : vector<90x64xbf16> to vector<10x64xbf16>
    %237 = vector.extract_strided_slice %228 {offsets = [80, 0], sizes = [10, 64], strides = [1, 1]} : vector<90x64xbf16> to vector<10x64xbf16>
    %238 = tpu.concatenate %229, %230, %231, %232, %233, %234, %235, %236, %237 in 1 : vector<10x64xbf16>, vector<10x64xbf16>, vector<10x64xbf16>, vector<10x64xbf16>, vector<10x64xbf16>, vector<10x64xbf16>, vector<10x64xbf16>, vector<10x64xbf16>, vector<10x64xbf16> -> vector<10x576xbf16>
    %c0_18 = arith.constant 0 : index
    %c0_19 = arith.constant 0 : index
    %239 = vector.load %arg8[%c0_18, %c0_19] : memref<10x10xbf16, #tpu.memory_space<vmem>>, vector<10x10xbf16>
    %c0_20 = arith.constant 0 : index
    %c0_21 = arith.constant 0 : index
    %240 = vector.load %arg9[%c0_20, %c0_21] : memref<1600x64xbf16, #tpu.memory_space<vmem>>, vector<1600x64xbf16>
    %c0_22 = arith.constant 0 : index
    %c0_23 = arith.constant 0 : index
    %241 = vector.load %arg10[%c0_22, %c0_23] : memref<1x64xf32, #tpu.memory_space<vmem>>, vector<1x64xf32>
    %cst_24 = arith.constant dense<0.000000e+00> : vector<10x576xf32>
    %242 = tpu.matmul %239, %238, %cst_24 {dimension_numbers = #tpu.dot_dimension_numbers<[1], [0], [0], [1], [0, 0, 1, 1], [], []>} : vector<10x10xbf16>, vector<10x576xbf16>, vector<10x576xf32> -> vector<10x576xf32>
    %243 = arith.truncf %242 : vector<10x576xf32> to vector<10x576xbf16>
    %244 = vector.extract_strided_slice %243 {offsets = [0, 0], sizes = [2, 576], strides = [1, 1]} : vector<10x576xbf16> to vector<2x576xbf16>
    %245 = vector.extract_strided_slice %244 {offsets = [0, 0], sizes = [2, 320], strides = [1, 1]} : vector<2x576xbf16> to vector<2x320xbf16>
    %246 = vector.extract_strided_slice %244 {offsets = [0, 128], sizes = [2, 320], strides = [1, 1]} : vector<2x576xbf16> to vector<2x320xbf16>
    %247 = vector.extract_strided_slice %244 {offsets = [0, 256], sizes = [2, 320], strides = [1, 1]} : vector<2x576xbf16> to vector<2x320xbf16>
    %248 = tpu.concatenate %245, %246, %247 in 0 : vector<2x320xbf16>, vector<2x320xbf16>, vector<2x320xbf16> -> vector<6x320xbf16>
    %249 = vector.extract_strided_slice %243 {offsets = [2, 0], sizes = [2, 576], strides = [1, 1]} : vector<10x576xbf16> to vector<2x576xbf16>
    %250 = vector.extract_strided_slice %249 {offsets = [0, 0], sizes = [2, 320], strides = [1, 1]} : vector<2x576xbf16> to vector<2x320xbf16>
    %251 = vector.extract_strided_slice %249 {offsets = [0, 128], sizes = [2, 320], strides = [1, 1]} : vector<2x576xbf16> to vector<2x320xbf16>
    %252 = vector.extract_strided_slice %249 {offsets = [0, 256], sizes = [2, 320], strides = [1, 1]} : vector<2x576xbf16> to vector<2x320xbf16>
    %253 = tpu.concatenate %250, %251, %252 in 0 : vector<2x320xbf16>, vector<2x320xbf16>, vector<2x320xbf16> -> vector<6x320xbf16>
    %254 = vector.extract_strided_slice %243 {offsets = [4, 0], sizes = [2, 576], strides = [1, 1]} : vector<10x576xbf16> to vector<2x576xbf16>
    %255 = vector.extract_strided_slice %254 {offsets = [0, 0], sizes = [2, 320], strides = [1, 1]} : vector<2x576xbf16> to vector<2x320xbf16>
    %256 = vector.extract_strided_slice %254 {offsets = [0, 128], sizes = [2, 320], strides = [1, 1]} : vector<2x576xbf16> to vector<2x320xbf16>
    %257 = vector.extract_strided_slice %254 {offsets = [0, 256], sizes = [2, 320], strides = [1, 1]} : vector<2x576xbf16> to vector<2x320xbf16>
    %258 = tpu.concatenate %255, %256, %257 in 0 : vector<2x320xbf16>, vector<2x320xbf16>, vector<2x320xbf16> -> vector<6x320xbf16>
    %259 = vector.extract_strided_slice %243 {offsets = [6, 0], sizes = [2, 576], strides = [1, 1]} : vector<10x576xbf16> to vector<2x576xbf16>
    %260 = vector.extract_strided_slice %259 {offsets = [0, 0], sizes = [2, 320], strides = [1, 1]} : vector<2x576xbf16> to vector<2x320xbf16>
    %261 = vector.extract_strided_slice %259 {offsets = [0, 128], sizes = [2, 320], strides = [1, 1]} : vector<2x576xbf16> to vector<2x320xbf16>
    %262 = vector.extract_strided_slice %259 {offsets = [0, 256], sizes = [2, 320], strides = [1, 1]} : vector<2x576xbf16> to vector<2x320xbf16>
    %263 = tpu.concatenate %260, %261, %262 in 0 : vector<2x320xbf16>, vector<2x320xbf16>, vector<2x320xbf16> -> vector<6x320xbf16>
    %264 = vector.extract_strided_slice %243 {offsets = [8, 0], sizes = [2, 576], strides = [1, 1]} : vector<10x576xbf16> to vector<2x576xbf16>
    %265 = vector.extract_strided_slice %264 {offsets = [0, 0], sizes = [2, 320], strides = [1, 1]} : vector<2x576xbf16> to vector<2x320xbf16>
    %266 = vector.extract_strided_slice %264 {offsets = [0, 128], sizes = [2, 320], strides = [1, 1]} : vector<2x576xbf16> to vector<2x320xbf16>
    %267 = vector.extract_strided_slice %264 {offsets = [0, 256], sizes = [2, 320], strides = [1, 1]} : vector<2x576xbf16> to vector<2x320xbf16>
    %268 = tpu.concatenate %265, %266, %267 in 0 : vector<2x320xbf16>, vector<2x320xbf16>, vector<2x320xbf16> -> vector<6x320xbf16>
    %269 = tpu.concatenate %248, %253, %258, %263, %268 in 1 : vector<6x320xbf16>, vector<6x320xbf16>, vector<6x320xbf16>, vector<6x320xbf16>, vector<6x320xbf16> -> vector<6x1600xbf16>
    %cst_25 = arith.constant dense<0.000000e+00> : vector<6x64xf32>
    %270 = tpu.matmul %269, %240, %cst_25 {dimension_numbers = #tpu.dot_dimension_numbers<[1], [0], [0], [1], [0, 0, 1, 1], [], []>} : vector<6x1600xbf16>, vector<1600x64xbf16>, vector<6x64xf32> -> vector<6x64xf32>
    %271 = vector.broadcast %241 : vector<1x64xf32> to vector<6x64xf32>
    %272 = arith.addf %270, %271 : vector<6x64xf32>
    %cst_26 = arith.constant 0.000000e+00 : f32
    %273 = vector.broadcast %cst_26 : f32 to vector<6x64xf32>
    %274 = arith.maximumf %272, %273 : vector<6x64xf32>
    %275 = arith.truncf %274 : vector<6x64xf32> to vector<6x64xbf16>
    %276 = vector.extract_strided_slice %275 {offsets = [0, 0], sizes = [2, 64], strides = [1, 1]} : vector<6x64xbf16> to vector<2x64xbf16>
    %277 = vector.extract_strided_slice %275 {offsets = [2, 0], sizes = [2, 64], strides = [1, 1]} : vector<6x64xbf16> to vector<2x64xbf16>
    %278 = vector.extract_strided_slice %275 {offsets = [4, 0], sizes = [2, 64], strides = [1, 1]} : vector<6x64xbf16> to vector<2x64xbf16>
    %279 = tpu.concatenate %276, %277, %278 in 1 : vector<2x64xbf16>, vector<2x64xbf16>, vector<2x64xbf16> -> vector<2x192xbf16>
    %c0_27 = arith.constant 0 : index
    %c0_28 = arith.constant 0 : index
    %280 = vector.load %arg11[%c0_27, %c0_28] : memref<192x128xbf16, #tpu.memory_space<vmem>>, vector<192x128xbf16>
    %cst_29 = arith.constant dense<0.000000e+00> : vector<2x128xf32>
    %281 = tpu.matmul %279, %280, %cst_29 {dimension_numbers = #tpu.dot_dimension_numbers<[1], [0], [0], [1], [0, 0, 1, 1], [], []>} : vector<2x192xbf16>, vector<192x128xbf16>, vector<2x128xf32> -> vector<2x128xf32>
    %c0_30 = arith.constant 0 : index
    %c0_31 = arith.constant 0 : index
    %282 = vector.load %arg12[%c0_30, %c0_31] : memref<1x128xf32, #tpu.memory_space<vmem>>, vector<1x128xf32>
    %283 = vector.broadcast %282 : vector<1x128xf32> to vector<2x128xf32>
    %284 = arith.addf %281, %283 : vector<2x128xf32>
    %c0_32 = arith.constant 0 : index
    %c0_33 = arith.constant 0 : index
    %285 = vector.load %arg13[%c0_32, %c0_33] : memref<2x128xf32, #tpu.memory_space<vmem>>, vector<2x128xf32>
    tpu.vector_store %arg13[%c0_32, %c0_33], %284 {strides = array<i32>} : memref<2x128xf32, #tpu.memory_space<vmem>>, vector<2x128xf32>,
    return
  }
  func.func @transform_0(%arg0: i32) -> (i32, i32) {
    %c0_i32 = arith.constant 0 : i32
    %c0_i32_0 = arith.constant 0 : i32
    %c0_i32_1 = arith.constant 0 : i32
    return %c0_i32, %c0_i32_0 : i32, i32
  }
  func.func @transform_1(%arg0: i32) -> (i32, i32) {
    %c0_i32 = arith.constant 0 : i32
    %c0_i32_0 = arith.constant 0 : i32
    %c0_i32_1 = arith.constant 0 : i32
    return %c0_i32, %c0_i32_0 : i32, i32
  }
  func.func @transform_2(%arg0: i32) -> (i32, i32) {
    %c0_i32 = arith.constant 0 : i32
    %c0_i32_0 = arith.constant 0 : i32
    %c0_i32_1 = arith.constant 0 : i32
    return %c0_i32, %c0_i32_0 : i32, i32
  }
  func.func @transform_3(%arg0: i32) -> (i32, i32) {
    %c0_i32 = arith.constant 0 : i32
    %c0_i32_0 = arith.constant 0 : i32
    %c0_i32_1 = arith.constant 0 : i32
    return %c0_i32, %c0_i32_0 : i32, i32
  }
  func.func @transform_4(%arg0: i32) -> (i32, i32) {
    %c0_i32 = arith.constant 0 : i32
    %c0_i32_0 = arith.constant 0 : i32
    %c0_i32_1 = arith.constant 0 : i32
    return %c0_i32, %c0_i32_0 : i32, i32
  }
  func.func @transform_5(%arg0: i32) -> (i32, i32) {
    %c0_i32 = arith.constant 0 : i32
    %c0_i32_0 = arith.constant 0 : i32
    %c0_i32_1 = arith.constant 0 : i32
    return %c0_i32, %c0_i32_0 : i32, i32
  }
  func.func @transform_6(%arg0: i32) -> (i32, i32) {
    %c0_i32 = arith.constant 0 : i32
    %c0_i32_0 = arith.constant 0 : i32
    %c0_i32_1 = arith.constant 0 : i32
    return %c0_i32, %c0_i32_0 : i32, i32
  }
  func.func @transform_7(%arg0: i32) -> (i32, i32) {
    %c0_i32 = arith.constant 0 : i32
    %c0_i32_0 = arith.constant 0 : i32
    %c0_i32_1 = arith.constant 0 : i32
    return %c0_i32, %c0_i32_0 : i32, i32
  }
  func.func @transform_8(%arg0: i32) -> (i32, i32) {
    %c0_i32 = arith.constant 0 : i32
    %c0_i32_0 = arith.constant 0 : i32
    %c0_i32_1 = arith.constant 0 : i32
    return %c0_i32, %c0_i32_0 : i32, i32
  }
  func.func @transform_9(%arg0: i32) -> (i32, i32) {
    %c0_i32 = arith.constant 0 : i32
    %c0_i32_0 = arith.constant 0 : i32
    %c0_i32_1 = arith.constant 0 : i32
    return %c0_i32, %c0_i32_0 : i32, i32
  }
  func.func @transform_10(%arg0: i32) -> (i32, i32) {
    %c0_i32 = arith.constant 0 : i32
    %c0_i32_0 = arith.constant 0 : i32
    %c0_i32_1 = arith.constant 0 : i32
    return %c0_i32, %c0_i32_0 : i32, i32
  }
  func.func @transform_11(%arg0: i32) -> (i32, i32) {
    %c0_i32 = arith.constant 0 : i32
    %c0_i32_0 = arith.constant 0 : i32
    %c0_i32_1 = arith.constant 0 : i32
    return %c0_i32, %c0_i32_0 : i32, i32
  }
  func.func @transform_12(%arg0: i32) -> (i32, i32) {
    %c0_i32 = arith.constant 0 : i32
    %c0_i32_0 = arith.constant 0 : i32
    %c0_i32_1 = arith.constant 0 : i32
    return %c0_i32, %c0_i32_0 : i32, i32
  }
}

</mosaic_0001>

<bundles_post_ra>
// kernel: dqn_forward.1
= control target key start
LH: loop header
LB: loop body
LE: loop exit
PB: predicated region body
PF: predicated region fallthrough
CT: control target
= control target key end

     0   :  { %v11335_v2 = vmov 0   ;;  %vm188_vm0 = vcmask 1044480   ;;  %vm160_vm1 = vcmask 474112   ;;  %s11322_s0 = inlined_call_operand.vmem [shape: bf16[58,135], index: 0, kind: input, shape index: {}]   ;;  %s11323_s1 = inlined_call_operand.vmem [shape: bf16[130,58], index: 1, kind: input, shape index: {}]   ;;  %s11324_s2 = inlined_call_operand.vmem [shape: bf16[75,32], index: 2, kind: input, shape index: {}]   ;;  %s11325_s3 = inlined_call_operand.vmem [shape: f32[1,32], index: 3, kind: input, shape index: {}]   ;;  %s11326_s4 = inlined_call_operand.vmem [shape: bf16[50,26], index: 4, kind: input, shape index: {}]   ;;  %s11327_s5 = inlined_call_operand.vmem [shape: bf16[800,64], index: 5, kind: input, shape index: {}]   ;;  %s11328_s6 = inlined_call_operand.vmem [shape: f32[1,64], index: 6, kind: input, shape index: {}]   ;;  %s11329_s7 = inlined_call_operand.vmem [shape: bf16[10,10], index: 7, kind: input, shape index: {}]   ;;  %s11330_s8 = inlined_call_operand.vmem [shape: bf16[1600,64], index: 8, kind: input, shape index: {}]   ;;  %s11331_s9 = inlined_call_operand.vmem [shape: f32[1,64], index: 9, kind: input, shape index: {}]   ;;  %s11332_s10 = inlined_call_operand.vmem [shape: bf16[192,128], index: 10, kind: input, shape index: {}]   ;;  %s11333_s11 = inlined_call_operand.vmem [shape: f32[1,128], index: 11, kind: input, shape index: {}]   ;;  %s11334_s12 = inlined_call_operand.hbm [shape: f32[2,128], index: 12, kind: output, shape index: {}]  }
   0x1   :  { %v6863_v0 = vld [vmem:[%s11322_s0 + $0x4] ss:$8 sps:$4 sm:$0xff]   ;;  %v6865_v1 = vld [vmem:[%s11322_s0] ss:$8 sps:$4 sm:$0xff]   ;;  %227 = vmatprep.mubr.bf16.mxu0 %v11335_v2  ;;  %v6866_v3 = vld [vmem:[%s11322_s0 + $0x14] ss:$8 sps:$4 sm:$0xff]  }
   0x2   :  { %195 = vmatprep.subr.bf16.mxu0 %v6863_v0  ;;  %v6868_v4 = vld [vmem:[%s11322_s0 + $0x10] ss:$8 sps:$4 sm:$0xff]   ;;  %v6869_v5 = vld [vmem:[%s11322_s0 + $0x24] ss:$8 sps:$4 sm:$0xff]   ;;  %v6871_v8 = vld [vmem:[%s11322_s0 + $0x20] ss:$8 sps:$4 sm:$0xff]  }
   0x3   :  { %196 = vmatpush1.bf16.msra.mxu0 %v6865_v1  ;;  %v6872_v6 = vld [vmem:[%s11322_s0 + $0x34] ss:$8 sps:$4 sm:$0x1f]   ;;  %v6874_v7 = vld [vmem:[%s11322_s0 + $0x30] ss:$8 sps:$4 sm:$0x1f]  }
   0x4   :  { %197 = vmatprep.subr.bf16.mxu0 %v6866_v3  ;;  %v190_v9 = vsel %vm188_vm0, %v6874_v7, 0  ;;  %v6875_v10 = vld [vmem:[%s11323_s1] sm:$0xff]   ;;  %v6876_v11 = vld [vmem:[%s11323_s1 + $0x8] sm:$0xff]   ;;  %v6877_v12 = vld [vmem:[%s11323_s1 + $0x10] sm:$0xff]  }
   0x5   :  { %v6878_v13 = vld [vmem:[%s11323_s1 + $0x18] sm:$0xff]   ;;  %v6879_v14 = vld [vmem:[%s11323_s1 + $0x20] sm:$0xff]   ;;  %v6880_v15 = vld [vmem:[%s11323_s1 + $0x28] sm:$0xff]  }
   0x6   :  { %v6881_v16 = vld [vmem:[%s11323_s1 + $0x30] sm:$0xff]   ;;  %v6882_v17 = vld [vmem:[%s11323_s1 + $0x38] sm:$0xff]   ;;  %v6883_v18 = vld [vmem:[%s11323_s1 + $0x40] ss:$0 sps:$4 sm:$0x11]  }
   0x7   :  { %198 = vmatpush1.bf16.msra.mxu0 %v6868_v4 }
   0x8   :  { %199 = vmatprep.subr.bf16.mxu0 %v6869_v5 }
   0xb   :  { %200 = vmatpush1.bf16.msra.mxu0 %v6871_v8 }
   0xc   :  { %6050 = vmatprep.subr.msk.bf16.mxu0 %vm188_vm0, %v6872_v6 }
   0xf   :  { %202 = vmatpush1.bf16.msra.mxu0 %v190_v9 }
  0x12   :  { %6051 = vmatmul.mubr.msk.bf16.vlgmr.msra.gmra.mrb[0].mxu0 %vm160_vm1, %v6875_v10 }
  0x13   :  { %237 = vmatprep.mubr.bf16.mxu0 %v11335_v2 }
  0x1a   :  { %6052 = vmatmul.mubr.msk.bf16.gmra.mrb[4].mxu0 %vm160_vm1, %v6876_v11 }
  0x1b   :  { %247 = vmatprep.mubr.bf16.mxu0 %v11335_v2 }
  0x22   :  { %6053 = vmatmul.mubr.msk.bf16.gmra.mrb[8].mxu0 %vm160_vm1, %v6877_v12 }
  0x23   :  { %257 = vmatprep.mubr.bf16.mxu0 %v11335_v2 }
  0x2a   :  { %6054 = vmatmul.mubr.msk.bf16.gmra.mrb[12].mxu0 %vm160_vm1, %v6878_v13 }
  0x2b   :  { %267 = vmatprep.mubr.bf16.mxu0 %v11335_v2 }
  0x32   :  { %6055 = vmatmul.mubr.msk.bf16.gmra.mrb[16].mxu0 %vm160_vm1, %v6879_v14 }
  0x33   :  { %277 = vmatprep.mubr.bf16.mxu0 %v11335_v2 }
  0x3a   :  { %6056 = vmatmul.mubr.msk.bf16.gmra.mrb[20].mxu0 %vm160_vm1, %v6880_v15 }
  0x3b   :  { %287 = vmatprep.mubr.bf16.mxu0 %v11335_v2 }
  0x42   :  { %6057 = vmatmul.mubr.msk.bf16.gmra.mrb[24].mxu0 %vm160_vm1, %v6881_v16 }
  0x43   :  { %297 = vmatprep.mubr.bf16.mxu0 %v11335_v2 }
  0x4a   :  { %6058 = vmatmul.mubr.msk.bf16.gmra.mrb[28].mxu0 %vm160_vm1, %v6882_v17 }
  0x4b   :  { %307 = vmatprep.mubr.bf16.mxu0 %v11335_v2 }
  0x52   :  { %6059 = vmatmul.mubr.msk.bf16.gmra.mrb[32].mxu0 %vm160_vm1, %v6883_v18 }
  0x53   :  { %17 = vsyncpa [#allocation3], 0  ;;  %s7082_s18 = smov 80   ;;  %s7083_s19 = smov 110   ;;  %vm346_vm2 = vcmask 1041408   ;;  %vm354_vm3 = vcmask 1046528  }
  0x54   :  { %s7084_s1 = smov 116   ;;  %s7085_s20 = smov 104   ;;  %vm382_vm4 = vcmask 1045504   ;;  %vm364_vm5 = vcmask 1043456   ;;  %vm374_vm6 = vcmask 1040384   ;;  %vm392_vm7 = vcmask 1042432  }
  0x55   :  { %s7086_s21 = smov 98   ;;  %s7087_s22 = smov 92   ;;  %vm7101_vm8 = vmmov 0   ;;  %vm1658_vm9 = vcmask 121856   ;;  %vm1821_vm10 = vcmask 367616   ;;  %vm1750_vm11 = vcmask 244736  }
  0x56   :  { %s7088_s0 = smov 74   ;;  %s7089_s23 = smov 86   ;;  %vm1998_vm12 = vcmask 613376   ;;  %vm1892_vm13 = vcmask 490496   ;;  %vm499_vm14 = vcmask 900096   ;;  %vm512_vm15 = vcmask 850944  }
  0x57   :  { %s7090_s24 = smov 122   ;;  %s7091_s25 = smov 62   ;;  %vm2620_vm1 = vcmask 261120  }
  0x58   :  { %s7092_s26 = smov 68   ;;  %s7093_s27 = smov 56  }
  0x59   :  { %s7094_s28 = smov 50   ;;  %s7095_s29 = smov 44  }
  0x5a   :  { %s7096_s30 = smov 15   ;;  %s7097_s13 = smov 30  }
  0x5b   :  { %s7098_s14 = smov 45  }
  0xe5   :  { %v229_v19 = vpop.f32.mrb[0].mxu0 }
  0xe6   :  { %v231_v20 = vpop.f32.mrb[1].mxu0 }
  0xe7   :  { %v233_v21 = vpop.f32.mrb[2].mxu0 }
  0xe8   :  { %v7244_v22 = vpack.c.bf16 %v233_v21, %v229_v19  ;;  %v235_v23 = vpop.f32.mrb[3].mxu0 }
  0xe9   :  { %v7246_v24 = vpack.c.bf16 %v235_v23, %v231_v20 }
  0xea   :  { %11470 = vst [vmem:[#allocation5_spill] sm:$0xff] %v7244_v22  ;;  %400 = vrot.lane.b32.xlu1 %v7244_v22, %s7082_s18  ;;  %v7251_v25 = vrot.slane %v7244_v22, 1  ;;  %v7256_v26 = vrot.slane %v7244_v22, 6  ;;  %v7261_v29 = vrot.slane %v7244_v22, 4  ;;  %v7268_v33 = vrot.slane %v7244_v22, 7 }
  0xeb   :  { %11471 = vst [vmem:[#allocation6_spill] sm:$0xff] %v7246_v24  ;;  %v7275_v35 = vrot.slane %v7244_v22, 2  ;;  %v7280_v36 = vrot.slane %v7244_v22, 3  ;;  %v7285_v39 = vrot.slane %v7244_v22, 5 }
  0xec   :  { %11472 = vst [vmem:[#allocation7_spill] sm:$0xff] %v7251_v25  ;;  %358 = vrot.lane.b32.xlu0 %v7251_v25, %s7083_s19  ;;  %11473 = vst [vmem:[#allocation8_spill] sm:$0xff] %v7256_v26 }
  0xed   :  { %v239_v27 = vpop.f32.mrb[4].mxu0  ;;  %11474 = vst [vmem:[#allocation9_spill] sm:$0xff] %v7261_v29  ;;  %11476 = vst [vmem:[#allocation11_spill] sm:$0xff] %v7268_v33 }
  0xee   :  { %350 = vrot.lane.b32.xlu1 %v7256_v26, %s7084_s1  ;;  %v241_v28 = vpop.f32.mrb[5].mxu0  ;;  %11478 = vst [vmem:[#allocation13_spill] sm:$0xff] %v7275_v35  ;;  %11479 = vst [vmem:[#allocation14_spill] sm:$0xff] %v7280_v36 }
  0xef   :  { %v243_v30 = vpop.f32.mrb[6].mxu0  ;;  %11480 = vst [vmem:[#allocation15_spill] sm:$0xff] %v7285_v39 }
  0xf0   :  { %v7263_v31 = vpack.c.bf16 %v243_v30, %v239_v27  ;;  %368 = vrot.lane.b32.xlu0 %v7261_v29, %s7085_s20  ;;  %v245_v32 = vpop.f32.mrb[7].mxu0 }
  0xf1   :  { %v7270_v34 = vpack.c.bf16 %v245_v32, %v241_v28 }
  0xf2   :  { %11475 = vst [vmem:[#allocation10_spill] sm:$0xff] %v7263_v31  ;;  %378 = vrot.lane.b32.xlu1 %v7268_v33, %s7086_s21  ;;  %v7300_v46 = vrot.slane %v7263_v31, 6  ;;  %v7314_v51 = vrot.slane %v7263_v31, 7  ;;  %v7319_v54 = vrot.slane %v7263_v31, 3  ;;  %v7342_v0 = vrot.slane %v7263_v31, 1 }
  0xf3   :  { %11477 = vst [vmem:[#allocation12_spill] sm:$0xff] %v7270_v34  ;;  %v11340_v43 = vrot.slane %v7270_v34, 6  ;;  %v7367_v8 = vrot.slane %v7263_v31, 4  ;;  %v7386_v13 = vrot.slane %v7263_v31, 2 }
  0xf4   :  { %386 = vrot.lane.b32.xlu0 %v7275_v35, %s7087_s22  ;;  %11483 = vst [vmem:[#allocation18_spill] sm:$0xff] %v7319_v54  ;;  %11485 = vst [vmem:[#allocation20_spill] sm:$0xff] %v7342_v0  ;;  %v7415_v21 = vsel %vm346_vm2, %v7256_v26, %v7300_v46  ;;  %v7422_v28 = vsel %vm188_vm0, %v7280_v36, %v7319_v54 }
  0xf5   :  { %v249_v37 = vpop.f32.mrb[8].mxu0  ;;  %11486 = vst [vmem:[#allocation21_spill] sm:$0xff] %v7367_v8  ;;  %11489 = vst [vmem:[#allocation24_spill] sm:$0xff] %v7386_v13 }
  0xf6   :  { %404 = vrot.lane.b32.xlu1 %v7280_v36, %s7088_s0  ;;  %v251_v38 = vpop.f32.mrb[9].mxu0  ;;  %11491 = vst [vmem:[#allocation26_spill] sm:$0xff] %v7415_v21 }
  0xf7   :  { %v253_v40 = vpop.f32.mrb[10].mxu0 }
  0xf8   :  { %v7287_v41 = vpack.c.bf16 %v253_v40, %v249_v37  ;;  %396 = vrot.lane.b32.xlu0 %v7285_v39, %s7089_s23  ;;  %v255_v42 = vpop.f32.mrb[11].mxu0 }
  0xf9   :  { %v7292_v44 = vpack.c.bf16 %v255_v42, %v251_v38  ;;  %v7431_v38 = vsel %vm354_vm3, %v7251_v25, %v7342_v0 }
  0xfa   :  { %613 = vrot.lane.b32.xlu1 %v7263_v31, %s7088_s0  ;;  %v11347_v56 = vrot.slane %v7287_v41, 6  ;;  %v11346_v57 = vrot.slane %v7287_v41, 3  ;;  %v11344_v62 = vrot.slane %v7287_v41, 1  ;;  %v11345_v4 = vrot.slane %v7287_v41, 2  ;;  %11492 = vst [vmem:[#allocation27_spill] sm:$0xff] %v7431_v38 }
  0xfb   :  { %11481 = vst [vmem:[#allocation16_spill] sm:$0xff] %v7292_v44  ;;  %v11338_v45 = vrot.slane %v7292_v44, 6  ;;  %v11339_v63 = vrot.slane %v7292_v44, 1 }
  0xfc   :  { %549 = vrot.lane.b32.xlu0 %v7263_v31, %s7090_s24 }
  0xfd   :  { %v259_v47 = vpop.f32.mrb[12].mxu0  ;;  %v7307_v48 = vsel %vm346_vm2, %v11340_v43, %v11338_v45 }
  0xfe   :  { %11482 = vst [vmem:[#allocation17_spill] sm:$0xff] %v7307_v48  ;;  %567 = vrot.lane.b32.xlu1 %v7300_v46, %s7083_s19  ;;  %v261_v49 = vpop.f32.mrb[13].mxu0 }
  0xff   :  { %v263_v50 = vpop.f32.mrb[14].mxu0 }
 0x100   :  { %402 = vrot.lane.b32.xlu0 %v7263_v31, %s7082_s18  ;;  %v7316_v52 = vpack.c.bf16 %v263_v50, %v259_v47  ;;  %v265_v53 = vpop.f32.mrb[15].mxu0 }
 0x101   :  { %v7321_v55 = vpack.c.bf16 %v265_v53, %v261_v49  ;;  %v7446_v53 = vsel %vm364_vm5, %v7261_v29, %v7367_v8 }
 0x102   :  { %595 = vrot.lane.b32.xlu1 %v7314_v51, %s7087_s22  ;;  %v7328_v58 = vrot.slane %v7316_v52, 1  ;;  %v7331_v59 = vrot.slane %v7316_v52, 3  ;;  %v7334_v60 = vrot.slane %v7316_v52, 6  ;;  %v11343_v7 = vrot.slane %v7316_v52, 2  ;;  %11494 = vst [vmem:[#allocation29_spill] sm:$0xff] %v7446_v53 }
 0x103   :  { %11484 = vst [vmem:[#allocation19_spill] sm:$0xff] %v7321_v55  ;;  %v11337_v61 = vrot.slane %v7321_v55, 1  ;;  %v7639_v29 = vrot.slane %v7316_v52, 4 }
 0x104   :  { %344 = vrot.lane.b32.xlu0 %v7319_v54, %s7090_s24  ;;  %v7348_v1 = vsel %vm188_vm0, %v11346_v57, %v7331_v59  ;;  %v7354_v3 = vsel %vm346_vm2, %v11347_v56, %v7334_v60  ;;  %v7361_v6 = vsel %vm354_vm3, %v11344_v62, %v7328_v58  ;;  %v7381_v12 = vsel %vm382_vm4, %v11345_v4, %v11343_v7 }
 0x105   :  { %v269_v5 = vpop.f32.mrb[16].mxu0  ;;  %v7374_v10 = vsel %vm354_vm3, %v11339_v63, %v11337_v61  ;;  %11488 = vst [vmem:[#allocation23_spill] sm:$0xff] %v7381_v12 }
 0x106   :  { %362 = vrot.lane.b32.xlu1 %v7342_v0, %s7083_s19  ;;  %v271_v9 = vpop.f32.mrb[17].mxu0  ;;  %11487 = vst [vmem:[#allocation22_spill] sm:$0xff] %v7374_v10 }
 0x107   :  { %v273_v11 = vpop.f32.mrb[18].mxu0 }
 0x108   :  { %372 = vrot.lane.b32.xlu0 %v7367_v8, %s7085_s20  ;;  %v7388_v14 = vpack.c.bf16 %v273_v11, %v269_v5  ;;  %v275_v15 = vpop.f32.mrb[19].mxu0  ;;  %v394_v5 = vrot.slane %v7263_v31, 5 }
 0x109   :  { %v7390_v16 = vpack.c.bf16 %v275_v15, %v271_v9 }
 0x10a   :  { %390 = vrot.lane.b32.xlu1 %v7386_v13, %s7087_s22  ;;  %v7395_v17 = vrot.slane %v7388_v14, 3  ;;  %v7398_v18 = vrot.slane %v7388_v14, 6  ;;  %v7438_v42 = vrot.slane %v7388_v14, 5  ;;  %v11342_v9 = vrot.slane %v7388_v14, 7 }
 0x10b   :  { %11490 = vst [vmem:[#allocation25_spill] sm:$0xff] %v7390_v16  ;;  %v7481_v45 = vsel %vm392_vm7, %v7285_v39, %v394_v5 }
 0x10c   :  { %623 = vrot.lane.b32.xlu0 %v7300_v46, %s7091_s25  ;;  %v7405_v19 = vsel %vm188_vm0, %v7331_v59, %v7395_v17  ;;  %v7410_v20 = vsel %vm346_vm2, %v7334_v60, %v7398_v18  ;;  %11497 = vst [vmem:[#allocation32_spill] sm:$0xff] %v7481_v45 }
 0x10d   :  { %v279_v23 = vpop.f32.mrb[20].mxu0 }
 0x10e   :  { %352 = vrot.lane.b32.xlu1 %v7415_v21, %s7084_s1  ;;  %v281_v27 = vpop.f32.mrb[21].mxu0 }
 0x10f   :  { %v283_v30 = vpop.f32.mrb[22].mxu0 }
 0x110   :  { %342 = vrot.lane.b32.xlu0 %v7422_v28, %s7090_s24  ;;  %v7426_v32 = vpack.c.bf16 %v283_v30, %v279_v23  ;;  %v285_v37 = vpop.f32.mrb[23].mxu0  ;;  %v7470_v30 = vsel %vm374_vm6, %v7268_v33, %v7314_v51 }
 0x111   :  { %v7433_v40 = vpack.c.bf16 %v285_v37, %v281_v27  ;;  %11495 = vst [vmem:[#allocation30_spill] sm:$0xff] %v7470_v30 }
 0x112   :  { %360 = vrot.lane.b32.xlu1 %v7431_v38, %s7083_s19  ;;  %v947_v47 = vrot.slane %v7426_v32, 5  ;;  %v961_v49 = vrot.slane %v7426_v32, 3  ;;  %v11341_v50 = vrot.slane %v7426_v32, 6  ;;  %v933_v11 = vrot.slane %v7426_v32, 7 }
 0x113   :  { %11493 = vst [vmem:[#allocation28_spill] sm:$0xff] %v7433_v40  ;;  %v11352_v62 = vrot.slane %v7426_v32, 2  ;;  %v11516_v40 = vrot.slane %v7287_v41, 5 }
 0x114   :  { %370 = vrot.lane.b32.xlu0 %v7446_v53, %s7085_s20  ;;  %v7455_v15 = vsel %vm392_vm7, %v7438_v42, %v947_v47  ;;  %v7459_v23 = vsel %vm188_vm0, %v7395_v17, %v961_v49  ;;  %v7465_v27 = vsel %vm346_vm2, %v7398_v18, %v11341_v50  ;;  %v7475_v2 = vsel %vm374_vm6, %v11342_v9, %v933_v11 }
 0x115   :  { %v289_v37 = vpop.f32.mrb[24].mxu0  ;;  %11496 = vst [vmem:[#allocation31_spill] sm:$0xff] %v7475_v2  ;;  %v7490_v9 = vsel %vm382_vm4, %v7275_v35, %v7386_v13 }
 0x116   :  { %380 = vrot.lane.b32.xlu1 %v7470_v30, %s7086_s21  ;;  %v291_v61 = vpop.f32.mrb[25].mxu0  ;;  %11498 = vst [vmem:[#allocation33_spill] sm:$0xff] %v7490_v9 }
 0x117   :  { %v293_v63 = vpop.f32.mrb[26].mxu0 }
 0x118   :  { %398 = vrot.lane.b32.xlu0 %v7481_v45, %s7089_s23  ;;  %v7485_v43 = vpack.c.bf16 %v293_v63, %v289_v37  ;;  %v295_v50 = vpop.f32.mrb[27].mxu0  ;;  %v11501_v45 = vrot.slane %v7426_v32, 4 }
 0x119   :  { %v7492_v7 = vpack.c.bf16 %v295_v50, %v291_v61 }
 0x11a   :  { %388 = vrot.lane.b32.xlu1 %v7490_v9, %s7087_s22  ;;  %v7498_v4 = vrot.slane %v7485_v43, 5  ;;  %v7501_v57 = vrot.slane %v7485_v43, 2  ;;  %v7504_v63 = vrot.slane %v7485_v43, 7  ;;  %v7508_v56 = vrot.slane %v7485_v43, 3 }
 0x11b   :  { %11499 = vst [vmem:[#allocation34_spill] sm:$0xff] %v7492_v7  ;;  %v991_v61 = vrot.slane %v7485_v43, 4  ;;  %v11358_v9 = vrot.slane %v7287_v41, 5 }
 0x11c   :  { %551 = vrot.lane.b32.xlu0 %v7287_v41, %s7090_s24  ;;  %v7517_v50 = vsel %vm382_vm4, %v11352_v62, %v7501_v57  ;;  %v7521_v31 = vsel %vm392_vm7, %v947_v47, %v7498_v4  ;;  %v7525_v37 = vsel %vm374_vm6, %v933_v11, %v7504_v63  ;;  %v7529_v22 = vsel %vm188_vm0, %v961_v49, %v7508_v56 }
 0x11d   :  { %11500 = vst [vmem:[#allocation35_spill] sm:$0xff] %v7525_v37  ;;  %v7534_v10 = vsel %vm364_vm5, %v11501_v45, %v991_v61  ;;  %v11503_v62 = vrot.slane %v7287_v41, 6  ;;  %v11504_v11 = vrot.slane %v7287_v41, 3  ;;  %v11505_v45 = vrot.slane %v7287_v41, 2 }
 0x11e   :  { %11502 = vst [vmem:[#allocation36_spill] sm:$0xff] %v7534_v10  ;;  %615 = vrot.lane.b32.xlu1 %v7287_v41, %s7088_s0  ;;  %v7566_v24 = vsel %vm392_vm7, %v394_v5, %v11358_v9 }
 0x11f   :  { %v564_v47 = vsel %vm346_vm2, %v7300_v46, %v11503_v62  ;;  %v556_v49 = vsel %vm188_vm0, %v7319_v54, %v11504_v11  ;;  %v7552_v39 = vsel %vm382_vm4, %v7386_v13, %v11505_v45  ;;  %v11507_v46 = vrot.slane %v7287_v41, 1  ;;  %11508 = vst [vmem:[#allocation38_spill] sm:$0xff] %v7566_v24 }
 0x120   :  { %569 = vrot.lane.b32.xlu0 %v564_v47, %s7083_s19  ;;  %11506 = vst [vmem:[#allocation37_spill] sm:$0xff] %v7552_v39  ;;  %v583_v11 = vrot.slane %v7287_v41, 4  ;;  %v591_v13 = vrot.slane %v7287_v41, 7 }
 0x121   :  { %v574_v62 = vsel %vm354_vm3, %v7342_v0, %v11507_v46  ;;  %v299_v46 = vpop.f32.mrb[28].mxu0  ;;  %v7623_v0 = vrot.slane %v7316_v52, 7 }
 0x122   :  { %559 = vrot.lane.b32.xlu1 %v556_v49, %s7084_s1  ;;  %v584_v45 = vsel %vm364_vm5, %v7367_v8, %v583_v11  ;;  %v7577_v30 = vsel %vm374_vm6, %v7314_v51, %v591_v13  ;;  %v301_v5 = vpop.f32.mrb[29].mxu0 }
 0x123   :  { %11509 = vst [vmem:[#allocation39_spill] sm:$0xff] %v7577_v30  ;;  %v303_v9 = vpop.f32.mrb[30].mxu0  ;;  %11512 = vst [vmem:[#allocation42_spill] sm:$0xff] %v7623_v0 }
 0x124   :  { %605 = vrot.lane.b32.xlu0 %v7552_v39, %s7089_s23  ;;  %v7581_v35 = vpack.c.bf16 %v303_v9, %v299_v46  ;;  %v305_v8 = vpop.f32.mrb[31].mxu0 }
 0x125   :  { %v7584_v33 = vpack.c.bf16 %v305_v8, %v301_v5 }
 0x126   :  { %577 = vrot.lane.b32.xlu1 %v574_v62, %s7085_s20  ;;  %v1146_v53 = vrot.slane %v7581_v35, 2  ;;  %v1154_v36 = vrot.slane %v7581_v35, 5  ;;  %v1170_v9 = vrot.slane %v7581_v35, 3  ;;  %v1132_v8 = vrot.slane %v7581_v35, 4 }
 0x127   :  { %11510 = vst [vmem:[#allocation40_spill] sm:$0xff] %v7584_v33  ;;  %v11519_v39 = vrot.slane %v7581_v35, 6 }
 0x128   :  { %609 = vrot.lane.b32.xlu0 %v7566_v24, %s7082_s18  ;;  %v7605_v46 = vsel %vm392_vm7, %v7498_v4, %v1154_v36  ;;  %v7609_v5 = vsel %vm188_vm0, %v7508_v56, %v1170_v9  ;;  %v309_v24 = vpop.f32.mrb[32].mxu0 }
 0x129   :  { %v7661_v38 = vpop.f32.mrb[33].mxu0  ;;  %v7663_v44 = vpack.c.bf16 %v309_v24, %v309_v24 }
 0x12a   :  { %587 = vrot.lane.b32.xlu1 %v584_v45, %s7086_s21  ;;  %11514 = vst [vmem:[#allocation44_spill] sm:$0xff] %v7661_v38  ;;  %v313_v21 = vpop.f32.mrb[34].mxu0 }
 0x12b   :  { %v1138_v38 = vrot.slane %v7663_v44, 7  ;;  %v1190_v21 = vrot.slane %v7663_v44, 1 }
 0x12c   :  { %619 = vrot.lane.b32.xlu0 %v556_v49, %s7092_s26  ;;  %v1136_v49 = vrot.slane %v7581_v35, 7 }
 0x12e   :  { %597 = vrot.lane.b32.xlu1 %v7577_v30, %s7087_s22 }
 0x130   :  { %625 = vrot.lane.b32.xlu0 %v564_v47, %s7091_s25  ;;  %v7597_v47 = vsel %vm374_vm6, %v7504_v63, %v1136_v49 }
 0x132   :  { %629 = vrot.lane.b32.xlu1 %v574_v62, %s7093_s27  ;;  %v7601_v62 = vsel %vm382_vm4, %v7501_v57, %v1146_v53 }
 0x134   :  { %553 = vrot.lane.b32.xlu0 %v7316_v52, %s7090_s24 }
 0x136   :  { %635 = vrot.lane.b32.xlu1 %v584_v45, %s7094_s28  ;;  %v7614_v45 = vsel %vm364_vm5, %v991_v61, %v1132_v8  ;;  %v7634_v61 = vrot.slane %v7316_v52, 5 }
 0x137   :  { %11511 = vst [vmem:[#allocation41_spill] sm:$0xff] %v7614_v45 }
 0x138   :  { %808 = vrot.lane.b32.xlu0 %v7316_v52, %s7092_s26  ;;  %v7679_v24 = vsel %vm392_vm7, %v11516_v40, %v7634_v61  ;;  %v1148_v40 = vrot.slane %v7663_v44, 2 }
 0x139   :  { %11517 = vst [vmem:[#allocation46_spill] sm:$0xff] %v7679_v24 }
 0x13a   :  { %758 = vrot.lane.b32.xlu1 %v7316_v52, %s7084_s1  ;;  %v7713_v26 = vsel %vm382_vm4, %v1146_v53, %v1148_v40  ;;  %v7767_v40 = vrot.slane %v7388_v14, 1 }
 0x13c   :  { %581 = vrot.lane.b32.xlu0 %v7328_v58, %s7085_s20 }
 0x13e   :  { %617 = vrot.lane.b32.xlu1 %v7316_v52, %s7088_s0 }
 0x140   :  { %794 = vrot.lane.b32.xlu0 %v7623_v0, %s7089_s23 }
 0x142   :  { %764 = vrot.lane.b32.xlu1 %v7331_v59, %s7083_s19 }
 0x144   :  { %812 = vrot.lane.b32.xlu0 %v7331_v59, %s7091_s25  ;;  %v7655_v59 = vsel %vm374_vm6, %v591_v13, %v7623_v0  ;;  %v7669_v13 = vsel %vm364_vm5, %v583_v11, %v7639_v29  ;;  %v1134_v11 = vrot.slane %v7663_v44, 4 }
 0x145   :  { %11513 = vst [vmem:[#allocation43_spill] sm:$0xff] %v7655_v59 }
 0x146   :  { %772 = vrot.lane.b32.xlu1 %v7334_v60, %s7085_s20 }
 0x148   :  { %752 = vrot.lane.b32.xlu0 %v7634_v61, %s7090_s24 }
 0x14a   :  { %786 = vrot.lane.b32.xlu1 %v7639_v29, %s7087_s22 }
 0x14c   :  { %633 = vrot.lane.b32.xlu0 %v7328_v58, %s7093_s27 }
 0x14e   :  { %802 = vrot.lane.b32.xlu1 %v7634_v61, %s7088_s0 }
 0x150   :  { %561 = vrot.lane.b32.xlu0 %v7348_v1, %s7084_s1 }
 0x152   :  { %818 = vrot.lane.b32.xlu1 %v7334_v60, %s7093_s27  ;;  %v314_v60 = vpop.f32.mrb[35].mxu0 }
 0x153   :  { %v1180_v60 = vrot.slane %v7663_v44, 6 }
 0x154   :  { %571 = vrot.lane.b32.xlu0 %v7354_v3, %s7083_s19 }
 0x155   :  { %v7700_v48 = vsel %vm346_vm2, %v11519_v39, %v1180_v60  ;;  %v11522_v39 = vrot.slane %v7581_v35, 1 }
 0x156   :  { %599 = vrot.lane.b32.xlu1 %v7655_v59, %s7087_s22  ;;  %v1156_v59 = vrot.slane %v7663_v44, 5 }
 0x158   :  { %579 = vrot.lane.b32.xlu0 %v7361_v6, %s7085_s20 }
 0x15a   :  { %607 = vrot.lane.b32.xlu1 %v7381_v12, %s7089_s23  ;;  %v1172_v12 = vrot.slane %v7663_v44, 3 }
 0x15c   :  { %v7671_v25 = vpop.permute.xlu1 %400  ;;  %589 = vrot.lane.b32.xlu0 %v7669_v13, %s7086_s21  ;;  %v7695_v33 = vsel %vm188_vm0, %v1170_v9, %v1172_v12  ;;  %v7716_v12 = vsel %vm392_vm7, %v1154_v36, %v1156_v59  ;;  %v7721_v9 = vsel %vm354_vm3, %v11522_v39, %v1190_v21 }
 0x15d   :  { %11515 = vst [vmem:[#allocation45_spill] sm:$0xff] %v7671_v25 }
 0x15e   :  { %v7686_v25 = vpop.permute.xlu0 %358  ;;  %621 = vrot.lane.b32.xlu1 %v7348_v1, %s7092_s26  ;;  %v7706_v1 = vsel %vm374_vm6, %v1136_v49, %v1138_v38  ;;  %v7740_v49 = vrot.slane %v7388_v14, 4 }
 0x15f   :  { %11518 = vst [vmem:[#allocation47_spill] sm:$0xff] %v7686_v25  ;;  %v7703_v25 = vsel %vm364_vm5, %v1132_v8, %v1134_v11 }
 0x160   :  { %11520 = vst [vmem:[#allocation48_spill] sm:$0xff] %v7703_v25  ;;  %v7708_v41 = vpop.permute.xlu1 %350  ;;  %611 = vrot.lane.b32.xlu0 %v7679_v24, %s7082_s18  ;;  %11527 = vst [vmem:[#allocation54_spill] sm:$0xff] %v7740_v49  ;;  %v11537_v24 = vrot.slane %v7316_v52, 2 }
 0x161   :  { %11521 = vst [vmem:[#allocation49_spill] sm:$0xff] %v7708_v41 }
 0x162   :  { %v7723_v8 = vpop.permute.xlu0 %368  ;;  %955 = vrot.lane.b32.xlu1 %v7388_v14, %s7083_s19 }
 0x163   :  { %11523 = vst [vmem:[#allocation50_spill] sm:$0xff] %v7723_v8 }
 0x164   :  { %v7727_v38 = vpop.permute.xlu1 %378  ;;  %627 = vrot.lane.b32.xlu0 %v7354_v3, %s7091_s25 }
 0x165   :  { %11524 = vst [vmem:[#allocation51_spill] sm:$0xff] %v7727_v38 }
 0x166   :  { %v7731_v53 = vpop.permute.xlu0 %386  ;;  %810 = vrot.lane.b32.xlu1 %v7388_v14, %s7092_s26 }
 0x167   :  { %11525 = vst [vmem:[#allocation52_spill] sm:$0xff] %v7731_v53 }
 0x168   :  { %v7735_v36 = vpop.permute.xlu1 %404  ;;  %631 = vrot.lane.b32.xlu0 %v7361_v6, %s7093_s27 }
 0x169   :  { %11526 = vst [vmem:[#allocation53_spill] sm:$0xff] %v7735_v36 }
 0x16a   :  { %v7742_v59 = vpop.permute.xlu0 %396  ;;  %790 = vrot.lane.b32.xlu1 %v7740_v49, %s7087_s22 }
 0x16b   :  { %11528 = vst [vmem:[#allocation55_spill] sm:$0xff] %v7742_v59  ;;  %v7781_v59 = vrot.slane %v7388_v14, 2 }
 0x16c   :  { %v7746_v21 = vpop.permute.xlu1 %613  ;;  %760 = vrot.lane.b32.xlu0 %v7388_v14, %s7084_s1 }
 0x16d   :  { %11534 = vst [vmem:[#allocation61_spill] sm:$0xff] %v7781_v59 }
 0x16e   :  { %v7750_v3 = vpop.permute.xlu0 %549  ;;  %806 = vrot.lane.b32.xlu1 %v7438_v42, %s7088_s0 }
 0x16f   :  { %11529 = vst [vmem:[#allocation56_spill] sm:$0xff] %v7750_v3  ;;  %v7794_v3 = vsel %vm382_vm4, %v11537_v24, %v7781_v59 }
 0x170   :  { %v7754_v60 = vpop.permute.xlu1 %567  ;;  %1011 = vrot.lane.b32.xlu0 %v7388_v14, %s7091_s25  ;;  %11538 = vst [vmem:[#allocation64_spill] sm:$0xff] %v7794_v3 }
 0x171   :  { %11530 = vst [vmem:[#allocation57_spill] sm:$0xff] %v7754_v60 }
 0x172   :  { %v7758_v6 = vpop.permute.xlu0 %402  ;;  %766 = vrot.lane.b32.xlu1 %v7405_v19, %s7083_s19 }
 0x173   :  { %11531 = vst [vmem:[#allocation58_spill] sm:$0xff] %v7758_v6  ;;  %v779_v6 = vsel %vm354_vm3, %v7328_v58, %v7767_v40 }
 0x174   :  { %v7762_v11 = vpop.permute.xlu1 %595  ;;  %756 = vrot.lane.b32.xlu0 %v7438_v42, %s7090_s24 }
 0x176   :  { %v7769_v39 = vpop.permute.xlu0 %344  ;;  %774 = vrot.lane.b32.xlu1 %v7410_v20, %s7085_s20 }
 0x177   :  { %11532 = vst [vmem:[#allocation59_spill] sm:$0xff] %v7769_v39  ;;  %v11553_v39 = vrot.slane %v7426_v32, 2 }
 0x178   :  { %v7773_v36 = vpop.permute.xlu1 %362  ;;  %768 = vrot.lane.b32.xlu0 %v7395_v17, %s7083_s19 }
 0x179   :  { %11533 = vst [vmem:[#allocation60_spill] sm:$0xff] %v7773_v36  ;;  %v938_v41 = vsel %vm382_vm4, %v7781_v59, %v11553_v39 }
 0x17a   :  { %v7783_v53 = vpop.permute.xlu0 %372  ;;  %780 = vrot.lane.b32.xlu1 %v779_v6, %s7086_s21 }
 0x17b   :  { %11535 = vst [vmem:[#allocation62_spill] sm:$0xff] %v7783_v53 }
 0x17c   :  { %v7786_v38 = vpop.permute.xlu1 %390  ;;  %776 = vrot.lane.b32.xlu0 %v7398_v18, %s7085_s20 }
 0x17d   :  { %11536 = vst [vmem:[#allocation63_spill] sm:$0xff] %v7786_v38 }
 0x17e   :  { %v7796_v36 = vpop.permute.xlu0 %623  ;;  %798 = vrot.lane.b32.xlu1 %v7794_v3, %s7082_s18 }
 0x17f   :  { %11539 = vst [vmem:[#allocation65_spill] sm:$0xff] %v7796_v36 }
 0x180   :  { %v7800_v58 = vpop.permute.xlu1 %352  ;;  %782 = vrot.lane.b32.xlu0 %v7767_v40, %s7086_s21 }
 0x181   :  { %11540 = vst [vmem:[#allocation66_spill] sm:$0xff] %v7800_v58 }
 0x182   :  { %v7804_v38 = vpop.permute.xlu0 %342  ;;  %814 = vrot.lane.b32.xlu1 %v7405_v19, %s7091_s25 }
 0x183   :  { %11541 = vst [vmem:[#allocation67_spill] sm:$0xff] %v7804_v38 }
 0x184   :  { %v7808_v53 = vpop.permute.xlu1 %360  ;;  %800 = vrot.lane.b32.xlu0 %v7781_v59, %s7082_s18 }
 0x185   :  { %11542 = vst [vmem:[#allocation68_spill] sm:$0xff] %v7808_v53 }
 0x186   :  { %v7812_v52 = vpop.permute.xlu0 %370  ;;  %824 = vrot.lane.b32.xlu1 %v779_v6, %s7094_s28  ;;  %v751_v6 = vsel %vm392_vm7, %v7634_v61, %v7438_v42 }
 0x187   :  { %11543 = vst [vmem:[#allocation69_spill] sm:$0xff] %v7812_v52  ;;  %v11550_v52 = vrot.slane %v7388_v14, 7 }
 0x188   :  { %v7815_v24 = vpop.permute.xlu1 %380  ;;  %816 = vrot.lane.b32.xlu0 %v7395_v17, %s7091_s25 }
 0x189   :  { %11544 = vst [vmem:[#allocation70_spill] sm:$0xff] %v7815_v24  ;;  %v7863_v3 = vsel %vm374_vm6, %v7623_v0, %v11550_v52 }
 0x18a   :  { %v7819_v8 = vpop.permute.xlu0 %398  ;;  %951 = vrot.lane.b32.xlu1 %v7455_v15, %s7084_s1  ;;  %11551 = vst [vmem:[#allocation76_spill] sm:$0xff] %v7863_v3 }
 0x18b   :  { %11545 = vst [vmem:[#allocation71_spill] sm:$0xff] %v7819_v8  ;;  %v979_v8 = vrot.slane %v7426_v32, 1 }
 0x18c   :  { %v7823_v19 = vpop.permute.xlu1 %388  ;;  %822 = vrot.lane.b32.xlu0 %v7398_v18, %s7093_s27  ;;  %v7845_v18 = vsel %vm364_vm5, %v7639_v29, %v7740_v49 }
 0x18d   :  { %11546 = vst [vmem:[#allocation72_spill] sm:$0xff] %v7823_v19  ;;  %11549 = vst [vmem:[#allocation75_spill] sm:$0xff] %v7845_v18  ;;  %v7853_v42 = vsel %vm354_vm3, %v7767_v40, %v979_v8 }
 0x18e   :  { %v7827_v53 = vpop.permute.xlu0 %551  ;;  %965 = vrot.lane.b32.xlu1 %v7459_v23, %s7085_s20 }
 0x18f   :  { %11547 = vst [vmem:[#allocation73_spill] sm:$0xff] %v7827_v53 }
 0x190   :  { %v7834_v17 = vpop.permute.xlu1 %615  ;;  %754 = vrot.lane.b32.xlu0 %v751_v6, %s7090_s24 }
 0x192   :  { %v7838_v24 = vpop.permute.xlu0 %569  ;;  %975 = vrot.lane.b32.xlu1 %v7465_v27, %s7086_s21 }
 0x193   :  { %11548 = vst [vmem:[#allocation74_spill] sm:$0xff] %v7838_v24 }
 0x194   :  { %v7847_v19 = vpop.permute.xlu1 %559  ;;  %788 = vrot.lane.b32.xlu0 %v7845_v18, %s7087_s22 }
 0x196   :  { %v7855_v61 = vpop.permute.xlu0 %605  ;;  %983 = vrot.lane.b32.xlu1 %v7853_v42, %s7087_s22 }
 0x198   :  { %v7865_v58 = vpop.permute.xlu1 %577  ;;  %796 = vrot.lane.b32.xlu0 %v7863_v3, %s7089_s23 }
 0x199   :  { %11552 = vst [vmem:[#allocation77_spill] sm:$0xff] %v7865_v58 }
 0x19a   :  { %v7873_v38 = vpop.permute.xlu0 %609  ;;  %1001 = vrot.lane.b32.xlu1 %v938_v41, %s7088_s0 }
 0x19c   :  { %v7876_v36 = vpop.permute.xlu1 %587  ;;  %804 = vrot.lane.b32.xlu0 %v751_v6, %s7088_s0 }
 0x19e   :  { %v7879_v14 = vpop.permute.xlu0 %619  ;;  %1017 = vrot.lane.b32.xlu1 %v7459_v23, %s7093_s27 }
 0x19f   :  { %11554 = vst [vmem:[#allocation78_spill] sm:$0xff] %v7879_v14 }
 0x1a0   :  { %v7883_v52 = vpop.permute.xlu1 %597  ;;  %820 = vrot.lane.b32.xlu0 %v7410_v20, %s7093_s27 }
 0x1a2   :  { %v7887_v3 = vpop.permute.xlu0 %625  ;;  %941 = vrot.lane.b32.xlu1 %v938_v41, %s7090_s24  ;;  %v11559_v41 = vrot.slane %v7426_v32, 4 }
 0x1a3   :  { %11555 = vst [vmem:[#allocation79_spill] sm:$0xff] %v7887_v3  ;;  %v7925_v3 = vrot.slane %v7485_v43, 1 }
 0x1a4   :  { %v7890_v39 = vpop.permute.xlu1 %629  ;;  %957 = vrot.lane.b32.xlu0 %v7426_v32, %s7083_s19  ;;  %v7910_v59 = vsel %vm364_vm5, %v7740_v49, %v11559_v41 }
 0x1a5   :  { %11556 = vst [vmem:[#allocation80_spill] sm:$0xff] %v7890_v39  ;;  %11560 = vst [vmem:[#allocation83_spill] sm:$0xff] %v7910_v59 }
 0x1a6   :  { %v7894_v6 = vpop.permute.xlu0 %553  ;;  %1023 = vrot.lane.b32.xlu1 %v7465_v27, %s7094_s28 }
 0x1a8   :  { %v7898_v23 = vpop.permute.xlu1 %635  ;;  %1013 = vrot.lane.b32.xlu0 %v7426_v32, %s7091_s25 }
 0x1a9   :  { %11557 = vst [vmem:[#allocation81_spill] sm:$0xff] %v7898_v23 }
 0x1aa   :  { %v7902_v20 = vpop.permute.xlu0 %808  ;;  %1164 = vrot.lane.b32.xlu1 %v7485_v43, %s7085_s20 }
 0x1ab   :  { %11558 = vst [vmem:[#allocation82_spill] sm:$0xff] %v7902_v20 }
 0x1ac   :  { %v7912_v39 = vpop.permute.xlu1 %758  ;;  %993 = vrot.lane.b32.xlu0 %v7910_v59, %s7089_s23 }
 0x1ae   :  { %v7916_v27 = vpop.permute.xlu0 %581  ;;  %1158 = vrot.lane.b32.xlu1 %v7498_v4, %s7083_s19 }
 0x1af   :  { %11561 = vst [vmem:[#allocation84_spill] sm:$0xff] %v7916_v27 }
 0x1b0   :  { %v7920_v23 = vpop.permute.xlu1 %617  ;;  %997 = vrot.lane.b32.xlu0 %v7475_v2, %s7082_s18 }
 0x1b1   :  { %11562 = vst [vmem:[#allocation85_spill] sm:$0xff] %v7920_v23 }
 0x1b2   :  { %v7927_v41 = vpop.permute.xlu0 %794  ;;  %987 = vrot.lane.b32.xlu1 %v7925_v3, %s7087_s22 }
 0x1b4   :  { %v7931_v0 = vpop.permute.xlu1 %764  ;;  %1007 = vrot.lane.b32.xlu0 %v7455_v15, %s7092_s26 }
 0x1b5   :  { %11563 = vst [vmem:[#allocation86_spill] sm:$0xff] %v7931_v0 }
 0x1b6   :  { %v7935_v59 = vpop.permute.xlu0 %812  ;;  %1005 = vrot.lane.b32.xlu1 %v7501_v57, %s7088_s0 }
 0x1b7   :  { %11564 = vst [vmem:[#allocation87_spill] sm:$0xff] %v7935_v59 }
 0x1b8   :  { %v7939_v49 = vpop.permute.xlu1 %772  ;;  %959 = vrot.lane.b32.xlu0 %v7485_v43, %s7083_s19 }
 0x1b9   :  { %11565 = vst [vmem:[#allocation88_spill] sm:$0xff] %v7939_v49 }
 0x1ba   :  { %v7943_v2 = vpop.permute.xlu0 %752  ;;  %1210 = vrot.lane.b32.xlu1 %v7498_v4, %s7091_s25 }
 0x1bb   :  { %11566 = vst [vmem:[#allocation89_spill] sm:$0xff] %v7943_v2 }
 0x1bc   :  { %v7947_v20 = vpop.permute.xlu1 %786  ;;  %1015 = vrot.lane.b32.xlu0 %v7485_v43, %s7091_s25 }
 0x1be   :  { %v7951_v15 = vpop.permute.xlu0 %633  ;;  %1140 = vrot.lane.b32.xlu1 %v7504_v63, %s7090_s24 }
 0x1bf   :  { %11567 = vst [vmem:[#allocation90_spill] sm:$0xff] %v7951_v15  ;;  %v7969_v15 = vsel %vm354_vm3, %v979_v8, %v7925_v3 }
 0x1c0   :  { %v7955_v59 = vpop.permute.xlu1 %802  ;;  %1216 = vrot.lane.b32.xlu0 %v7485_v43, %s7093_s27  ;;  %11570 = vst [vmem:[#allocation93_spill] sm:$0xff] %v7969_v15 }
 0x1c2   :  { %v7959_v23 = vpop.permute.xlu0 %561  ;;  %943 = vrot.lane.b32.xlu1 %v7517_v50, %s7090_s24 }
 0x1c3   :  { %11568 = vst [vmem:[#allocation91_spill] sm:$0xff] %v7959_v23 }
 0x1c4   :  { %v7963_v4 = vpop.permute.xlu1 %818  ;;  %945 = vrot.lane.b32.xlu0 %v7501_v57, %s7090_s24  ;;  %v7984_v57 = vrot.slane %v7485_v43, 6 }
 0x1c5   :  { %11569 = vst [vmem:[#allocation92_spill] sm:$0xff] %v7963_v4 }
 0x1c6   :  { %v7971_v2 = vpop.permute.xlu0 %571  ;;  %985 = vrot.lane.b32.xlu1 %v7969_v15, %s7087_s22 }
 0x1c7   :  { %11571 = vst [vmem:[#allocation94_spill] sm:$0xff] %v7971_v2 }
 0x1c8   :  { %v7975_v14 = vpop.permute.xlu1 %599  ;;  %969 = vrot.lane.b32.xlu0 %v7508_v56, %s7085_s20 }
 0x1ca   :  { %v7979_v18 = vpop.permute.xlu0 %579  ;;  %1003 = vrot.lane.b32.xlu1 %v7517_v50, %s7088_s0 }
 0x1cb   :  { %11572 = vst [vmem:[#allocation95_spill] sm:$0xff] %v7979_v18 }
 0x1cc   :  { %v7986_v8 = vpop.permute.xlu1 %607  ;;  %1182 = vrot.lane.b32.xlu0 %v7984_v57, %s7087_s22 }
 0x1ce   :  { %v7990_v4 = vpop.permute.xlu0 %589  ;;  %1009 = vrot.lane.b32.xlu1 %v7521_v31, %s7092_s26 }
 0x1d0   :  { %v7994_v15 = vpop.permute.xlu1 %621  ;;  %1200 = vrot.lane.b32.xlu0 %v7504_v63, %s7088_s0 }
 0x1d1   :  { %11573 = vst [vmem:[#allocation96_spill] sm:$0xff] %v7994_v15 }
 0x1d2   :  { %v7998_v30 = vpop.permute.xlu0 %611  ;;  %1166 = vrot.lane.b32.xlu1 %v7581_v35, %s7085_s20 }
 0x1d4   :  { %v8002_v43 = vpop.permute.xlu1 %955  ;;  %1021 = vrot.lane.b32.xlu0 %v7508_v56, %s7093_s27 }
 0x1d5   :  { %11574 = vst [vmem:[#allocation97_spill] sm:$0xff] %v8002_v43 }
 0x1d6   :  { %v8006_v50 = vpop.permute.xlu0 %627  ;;  %1142 = vrot.lane.b32.xlu1 %v7597_v47, %s7090_s24 }
 0x1d7   :  { %11575 = vst [vmem:[#allocation98_spill] sm:$0xff] %v8006_v50  ;;  %v11579_v50 = vrot.slane %v7426_v32, 6  ;;  %v11583_v32 = vrot.slane %v7581_v35, 6 }
 0x1d8   :  { %v8010_v54 = vpop.permute.xlu1 %810  ;;  %953 = vrot.lane.b32.xlu0 %v7521_v31, %s7084_s1 }
 0x1d9   :  { %11576 = vst [vmem:[#allocation99_spill] sm:$0xff] %v8010_v54  ;;  %v8030_v31 = vsel %vm346_vm2, %v11579_v50, %v7984_v57  ;;  %v8048_v50 = vsel %vm346_vm2, %v7984_v57, %v11583_v32 }
 0x1da   :  { %v8014_v63 = vpop.permute.xlu0 %631  ;;  %1150 = vrot.lane.b32.xlu1 %v7601_v62, %s7084_s1  ;;  %11584 = vst [vmem:[#allocation105_spill] sm:$0xff] %v8048_v50 }
 0x1db   :  { %11577 = vst [vmem:[#allocation100_spill] sm:$0xff] %v8014_v63 }
 0x1dc   :  { %v8018_v15 = vpop.permute.xlu1 %790  ;;  %967 = vrot.lane.b32.xlu0 %v7529_v22, %s7085_s20 }
 0x1de   :  { %v8022_v56 = vpop.permute.xlu0 %760  ;;  %1160 = vrot.lane.b32.xlu1 %v7605_v46, %s7083_s19 }
 0x1df   :  { %11578 = vst [vmem:[#allocation101_spill] sm:$0xff] %v8022_v56 }
 0x1e0   :  { %v8032_v63 = vpop.permute.xlu1 %806  ;;  %977 = vrot.lane.b32.xlu0 %v8030_v31, %s7086_s21 }
 0x1e1   :  { %11580 = vst [vmem:[#allocation102_spill] sm:$0xff] %v8032_v63 }
 0x1e2   :  { %v8036_v54 = vpop.permute.xlu0 %1011  ;;  %1174 = vrot.lane.b32.xlu1 %v7609_v5, %s7086_s21 }
 0x1e3   :  { %11581 = vst [vmem:[#allocation103_spill] sm:$0xff] %v8036_v54 }
 0x1e4   :  { %v8040_v16 = vpop.permute.xlu1 %766  ;;  %995 = vrot.lane.b32.xlu0 %v7534_v10, %s7089_s23 }
 0x1e5   :  { %11582 = vst [vmem:[#allocation104_spill] sm:$0xff] %v8040_v16 }
 0x1e6   :  { %v8050_v63 = vpop.permute.xlu0 %756  ;;  %1184 = vrot.lane.b32.xlu1 %v8048_v50, %s7087_s22 }
 0x1e8   :  { %v8054_v54 = vpop.permute.xlu1 %774  ;;  %999 = vrot.lane.b32.xlu0 %v7525_v37, %s7082_s18 }
 0x1e9   :  { %11585 = vst [vmem:[#allocation106_spill] sm:$0xff] %v8054_v54 }
 0x1ea   :  { %v8058_v7 = vpop.permute.xlu0 %768  ;;  %1202 = vrot.lane.b32.xlu1 %v7597_v47, %s7088_s0  ;;  %v11588_v47 = vrot.slane %v7581_v35, 1 }
 0x1eb   :  { %11586 = vst [vmem:[#allocation107_spill] sm:$0xff] %v8058_v7 }
 0x1ec   :  { %v8062_v10 = vpop.permute.xlu1 %780  ;;  %1019 = vrot.lane.b32.xlu0 %v7529_v22, %s7093_s27  ;;  %v8082_v22 = vsel %vm354_vm3, %v7925_v3, %v11588_v47 }
 0x1ee   :  { %v8066_v32 = vpop.permute.xlu0 %776  ;;  %1176 = vrot.lane.b32.xlu1 %v7695_v33, %s7086_s21 }
 0x1ef   :  { %11587 = vst [vmem:[#allocation108_spill] sm:$0xff] %v8066_v32 }
 0x1f0   :  { %v8070_v50 = vpop.permute.xlu1 %798  ;;  %1218 = vrot.lane.b32.xlu0 %v7581_v35, %s7093_s27 }
 0x1f2   :  { %v8074_v37 = vpop.permute.xlu0 %782  ;;  %1186 = vrot.lane.b32.xlu1 %v7700_v48, %s7087_s22 }
 0x1f4   :  { %v8084_v55 = vpop.permute.xlu1 %814  ;;  %1192 = vrot.lane.b32.xlu0 %v8082_v22, %s7089_s23 }
 0x1f5   :  { %11589 = vst [vmem:[#allocation109_spill] sm:$0xff] %v8084_v55 }
 0x1f6   :  { %v8088_v34 = vpop.permute.xlu0 %800  ;;  %1198 = vrot.lane.b32.xlu1 %v7703_v25, %s7082_s18 }
 0x1f8   :  { %v8092_v43 = vpop.permute.xlu1 %824  ;;  %1196 = vrot.lane.b32.xlu0 %v7614_v45, %s7082_s18 }
 0x1f9   :  { %11590 = vst [vmem:[#allocation110_spill] sm:$0xff] %v8092_v43 }
 0x1fa   :  { %v8096_v35 = vpop.permute.xlu0 %816  ;;  %1204 = vrot.lane.b32.xlu1 %v7706_v1, %s7088_s0 }
 0x1fb   :  { %11591 = vst [vmem:[#allocation111_spill] sm:$0xff] %v8096_v35 }
 0x1fc   :  { %v8100_v47 = vpop.permute.xlu1 %951  ;;  %1206 = vrot.lane.b32.xlu0 %v7601_v62, %s7092_s26 }
 0x1fe   :  { %v8104_v55 = vpop.permute.xlu0 %822  ;;  %1222 = vrot.lane.b32.xlu1 %v7609_v5, %s7094_s28 }
 0x1ff   :  { %11592 = vst [vmem:[#allocation112_spill] sm:$0xff] %v8104_v55 }
 0x200   :  { %v8108_v25 = vpop.permute.xlu1 %965  ;;  %1212 = vrot.lane.b32.xlu0 %v7605_v46, %s7091_s25 }
 0x201   :  { %11593 = vst [vmem:[#allocation113_spill] sm:$0xff] %v8108_v25 }
 0x202   :  { %v8112_v43 = vpop.permute.xlu0 %754  ;;  %639 = vrot.lane.b32.xlu1 %v7314_v51, %s7095_s29 }
 0x204   :  { %v8116_v35 = vpop.permute.xlu1 %975  ;;  %1168 = vrot.lane.b32.xlu0 %v7663_v44, %s7085_s20 }
 0x206   :  { %v8120_v62 = vpop.permute.xlu0 %788  ;;  %828 = vrot.lane.b32.xlu1 %v7639_v29, %s7095_s29 }
 0x208   :  { %v8124_v5 = vpop.permute.xlu1 %983  ;;  %1144 = vrot.lane.b32.xlu0 %v7706_v1, %s7090_s24 }
 0x20a   :  { %v8128_v46 = vpop.permute.xlu0 %796  ;;  %1027 = vrot.lane.b32.xlu1 %v7853_v42, %s7095_s29 }
 0x20c   :  { %v8132_v51 = vpop.permute.xlu1 %1001  ;;  %1152 = vrot.lane.b32.xlu0 %v7713_v26, %s7084_s1 }
 0x20e   :  { %v8136_v55 = vpop.permute.xlu0 %804  ;;  %1214 = vrot.lane.b32.xlu1 %v7716_v12, %s7091_s25 }
 0x210   :  { %v8140_v29 = vpop.permute.xlu1 %1017  ;;  %1162 = vrot.lane.b32.xlu0 %v7716_v12, %s7083_s19 }
 0x211   :  { %11594 = vst [vmem:[#allocation114_spill] sm:$0xff] %v8140_v29 }
 0x212   :  { %v8144_v1 = vpop.permute.xlu0 %820  ;;  %1224 = vrot.lane.b32.xlu1 %v7695_v33, %s7094_s28 }
 0x213   :  { %11595 = vst [vmem:[#allocation115_spill] sm:$0xff] %v8144_v1 }
 0x214   :  { %v8148_v42 = vpop.permute.xlu1 %941  ;;  %1194 = vrot.lane.b32.xlu0 %v7721_v9, %s7089_s23 }
 0x216   :  { %v8152_v45 = vpop.permute.xlu0 %957  ;;  %1346 = vrot.lane.b32.xlu1 %v7827_v53, %s7096_s30 }
 0x217   :  { %11596 = vst [vmem:[#allocation116_spill] sm:$0xff] %v8152_v45 }
 0x218   :  { %v8156_v29 = vpop.permute.xlu1 %1023  ;;  %1208 = vrot.lane.b32.xlu0 %v7713_v26, %s7092_s26 }
 0x219   :  { %11597 = vst [vmem:[#allocation117_spill] sm:$0xff] %v8156_v29 }
 0x21a   :  { %v8160_v12 = vpop.permute.xlu0 %1013  ;;  %1372 = vrot.lane.b32.xlu1 %v7834_v17, %s7096_s30 }
 0x21c   :  { %v8164_v33 = vpop.permute.xlu1 %1164  ;;  %1220 = vrot.lane.b32.xlu0 %v7663_v44, %s7093_s27 }
 0x21d   :  { %11598 = vst [vmem:[#allocation118_spill] sm:$0xff] %v8164_v33 }
 0x21e   :  { %v8168_v1 = vpop.permute.xlu0 %993  ;;  %1352 = vrot.lane.b32.xlu1 %v7838_v24, %s7096_s30 }
 0x220   :  { %v8172_v53 = vpop.permute.xlu1 %1158  ;;  %637 = vrot.lane.b32.xlu0 %v7669_v13, %s7094_s28 }
 0x221   :  { %11599 = vst [vmem:[#allocation119_spill] sm:$0xff] %v8172_v53 }
 0x222   :  { %v8176_v26 = vpop.permute.xlu0 %997  ;;  %1368 = vrot.lane.b32.xlu1 %v7873_v38, %s7096_s30 }
 0x224   :  { %v8180_v17 = vpop.permute.xlu1 %987  ;;  %826 = vrot.lane.b32.xlu0 %v7767_v40, %s7094_s28  ;;  %v657_v40 = vsel %vm354_vm3, %v7959_v23, %v7754_v60 }
 0x226   :  { %v8184_v44 = vpop.permute.xlu0 %1007  ;;  %1356 = vrot.lane.b32.xlu1 %v7979_v18, %s7096_s30 }
 0x228   :  { %v8188_v24 = vpop.permute.xlu1 %1005  ;;  %1025 = vrot.lane.b32.xlu0 %v8030_v31, %s7094_s28 }
 0x22a   :  { %v8192_v13 = vpop.permute.xlu0 %959  ;;  %1366 = vrot.lane.b32.xlu1 %v7986_v8, %s7096_s30  ;;  %v660_v8 = vsel %vm364_vm5, %v7971_v2, %v7865_v58  ;;  %v1057_v2 = vsel %vm392_vm7, %v8180_v17, %v8168_v1 }
 0x22b   :  { %11600 = vst [vmem:[#allocation120_spill] sm:$0xff] %v8192_v13 }
 0x22c   :  { %v8196_v38 = vpop.permute.xlu1 %1210  ;;  %406 = vrot.lane.b32.xlu0 %v7422_v28, %s7088_s0 }
 0x22e   :  { %v8203_v18 = vpop.permute.xlu0 %1015  ;;  %1350 = vrot.lane.b32.xlu1 %v657_v40, %s7096_s30  ;;  %v666_v40 = vsel %vm382_vm4, %v7990_v4, %v7762_v11  ;;  %v663_v11 = vsel %vm374_vm6, %v7916_v27, %v7876_v36  ;;  %v849_v36 = vsel %vm364_vm5, %v8058_v7, %v7939_v49  ;;  %v11628_v49 = vld [vmem:[#allocation39_spill] sm:$0xff] }
 0x230   :  { %v8206_v29 = vpop.permute.xlu1 %1140  ;;  %1226 = vrot.lane.b32.xlu0 %v7984_v57, %s7095_s29  ;;  %v8227_v57 = vsel %vm346_vm2, %v7894_v6, %v7847_v19 }
 0x232   :  { %v8213_v31 = vpop.permute.xlu0 %1216  ;;  %1354 = vrot.lane.b32.xlu1 %v660_v8, %s7096_s30 }
 0x234   :  { %v8216_v28 = vpop.permute.xlu1 %943  ;;  %1362 = vrot.lane.b32.xlu0 %v7883_v52, %s7096_s30  ;;  %v669_v52 = vsel %vm392_vm7, %v7975_v14, %v7855_v61  ;;  %v672_v61 = vsel %vm188_vm0, %v7998_v30, %v7746_v21 }
 0x236   :  { %v946_v23 = vpop.permute.xlu0 %945  ;;  %1360 = vrot.lane.b32.xlu1 %v666_v40, %s7096_s30  ;;  %v846_v40 = vsel %vm354_vm3, %v8022_v56, %v7931_v0  ;;  %v11635_v56 = vld [vmem:[#allocation93_spill] sm:$0xff] }
 0x238   :  { %v8229_v58 = vpop.permute.xlu1 %985  ;;  %1348 = vrot.lane.b32.xlu0 %v8227_v57, %s7096_s30 }
 0x23a   :  { %v8236_v8 = vpop.permute.xlu0 %969  ;;  %1364 = vrot.lane.b32.xlu1 %v669_v52, %s7096_s30 }
 0x23b   :  { %11601 = vst [vmem:[#allocation121_spill] sm:$0xff] %v8236_v8 }
 0x23c   :  { %v8242_v4 = vpop.permute.xlu1 %1003  ;;  %1358 = vrot.lane.b32.xlu0 %v663_v11, %s7096_s30  ;;  %v858_v11 = vsel %vm392_vm7, %v8018_v15, %v7927_v41 }
 0x23e   :  { %v8245_v19 = vpop.permute.xlu0 %1182  ;;  %1434 = vrot.lane.b32.xlu1 %v8040_v16, %s7097_s13 }
 0x240   :  { %v8252_v14 = vpop.permute.xlu1 %1009  ;;  %1370 = vrot.lane.b32.xlu0 %v672_v61, %s7096_s30 }
 0x242   :  { %v8258_v6 = vpop.permute.xlu0 %1200  ;;  %1436 = vrot.lane.b32.xlu1 %v849_v36, %s7097_s13  ;;  %v8284_v36 = vsel %vm346_vm2, %v8050_v63, %v7912_v39  ;;  %v861_v39 = vsel %vm188_vm0, %v8088_v34, %v7955_v59  ;;  %v855_v63 = vsel %vm382_vm4, %v8074_v37, %v7947_v20  ;;  %v8316_v34 = vsel %vm346_vm2, %v946_v23, %v8100_v47  ;;  %v6884_v23 = vld [vmem:[%s11324_s2] sm:$0xff]  }
 0x243   :  { %v852_v37 = vsel %vm374_vm6, %v8066_v32, %v8062_v10 }
 0x244   :  { %v8264_v52 = vpop.permute.xlu1 %1166  ;;  %1432 = vrot.lane.b32.xlu0 %v846_v40, %s7097_s13 }
 0x245   :  { %11602 = vst [vmem:[#allocation122_spill] sm:$0xff] %v8264_v52 }
 0x246   :  { %v8267_v30 = vpop.permute.xlu0 %1021  ;;  %1444 = vrot.lane.b32.xlu1 %v8120_v62, %s7097_s13 }
 0x248   :  { %v8271_v21 = vpop.permute.xlu1 %1142  ;;  %1428 = vrot.lane.b32.xlu0 %v8112_v43, %s7097_s13 }
 0x24a   :  { %v8278_v61 = vpop.permute.xlu0 %953  ;;  %1446 = vrot.lane.b32.xlu1 %v858_v11, %s7097_s13 }
 0x24b   :  { %11603 = vst [vmem:[#allocation123_spill] sm:$0xff] %v8278_v61 }
 0x24c   :  { %v8286_v40 = vpop.permute.xlu1 %1150  ;;  %1430 = vrot.lane.b32.xlu0 %v8284_v36, %s7097_s13 }
 0x24e   :  { %v8290_v62 = vpop.permute.xlu0 %967  ;;  %1450 = vrot.lane.b32.xlu1 %v8070_v50, %s7097_s13 }
 0x24f   :  { %11604 = vst [vmem:[#allocation124_spill] sm:$0xff] %v8290_v62 }
 0x250   :  { %v8294_v41 = vpop.permute.xlu1 %1160  ;;  %1438 = vrot.lane.b32.xlu0 %v8054_v54, %s7097_s13  ;;  %v7100_v54 = vmov 65535  }
 0x251   :  { %11605 = vst [vmem:[#allocation125_spill] sm:$0xff] %v8294_v41 }
 0x252   :  { %v978_v15 = vpop.permute.xlu0 %977  ;;  %1452 = vrot.lane.b32.xlu1 %v861_v39, %s7097_s13  ;;  %v11428_v39 = vmov 0.0  }
 0x253   :  { %6826 = vmatprep.subr.bf16.mxu1 %v11428_v39  ;;  %6642 = vmatprep.subr.bf16.mxu0 %v11428_v39 }
 0x254   :  { %v8305_v11 = vpop.permute.xlu1 %1174  ;;  %1442 = vrot.lane.b32.xlu0 %v855_v63, %s7097_s13  ;;  %6831 = vmatpush3.bf16.msra.mxu1 %v6884_v23  ;;  %v6885_v63 = vld [vmem:[%s11324_s2 + $0x8] sm:$0xff]  }
 0x255   :  { %6643 = vmatpush3.bf16.msra.mxu0 %v6884_v23  ;;  %6827 = vmatprep.subr.bf16.mxu1 %v11428_v39 }
 0x256   :  { %v996_v50 = vpop.permute.xlu0 %995  ;;  %1510 = vrot.lane.b32.xlu1 %v8216_v28, %s7098_s14  ;;  %6644 = vmatprep.subr.bf16.mxu0 %v11428_v39 }
 0x257   :  { %6660 = vmatprep.mubr.msk.bf16.mxu1 %vm7101_vm8, %v11428_v39  ;;  %6652 = vmatprep.mubr.msk.bf16.mxu0 %vm7101_vm8, %v11428_v39 }
 0x258   :  { %v8310_v27 = vpop.permute.xlu1 %1184  ;;  %1448 = vrot.lane.b32.xlu0 %v8128_v46, %s7097_s13  ;;  %v1051_v46 = vsel %vm374_vm6, %v8236_v8, %v8116_v35  ;;  %6832 = vmatpush3.bf16.msra.mxu1 %v6885_v63  ;;  %v6886_v35 = vld [vmem:[%s11324_s2 + $0x10] sm:$0xff]  }
 0x259   :  { %6645 = vmatpush3.bf16.msra.mxu0 %v6885_v63  ;;  %6828 = vmatprep.subr.bf16.mxu1 %v11428_v39  ;;  %v11606_v63 = vld [vmem:[#allocation97_spill] sm:$0xff] }
 0x25a   :  { %v8318_v59 = vpop.permute.xlu0 %999  ;;  %1512 = vrot.lane.b32.xlu1 %v8316_v34, %s7098_s14  ;;  %6646 = vmatprep.subr.bf16.mxu0 %v11428_v39  ;;  %v1045_v32 = vsel %vm354_vm3, %v8278_v61, %v11606_v63 }
 0x25c   :  { %v8325_v20 = vpop.permute.xlu1 %1202  ;;  %1440 = vrot.lane.b32.xlu0 %v852_v37, %s7097_s13  ;;  %6833 = vmatpush3.bf16.msra.mxu1 %v6886_v35 }
 0x25d   :  { %6647 = vmatpush3.bf16.msra.mxu0 %v6886_v35  ;;  %6829 = vmatprep.subr.bf16.mxu1 %v11428_v39 }
 0x25e   :  { %v8333_v47 = vpop.permute.xlu0 %1019  ;;  %1520 = vrot.lane.b32.xlu1 %v8290_v62, %s7098_s14  ;;  %6648 = vmatprep.subr.bf16.mxu0 %v11428_v39 }
 0x260   :  { %v8337_v10 = vpop.permute.xlu1 %1176  ;;  %1516 = vrot.lane.b32.xlu0 %v8152_v45, %s7098_s14 }
 0x262   :  { %v8349_v37 = vpop.permute.xlu0 %1218  ;;  %1522 = vrot.lane.b32.xlu1 %v1051_v46, %s7098_s14  ;;  %v1048_v46 = vsel %vm364_vm5, %v8192_v13, %v8108_v25  ;;  %v2069_v25 = vsel %vm188_vm0, 4294967295, %v7100_v54  ;;  %v1054_v13 = vsel %vm382_vm4, %v978_v15, %v8124_v5 }
 0x264   :  { %v8352_v23 = vpop.permute.xlu1 %1186  ;;  %1532 = vrot.lane.b32.xlu0 %v8176_v26, %s7098_s14 }
 0x266   :  { %v8361_v8 = vpop.permute.xlu0 %1192  ;;  %1530 = vrot.lane.b32.xlu1 %v996_v50, %s7098_s14  ;;  %v6887_v50 = vld [vmem:[%s11324_s2 + $0x18] sm:$0xff]  }
 0x267   :  { %6834 = vmatpush3.bf16.msra.mxu1 %v6887_v50  ;;  %6649 = vmatpush3.bf16.msra.mxu0 %v6887_v50 }
 0x268   :  { %1518 = vrot.lane.b32.xlu0 %v1048_v46, %s7098_s14  ;;  %v8368_v26 = vpop.permute.xlu1 %1198  ;;  %6830 = vmatprep.subr.bf16.mxu1 %v11428_v39  ;;  %v6888_v46 = vld [vmem:[%s11324_s2 + $0x20] sm:$0x3f]   ;;  %s7102_s2 = smov 60  }
 0x269   :  { %6650 = vmatprep.subr.bf16.mxu0 %v11428_v39 }
 0x26a   :  { %v1197_v62 = vpop.permute.xlu0 %1196  ;;  %1514 = vrot.lane.b32.xlu1 %v1045_v32, %s7098_s14  ;;  %v2070_v32 = vsel %vm382_vm4, %v2069_v25, 0 }
 0x26c   :  { %1526 = vrot.lane.b32.xlu0 %v8229_v58, %s7098_s14  ;;  %v8381_v35 = vpop.permute.xlu1 %1204  ;;  %v2072_v58 = vand.u32 %v6888_v46, %v2070_v32 }
 0x26e   :  { %v8392_v50 = vpop.permute.xlu0 %1206  ;;  %1524 = vrot.lane.b32.xlu1 %v1054_v13, %s7098_s14  ;;  %6835 = vmatpush3.bf16.msra.mxu1 %v2072_v58 }
 0x26f   :  { %6651 = vmatpush3.bf16.msra.mxu0 %v2072_v58 }
 0x270   :  { %1528 = vrot.lane.b32.xlu0 %v1057_v2, %s7098_s14  ;;  %v8399_v7 = vpop.permute.xlu1 %1222  ;;  %v1060_v2 = vsel %vm188_vm0, %v8318_v59, %v8132_v51 }
 0x272   :  { %v8403_v25 = vpop.permute.xlu0 %1212  ;;  %1598 = vrot.lane.b32.xlu1 %v8294_v41, %s7102_s2  ;;  %v11629_v41 = vld [vmem:[#allocation75_spill] sm:$0xff] }
 0x274   :  { %1534 = vrot.lane.b32.xlu0 %v1060_v2, %s7098_s14  ;;  %v8413_v54 = vpop.permute.xlu1 %639 }
 0x275   :  { %11607 = vst [vmem:[#allocation126_spill] sm:$0xff] %v8413_v54 }
 0x276   :  { %v8415_v5 = vpop.permute.xlu0 %1168  ;;  %1608 = vrot.lane.b32.xlu1 %v8310_v27, %s7102_s2 }
 0x277   :  { %11608 = vst [vmem:[#allocation127_spill] sm:$0xff] %v8415_v5  ;;  %v1250_v15 = vsel %vm374_vm6, %v8415_v5, %v8305_v11 }
 0x278   :  { %1602 = vrot.lane.b32.xlu0 %v8264_v52, %s7102_s2  ;;  %v8421_v1 = vpop.permute.xlu1 %828 }
 0x279   :  { %11609 = vst [vmem:[#allocation128_spill] sm:$0xff] %v8421_v1  ;;  %v11648_v1 = vld [vmem:[#allocation26_spill] sm:$0xff] }
 0x27a   :  { %v1145_v17 = vpop.permute.xlu0 %1144  ;;  %1614 = vrot.lane.b32.xlu1 %v1197_v62, %s7102_s2 }
 0x27b   :  { %v8440_v62 = vsel %vm346_vm2, %v1145_v17, %v8286_v40  ;;  %v1253_v17 = vsel %vm382_vm4, %v8337_v10, %v8245_v19  ;;  %v1259_v19 = vsel %vm188_vm0, %v8368_v26, %v8258_v6  ;;  %v11621_v6 = vld [vmem:[#allocation19_spill] sm:$0xff] }
 0x27c   :  { %1592 = vrot.lane.b32.xlu0 %v8271_v21, %s7102_s2  ;;  %v8426_v51 = vpop.permute.xlu1 %1027  ;;  %11613 = vst [vmem:[#allocation132_spill] sm:$0xff] %v8440_v62  ;;  %v881_v26 = vrot.slane %v11621_v6, 3 }
 0x27d   :  { %11610 = vst [vmem:[#allocation129_spill] sm:$0xff] %v8426_v51  ;;  %v11655_v51 = vld [vmem:[#allocation96_spill] sm:$0xff] }
 0x27e   :  { %v8428_v13 = vpop.permute.xlu0 %1152 }
 0x27f   :  { %11611 = vst [vmem:[#allocation130_spill] sm:$0xff] %v8428_v13  ;;  %v1244_v11 = vsel %vm354_vm3, %v8428_v13, %v8172_v53  ;;  %v11630_v13 = vld [vmem:[#allocation78_spill] sm:$0xff]  ;;  %v11631_v53 = vld [vmem:[#allocation85_spill] sm:$0xff] }
 0x280   :  { %1604 = vrot.lane.b32.xlu0 %v1250_v15, %s7102_s2  ;;  %v8434_v27 = vpop.permute.xlu1 %1214  ;;  %v675_v61 = vsel %vm346_vm2, %v11631_v53, %v11630_v13 }
 0x282   :  { %v8436_v59 = vpop.permute.xlu0 %1162 }
 0x283   :  { %11612 = vst [vmem:[#allocation131_spill] sm:$0xff] %v8436_v59  ;;  %v1247_v40 = vsel %vm364_vm5, %v8436_v59, %v8164_v33 }
 0x284   :  { %1594 = vrot.lane.b32.xlu0 %v8440_v62, %s7102_s2  ;;  %v8444_v46 = vpop.permute.xlu1 %1224 }
 0x285   :  { %11614 = vst [vmem:[#allocation133_spill] sm:$0xff] %v8444_v46 }
 0x286   :  { %v1195_v32 = vpop.permute.xlu0 %1194 }
 0x287   :  { %1612 = vrot.lane.b32.xlu1 %v1195_v32, %s7102_s2  ;;  %v1256_v32 = vsel %vm392_vm7, %v8352_v23, %v8361_v8 }
 0x288   :  { %1596 = vrot.lane.b32.xlu0 %v1244_v11, %s7102_s2  ;;  %v8451_v58 = vpop.permute.xlu1 %1346 }
 0x28a   :  { %v8453_v2 = vpop.permute.xlu0 %1208 }
 0x28b   :  { %1600 = vrot.lane.b32.xlu1 %v1247_v40, %s7102_s2  ;;  %v11619_v40 = vld [vmem:[#allocation12_spill] sm:$0xff] }
 0x28c   :  { %1606 = vrot.lane.b32.xlu0 %v1253_v17, %s7102_s2  ;;  %v8463_v15 = vpop.permute.xlu1 %1372 }
 0x28d   :  { %11615 = vst [vmem:[#allocation134_spill] sm:$0xff] %v8463_v15  ;;  %v11634_v15 = vld [vmem:[#allocation102_spill] sm:$0xff] }
 0x28e   :  { %v8468_v11 = vpop.permute.xlu0 %1220 }
 0x28f   :  { %1610 = vrot.lane.b32.xlu1 %v1256_v32, %s7102_s2 }
 0x290   :  { %1454 = vrot.lane.b32.xlu0 %v8136_v55, %s7097_s13  ;;  %v8473_v39 = vpop.permute.xlu1 %1352  ;;  %v11620_v55 = vrot.slane %v11619_v40, 6 }
 0x292   :  { %v8478_v10 = vpop.permute.xlu0 %637 }
 0x293   :  { %11616 = vst [vmem:[#allocation135_spill] sm:$0xff] %v8478_v10  ;;  %1616 = vrot.lane.b32.xlu1 %v1259_v19, %s7102_s2  ;;  %v11623_v19 = vld [vmem:[#allocation34_spill] sm:$0xff] }
 0x294   :  { %1536 = vrot.lane.b32.xlu0 %v8242_v4, %s7098_s14  ;;  %v8483_v8 = vpop.permute.xlu1 %1368  ;;  %v1280_v5 = vrot.slane %v11623_v19, 5 }
 0x295   :  { %11617 = vst [vmem:[#allocation136_spill] sm:$0xff] %v8483_v8  ;;  %v11651_v8 = vld [vmem:[#allocation99_spill] sm:$0xff] }
 0x296   :  { %v8485_v23 = vpop.permute.xlu0 %826 }
 0x297   :  { %11618 = vst [vmem:[#allocation137_spill] sm:$0xff] %v8485_v23  ;;  %698 = vrot.lane.b32.xlu1 %v11620_v55, %s7083_s19  ;;  %v11625_v55 = vld [vmem:[#allocation25_spill] sm:$0xff] }
 0x298   :  { %1618 = vrot.lane.b32.xlu0 %v8325_v20, %s7102_s2  ;;  %v8492_v17 = vpop.permute.xlu1 %1356  ;;  %v11626_v20 = vld [vmem:[#allocation18_spill] sm:$0xff]  ;;  %v8541_v13 = vrot.slane %v11625_v55, 3 }
 0x29a   :  { %v8495_v32 = vpop.permute.xlu0 %1025 }
 0x29b   :  { %11622 = vst [vmem:[#allocation138_spill] sm:$0xff] %v8495_v32  ;;  %884 = vrot.lane.b32.xlu1 %v881_v26, %s7083_s19  ;;  %v11654_v32 = vld [vmem:[#allocation65_spill] sm:$0xff] }
 0x29c   :  { %1285 = vrot.lane.b32.xlu0 %v1280_v5, %s7083_s19  ;;  %v8500_v4 = vpop.permute.xlu1 %1366  ;;  %v678_v10 = vsel %vm354_vm3, %v11655_v51, %v11654_v32  ;;  %v11660_v32 = vld [vmem:[#allocation103_spill] sm:$0xff] }
 0x29e   :  { %v8502_v52 = vpop.permute.xlu0 %406 }
 0x29f   :  { %11624 = vst [vmem:[#allocation139_spill] sm:$0xff] %v8502_v52  ;;  %1081 = vrot.lane.b32.xlu1 %v11625_v55, %s7083_s19  ;;  %v11641_v55 = vld [vmem:[#allocation43_spill] sm:$0xff] }
 0x2a0   :  { %408 = vrot.lane.b32.xlu0 %v11626_v20, %s7088_s0  ;;  %v8508_v33 = vpop.permute.xlu1 %1350  ;;  %v11632_v20 = vld [vmem:[#allocation8_spill] sm:$0xff]  ;;  %s7103_s0 = smov 38  }
 0x2a2   :  { %v8510_v59 = vpop.permute.xlu0 %1226 }
 0x2a3   :  { %11627 = vst [vmem:[#allocation18_spill] sm:$0xff] %v8510_v59  ;;  %641 = vrot.lane.b32.xlu1 %v11628_v49, %s7095_s29  ;;  %v11633_v49 = vld [vmem:[#allocation82_spill] sm:$0xff] }
 0x2a4   :  { %830 = vrot.lane.b32.xlu0 %v11629_v41, %s7095_s29  ;;  %v8516_v45 = vpop.permute.xlu1 %1354  ;;  %v864_v41 = vsel %vm346_vm2, %v11634_v15, %v11633_v49  ;;  %v883_v49 = vsel %vm188_vm0, %v881_v26, %v8541_v13  ;;  %v11640_v26 = vld [vmem:[#allocation40_spill] sm:$0xff] }
 0x2a6   :  { %v8518_v16 = vpop.permute.xlu0 %1362 }
 0x2a7   :  { %410 = vrot.lane.b32.xlu1 %v11632_v20, %s7092_s26  ;;  %v11637_v20 = vld [vmem:[#allocation17_spill] sm:$0xff] }
 0x2a8   :  { %1374 = vrot.lane.b32.xlu0 %v675_v61, %s7096_s30  ;;  %v8526_v63 = vpop.permute.xlu1 %1360  ;;  %v11636_v61 = vld [vmem:[#allocation105_spill] sm:$0xff] }
 0x2aa   :  { %v8528_v52 = vpop.permute.xlu0 %1348 }
 0x2ab   :  { %1029 = vrot.lane.b32.xlu1 %v11635_v56, %s7095_s29  ;;  %v1063_v56 = vsel %vm346_vm2, %v8188_v24, %v8184_v44  ;;  %v11639_v24 = vld [vmem:[#allocation37_spill] sm:$0xff] }
 0x2ac   :  { %1456 = vrot.lane.b32.xlu0 %v864_v41, %s7097_s13  ;;  %v8536_v0 = vpop.permute.xlu1 %1364 }
 0x2ae   :  { %v8538_v53 = vpop.permute.xlu0 %1358 }
 0x2af   :  { %1228 = vrot.lane.b32.xlu1 %v11636_v61, %s7095_s29  ;;  %v1262_v61 = vsel %vm346_vm2, %v8381_v35, %v8392_v50 }
 0x2b0   :  { %700 = vrot.lane.b32.xlu0 %v11637_v20, %s7083_s19  ;;  %v8547_v60 = vpop.permute.xlu1 %1434 }
 0x2b2   :  { %v8552_v15 = vpop.permute.xlu0 %1370 }
 0x2b3   :  { %11638 = vst [vmem:[#allocation39_spill] sm:$0xff] %v8552_v15  ;;  %1538 = vrot.lane.b32.xlu1 %v1063_v56, %s7098_s14  ;;  %v11642_v15 = vld [vmem:[#allocation54_spill] sm:$0xff] }
 0x2b4   :  { %886 = vrot.lane.b32.xlu0 %v883_v49, %s7083_s19  ;;  %v8558_v41 = vpop.permute.xlu1 %1436  ;;  %v1281_v49 = vrot.slane %v11640_v26, 5 }
 0x2b6   :  { %v8563_v20 = vpop.permute.xlu0 %1432 }
 0x2b7   :  { %1620 = vrot.lane.b32.xlu1 %v1262_v61, %s7102_s2  ;;  %v11643_v61 = vld [vmem:[#allocation28_spill] sm:$0xff] }
 0x2b8   :  { %645 = vrot.lane.b32.xlu0 %v11639_v24, %s7103_s0  ;;  %v8568_v44 = vpop.permute.xlu1 %1444  ;;  %v1282_v24 = vsel %vm392_vm7, %v1280_v5, %v1281_v49  ;;  %v11649_v5 = vld [vmem:[#allocation83_spill] sm:$0xff] }
 0x2ba   :  { %v8570_v56 = vpop.permute.xlu0 %1428 }
 0x2bb   :  { %643 = vrot.lane.b32.xlu1 %v11641_v55, %s7095_s29  ;;  %v11645_v55 = vld [vmem:[#allocation42_spill] sm:$0xff] }
 0x2bc   :  { %832 = vrot.lane.b32.xlu0 %v11642_v15, %s7095_s29  ;;  %v8577_v35 = vpop.permute.xlu1 %1446  ;;  %v11646_v15 = vld [vmem:[#allocation7_spill] sm:$0xff] }
 0x2be   :  { %v8579_v50 = vpop.permute.xlu0 %1430 }
 0x2bf   :  { %1083 = vrot.lane.b32.xlu1 %v11643_v61, %s7083_s19 }
 0x2c0   :  { %1287 = vrot.lane.b32.xlu0 %v1282_v24, %s7083_s19  ;;  %v8585_v46 = vpop.permute.xlu1 %1450 }
 0x2c1   :  { %11644 = vst [vmem:[#allocation75_spill] sm:$0xff] %v8585_v46 }
 0x2c2   :  { %v8587_v26 = vpop.permute.xlu0 %1438 }
 0x2c3   :  { %834 = vrot.lane.b32.xlu1 %v11645_v55, %s7103_s0 }
 0x2c4   :  { %414 = vrot.lane.b32.xlu0 %v11646_v15, %s7091_s25  ;;  %v8593_v59 = vpop.permute.xlu1 %1452 }
 0x2c5   :  { %11647 = vst [vmem:[#allocation78_spill] sm:$0xff] %v8593_v59  ;;  %v11650_v59 = vld [vmem:[#allocation87_spill] sm:$0xff] }
 0x2c6   :  { %v8595_v23 = vpop.permute.xlu0 %1442 }
 0x2c7   :  { %412 = vrot.lane.b32.xlu1 %v11648_v1, %s7092_s26  ;;  %v867_v1 = vsel %vm354_vm3, %v11651_v8, %v11650_v59  ;;  %v11656_v59 = vld [vmem:[#allocation16_spill] sm:$0xff]  ;;  %s7104_s26 = smov 32  }
 0x2c8   :  { %1033 = vrot.lane.b32.xlu0 %v11649_v5, %s7103_s0  ;;  %v1511_v24 = vpop.permute.xlu1 %1510 }
 0x2ca   :  { %v8601_v46 = vpop.permute.xlu0 %1448 }
 0x2cb   :  { %1031 = vrot.lane.b32.xlu1 %v7925_v3, %s7095_s29  ;;  %v8620_v3 = vrot.slane %v11619_v40, 1 }
 0x2cc   :  { %1232 = vrot.lane.b32.xlu0 %v8082_v22, %s7103_s0  ;;  %v8607_v55 = vpop.permute.xlu1 %1512  ;;  %v8623_v22 = vrot.slane %v11621_v6, 6  ;;  %v11659_v6 = vrot.slane %v11656_v59, 6 }
 0x2cd   :  { %11652 = vst [vmem:[#allocation85_spill] sm:$0xff] %v8620_v3 }
 0x2ce   :  { %v8609_v15 = vpop.permute.xlu0 %1440  ;;  %11653 = vst [vmem:[#allocation8_spill] sm:$0xff] %v8623_v22  ;;  %v697_v51 = vsel %vm346_vm2, %v11659_v6, %v8623_v22 }
 0x2cf   :  { %1230 = vrot.lane.b32.xlu1 %v7700_v48, %s7095_s29  ;;  %v11657_v48 = vrot.slane %v11656_v59, 1  ;;  %v1265_v59 = vsel %vm354_vm3, %v8453_v2, %v8196_v38 }
 0x2d0   :  { %1458 = vrot.lane.b32.xlu0 %v867_v1, %s7097_s13  ;;  %v8617_v5 = vpop.permute.xlu1 %1520 }
 0x2d1   :  { %v708_v8 = vsel %vm354_vm3, %v8620_v3, %v11657_v48  ;;  %v1066_v48 = vsel %vm354_vm3, %v8252_v14, %v11660_v32  ;;  %v11450_v3 = vrot.slane %v11643_v61, 3 }
 0x2d2   :  { %v8628_v54 = vpop.permute.xlu0 %1516 }
 0x2d3   :  { %1376 = vrot.lane.b32.xlu1 %v678_v10, %s7096_s30  ;;  %v1091_v14 = vsel %vm188_vm0, %v8541_v13, %v11450_v3  ;;  %v11664_v3 = vld [vmem:[#allocation23_spill] sm:$0xff] }
 0x2d4   :  { %711 = vrot.lane.b32.xlu0 %v708_v8, %s7085_s20  ;;  %v8636_v1 = vpop.permute.xlu1 %1522 }
 0x2d6   :  { %v8638_v40 = vpop.permute.xlu0 %1532 }
 0x2d7   :  { %11658 = vst [vmem:[#allocation82_spill] sm:$0xff] %v8638_v40  ;;  %702 = vrot.lane.b32.xlu1 %v697_v51, %s7083_s19  ;;  %v11661_v51 = vld [vmem:[#allocation44_spill] sm:$0xff] }
 0x2d8   :  { %888 = vrot.lane.b32.xlu0 %v8541_v13, %s7083_s19  ;;  %v8647_v10 = vpop.permute.xlu1 %1530  ;;  %v8662_v40 = vpack.c.bf16 %v11661_v51, %v11661_v51  ;;  %v11663_v13 = vld [vmem:[#allocation76_spill] sm:$0xff] }
 0x2da   :  { %v8652_v8 = vpop.permute.xlu0 %1518  ;;  %11662 = vst [vmem:[#allocation102_spill] sm:$0xff] %v8662_v40  ;;  %v1283_v38 = vrot.slane %v8662_v40, 5  ;;  %v11665_v40 = vld [vmem:[#allocation67_spill] sm:$0xff] }
 0x2db   :  { %1540 = vrot.lane.b32.xlu1 %v1066_v48, %s7098_s14  ;;  %v1666_v61 = vsel %vm1658_vm9, %v11665_v40, %v8451_v58  ;;  %v11668_v58 = vmov 0.0  }
 0x2dc   :  { %1622 = vrot.lane.b32.xlu0 %v1265_v59, %s7102_s2  ;;  %v1515_v6 = vpop.permute.xlu1 %1514  ;;  %v1284_v59 = vsel %vm392_vm7, %v1281_v49, %v1283_v38  ;;  %v11666_v49 = vld [vmem:[#allocation36_spill] sm:$0xff]  ;;  %v1756_v38 = vsel %vm1750_vm11, %v1666_v61, %v8570_v56  ;;  %v11669_v61 = vld [vmem:[#allocation49_spill] sm:$0xff] }
 0x2de   :  { %v8664_v62 = vpop.permute.xlu0 %1526 }
 0x2df   :  { %895 = vrot.lane.b32.xlu1 %v8623_v22, %s7085_s20  ;;  %v11667_v22 = vld [vmem:[#allocation27_spill] sm:$0xff] }
 0x2e0   :  { %1094 = vrot.lane.b32.xlu0 %v1091_v14, %s7085_s20  ;;  %v8676_v32 = vpop.permute.xlu1 %1524 }
 0x2e2   :  { %v8674_v2 = vpop.permute.xlu0 %1528 }
 0x2e3   :  { %1085 = vrot.lane.b32.xlu1 %v11623_v19, %s7083_s19 }
 0x2e4   :  { %1294 = vrot.lane.b32.xlu0 %v11623_v19, %s7085_s20  ;;  %v1599_v51 = vpop.permute.xlu1 %1598 }
 0x2e6   :  { %v8682_v48 = vpop.permute.xlu0 %1534 }
 0x2e7   :  { %1289 = vrot.lane.b32.xlu1 %v1284_v59, %s7083_s19  ;;  %v1827_v59 = vsel %vm1821_vm10, %v1756_v38, %v1511_v24  ;;  %v11670_v24 = vld [vmem:[#allocation59_spill] sm:$0xff] }
 0x2e8   :  { %836 = vrot.lane.b32.xlu0 %v11663_v13, %s7103_s0  ;;  %v8700_v19 = vpop.permute.xlu1 %1608  ;;  %v11672_v38 = vld [vmem:[#allocation79_spill] sm:$0xff] }
 0x2ea   :  { %v8688_v14 = vpop.permute.xlu0 %1602 }
 0x2eb   :  { %647 = vrot.lane.b32.xlu1 %v11664_v3, %s7103_s0 }
 0x2ec   :  { %1035 = vrot.lane.b32.xlu0 %v11666_v49, %s7103_s0  ;;  %v8715_v49 = vsel %vm346_vm2, %v11670_v24, %v11669_v61  ;;  %v11673_v24 = vld [vmem:[#allocation109_spill] sm:$0xff] }
 0x2ed   :  { %11671 = vst [vmem:[#allocation93_spill] sm:$0xff] %v8715_v49 }
 0x2ee   :  { %v1593_v13 = vpop.permute.xlu0 %1592 }
 0x2ef   :  { %v1898_v3 = vsel %vm1892_vm13, %v1827_v59, %v1593_v13  ;;  %416 = vrot.lane.b32.xlu1 %v11667_v22, %s7091_s25  ;;  %v1668_v22 = vsel %vm1658_vm9, %v8715_v49, %v8528_v52  ;;  %v8726_v59 = vpop.permute.xlu1 %1614  ;;  %v11674_v52 = vld [vmem:[#allocation38_spill] sm:$0xff] }
 0x2f0   :  { %1234 = vrot.lane.b32.xlu0 %v7721_v9, %s7103_s0  ;;  %6661 = vmatmul.mubr.msk.bf16.vlgmr.msra.gmra.mrb[0].mxu1 %vm1998_vm12, %v1898_v3  ;;  %v1758_v9 = vsel %vm1750_vm11, %v1668_v22, %v8579_v50 }
 0x2f1   :  { %6664 = vmatprep.mubr.msk.bf16.mxu1 %vm7101_vm8, %v11668_v58  ;;  %v1829_v13 = vsel %vm1821_vm10, %v1758_v9, %v8607_v55  ;;  %v11676_v55 = vld [vmem:[#allocation66_spill] sm:$0xff] }
 0x2f2   :  { %v8710_v56 = vpop.permute.xlu0 %1604 }
 0x2f3   :  { %1378 = vrot.lane.b32.xlu1 %v11672_v38, %s7096_s30  ;;  %v11675_v38 = vld [vmem:[#allocation47_spill] sm:$0xff] }
 0x2f4   :  { %1542 = vrot.lane.b32.xlu0 %v8160_v12, %s7098_s14  ;;  %v450_v22 = vsel %vm354_vm3, %v11676_v55, %v11675_v38  ;;  %v11678_v55 = vld [vmem:[#allocation20_spill] sm:$0xff] }
 0x2f5   :  { %v1670_v9 = vsel %vm1658_vm9, %v450_v22, %v8508_v33 }
 0x2f6   :  { %v1595_v3 = vpop.permute.xlu0 %1594 }
 0x2f7   :  { %v1900_v61 = vsel %vm1892_vm13, %v1829_v13, %v1595_v3  ;;  %1460 = vrot.lane.b32.xlu1 %v11673_v24, %s7097_s13  ;;  %v11677_v13 = vld [vmem:[#allocation9_spill] sm:$0xff]  ;;  %v1760_v3 = vsel %vm1750_vm11, %v1670_v9, %v8563_v20 }
 0x2f8   :  { %729 = vrot.lane.b32.xlu0 %v11674_v52, %s7104_s26  ;;  %6665 = vmatmul.mubr.msk.bf16.gmra.mrb[4].mxu1 %vm1998_vm12, %v1900_v61  ;;  %v1831_v24 = vsel %vm1821_vm10, %v1760_v3, %v1515_v6  ;;  %v11681_v6 = vld [vmem:[#allocation64_spill] sm:$0xff]  ;;  %v11685_v3 = vld [vmem:[#allocation98_spill] sm:$0xff] }
 0x2f9   :  { %v8736_v12 = vpop.permute.xlu1 %1612  ;;  %6668 = vmatprep.mubr.msk.bf16.mxu1 %vm7101_vm8, %v11668_v58 }
 0x2fa   :  { %v1597_v50 = vpop.permute.xlu0 %1596 }
 0x2fb   :  { %1624 = vrot.lane.b32.xlu1 %v8403_v25, %s7102_s2  ;;  %v1902_v40 = vsel %vm1892_vm13, %v1831_v24, %v1597_v50  ;;  %v11679_v25 = vld [vmem:[#allocation31_spill] sm:$0xff]  ;;  %v11682_v50 = vld [vmem:[#allocation68_spill] sm:$0xff] }
 0x2fc   :  { %420 = vrot.lane.b32.xlu0 %v11677_v13, %s7093_s27  ;;  %v1673_v22 = vsel %vm1658_vm9, %v11682_v50, %v8473_v39  ;;  %v11684_v13 = vld [vmem:[#allocation80_spill] sm:$0xff] }
 0x2fd   :  { %v1601_v61 = vpop.permute.xlu1 %1600  ;;  %v681_v24 = vsel %vm364_vm5, %v11685_v3, %v11684_v13 }
 0x2fe   :  { %v8752_v49 = vpop.permute.xlu0 %1606 }
 0x2ff   :  { %418 = vrot.lane.b32.xlu1 %v11678_v55, %s7091_s25  ;;  %v11683_v55 = vld [vmem:[#allocation41_spill] sm:$0xff]  ;;  %s7106_s25 = smov 96  }
 0x300   :  { %1112 = vrot.lane.b32.xlu0 %v11679_v25, %s7104_s26  ;;  %6669 = vmatmul.mubr.msk.bf16.gmra.mrb[8].mxu1 %vm1998_vm12, %v1902_v40  ;;  %v1762_v40 = vsel %vm1750_vm11, %v1673_v22, %v8547_v60  ;;  %v11686_v25 = vld [vmem:[#allocation114_spill] sm:$0xff]  ;;  %v11688_v22 = vld [vmem:[#allocation111_spill] sm:$0xff] }
 0x301   :  { %v8760_v33 = vpop.permute.xlu1 %1610  ;;  %6672 = vmatprep.mubr.msk.bf16.mxu1 %vm7101_vm8, %v11668_v58  ;;  %v1833_v38 = vsel %vm1821_vm10, %v1762_v40, %v8628_v54  ;;  %v1069_v39 = vsel %vm364_vm5, %v8203_v18, %v11686_v25  ;;  %v11687_v54 = vld [vmem:[#allocation92_spill] sm:$0xff]  ;;  %v11689_v18 = vld [vmem:[#allocation50_spill] sm:$0xff] }
 0x302   :  { %v8764_v20 = vpop.permute.xlu0 %1454  ;;  %v1904_v50 = vsel %vm1892_vm13, %v1833_v38, %v1599_v51  ;;  %v870_v40 = vsel %vm364_vm5, %v11688_v22, %v11687_v54  ;;  %v11690_v25 = vld [vmem:[#allocation60_spill] sm:$0xff] }
 0x303   :  { %11680 = vst [vmem:[#allocation105_spill] sm:$0xff] %v8764_v20  ;;  %913 = vrot.lane.b32.xlu1 %v11681_v6, %s7104_s26  ;;  %v454_v51 = vsel %vm364_vm5, %v11690_v25, %v11689_v18  ;;  %v11693_v25 = vld [vmem:[#allocation61_spill] sm:$0xff] }
 0x304   :  { %1312 = vrot.lane.b32.xlu0 %v11683_v55, %s7104_s26  ;;  %v1675_v38 = vsel %vm1658_vm9, %v454_v51, %v8516_v45 }
 0x305   :  { %v8775_v9 = vpop.permute.xlu1 %1616  ;;  %v1764_v3 = vsel %vm1750_vm11, %v1675_v38, %v8558_v41  ;;  %v11695_v41 = vld [vmem:[#allocation46_spill] sm:$0xff] }
 0x306   :  { %v8782_v20 = vpop.permute.xlu0 %1536  ;;  %v1835_v54 = vsel %vm1821_vm10, %v1764_v3, %v8652_v8 }
 0x307   :  { %1380 = vrot.lane.b32.xlu1 %v681_v24, %s7096_s30  ;;  %v1906_v51 = vsel %vm1892_vm13, %v1835_v54, %v1601_v61  ;;  %v11696_v61 = vld [vmem:[#allocation35_spill] sm:$0xff] }
 0x308   :  { %1544 = vrot.lane.b32.xlu0 %v1069_v39, %s7098_s14  ;;  %6673 = vmatmul.mubr.msk.bf16.gmra.mrb[12].mxu1 %vm1998_vm12, %v1904_v50  ;;  %v11691_v50 = vld [vmem:[#allocation14_spill] sm:$0xff]  ;;  %v1268_v39 = vsel %vm364_vm5, %v8434_v27, %v8213_v31  ;;  %v11694_v27 = vld [vmem:[#allocation56_spill] sm:$0xff]  ;;  %v8843_v38 = vsel %vm188_vm0, %v11696_v61, %v8148_v42 }
 0x309   :  { %v8791_v60 = vpop.permute.xlu1 %698  ;;  %6676 = vmatprep.mubr.msk.bf16.mxu1 %vm7101_vm8, %v11668_v58  ;;  %v8836_v8 = vsel %vm188_vm0, %v11695_v41, %v11694_v27  ;;  %v11699_v41 = vld [vmem:[#allocation29_spill] sm:$0xff]  ;;  %v11701_v61 = vld [vmem:[#allocation62_spill] sm:$0xff] }
 0x30a   :  { %v8798_v13 = vpop.permute.xlu0 %1618 }
 0x30b   :  { %1462 = vrot.lane.b32.xlu1 %v870_v40, %s7097_s13  ;;  %v11692_v40 = vld [vmem:[#allocation89_spill] sm:$0xff] }
 0x30c   :  { %340 = vrot.lane.b32.xlu0 %v11691_v50, %s7090_s24  ;;  %v8822_v45 = vsel %vm188_vm0, %v11693_v25, %v11692_v40  ;;  %v11697_v50 = vld [vmem:[#allocation69_spill] sm:$0xff] }
 0x30d   :  { %v8810_v24 = vpop.permute.xlu1 %884  ;;  %v1678_v3 = vsel %vm1658_vm9, %v11697_v50, %v8492_v17 }
 0x30e   :  { %v8817_v22 = vpop.permute.xlu0 %1285 }
 0x30f   :  { %1626 = vrot.lane.b32.xlu1 %v1268_v39, %s7102_s2  ;;  %v1766_v39 = vsel %vm1750_vm11, %v1678_v3, %v8587_v26 }
 0x310   :  { %915 = vrot.lane.b32.xlu0 %v8822_v45, %s7104_s26  ;;  %6677 = vmatmul.mubr.msk.bf16.gmra.mrb[16].mxu1 %vm1998_vm12, %v1906_v51  ;;  %v1837_v40 = vsel %vm1821_vm10, %v1766_v39, %v8617_v5  ;;  %v11698_v51 = vld [vmem:[#allocation48_spill] sm:$0xff] }
 0x311   :  { %v8829_v31 = vpop.permute.xlu1 %1081  ;;  %6680 = vmatprep.mubr.msk.bf16.mxu1 %vm7101_vm8, %v11668_v58  ;;  %v8863_v27 = vsel %vm188_vm0, %v11698_v51, %v8206_v29  ;;  %v1908_v17 = vsel %vm1892_vm13, %v1837_v40, %v8688_v14  ;;  %v11700_v29 = vld [vmem:[#allocation51_spill] sm:$0xff]  ;;  %v11702_v14 = vld [vmem:[#allocation100_spill] sm:$0xff] }
 0x312   :  { %v8838_v25 = vpop.permute.xlu0 %408  ;;  %v458_v3 = vsel %vm374_vm6, %v11701_v61, %v11700_v29 }
 0x313   :  { %731 = vrot.lane.b32.xlu1 %v8836_v8, %s7104_s26  ;;  %v1680_v39 = vsel %vm1658_vm9, %v458_v3, %v8538_v53  ;;  %v11706_v3 = vld [vmem:[#allocation70_spill] sm:$0xff] }
 0x314   :  { %1114 = vrot.lane.b32.xlu0 %v8843_v38, %s7104_s26  ;;  %v1768_v40 = vsel %vm1750_vm11, %v1680_v39, %v8609_v15 }
 0x315   :  { %v8854_v54 = vpop.permute.xlu1 %641 }
 0x316   :  { %v8858_v42 = vpop.permute.xlu0 %830 }
 0x317   :  { %422 = vrot.lane.b32.xlu1 %v11699_v41, %s7093_s27 }
 0x318   :  { %6681 = vmatmul.mubr.msk.bf16.gmra.mrb[20].mxu1 %vm1998_vm12, %v1908_v17  ;;  %1314 = vrot.lane.b32.xlu0 %v8863_v27, %s7104_s26  ;;  %v1839_v17 = vsel %vm1821_vm10, %v1768_v40, %v8636_v1  ;;  %v11705_v1 = vld [vmem:[#allocation52_spill] sm:$0xff]  ;;  %v11707_v40 = vld [vmem:[#allocation11_spill] sm:$0xff] }
 0x319   :  { %v8872_v26 = vpop.permute.xlu1 %410  ;;  %6684 = vmatprep.mubr.msk.bf16.mxu1 %vm7101_vm8, %v11668_v58  ;;  %v1910_v29 = vsel %vm1892_vm13, %v1839_v17, %v8710_v56  ;;  %v462_v39 = vsel %vm382_vm4, %v11706_v3, %v11705_v1 }
 0x31a   :  { %v8876_v5 = vpop.permute.xlu0 %1374  ;;  %v1682_v56 = vsel %vm1658_vm9, %v462_v39, %v8526_v63  ;;  %v11710_v39 = vld [vmem:[#allocation81_spill] sm:$0xff] }
 0x31b   :  { %1382 = vrot.lane.b32.xlu1 %v11702_v14, %s7096_s30  ;;  %v11703_v14 = vld [vmem:[#allocation115_spill] sm:$0xff]  ;;  %v1770_v17 = vsel %vm1750_vm11, %v1682_v56, %v8595_v23  ;;  %v11711_v56 = vld [vmem:[#allocation90_spill] sm:$0xff] }
 0x31c   :  { %1546 = vrot.lane.b32.xlu0 %v8333_v47, %s7098_s14  ;;  %v11704_v47 = vld [vmem:[#allocation73_spill] sm:$0xff] }
 0x31d   :  { %v8889_v51 = vpop.permute.xlu1 %1029 }
 0x31e   :  { %v8893_v41 = vpop.permute.xlu0 %1456 }
 0x31f   :  { %1464 = vrot.lane.b32.xlu1 %v11703_v14, %s7097_s13  ;;  %v1841_v14 = vsel %vm1821_vm10, %v1770_v17, %v8676_v32  ;;  %v11709_v32 = vld [vmem:[#allocation72_spill] sm:$0xff] }
 0x320   :  { %6685 = vmatmul.mubr.msk.bf16.gmra.mrb[24].mxu1 %vm1998_vm12, %v1910_v29  ;;  %733 = vrot.lane.b32.xlu0 %v11704_v47, %s7104_s26  ;;  %v1912_v1 = vsel %vm1892_vm13, %v1841_v14, %v8752_v49  ;;  %v1685_v49 = vsel %vm1658_vm9, %v11709_v32, %v8518_v16  ;;  %v11712_v14 = vld [vmem:[#allocation117_spill] sm:$0xff] }
 0x321   :  { %v8902_v53 = vpop.permute.xlu1 %1228  ;;  %6688 = vmatprep.mubr.msk.bf16.mxu1 %vm7101_vm8, %v11668_v58  ;;  %v1072_v16 = vsel %vm374_vm6, %v8267_v30, %v11712_v14  ;;  %v11715_v30 = vld [vmem:[#allocation55_spill] sm:$0xff] }
 0x322   :  { %v8906_v15 = vpop.permute.xlu0 %700 }
 0x323   :  { %1628 = vrot.lane.b32.xlu1 %v8349_v37, %s7102_s2  ;;  %v11708_v37 = vld [vmem:[#allocation21_spill] sm:$0xff] }
 0x324   :  { %426 = vrot.lane.b32.xlu0 %v11707_v40, %s7094_s28  ;;  %v684_v40 = vsel %vm374_vm6, %v11711_v56, %v11710_v39 }
 0x325   :  { %v8919_v29 = vpop.permute.xlu1 %1538 }
 0x326   :  { %v8923_v47 = vpop.permute.xlu0 %886 }
 0x327   :  { %424 = vrot.lane.b32.xlu1 %v11708_v37, %s7093_s27 }
 0x328   :  { %6689 = vmatmul.mubr.msk.bf16.gmra.mrb[28].mxu1 %vm1998_vm12, %v1912_v1  ;;  %1116 = vrot.lane.b32.xlu0 %v8216_v28, %s7104_s26  ;;  %v1772_v28 = vsel %vm1750_vm11, %v1685_v49, %v8568_v44  ;;  %v11714_v1 = vld [vmem:[#allocation112_spill] sm:$0xff]  ;;  %v11716_v49 = vld [vmem:[#allocation63_spill] sm:$0xff] }
 0x329   :  { %v8932_v63 = vpop.permute.xlu1 %1620  ;;  %6692 = vmatprep.mubr.msk.bf16.mxu1 %vm7101_vm8, %v11668_v58  ;;  %v1843_v17 = vsel %vm1821_vm10, %v1772_v28, %v8664_v62  ;;  %v11713_v62 = vld [vmem:[#allocation110_spill] sm:$0xff] }
 0x32a   :  { %v8936_v23 = vpop.permute.xlu0 %645  ;;  %v873_v37 = vsel %vm374_vm6, %v11714_v1, %v11713_v62 }
 0x32b   :  { %917 = vrot.lane.b32.xlu1 %v8112_v43, %s7104_s26 }
 0x32c   :  { %1316 = vrot.lane.b32.xlu0 %v8271_v21, %s7104_s26  ;;  %v1914_v21 = vsel %vm1892_vm13, %v1843_v17, %v8700_v19  ;;  %v466_v19 = vsel %vm392_vm7, %v11716_v49, %v11715_v30 }
 0x32d   :  { %v8947_v3 = vpop.permute.xlu1 %643  ;;  %v1687_v28 = vsel %vm1658_vm9, %v466_v19, %v8536_v0  ;;  %v11724_v19 = vld [vmem:[#allocation138_spill] sm:$0xff] }
 0x32e   :  { %v8954_v43 = vpop.permute.xlu0 %832  ;;  %v1774_v39 = vsel %vm1750_vm11, %v1687_v28, %v8577_v35  ;;  %v11725_v28 = vld [vmem:[#allocation136_spill] sm:$0xff] }
 0x32f   :  { %1384 = vrot.lane.b32.xlu1 %v684_v40, %s7096_s30  ;;  %v1271_v40 = vsel %vm374_vm6, %v8468_v11, %v8399_v7  ;;  %v1845_v17 = vsel %vm1821_vm10, %v1774_v39, %v8674_v2  ;;  %v11718_v11 = vld [vmem:[#allocation30_spill] sm:$0xff]  ;;  %v11719_v2 = vld [vmem:[#allocation71_spill] sm:$0xff]  ;;  %v11726_v39 = vld [vmem:[#allocation45_spill] sm:$0xff] }
 0x330   :  { %6693 = vmatmul.mubr.msk.bf16.gmra.mrb[32].mxu1 %vm1998_vm12, %v1914_v21  ;;  %1548 = vrot.lane.b32.xlu0 %v1072_v16, %s7098_s14  ;;  %v1916_v0 = vsel %vm1892_vm13, %v1845_v17, %v8760_v33  ;;  %v1690_v33 = vsel %vm1658_vm9, %v11719_v2, %v8500_v4  ;;  %v11727_v17 = vld [vmem:[#allocation75_spill] sm:$0xff]  ;;  %v11729_v2 = vld [vmem:[#allocation137_spill] sm:$0xff] }
 0x331   :  { %v8964_v44 = vpop.permute.xlu1 %1083  ;;  %6696 = vmatprep.mubr.msk.bf16.mxu1 %vm7101_vm8, %v11668_v58  ;;  %v1776_v16 = vsel %vm1750_vm11, %v1690_v33, %v8601_v46  ;;  %v11721_v46 = vld [vmem:[#allocation126_spill] sm:$0xff] }
 0x332   :  { %v8971_v32 = vpop.permute.xlu0 %1287  ;;  %v1847_v62 = vsel %vm1821_vm10, %v1776_v16, %v8647_v10  ;;  %v11722_v10 = vld [vmem:[#allocation135_spill] sm:$0xff]  ;;  %v11730_v16 = vld [vmem:[#allocation82_spill] sm:$0xff] }
 0x333   :  { %1466 = vrot.lane.b32.xlu1 %v873_v37, %s7097_s13  ;;  %v1918_v37 = vsel %vm1892_vm13, %v1847_v62, %v8736_v12  ;;  %v687_v30 = vsel %vm382_vm4, %v11722_v10, %v11721_v46  ;;  %v11723_v12 = vld [vmem:[#allocation129_spill] sm:$0xff] }
 0x334   :  { %735 = vrot.lane.b32.xlu0 %v8227_v57, %s7104_s26  ;;  %v11717_v57 = vld [vmem:[#allocation13_spill] sm:$0xff] }
 0x335   :  { %v8983_v56 = vpop.permute.xlu1 %834  ;;  %v11732_v46 = vld [vmem:[#allocation133_spill] sm:$0xff] }
 0x336   :  { %v8990_v14 = vpop.permute.xlu0 %414 }
 0x337   :  { %1630 = vrot.lane.b32.xlu1 %v1271_v40, %s7102_s2  ;;  %v1693_v40 = vsel %vm1658_vm9, %v11726_v39, %v11725_v28  ;;  %v11734_v28 = vld [vmem:[#allocation58_spill] sm:$0xff] }
 0x338   :  { %6697 = vmatmul.mubr.msk.bf16.gmra.mrb[36].mxu1 %vm1998_vm12, %v1916_v0  ;;  %430 = vrot.lane.b32.xlu0 %v11717_v57, %s7095_s29  ;;  %v1778_v0 = vsel %vm1750_vm11, %v1693_v40, %v11727_v17  ;;  %v11736_v17 = vld [vmem:[#allocation57_spill] sm:$0xff] }
 0x339   :  { %v8998_v35 = vpop.permute.xlu1 %412  ;;  %6700 = vmatprep.mubr.msk.bf16.mxu1 %vm7101_vm8, %v11668_v58  ;;  %v1849_v62 = vsel %vm1821_vm10, %v1778_v0, %v11730_v16  ;;  %v704_v0 = vsel %vm499_vm14, %v11736_v17, %v8791_v60  ;;  %v11745_v17 = vld [vmem:[#allocation97_spill] sm:$0xff] }
 0x33a   :  { %v9002_v7 = vpop.permute.xlu0 %1033 }
 0x33b   :  { %428 = vrot.lane.b32.xlu1 %v11718_v11, %s7094_s28  ;;  %v11728_v11 = vld [vmem:[#allocation128_spill] sm:$0xff] }
 0x33c   :  { %1118 = vrot.lane.b32.xlu0 %v8316_v34, %s7104_s26  ;;  %v11720_v34 = vld [vmem:[#allocation132_spill] sm:$0xff]  ;;  %v876_v33 = vsel %vm382_vm4, %v11729_v2, %v11728_v11  ;;  %v11737_v11 = vld [vmem:[#allocation6_spill] sm:$0xff] }
 0x33d   :  { %v9013_v21 = vpop.permute.xlu1 %1031  ;;  %v490_v2 = vrot.slane %v11737_v11, 1 }
 0x33e   :  { %v9017_v1 = vpop.permute.xlu0 %1232 }
 0x33f   :  { %919 = vrot.lane.b32.xlu1 %v8284_v36, %s7104_s26  ;;  %v1075_v36 = vsel %vm382_vm4, %v11724_v19, %v11723_v12 }
 0x340   :  { %6701 = vmatmul.mubr.msk.bf16.gmra.mrb[40].mxu1 %vm1998_vm12, %v1918_v37  ;;  %1318 = vrot.lane.b32.xlu0 %v11720_v34, %s7104_s26  ;;  %v11731_v34 = vld [vmem:[#allocation18_spill] sm:$0xff] }
 0x341   :  { %v9026_v4 = vpop.permute.xlu1 %1230  ;;  %6704 = vmatprep.mubr.msk.bf16.mxu1 %vm7101_vm8, %v11668_v58  ;;  %v1274_v10 = vsel %vm382_vm4, %v11732_v46, %v11731_v34 }
 0x342   :  { %v9033_v49 = vpop.permute.xlu0 %1458 }
 0x343   :  { %1386 = vrot.lane.b32.xlu1 %v687_v30, %s7096_s30  ;;  %v1920_v30 = vsel %vm1892_vm13, %v1849_v62, %v8726_v59  ;;  %v11735_v59 = vld [vmem:[#allocation39_spill] sm:$0xff] }
 0x344   :  { %1550 = vrot.lane.b32.xlu0 %v1075_v36, %s7098_s14  ;;  %v11733_v36 = vld [vmem:[#allocation53_spill] sm:$0xff] }
 0x345   :  { %v9045_v57 = vpop.permute.xlu1 %1376  ;;  %v469_v39 = vsel %vm188_vm0, %v11734_v28, %v11733_v36  ;;  %v11742_v28 = vld [vmem:[#allocation101_spill] sm:$0xff] }
 0x346   :  { %v9052_v37 = vpop.permute.xlu0 %711  ;;  %v1695_v40 = vsel %vm1658_vm9, %v469_v39, %v11735_v59  ;;  %v11743_v59 = vld [vmem:[#allocation134_spill] sm:$0xff] }
 0x347   :  { %1468 = vrot.lane.b32.xlu1 %v876_v33, %s7097_s13  ;;  %v11738_v33 = vld [vmem:[#allocation78_spill] sm:$0xff] }
 0x348   :  { %6705 = vmatmul.mubr.msk.bf16.gmra.mrb[44].mxu1 %vm1998_vm12, %v1920_v30  ;;  %1632 = vrot.lane.b32.xlu0 %v1274_v10, %s7102_s2  ;;  %v1780_v16 = vsel %vm1750_vm11, %v1695_v40, %v11738_v33  ;;  %v11739_v10 = vld [vmem:[#allocation91_spill] sm:$0xff]  ;;  %v11746_v33 = vld [vmem:[#allocation105_spill] sm:$0xff] }
 0x349   :  { %v9062_v12 = vpop.permute.xlu1 %702  ;;  %6708 = vmatprep.mubr.msk.bf16.mxu1 %vm7101_vm8, %v11668_v58  ;;  %v1851_v34 = vsel %vm1821_vm10, %v1780_v16, %v8682_v48  ;;  %v721_v60 = vsel %vm354_vm3, %v11739_v10, %v704_v0  ;;  %v11744_v40 = vld [vmem:[#allocation139_spill] sm:$0xff]  ;;  %v1087_v0 = vsel %vm499_vm14, %v11745_v17, %v8829_v31 }
 0x34a   :  { %v9066_v19 = vpop.permute.xlu0 %888  ;;  %v1922_v46 = vsel %vm1892_vm13, %v1851_v34, %v8775_v9  ;;  %v11741_v9 = vld [vmem:[#allocation31_spill] sm:$0xff] }
 0x34b   :  { %1342 = vrot.lane.b32.xlu1 %v11674_v52, %s7096_s30 }
 0x34c   :  { %1424 = vrot.lane.b32.xlu0 %v11681_v6, %s7097_s13  ;;  %v11740_v6 = vld [vmem:[#allocation86_spill] sm:$0xff] }
 0x34d   :  { %v1541_v62 = vpop.permute.xlu1 %1540  ;;  %v890_v30 = vsel %vm499_vm14, %v11740_v6, %v8810_v24  ;;  %v1698_v24 = vsel %vm1658_vm9, %v11744_v40, %v11743_v59  ;;  %v11747_v6 = vld [vmem:[#allocation123_spill] sm:$0xff] }
 0x34e   :  { %v1623_v52 = vpop.permute.xlu0 %1622  ;;  %v905_v39 = vsel %vm354_vm3, %v11742_v28, %v890_v30  ;;  %v1782_v16 = vsel %vm1750_vm11, %v1698_v24, %v11746_v33  ;;  %v1104_v31 = vsel %vm354_vm3, %v11747_v6, %v1087_v0  ;;  %v11748_v30 = vld [vmem:[#allocation119_spill] sm:$0xff]  ;;  %v475_v0 = vsel %vm354_vm3, %v8998_v35, %v8990_v14  ;;  %v11753_v6 = vld [vmem:[#allocation24_spill] sm:$0xff] }
 0x34f   :  { %493 = vrot.lane.b32.xlu1 %v490_v2, %s7083_s19 }
 0x350   :  { %6709 = vmatmul.mubr.msk.bf16.gmra.mrb[48].mxu1 %vm1998_vm12, %v1922_v46  ;;  %737 = vrot.lane.b32.xlu0 %v721_v60, %s7104_s26  ;;  %v1853_v46 = vsel %vm1821_vm10, %v1782_v16, %v8782_v20  ;;  %v472_v20 = vsel %vm346_vm2, %v8838_v25, %v8872_v26 }
 0x351   :  { %v9095_v36 = vpop.permute.xlu1 %895  ;;  %6712 = vmatprep.mubr.msk.bf16.mxu1 %vm7101_vm8, %v11668_v58  ;;  %v1924_v60 = vsel %vm1892_vm13, %v1853_v46, %v8798_v13  ;;  %v11749_v13 = vld [vmem:[#allocation33_spill] sm:$0xff]  ;;  %v1700_v59 = vsel %vm1658_vm9, %v472_v20, %v8876_v5  ;;  %v1702_v5 = vsel %vm1658_vm9, %v475_v0, %v9045_v57 }
 0x352   :  { %v9099_v48 = vpop.permute.xlu0 %1094  ;;  %v1784_v25 = vsel %vm1750_vm11, %v1700_v59, %v8893_v41  ;;  %v11751_v57 = vld [vmem:[#allocation85_spill] sm:$0xff]  ;;  %v11757_v59 = vld [vmem:[#allocation15_spill] sm:$0xff] }
 0x353   :  { %1506 = vrot.lane.b32.xlu1 %v11741_v9, %s7098_s14  ;;  %v1291_v9 = vsel %vm499_vm14, %v11748_v30, %v8817_v22  ;;  %v1855_v40 = vsel %vm1821_vm10, %v1784_v25, %v8919_v29  ;;  %v492_v33 = vsel %vm354_vm3, %v490_v2, %v11751_v57  ;;  %v11755_v20 = vld [vmem:[#allocation25_spill] sm:$0xff] }
 0x354   :  { %921 = vrot.lane.b32.xlu0 %v905_v39, %s7104_s26  ;;  %v11750_v39 = vld [vmem:[#allocation130_spill] sm:$0xff]  ;;  %v1926_v17 = vsel %vm1892_vm13, %v1855_v40, %v8932_v63  ;;  %v1786_v63 = vsel %vm1750_vm11, %v1702_v5, %v9033_v49  ;;  %v11759_v40 = vld [vmem:[#allocation8_spill] sm:$0xff] }
 0x355   :  { %v9114_v34 = vpop.permute.xlu1 %1085  ;;  %v1304_v22 = vsel %vm354_vm3, %v11750_v39, %v1291_v9  ;;  %v11756_v39 = vld [vmem:[#allocation116_spill] sm:$0xff] }
 0x356   :  { %v9118_v10 = vpop.permute.xlu0 %1294 }
 0x357   :  { %1588 = vrot.lane.b32.xlu1 %v11683_v55, %s7102_s2 }
 0x358   :  { %6713 = vmatmul.mubr.msk.bf16.gmra.mrb[52].mxu1 %vm1998_vm12, %v1924_v60  ;;  %1120 = vrot.lane.b32.xlu0 %v1104_v31, %s7104_s26  ;;  %v11754_v31 = vld [vmem:[#allocation104_spill] sm:$0xff] }
 0x359   :  { %v9134_v28 = vpop.permute.xlu1 %1289  ;;  %6716 = vmatprep.mubr.msk.bf16.mxu1 %vm7101_vm8, %v11668_v58  ;;  %v891_v30 = vsel %vm499_vm14, %v11754_v31, %v8923_v47 }
 0x35a   :  { %v9138_v55 = vpop.permute.xlu0 %836 }
 0x35b   :  { %432 = vrot.lane.b32.xlu1 %v11749_v13, %s7095_s29  ;;  %v893_v13 = vrot.slane %v11755_v20, 6  ;;  %v11777_v20 = vld [vmem:[#allocation5_spill] sm:$0xff] }
 0x35c   :  { %1320 = vrot.lane.b32.xlu0 %v1304_v22, %s7104_s26  ;;  %v1088_v22 = vsel %vm499_vm14, %v11756_v39, %v8964_v44  ;;  %v11767_v39 = vld [vmem:[#allocation94_spill] sm:$0xff] }
 0x35d   :  { %v9149_v26 = vpop.permute.xlu1 %647 }
 0x35e   :  { %v9153_v24 = vpop.permute.xlu0 %1035 }
 0x35f   :  { %1388 = vrot.lane.b32.xlu1 %v8854_v54, %s7096_s30  ;;  %v1857_v54 = vsel %vm1821_vm10, %v1786_v63, %v1541_v62 }
 0x360   :  { %6717 = vmatmul.mubr.msk.bf16.gmra.mrb[56].mxu1 %vm1998_vm12, %v1926_v17  ;;  %1552 = vrot.lane.b32.xlu0 %v8889_v51, %s7098_s14  ;;  %v1928_v51 = vsel %vm1892_vm13, %v1857_v54, %v1623_v52  ;;  %v11752_v52 = vld [vmem:[#allocation74_spill] sm:$0xff]  ;;  %v894_v17 = vsel %vm346_vm2, %v11759_v40, %v893_v13 }
 0x361   :  { %v417_v41 = vpop.permute.xlu1 %416  ;;  %6720 = vmatprep.mubr.msk.bf16.mxu1 %vm7101_vm8, %v11668_v58 }
 0x362   :  { %v9169_v29 = vpop.permute.xlu0 %1234 }
 0x363   :  { %1470 = vrot.lane.b32.xlu1 %v8858_v42, %s7097_s13 }
 0x364   :  { %1634 = vrot.lane.b32.xlu0 %v8902_v53, %s7102_s2 }
 0x365   :  { %v1379_v14 = vpop.permute.xlu1 %1378 }
 0x366   :  { %v1543_v35 = vpop.permute.xlu0 %1542  ;;  %v1705_v42 = vsel %vm1658_vm9, %v417_v41, %v1379_v14  ;;  %v690_v41 = vsel %vm392_vm7, %v8947_v3, %v8936_v23  ;;  %v879_v14 = vsel %vm392_vm7, %v8954_v43, %v8983_v56  ;;  %v1078_v43 = vsel %vm392_vm7, %v9013_v21, %v9002_v7 }
 0x367   :  { %1344 = vrot.lane.b32.xlu1 %v8836_v8, %s7096_s30  ;;  %v705_v8 = vsel %vm499_vm14, %v11752_v52, %v8906_v15  ;;  %v11762_v52 = vld [vmem:[#allocation28_spill] sm:$0xff]  ;;  %v1277_v7 = vsel %vm392_vm7, %v9026_v4, %v9017_v1  ;;  %v11766_v4 = vld [vmem:[#allocation107_spill] sm:$0xff] }
 0x368   :  { %6721 = vmatmul.mubr.msk.bf16.gmra.mrb[60].mxu1 %vm1998_vm12, %v1928_v51  ;;  %495 = vrot.lane.b32.xlu0 %v492_v33, %s7083_s19  ;;  %v11760_v33 = vld [vmem:[#allocation125_spill] sm:$0xff]  ;;  %v892_v31 = vsel %vm499_vm14, %v11766_v4, %v9066_v19 }
 0x369   :  { %v1461_v49 = vpop.permute.xlu1 %1460  ;;  %6724 = vmatprep.mubr.msk.bf16.mxu1 %vm7101_vm8, %v11668_v58 }
 0x36a   :  { %v1788_v53 = vsel %vm1750_vm11, %v1705_v42, %v1461_v49  ;;  %v9189_v62 = vpop.permute.xlu0 %729  ;;  %v1292_v42 = vsel %vm499_vm14, %v11760_v33, %v8971_v32  ;;  %v11761_v49 = vld [vmem:[#allocation34_spill] sm:$0xff]  ;;  %v11774_v33 = vld [vmem:[#allocation113_spill] sm:$0xff] }
 0x36b   :  { %1426 = vrot.lane.b32.xlu1 %v8822_v45, %s7097_s13  ;;  %v1859_v2 = vsel %vm1821_vm10, %v1788_v53, %v1543_v35  ;;  %v1092_v53 = vrot.slane %v11761_v49, 3 }
 0x36c   :  { %739 = vrot.lane.b32.xlu0 %v705_v8, %s7104_s26  ;;  %v11763_v8 = vrot.slane %v11762_v52, 3 }
 0x36d   :  { %v1625_v16 = vpop.permute.xlu1 %1624 }
 0x36e   :  { %v1930_v46 = vsel %vm1892_vm13, %v1859_v2, %v1625_v16  ;;  %v421_v60 = vpop.permute.xlu0 %420  ;;  %v1093_v2 = vsel %vm188_vm0, %v11763_v8, %v1092_v53  ;;  %v503_v16 = vrot.slane %v11737_v11, 4 }
 0x36f   :  { %1508 = vrot.lane.b32.xlu1 %v8843_v38, %s7098_s14 }
 0x370   :  { %434 = vrot.lane.b32.xlu0 %v11753_v6, %s7095_s29  ;;  %6725 = vmatmul.mubr.msk.bf16.gmra.mrb[64].mxu1 %vm1998_vm12, %v1930_v46  ;;  %v11765_v6 = vld [vmem:[#allocation88_spill] sm:$0xff] }
 0x371   :  { %v419_v15 = vpop.permute.xlu1 %418  ;;  %6728 = vmatprep.mubr.msk.bf16.mxu1 %vm7101_vm8, %v11668_v58 }
 0x372   :  { %v9206_v45 = vpop.permute.xlu0 %1112  ;;  %v478_v0 = vsel %vm364_vm5, %v419_v15, %v421_v60  ;;  %v11764_v60 = vld [vmem:[#allocation40_spill] sm:$0xff]  ;;  %v901_v15 = vsel %vm512_vm15, %v11765_v6, %v9095_v36  ;;  %v11768_v36 = vld [vmem:[#allocation77_spill] sm:$0xff] }
 0x373   :  { %1590 = vrot.lane.b32.xlu1 %v8863_v27, %s7102_s2  ;;  %v11758_v27 = vld [vmem:[#allocation22_spill] sm:$0xff] }
 0x374   :  { %923 = vrot.lane.b32.xlu0 %v891_v30, %s7104_s26 }
 0x375   :  { %v9214_v38 = vpop.permute.xlu1 %913 }
 0x376   :  { %v9216_v9 = vpop.permute.xlu0 %1312 }
 0x377   :  { %436 = vrot.lane.b32.xlu1 %v11757_v59, %s7103_s0  ;;  %v908_v59 = vsel %vm364_vm5, %v892_v31, %v901_v15 }
 0x378   :  { %1122 = vrot.lane.b32.xlu0 %v1088_v22, %s7104_s26  ;;  %v706_v22 = vsel %vm499_vm14, %v11767_v39, %v9062_v12 }
 0x379   :  { %v1381_v47 = vpop.permute.xlu1 %1380 }
 0x37a   :  { %v1545_v25 = vpop.permute.xlu0 %1544  ;;  %v1707_v44 = vsel %vm1658_vm9, %v478_v0, %v1381_v47  ;;  %v717_v47 = vsel %vm512_vm15, %v11768_v36, %v9052_v37 }
 0x37b   :  { %713 = vrot.lane.b32.xlu1 %v11758_v27, %s7085_s20  ;;  %v724_v12 = vsel %vm364_vm5, %v706_v22, %v717_v47  ;;  %v11779_v47 = vld [vmem:[#allocation67_spill] sm:$0xff] }
 0x37c   :  { %897 = vrot.lane.b32.xlu0 %v894_v17, %s7085_s20 }
 0x37d   :  { %v1463_v5 = vpop.permute.xlu1 %1462 }
 0x37e   :  { %v1790_v63 = vsel %vm1750_vm11, %v1707_v44, %v1463_v5  ;;  %v9238_v54 = vpop.permute.xlu0 %340 }
 0x37f   :  { %1390 = vrot.lane.b32.xlu1 %v690_v41, %s7096_s30  ;;  %v1861_v35 = vsel %vm1821_vm10, %v1790_v63, %v1545_v25  ;;  %v11771_v41 = vld [vmem:[#allocation120_spill] sm:$0xff] }
 0x380   :  { %1472 = vrot.lane.b32.xlu0 %v879_v14, %s7097_s13  ;;  %v1089_v63 = vsel %vm499_vm14, %v11771_v41, %v9114_v34  ;;  %v11772_v14 = vld [vmem:[#allocation32_spill] sm:$0xff] }
 0x381   :  { %v1627_v51 = vpop.permute.xlu1 %1626 }
 0x382   :  { %v1932_v23 = vsel %vm1892_vm13, %v1861_v35, %v1627_v51  ;;  %v9250_v3 = vpop.permute.xlu0 %915  ;;  %v11773_v35 = vld [vmem:[#allocation131_spill] sm:$0xff] }
 0x383   :  { %1322 = vrot.lane.b32.xlu1 %v1292_v42, %s7104_s26  ;;  %6729 = vmatmul.mubr.msk.bf16.gmra.mrb[68].mxu1 %vm1998_vm12, %v1932_v23  ;;  %v1293_v51 = vsel %vm499_vm14, %v11773_v35, %v9134_v28  ;;  %v1100_v42 = vsel %vm512_vm15, %v11774_v33, %v9099_v48  ;;  %v11775_v23 = vld [vmem:[#allocation118_spill] sm:$0xff] }
 0x384   :  { %1554 = vrot.lane.b32.xlu0 %v1078_v43, %s7098_s14  ;;  %6732 = vmatprep.mubr.msk.bf16.mxu1 %vm7101_vm8, %v11668_v58  ;;  %v1300_v49 = vsel %vm512_vm15, %v11775_v23, %v9118_v10  ;;  %v1107_v52 = vsel %vm364_vm5, %v1089_v63, %v1100_v42 }
 0x385   :  { %v9261_v32 = vpop.permute.xlu1 %731  ;;  %v1307_v28 = vsel %vm364_vm5, %v1293_v51, %v1300_v49  ;;  %v11780_v49 = vld [vmem:[#allocation93_spill] sm:$0xff] }
 0x386   :  { %v9263_v56 = vpop.permute.xlu0 %1114 }
 0x387   :  { %1096 = vrot.lane.b32.xlu1 %v1093_v2, %s7085_s20 }
 0x388   :  { %1636 = vrot.lane.b32.xlu0 %v1277_v7, %s7102_s2  ;;  %v11776_v7 = vld [vmem:[#allocation102_spill] sm:$0xff] }
 0x389   :  { %v423_v21 = vpop.permute.xlu1 %422 }
 0x38a   :  { %v9274_v46 = vpop.permute.xlu0 %1314 }
 0x38b   :  { %1296 = vrot.lane.b32.xlu1 %v11764_v60, %s7085_s20 }
 0x38c   :  { %506 = vrot.lane.b32.xlu0 %v503_v16, %s7085_s20 }
 0x38d   :  { %v1383_v1 = vpop.permute.xlu1 %1382 }
 0x38e   :  { %v1547_v30 = vpop.permute.xlu0 %1546  ;;  %v1710_v25 = vsel %vm1658_vm9, %v423_v21, %v1383_v1 }
 0x38f   :  { %497 = vrot.lane.b32.xlu1 %v11751_v57, %s7083_s19  ;;  %v11769_v57 = vld [vmem:[#allocation19_spill] sm:$0xff] }
 0x390   :  { %925 = vrot.lane.b32.xlu0 %v908_v59, %s7104_s26  ;;  %v11770_v17 = vrot.slane %v11769_v57, 1 }
 0x391   :  { %v1465_v27 = vpop.permute.xlu1 %1464 }
 0x392   :  { %v1792_v19 = vsel %vm1750_vm11, %v1710_v25, %v1465_v27  ;;  %v9299_v40 = vpop.permute.xlu0 %733 }
 0x393   :  { %741 = vrot.lane.b32.xlu1 %v724_v12, %s7104_s26  ;;  %v1863_v0 = vsel %vm1821_vm10, %v1792_v19, %v1547_v30 }
 0x394   :  { %715 = vrot.lane.b32.xlu0 %v11770_v17, %s7085_s20 }
 0x395   :  { %v1629_v44 = vpop.permute.xlu1 %1628 }
 0x396   :  { %v1934_v37 = vsel %vm1892_vm13, %v1863_v0, %v1629_v44  ;;  %v427_v5 = vpop.permute.xlu0 %426 }
 0x397   :  { %438 = vrot.lane.b32.xlu1 %v11772_v14, %s7103_s0  ;;  %6733 = vmatmul.mubr.msk.bf16.gmra.mrb[72].mxu1 %vm1998_vm12, %v1934_v37 }
 0x398   :  { %1392 = vrot.lane.b32.xlu0 %v9149_v26, %s7096_s30  ;;  %6736 = vmatprep.mubr.msk.bf16.mxu1 %vm7101_vm8, %v11668_v58 }
 0x399   :  { %v425_v34 = vpop.permute.xlu1 %424 }
 0x39a   :  { %v9327_v43 = vpop.permute.xlu0 %1116  ;;  %v481_v2 = vsel %vm374_vm6, %v425_v34, %v427_v5 }
 0x39b   :  { %1124 = vrot.lane.b32.xlu1 %v1107_v52, %s7104_s26 }
 0x39c   :  { %1324 = vrot.lane.b32.xlu0 %v1307_v28, %s7104_s26 }
 0x39d   :  { %v918_v26 = vpop.permute.xlu1 %917 }
 0x39e   :  { %v1317_v8 = vpop.permute.xlu0 %1316 }
 0x39f   :  { %899 = vrot.lane.b32.xlu1 %v893_v13, %s7085_s20 }
 0x3a0   :  { %1098 = vrot.lane.b32.xlu0 %v1092_v53, %s7085_s20 }
 0x3a1   :  { %v1385_v48 = vpop.permute.xlu1 %1384 }
 0x3a2   :  { %v1549_v10 = vpop.permute.xlu0 %1548  ;;  %v1712_v21 = vsel %vm1658_vm9, %v481_v2, %v1385_v48 }
 0x3a3   :  { %1474 = vrot.lane.b32.xlu1 %v9138_v55, %s7097_s13 }
 0x3a4   :  { %1298 = vrot.lane.b32.xlu0 %v11776_v7, %s7085_s20 }
 0x3a5   :  { %v1467_v60 = vpop.permute.xlu1 %1466 }
 0x3a6   :  { %v1794_v6 = vsel %vm1750_vm11, %v1712_v21, %v1467_v60  ;;  %v736_v15 = vpop.permute.xlu0 %735  ;;  %v11782_v21 = vld [vmem:[#allocation66_spill] sm:$0xff] }
 0x3a7   :  { %1556 = vrot.lane.b32.xlu1 %v9153_v24, %s7098_s14  ;;  %v1865_v13 = vsel %vm1821_vm10, %v1794_v6, %v1549_v10 }
 0x3a8   :  { %525 = vrot.lane.b32.xlu0 %v11777_v20, %s7104_s26 }
 0x3a9   :  { %v1631_v55 = vpop.permute.xlu1 %1630 }
 0x3aa   :  { %v1936_v53 = vsel %vm1892_vm13, %v1865_v13, %v1631_v55  ;;  %v431_v1 = vpop.permute.xlu0 %430 }
 0x3ab   :  { %1638 = vrot.lane.b32.xlu1 %v9169_v29, %s7102_s2  ;;  %6737 = vmatmul.mubr.msk.bf16.gmra.mrb[76].mxu1 %vm1998_vm12, %v1936_v53 }
 0x3ac   :  { %1476 = vrot.lane.b32.xlu0 %v9214_v38, %s7097_s13  ;;  %6740 = vmatprep.mubr.msk.bf16.mxu1 %vm7101_vm8, %v11668_v58  ;;  %v11778_v38 = vld [vmem:[#allocation10_spill] sm:$0xff] }
 0x3ad   :  { %v429_v24 = vpop.permute.xlu1 %428  ;;  %v9370_v39 = vsel %vm188_vm0, %v11778_v38, %v9238_v54 }
 0x3ae   :  { %v1119_v4 = vpop.permute.xlu0 %1118 }
 0x3af   :  { %1394 = vrot.lane.b32.xlu1 %v9189_v62, %s7096_s30  ;;  %v484_v62 = vsel %vm382_vm4, %v429_v24, %v431_v1 }
 0x3b0   :  { %1640 = vrot.lane.b32.xlu0 %v9216_v9, %s7102_s2 }
 0x3b1   :  { %v920_v31 = vpop.permute.xlu1 %919 }
 0x3b2   :  { %v9361_v30 = vpop.permute.xlu0 %1318 }
 0x3b3   :  { %1558 = vrot.lane.b32.xlu1 %v9206_v45, %s7098_s14 }
 0x3b4   :  { %1396 = vrot.lane.b32.xlu0 %v9261_v32, %s7096_s30 }
 0x3b5   :  { %v1387_v29 = vpop.permute.xlu1 %1386 }
 0x3b6   :  { %v1551_v22 = vpop.permute.xlu0 %1550  ;;  %v1714_v45 = vsel %vm1658_vm9, %v484_v62, %v1387_v29 }
 0x3b7   :  { %527 = vrot.lane.b32.xlu1 %v9370_v39, %s7104_s26 }
 0x3b8   :  { %1560 = vrot.lane.b32.xlu0 %v9263_v56, %s7098_s14 }
 0x3b9   :  { %v1469_v9 = vpop.permute.xlu1 %1468 }
 0x3ba   :  { %v1796_v32 = vsel %vm1750_vm11, %v1714_v45, %v1469_v9  ;;  %v1633_v59 = vpop.permute.xlu0 %1632 }
 0x3bb   :  { %v1867_v36 = vsel %vm1821_vm10, %v1796_v32, %v1551_v22  ;;  %1478 = vrot.lane.b32.xlu1 %v9250_v3, %s7097_s13  ;;  %v9394_v3 = vld [vmem:[%s11325_s3] ss:$0 sm:$0xff] }
 0x3bc   :  { %v1938_v54 = vsel %vm1892_vm13, %v1867_v36, %v1633_v59  ;;  %529 = vrot.lane.b32.xlu0 %v11779_v47, %s7104_s26 }
 0x3bd   :  { %6741 = vmatmul.mubr.msk.bf16.gmra.mrb[80].mxu1 %vm1998_vm12, %v1938_v54  ;;  %v1343_v25 = vpop.permute.xlu1 %1342 }
 0x3be   :  { %v1425_v56 = vpop.permute.xlu0 %1424  ;;  %6744 = vmatprep.mubr.msk.bf16.mxu1 %vm7101_vm8, %v11668_v58 }
 0x3bf   :  { %1642 = vrot.lane.b32.xlu1 %v9274_v46, %s7102_s2  ;;  %v1661_v46 = vsel %vm1658_vm9, %v11777_v20, %v1343_v25 }
 0x3c0   :  { %1480 = vrot.lane.b32.xlu0 %v918_v26, %s7097_s13  ;;  %v1752_v63 = vsel %vm1750_vm11, %v1661_v46, %v1425_v56 }
 0x3c1   :  { %v494_v27 = vpop.permute.xlu1 %493 }
 0x3c2   :  { %v738_v19 = vpop.permute.xlu0 %737 }
 0x3c3   :  { %v2124_v12 = vpop.f32.mrb[0].mxu1  ;;  %1398 = vrot.lane.b32.xlu1 %v9299_v40, %s7096_s30 }
 0x3c4   :  { %v2125_v57 = vadd.f32 %v9394_v3, %v2124_v12  ;;  %v6662_v17 = vpop.f32.mrb[1].mxu1  ;;  %1644 = vrot.lane.b32.xlu0 %v1317_v8, %s7102_s2 }
 0x3c5   :  { %v2127_v0 = vpop.f32.mrb[2].mxu1  ;;  %v1507_v44 = vpop.permute.xlu1 %1506 }
 0x3c6   :  { %v2128_v37 = vadd.f32 %v9394_v3, %v2127_v0  ;;  %v6663_v5 = vpop.f32.mrb[3].mxu1  ;;  %v922_v41 = vpop.permute.xlu0 %921  ;;  %v2390_v40 = vmax.f32 %v2125_v57, 0.0  ;;  %v1823_v35 = vsel %vm1821_vm10, %v1752_v63, %v1507_v44 }
 0x3c7   :  { %1562 = vrot.lane.b32.xlu1 %v9327_v43, %s7098_s14  ;;  %v11781_v43 = vld [vmem:[#allocation47_spill] sm:$0xff] }
 0x3c8   :  { %v2391_v14 = vmax.f32 %v2128_v37, 0.0  ;;  %1400 = vrot.lane.b32.xlu0 %v736_v15, %s7096_s30  ;;  %v500_v52 = vsel %vm499_vm14, %v11781_v43, %v494_v27  ;;  %v11783_v37 = vld [vmem:[#allocation12_spill] sm:$0xff] }
 0x3c9   :  { %v1589_v51 = vpop.permute.xlu1 %1588  ;;  %v517_v60 = vsel %vm354_vm3, %v11782_v21, %v500_v52  ;;  %v504_v5 = vrot.slane %v11783_v37, 4 }
 0x3ca   :  { %v9408_v33 = vpack.c.bf16 %v2391_v14, %v2390_v40  ;;  %v1894_v42 = vsel %vm1892_vm13, %v1823_v35, %v1589_v51  ;;  %v1121_v34 = vpop.permute.xlu0 %1120 }
 0x3cb   :  { %v2132_v23 = vpop.f32.mrb[4].mxu1  ;;  %531 = vrot.lane.b32.xlu1 %v11780_v49, %s7104_s26  ;;  %6653 = vmatmul.mubr.msk.bf16.vlgmr.msra.gmra.mrb[36].mxu0 %vm1998_vm12, %v1894_v42  ;;  %v505_v52 = vsel %vm364_vm5, %v503_v16, %v504_v5 }
 0x3cc   :  { %v2133_v28 = vadd.f32 %v9394_v3, %v2132_v23  ;;  %v6666_v26 = vpop.f32.mrb[5].mxu1  ;;  %1564 = vrot.lane.b32.xlu0 %v1119_v4, %s7098_s14  ;;  %6656 = vmatprep.mubr.msk.bf16.mxu0 %vm7101_vm8, %v11668_v58  ;;  %v2494_v1 = vrot.slane %v9408_v33, 5 }
 0x3cd   :  { %v2135_v8 = vpop.f32.mrb[6].mxu1  ;;  %v433_v48 = vpop.permute.xlu1 %432 }
 0x3ce   :  { %v2136_v10 = vadd.f32 %v9394_v3, %v2135_v8  ;;  %v6667_v2 = vpop.f32.mrb[7].mxu1  ;;  %v1321_v7 = vpop.permute.xlu0 %1320  ;;  %v2392_v6 = vmax.f32 %v2133_v28, 0.0 }
 0x3cf   :  { %1482 = vrot.lane.b32.xlu1 %v920_v31, %s7097_s13 }
 0x3d0   :  { %v2393_v15 = vmax.f32 %v2136_v10, 0.0  ;;  %533 = vrot.lane.b32.xlu0 %v517_v60, %s7104_s26 }
 0x3d1   :  { %v1389_v20 = vpop.permute.xlu1 %1388 }
 0x3d2   :  { %v2458_v13 = vpack.c.bf16 %v2393_v15, %v2392_v6  ;;  %v1553_v55 = vpop.permute.xlu0 %1552  ;;  %v1717_v29 = vsel %vm1658_vm9, %v433_v48, %v1389_v20 }
 0x3d3   :  { %v2140_v53 = vpop.f32.mrb[8].mxu1  ;;  %1646 = vrot.lane.b32.xlu1 %v9361_v30, %s7102_s2 }
 0x3d4   :  { %v2496_v24 = vrot.slane %v2458_v13, 5  ;;  %v2141_v4 = vadd.f32 %v9394_v3, %v2140_v53  ;;  %v6670_v31 = vpop.f32.mrb[9].mxu1  ;;  %1484 = vrot.lane.b32.xlu0 %v922_v41, %s7097_s13  ;;  %v2503_v57 = vrot.slane %v2458_v13, 2  ;;  %v11784_v41 = vld [vmem:[#allocation68_spill] sm:$0xff]  ;;  %v11785_v53 = vmov 0  }
 0x3d5   :  { %v2143_v38 = vpop.f32.mrb[10].mxu1  ;;  %v1471_v22 = vpop.permute.xlu1 %1470 }
 0x3d6   :  { %v2144_v62 = vadd.f32 %v9394_v3, %v2143_v38  ;;  %v1798_v45 = vsel %vm1750_vm11, %v1717_v29, %v1471_v22  ;;  %v6671_v9 = vpop.f32.mrb[11].mxu1  ;;  %v1635_v32 = vpop.permute.xlu0 %1634  ;;  %v9436_v30 = vsel %vm392_vm7, %v2494_v1, %v2496_v24  ;;  %v2394_v36 = vmax.f32 %v2141_v4, 0.0 }
 0x3d7   :  { %v1869_v59 = vsel %vm1821_vm10, %v1798_v45, %v1553_v55  ;;  %1402 = vrot.lane.b32.xlu1 %v738_v19, %s7096_s30 }
 0x3d8   :  { %v2395_v54 = vmax.f32 %v2144_v62, 0.0  ;;  %v1940_v47 = vsel %vm1892_vm13, %v1869_v59, %v1635_v32  ;;  %1648 = vrot.lane.b32.xlu0 %v1321_v7, %s7102_s2  ;;  %v11786_v59 = vld [vmem:[#allocation95_spill] sm:$0xff] }
 0x3d9   :  { %6745 = vmatmul.mubr.msk.bf16.gmra.mrb[84].mxu1 %vm1998_vm12, %v1940_v47  ;;  %v1345_v25 = vpop.permute.xlu1 %1344 }
 0x3da   :  { %v9443_v56 = vpack.c.bf16 %v2395_v54, %v2394_v36  ;;  %v496_v27 = vpop.permute.xlu0 %495  ;;  %6748 = vmatprep.mubr.msk.bf16.mxu1 %vm7101_vm8, %v11668_v58  ;;  %v1663_v28 = vsel %vm1658_vm9, %v9370_v39, %v1345_v25 }
 0x3db   :  { %v2148_v12 = vpop.f32.mrb[12].mxu1  ;;  %1566 = vrot.lane.b32.xlu1 %v1121_v34, %s7098_s14  ;;  %v501_v63 = vsel %vm499_vm14, %v11784_v41, %v496_v27 }
 0x3dc   :  { %v2504_v19 = vrot.slane %v9443_v56, 2  ;;  %v2149_v17 = vadd.f32 %v9394_v3, %v2148_v12  ;;  %v6674_v46 = vpop.f32.mrb[13].mxu1  ;;  %v2512_v8 = vrot.slane %v9443_v56, 7 }
 0x3dd   :  { %v2151_v0 = vpop.f32.mrb[14].mxu1  ;;  %v1427_v44 = vpop.permute.xlu1 %1426  ;;  %v11787_v46 = vld [vmem:[#allocation106_spill] sm:$0xff] }
 0x3de   :  { %v2152_v40 = vadd.f32 %v9394_v3, %v2151_v0  ;;  %v6675_v14 = vpop.f32.mrb[15].mxu1  ;;  %v740_v35 = vpop.permute.xlu0 %739  ;;  %v9457_v51 = vsel %vm382_vm4, %v2503_v57, %v2504_v19  ;;  %v2396_v42 = vmax.f32 %v2149_v17, 0.0  ;;  %v1754_v10 = vsel %vm1750_vm11, %v1663_v28, %v1427_v44 }
 0x3df   :  { %535 = vrot.lane.b32.xlu1 %v501_v63, %s7104_s26  ;;  %1404 = vrot.lane.b32.xlu0 %v740_v35, %s7096_s30 }
 0x3e0   :  { %v2397_v34 = vmax.f32 %v2152_v40, 0.0 }
 0x3e1   :  { %v1509_v23 = vpop.permute.xlu1 %1508 }
 0x3e2   :  { %v2460_v49 = vpack.c.bf16 %v2397_v34, %v2396_v42  ;;  %v435_v43 = vpop.permute.xlu0 %434  ;;  %v1825_v21 = vsel %vm1821_vm10, %v1754_v10, %v1509_v23 }
 0x3e3   :  { %v2156_v26 = vpop.f32.mrb[16].mxu1  ;;  %508 = vrot.lane.b32.xlu0 %v505_v52, %s7085_s20 }
 0x3e4   :  { %v2513_v48 = vrot.slane %v2460_v49, 7  ;;  %v2157_v2 = vadd.f32 %v9394_v3, %v2156_v26  ;;  %v6678_v7 = vpop.f32.mrb[17].mxu1 }
 0x3e5   :  { %v2159_v60 = vpop.f32.mrb[18].mxu1  ;;  %v1591_v11 = vpop.permute.xlu1 %1590 }
 0x3e6   :  { %v2160_v16 = vadd.f32 %v9394_v3, %v2159_v60  ;;  %v1896_v6 = vsel %vm1892_vm13, %v1825_v21, %v1591_v11  ;;  %v6679_v39 = vpop.f32.mrb[19].mxu1  ;;  %v924_v15 = vpop.permute.xlu0 %923  ;;  %v9476_v20 = vsel %vm374_vm6, %v2512_v8, %v2513_v48  ;;  %v2398_v13 = vmax.f32 %v2157_v2, 0.0  ;;  %v11788_v60 = vld [vmem:[#allocation124_spill] sm:$0xff] }
 0x3e7   :  { %1486 = vrot.lane.b32.xlu1 %v924_v15, %s7097_s13  ;;  %6657 = vmatmul.mubr.msk.bf16.gmra.mrb[40].mxu0 %vm1998_vm12, %v1896_v6 }
 0x3e8   :  { %v2399_v55 = vmax.f32 %v2160_v16, 0.0  ;;  %2921 = vmatprep.mubr.bf16.mxu0 %v11785_v53 }
 0x3e9   :  { %v437_v24 = vpop.permute.xlu1 %436 }
 0x3ea   :  { %v2461_v4 = vpack.c.bf16 %v2399_v55, %v2398_v13  ;;  %v1123_v31 = vpop.permute.xlu0 %1122  ;;  %v487_v42 = vsel %vm392_vm7, %v435_v43, %v437_v24 }
 0x3eb   :  { %v2164_v29 = vpop.f32.mrb[20].mxu1  ;;  %1568 = vrot.lane.b32.xlu1 %v1123_v31, %s7098_s14 }
 0x3ec   :  { %v2515_v38 = vrot.slane %v2461_v4, 7  ;;  %v2165_v22 = vadd.f32 %v9394_v3, %v2164_v29  ;;  %v6682_v62 = vpop.f32.mrb[21].mxu1  ;;  %v2523_v63 = vrot.slane %v2461_v4, 4  ;;  %v11789_v29 = vld [vmem:[#allocation122_spill] sm:$0xff] }
 0x3ed   :  { %v2167_v45 = vpop.f32.mrb[22].mxu1  ;;  %v714_v9 = vpop.permute.xlu1 %713 }
 0x3ee   :  { %v2168_v32 = vadd.f32 %v9394_v3, %v2167_v45  ;;  %v718_v36 = vsel %vm512_vm15, %v11786_v59, %v714_v9  ;;  %v6683_v54 = vpop.f32.mrb[23].mxu1  ;;  %v898_v47 = vpop.permute.xlu0 %897  ;;  %v9487_v25 = vsel %vm374_vm6, %v2513_v48, %v2515_v38  ;;  %v2400_v27 = vmax.f32 %v2165_v22, 0.0 }
 0x3ef   :  { %743 = vrot.lane.b32.xlu0 %v718_v36, %s7104_s26  ;;  %v902_v0 = vsel %vm512_vm15, %v11787_v46, %v898_v47  ;;  %v11790_v47 = vld [vmem:[#allocation60_spill] sm:$0xff] }
 0x3f0   :  { %v2401_v12 = vmax.f32 %v2168_v32, 0.0 }
 0x3f1   :  { %v1391_v57 = vpop.permute.xlu1 %1390 }
 0x3f2   :  { %v2462_v17 = vpack.c.bf16 %v2401_v12, %v2400_v27  ;;  %v1473_v44 = vpop.permute.xlu0 %1472  ;;  %v1719_v49 = vsel %vm1658_vm9, %v487_v42, %v1391_v57 }
 0x3f3   :  { %v2172_v41 = vpop.f32.mrb[24].mxu1  ;;  %927 = vrot.lane.b32.xlu0 %v902_v0, %s7104_s26  ;;  %v1800_v2 = vsel %vm1750_vm11, %v1719_v49, %v1473_v44 }
 0x3f4   :  { %v2524_v40 = vrot.slane %v2462_v17, 4  ;;  %v2173_v14 = vadd.f32 %v9394_v3, %v2172_v41  ;;  %v6686_v35 = vpop.f32.mrb[25].mxu1 }
 0x3f5   :  { %v2175_v34 = vpop.f32.mrb[26].mxu1  ;;  %v1323_v23 = vpop.permute.xlu1 %1322 }
 0x3f6   :  { %v2176_v52 = vadd.f32 %v9394_v3, %v2175_v34  ;;  %v6687_v28 = vpop.f32.mrb[27].mxu1  ;;  %v1555_v26 = vpop.permute.xlu0 %1554  ;;  %1650 = vrot.lane.b32.xlu1 %v1323_v23, %s7102_s2  ;;  %v9499_v8 = vsel %vm364_vm5, %v2523_v63, %v2524_v40  ;;  %v2402_v48 = vmax.f32 %v2173_v14, 0.0 }
 0x3f7   :  { %v1871_v43 = vsel %vm1821_vm10, %v1800_v2, %v1555_v26 }
 0x3f8   :  { %v2403_v10 = vmax.f32 %v2176_v52, 0.0 }
 0x3f9   :  { %v1097_v7 = vpop.permute.xlu1 %1096 }
 0x3fa   :  { %v9502_v21 = vpack.c.bf16 %v2403_v10, %v2402_v48  ;;  %v1101_v11 = vsel %vm512_vm15, %v11788_v60, %v1097_v7  ;;  %v1637_v16 = vpop.permute.xlu0 %1636  ;;  %v11791_v10 = vld [vmem:[#allocation84_spill] sm:$0xff] }
 0x3fb   :  { %v1942_v6 = vsel %vm1892_vm13, %v1871_v43, %v1637_v16  ;;  %v2180_v39 = vpop.f32.mrb[28].mxu1  ;;  %1126 = vrot.lane.b32.xlu1 %v1101_v11, %s7104_s26 }
 0x3fc   :  { %v2526_v15 = vrot.slane %v9502_v21, 4  ;;  %v2181_v13 = vadd.f32 %v9394_v3, %v2180_v39  ;;  %v6690_v55 = vpop.f32.mrb[29].mxu1  ;;  %6749 = vmatmul.mubr.msk.bf16.gmra.mrb[88].mxu1 %vm1998_vm12, %v1942_v6 }
 0x3fd   :  { %v2183_v24 = vpop.f32.mrb[30].mxu1  ;;  %v1297_v4 = vpop.permute.xlu1 %1296  ;;  %6752 = vmatprep.mubr.msk.bf16.mxu1 %vm7101_vm8, %v11668_v58 }
 0x3fe   :  { %v2184_v31 = vadd.f32 %v9394_v3, %v2183_v24  ;;  %v1301_v38 = vsel %vm512_vm15, %v11789_v29, %v1297_v4  ;;  %v6691_v22 = vpop.f32.mrb[31].mxu1  ;;  %v507_v62 = vpop.permute.xlu0 %506  ;;  %v9518_v45 = vsel %vm364_vm5, %v2524_v40, %v2526_v15  ;;  %v2404_v9 = vmax.f32 %v2181_v13, 0.0  ;;  %v11792_v13 = vld [vmem:[#allocation108_spill] sm:$0xff] }
 0x3ff   :  { %1326 = vrot.lane.b32.xlu0 %v1301_v38, %s7104_s26  ;;  %v513_v54 = vsel %vm512_vm15, %v11689_v18, %v507_v62  ;;  %v11793_v22 = vld [vmem:[#allocation121_spill] sm:$0xff] }
 0x400   :  { %v2405_v32 = vmax.f32 %v2184_v31, 0.0 }
 0x401   :  { %v498_v59 = vpop.permute.xlu1 %497 }
 0x402   :  { %v9521_v36 = vpack.c.bf16 %v2405_v32, %v2404_v9  ;;  %v502_v27 = vsel %vm499_vm14, %v11790_v47, %v498_v59  ;;  %v926_v12 = vpop.permute.xlu0 %925 }
 0x403   :  { %v2188_v57 = vpop.f32.mrb[32].mxu1  ;;  %v520_v17 = vsel %vm364_vm5, %v502_v27, %v513_v54 }
 0x404   :  { %v2189_v46 = vadd.f32 %v9394_v3, %v2188_v57  ;;  %v6694_v0 = vpop.f32.mrb[33].mxu1  ;;  %537 = vrot.lane.b32.xlu1 %v520_v17, %s7104_s26  ;;  %v2538_v52 = vrot.slane %v9521_v36, 6 }
 0x405   :  { %v2191_v44 = vpop.f32.mrb[34].mxu1  ;;  %v742_v41 = vpop.permute.xlu1 %741 }
 0x406   :  { %v2192_v63 = vadd.f32 %v9394_v3, %v2191_v44  ;;  %v6695_v40 = vpop.f32.mrb[35].mxu1  ;;  %v716_v14 = vpop.permute.xlu0 %715  ;;  %1406 = vrot.lane.b32.xlu0 %v742_v41, %s7096_s30  ;;  %v2406_v18 = vmax.f32 %v2189_v46, 0.0 }
 0x407   :  { %v719_v2 = vsel %vm512_vm15, %v11791_v10, %v716_v14 }
 0x408   :  { %v2407_v35 = vmax.f32 %v2192_v63, 0.0  ;;  %1488 = vrot.lane.b32.xlu1 %v926_v12, %s7097_s13  ;;  %v11794_v12 = vld [vmem:[#allocation127_spill] sm:$0xff] }
 0x409   :  { %v439_v42 = vpop.permute.xlu1 %438 }
 0x40a   :  { %v2465_v34 = vpack.c.bf16 %v2407_v35, %v2406_v18  ;;  %v1393_v23 = vpop.permute.xlu0 %1392  ;;  %510 = vrot.lane.b32.xlu0 %v504_v5, %s7085_s20  ;;  %s7105_s20 = smov 64  }
 0x40b   :  { %v2196_v49 = vpop.f32.mrb[36].mxu1  ;;  %v1722_v63 = vsel %vm1658_vm9, %v439_v42, %v1393_v23 }
 0x40c   :  { %v2539_v28 = vrot.slane %v2465_v34, 6  ;;  %v2197_v26 = vadd.f32 %v9394_v3, %v2196_v49  ;;  %v6698_v48 = vpop.f32.mrb[37].mxu1 }
 0x40d   :  { %v2199_v7 = vpop.f32.mrb[38].mxu1  ;;  %v1125_v43 = vpop.permute.xlu1 %1124 }
 0x40e   :  { %v2200_v60 = vadd.f32 %v9394_v3, %v2199_v7  ;;  %v6699_v11 = vpop.f32.mrb[39].mxu1  ;;  %v1325_v16 = vpop.permute.xlu0 %1324  ;;  %745 = vrot.lane.b32.xlu0 %v719_v2, %s7104_s26  ;;  %1570 = vrot.lane.b32.xlu1 %v1125_v43, %s7098_s14  ;;  %v9544_v37 = vsel %vm346_vm2, %v2538_v52, %v2539_v28  ;;  %v2408_v5 = vmax.f32 %v2197_v26, 0.0 }
 0x410   :  { %v2409_v6 = vmax.f32 %v2200_v60, 0.0 }
 0x411   :  { %v900_v39 = vpop.permute.xlu1 %899 }
 0x412   :  { %v2466_v15 = vpack.c.bf16 %v2409_v6, %v2408_v5  ;;  %v903_v55 = vsel %vm512_vm15, %v11792_v13, %v900_v39  ;;  %v1099_v24 = vpop.permute.xlu0 %1098  ;;  %1652 = vrot.lane.b32.xlu1 %v1325_v16, %s7102_s2 }
 0x413   :  { %v2204_v4 = vpop.f32.mrb[40].mxu1  ;;  %929 = vrot.lane.b32.xlu0 %v903_v55, %s7104_s26  ;;  %v1102_v62 = vsel %vm512_vm15, %v11793_v22, %v1099_v24 }
 0x414   :  { %v2541_v31 = vrot.slane %v2466_v15, 6  ;;  %v2205_v29 = vadd.f32 %v9394_v3, %v2204_v4  ;;  %v6702_v38 = vpop.f32.mrb[41].mxu1  ;;  %v2548_v14 = vrot.slane %v2466_v15, 3 }
 0x415   :  { %v2207_v9 = vpop.f32.mrb[42].mxu1  ;;  %v1475_v32 = vpop.permute.xlu1 %1474 }
 0x416   :  { %v2208_v59 = vadd.f32 %v9394_v3, %v2207_v9  ;;  %v6703_v54 = vpop.f32.mrb[43].mxu1  ;;  %v1299_v47 = vpop.permute.xlu0 %1298  ;;  %1128 = vrot.lane.b32.xlu1 %v1102_v62, %s7104_s26  ;;  %v9556_v27 = vsel %vm346_vm2, %v2539_v28, %v2541_v31  ;;  %v2410_v17 = vmax.f32 %v2205_v29, 0.0  ;;  %v1802_v35 = vsel %vm1750_vm11, %v1722_v63, %v1475_v32 }
 0x417   :  { %v1302_v57 = vsel %vm512_vm15, %v11794_v12, %v1299_v47 }
 0x418   :  { %v2411_v46 = vmax.f32 %v2208_v59, 0.0  ;;  %1328 = vrot.lane.b32.xlu0 %v1302_v57, %s7104_s26 }
 0x419   :  { %v1557_v0 = vpop.permute.xlu1 %1556 }
 0x41a   :  { %v9561_v44 = vpack.c.bf16 %v2411_v46, %v2410_v17  ;;  %v526_v41 = vpop.permute.xlu0 %525  ;;  %v1873_v52 = vsel %vm1821_vm10, %v1802_v35, %v1557_v0 }
 0x41b   :  { %v2212_v40 = vpop.f32.mrb[44].mxu1 }
 0x41c   :  { %v2549_v18 = vrot.slane %v9561_v44, 3  ;;  %v2213_v34 = vadd.f32 %v9394_v3, %v2212_v40  ;;  %v6706_v49 = vpop.f32.mrb[45].mxu1 }
 0x41d   :  { %v2215_v28 = vpop.f32.mrb[46].mxu1  ;;  %v1639_v26 = vpop.permute.xlu1 %1638 }
 0x41e   :  { %v2216_v48 = vadd.f32 %v9394_v3, %v2215_v28  ;;  %v1944_v10 = vsel %vm1892_vm13, %v1873_v52, %v1639_v26  ;;  %v6707_v2 = vpop.f32.mrb[47].mxu1  ;;  %v1477_v7 = vpop.permute.xlu0 %1476  ;;  %v9573_v42 = vsel %vm188_vm0, %v2548_v14, %v2549_v18  ;;  %v2412_v23 = vmax.f32 %v2213_v34, 0.0 }
 0x41f   :  { %6753 = vmatmul.mubr.msk.bf16.gmra.mrb[92].mxu1 %vm1998_vm12, %v1944_v10 }
 0x420   :  { %v2413_v43 = vmax.f32 %v2216_v48, 0.0  ;;  %6756 = vmatprep.mubr.msk.bf16.mxu1 %vm7101_vm8, %v11668_v58 }
 0x421   :  { %v1395_v60 = vpop.permute.xlu1 %1394 }
 0x422   :  { %v9578_v11 = vpack.c.bf16 %v2413_v43, %v2412_v23  ;;  %v1725_v16 = vsel %vm1658_vm9, %v526_v41, %v1395_v60  ;;  %v1641_v5 = vpop.permute.xlu0 %1640 }
 0x423   :  { %v2220_v6 = vpop.f32.mrb[48].mxu1  ;;  %v1804_v55 = vsel %vm1750_vm11, %v1725_v16, %v1477_v7 }
 0x424   :  { %v2221_v39 = vadd.f32 %v9394_v3, %v2220_v6  ;;  %v6710_v15 = vpop.f32.mrb[49].mxu1 }
 0x425   :  { %v2223_v13 = vpop.f32.mrb[50].mxu1  ;;  %v1559_v24 = vpop.permute.xlu1 %1558 }
 0x426   :  { %v2224_v4 = vadd.f32 %v9394_v3, %v2223_v13  ;;  %v1875_v31 = vsel %vm1821_vm10, %v1804_v55, %v1559_v24  ;;  %v6711_v29 = vpop.f32.mrb[51].mxu1  ;;  %v1397_v38 = vpop.permute.xlu0 %1396  ;;  %v2414_v62 = vmax.f32 %v2221_v39, 0.0 }
 0x427   :  { %v1946_v22 = vsel %vm1892_vm13, %v1875_v31, %v1641_v5 }
 0x428   :  { %v2415_v9 = vmax.f32 %v2224_v4, 0.0  ;;  %6757 = vmatmul.mubr.msk.bf16.gmra.mrb[96].mxu1 %vm1998_vm12, %v1946_v22 }
 0x429   :  { %v528_v32 = vpop.permute.xlu1 %527  ;;  %6760 = vmatprep.mubr.msk.bf16.mxu1 %vm7101_vm8, %v11668_v58 }
 0x42a   :  { %v9589_v59 = vpack.c.bf16 %v2415_v9, %v2414_v62  ;;  %v1561_v54 = vpop.permute.xlu0 %1560  ;;  %v1728_v17 = vsel %vm1658_vm9, %v528_v32, %v1397_v38 }
 0x42b   :  { %v2228_v47 = vpop.f32.mrb[52].mxu1 }
 0x42c   :  { %v2229_v12 = vadd.f32 %v9394_v3, %v2228_v47  ;;  %v6714_v57 = vpop.f32.mrb[53].mxu1 }
 0x42d   :  { %v2231_v46 = vpop.f32.mrb[54].mxu1  ;;  %v1479_v0 = vpop.permute.xlu1 %1478 }
 0x42e   :  { %v2232_v41 = vadd.f32 %v9394_v3, %v2231_v46  ;;  %v1806_v63 = vsel %vm1750_vm11, %v1728_v17, %v1479_v0  ;;  %v6715_v40 = vpop.f32.mrb[55].mxu1  ;;  %v530_v14 = vpop.permute.xlu0 %529  ;;  %v2416_v35 = vmax.f32 %v2229_v12, 0.0 }
 0x42f   :  { %v1877_v49 = vsel %vm1821_vm10, %v1806_v63, %v1561_v54 }
 0x430   :  { %v2417_v34 = vmax.f32 %v2232_v41, 0.0 }
 0x431   :  { %v1643_v52 = vpop.permute.xlu1 %1642 }
 0x432   :  { %v9596_v28 = vpack.c.bf16 %v2417_v34, %v2416_v35  ;;  %v1948_v26 = vsel %vm1892_vm13, %v1877_v49, %v1643_v52  ;;  %v1481_v48 = vpop.permute.xlu0 %1480 }
 0x433   :  { %v2236_v10 = vpop.f32.mrb[56].mxu1  ;;  %6761 = vmatmul.mubr.msk.bf16.gmra.mrb[100].mxu1 %vm1998_vm12, %v1948_v26 }
 0x434   :  { %v2237_v2 = vadd.f32 %v9394_v3, %v2236_v10  ;;  %v6718_v7 = vpop.f32.mrb[57].mxu1  ;;  %6764 = vmatprep.mubr.msk.bf16.mxu1 %vm7101_vm8, %v11668_v58  ;;  %v2559_v22 = vrot.slane %v9596_v28, 5 }
 0x435   :  { %v2239_v23 = vpop.f32.mrb[58].mxu1  ;;  %v1399_v43 = vpop.permute.xlu1 %1398 }
 0x436   :  { %v2240_v60 = vadd.f32 %v9394_v3, %v2239_v23  ;;  %v1731_v16 = vsel %vm1658_vm9, %v530_v14, %v1399_v43  ;;  %v6719_v5 = vpop.f32.mrb[59].mxu1  ;;  %v1645_v6 = vpop.permute.xlu0 %1644  ;;  %v2418_v39 = vmax.f32 %v2237_v2, 0.0 }
 0x437   :  { %v1808_v13 = vsel %vm1750_vm11, %v1731_v16, %v1481_v48 }
 0x438   :  { %v2419_v15 = vmax.f32 %v2240_v60, 0.0 }
 0x439   :  { %v1563_v55 = vpop.permute.xlu1 %1562 }
 0x43a   :  { %v2471_v24 = vpack.c.bf16 %v2419_v15, %v2418_v39  ;;  %v1879_v4 = vsel %vm1821_vm10, %v1808_v13, %v1563_v55  ;;  %v1401_v31 = vpop.permute.xlu0 %1400 }
 0x43b   :  { %v2244_v29 = vpop.f32.mrb[60].mxu1  ;;  %v1950_v38 = vsel %vm1892_vm13, %v1879_v4, %v1645_v6 }
 0x43c   :  { %v2561_v62 = vrot.slane %v2471_v24, 5  ;;  %v2245_v9 = vadd.f32 %v9394_v3, %v2244_v29  ;;  %v6722_v32 = vpop.f32.mrb[61].mxu1  ;;  %6765 = vmatmul.mubr.msk.bf16.gmra.mrb[104].mxu1 %vm1998_vm12, %v1950_v38  ;;  %v2568_v52 = vrot.slane %v2471_v24, 2 }
 0x43d   :  { %v2247_v54 = vpop.f32.mrb[62].mxu1  ;;  %v532_v47 = vpop.permute.xlu1 %531  ;;  %6768 = vmatprep.mubr.msk.bf16.mxu1 %vm7101_vm8, %v11668_v58 }
 0x43e   :  { %v2248_v12 = vadd.f32 %v9394_v3, %v2247_v54  ;;  %v6723_v57 = vpop.f32.mrb[63].mxu1  ;;  %v1565_v17 = vpop.permute.xlu0 %1564  ;;  %v9617_v46 = vsel %vm392_vm7, %v2559_v22, %v2561_v62  ;;  %v2420_v0 = vmax.f32 %v2245_v9, 0.0  ;;  %v1734_v63 = vsel %vm1658_vm9, %v532_v47, %v1401_v31 }
 0x440   :  { %v2421_v41 = vmax.f32 %v2248_v12, 0.0 }
 0x441   :  { %v1483_v40 = vpop.permute.xlu1 %1482 }
 0x442   :  { %v9620_v14 = vpack.c.bf16 %v2421_v41, %v2420_v0  ;;  %v1810_v35 = vsel %vm1750_vm11, %v1734_v63, %v1483_v40  ;;  %v534_v34 = vpop.permute.xlu0 %533 }
 0x443   :  { %v2252_v49 = vpop.f32.mrb[64].mxu1  ;;  %v1881_v7 = vsel %vm1821_vm10, %v1810_v35, %v1565_v17 }
 0x444   :  { %v2569_v26 = vrot.slane %v9620_v14, 2  ;;  %v2253_v48 = vadd.f32 %v9394_v3, %v2252_v49  ;;  %v6726_v10 = vpop.f32.mrb[65].mxu1  ;;  %v2577_v4 = vrot.slane %v9620_v14, 7 }
 0x445   :  { %v2255_v2 = vpop.f32.mrb[66].mxu1  ;;  %v1647_v23 = vpop.permute.xlu1 %1646 }
 0x446   :  { %v2256_v43 = vadd.f32 %v9394_v3, %v2255_v2  ;;  %v1952_v60 = vsel %vm1892_vm13, %v1881_v7, %v1647_v23  ;;  %v6727_v16 = vpop.f32.mrb[67].mxu1  ;;  %v9631_v5 = vsel %vm382_vm4, %v2568_v52, %v2569_v26  ;;  %v1485_v6 = vpop.permute.xlu0 %1484  ;;  %v2422_v39 = vmax.f32 %v2253_v48, 0.0 }
 0x447   :  { %6769 = vmatmul.mubr.msk.bf16.gmra.mrb[108].mxu1 %vm1998_vm12, %v1952_v60 }
 0x448   :  { %v2423_v15 = vmax.f32 %v2256_v43, 0.0  ;;  %6772 = vmatprep.mubr.msk.bf16.mxu1 %vm7101_vm8, %v11668_v58 }
 0x449   :  { %v1403_v13 = vpop.permute.xlu1 %1402 }
 0x44a   :  { %v2473_v55 = vpack.c.bf16 %v2423_v15, %v2422_v39  ;;  %v1737_v24 = vsel %vm1658_vm9, %v534_v34, %v1403_v13  ;;  %v1649_v29 = vpop.permute.xlu0 %1648 }
 0x44b   :  { %v1812_v38 = vsel %vm1750_vm11, %v1737_v24, %v1485_v6 }
 0x44c   :  { %v2578_v31 = vrot.slane %v2473_v55, 7 }
 0x44d   :  { %v1567_v62 = vpop.permute.xlu1 %1566 }
 0x44e   :  { %v1883_v9 = vsel %vm1821_vm10, %v1812_v38, %v1567_v62  ;;  %v9641_v32 = vsel %vm374_vm6, %v2577_v4, %v2578_v31 }
 0x44f   :  { %v1954_v54 = vsel %vm1892_vm13, %v1883_v9, %v1649_v29 }
 0x450   :  { %6773 = vmatmul.mubr.msk.bf16.gmra.mrb[112].mxu1 %vm1998_vm12, %v1954_v54 }
 0x451   :  { %v1405_v47 = vpop.permute.xlu0 %1404  ;;  %6776 = vmatprep.mubr.msk.bf16.mxu1 %vm7101_vm8, %v11668_v58  ;;  %v536_v34 = vpop.permute.xlu1 %535 }
 0x452   :  { %v1740_v60 = vsel %vm1658_vm9, %v536_v34, %v1405_v47 }
 0x455   :  { %v509_v12 = vpop.permute.xlu0 %508 }
 0x456   :  { %v514_v57 = vsel %vm512_vm15, %v11697_v50, %v509_v12  ;;  %v2260_v17 = vpop.f32.mrb[68].mxu1 }
 0x457   :  { %v2261_v0 = vadd.f32 %v9394_v3, %v2260_v17  ;;  %v6730_v41 = vpop.f32.mrb[69].mxu1  ;;  %539 = vrot.lane.b32.xlu1 %v514_v57, %s7104_s26 }
 0x458   :  { %v2263_v63 = vpop.f32.mrb[70].mxu1 }
 0x459   :  { %v2264_v40 = vadd.f32 %v9394_v3, %v2263_v63  ;;  %v6731_v35 = vpop.f32.mrb[71].mxu1  ;;  %v2424_v49 = vmax.f32 %v2261_v0, 0.0  ;;  %v1487_v10 = vpop.permute.xlu1 %1486 }
 0x45a   :  { %v1814_v16 = vsel %vm1750_vm11, %v1740_v60, %v1487_v10 }
 0x45b   :  { %v2425_v52 = vmax.f32 %v2264_v40, 0.0 }
 0x45d   :  { %v2474_v48 = vpack.c.bf16 %v2425_v52, %v2424_v49  ;;  %v1569_v50 = vpop.permute.xlu1 %1568 }
 0x45e   :  { %v1885_v6 = vsel %vm1821_vm10, %v1814_v16, %v1569_v50 }
 0x45f   :  { %v2580_v2 = vrot.slane %v2474_v48, 7  ;;  %v2588_v12 = vrot.slane %v2474_v48, 4 }
 0x461   :  { %v744_v7 = vpop.permute.xlu0 %743  ;;  %v9653_v23 = vsel %vm374_vm6, %v2578_v31, %v2580_v2 }
 0x462   :  { %1408 = vrot.lane.b32.xlu0 %v744_v7, %s7096_s30 }
 0x465   :  { %v928_v43 = vpop.permute.xlu0 %927 }
 0x466   :  { %1490 = vrot.lane.b32.xlu1 %v928_v43, %s7097_s13 }
 0x468   :  { %v1651_v39 = vpop.permute.xlu1 %1650 }
 0x469   :  { %v1956_v15 = vsel %vm1892_vm13, %v1885_v6, %v1651_v39 }
 0x46a   :  { %v2268_v13 = vpop.f32.mrb[72].mxu1  ;;  %6777 = vmatmul.mubr.msk.bf16.gmra.mrb[116].mxu1 %vm1998_vm12, %v1956_v15 }
 0x46b   :  { %v2269_v55 = vadd.f32 %v9394_v3, %v2268_v13  ;;  %v6734_v24 = vpop.f32.mrb[73].mxu1  ;;  %6780 = vmatprep.mubr.msk.bf16.mxu1 %vm7101_vm8, %v11668_v58 }
 0x46c   :  { %v2271_v4 = vpop.f32.mrb[74].mxu1 }
 0x46d   :  { %v2272_v31 = vadd.f32 %v9394_v3, %v2271_v4  ;;  %v6735_v29 = vpop.f32.mrb[75].mxu1  ;;  %v1127_v38 = vpop.permute.xlu1 %1126  ;;  %v2426_v62 = vmax.f32 %v2269_v55, 0.0  ;;  %v2530_v4 = vrot.slane %v9521_v36, 1 }
 0x46e   :  { %1572 = vrot.lane.b32.xlu0 %v1127_v38, %s7098_s14 }
 0x46f   :  { %v2427_v9 = vmax.f32 %v2272_v31, 0.0 }
 0x471   :  { %v2475_v54 = vpack.c.bf16 %v2427_v9, %v2426_v62  ;;  %v1327_v47 = vpop.permute.xlu0 %1326  ;;  %v2529_v62 = vrot.slane %v9502_v21, 1 }
 0x472   :  { %1654 = vrot.lane.b32.xlu1 %v1327_v47, %s7102_s2 }
 0x473   :  { %v2589_v57 = vrot.slane %v2475_v54, 4  ;;  %v2531_v9 = vsel %vm354_vm3, %v2529_v62, %v2530_v4 }
 0x475   :  { %v9669_v17 = vsel %vm364_vm5, %v2588_v12, %v2589_v57 }
 0x476   :  { %v538_v0 = vpop.permute.xlu1 %537 }
 0x478   :  { %v1407_v41 = vpop.permute.xlu0 %1406 }
 0x479   :  { %v1743_v48 = vsel %vm1658_vm9, %v538_v0, %v1407_v41 }
 0x47a   :  { %v1489_v40 = vpop.permute.xlu1 %1488 }
 0x47c   :  { %v511_v63 = vpop.permute.xlu0 %510 }
 0x47d   :  { %v515_v35 = vsel %vm512_vm15, %v11701_v61, %v511_v63  ;;  %v1816_v61 = vsel %vm1750_vm11, %v1743_v48, %v1489_v40 }
 0x47e   :  { %v2276_v34 = vpop.f32.mrb[76].mxu1  ;;  %541 = vrot.lane.b32.xlu0 %v515_v35, %s7104_s26 }
 0x47f   :  { %v2277_v49 = vadd.f32 %v9394_v3, %v2276_v34  ;;  %v6738_v52 = vpop.f32.mrb[77].mxu1 }
 0x480   :  { %v2279_v10 = vpop.f32.mrb[78].mxu1  ;;  %v746_v2 = vpop.permute.xlu0 %745 }
 0x481   :  { %v2280_v7 = vadd.f32 %v9394_v3, %v2279_v10  ;;  %v1571_v50 = vpop.permute.xlu1 %1570  ;;  %v6739_v43 = vpop.f32.mrb[79].mxu1  ;;  %1410 = vrot.lane.b32.xlu1 %v746_v2, %s7096_s30  ;;  %v2428_v60 = vmax.f32 %v2277_v49, 0.0 }
 0x482   :  { %v1887_v39 = vsel %vm1821_vm10, %v1816_v61, %v1571_v50 }
 0x483   :  { %v2429_v16 = vmax.f32 %v2280_v7, 0.0 }
 0x485   :  { %v2476_v6 = vpack.c.bf16 %v2429_v16, %v2428_v60  ;;  %v1653_v15 = vpop.permute.xlu1 %1652  ;;  %v930_v13 = vpop.permute.xlu0 %929 }
 0x486   :  { %v1958_v55 = vsel %vm1892_vm13, %v1887_v39, %v1653_v15  ;;  %1492 = vrot.lane.b32.xlu0 %v930_v13, %s7097_s13 }
 0x487   :  { %v2591_v24 = vrot.slane %v2476_v6, 4  ;;  %6781 = vmatmul.mubr.msk.bf16.gmra.mrb[120].mxu1 %vm1998_vm12, %v1958_v55  ;;  %v2594_v35 = vrot.slane %v2476_v6, 1 }
 0x488   :  { %6784 = vmatprep.mubr.msk.bf16.mxu1 %vm7101_vm8, %v11668_v58 }
 0x489   :  { %v1129_v31 = vpop.permute.xlu1 %1128  ;;  %v9687_v29 = vsel %vm364_vm5, %v2589_v57, %v2591_v24 }
 0x48a   :  { %1574 = vrot.lane.b32.xlu1 %v1129_v31, %s7098_s14  ;;  %v1329_v38 = vpop.permute.xlu0 %1328 }
 0x48b   :  { %1656 = vrot.lane.b32.xlu0 %v1329_v38, %s7102_s2 }
 0x48e   :  { %2532 = vrot.lane.b32.xlu1 %v2531_v9, %s7104_s26 }
 0x490   :  { %v2284_v54 = vpop.f32.mrb[80].mxu1 }
 0x491   :  { %v2285_v47 = vadd.f32 %v9394_v3, %v2284_v54  ;;  %v6742_v12 = vpop.f32.mrb[81].mxu1 }
 0x492   :  { %2543 = vrot.lane.b32.xlu1 %v9544_v37, %s7105_s20  ;;  %v2287_v57 = vpop.f32.mrb[82].mxu1 }
 0x493   :  { %v2288_v0 = vadd.f32 %v9394_v3, %v2287_v57  ;;  %v6743_v21 = vpop.f32.mrb[83].mxu1  ;;  %v2430_v41 = vmax.f32 %v2285_v47, 0.0 }
 0x495   :  { %v2431_v63 = vmax.f32 %v2288_v0, 0.0 }
 0x496   :  { %2500 = vrot.lane.b32.xlu1 %v9436_v30, %s7104_s26 }
 0x497   :  { %v9702_v40 = vpack.c.bf16 %v2431_v63, %v2430_v41 }
 0x499   :  { %v2595_v34 = vrot.slane %v9702_v40, 1  ;;  %v2603_v15 = vrot.slane %v9702_v40, 6 }
 0x49a   :  { %2508 = vrot.lane.b32.xlu1 %v2504_v19, %s7105_s20 }
 0x49b   :  { %v2596_v37 = vsel %vm354_vm3, %v2594_v35, %v2595_v34 }
 0x49e   :  { %2551 = vrot.lane.b32.xlu1 %v9573_v42, %s7106_s25  ;;  %v2108_v49 = vpop.f32.mrb[36].mxu0 }
 0x49f   :  { %v2109_v30 = vadd.f32 %v9394_v3, %v2108_v49  ;;  %v6654_v52 = vpop.f32.mrb[37].mxu0 }
 0x4a0   :  { %v2111_v10 = vpop.f32.mrb[38].mxu0 }
 0x4a1   :  { %v2112_v2 = vadd.f32 %v9394_v3, %v2111_v10  ;;  %v6655_v48 = vpop.f32.mrb[39].mxu0  ;;  %v2386_v56 = vmax.f32 %v2109_v30, 0.0 }
 0x4a2   :  { %2519 = vrot.lane.b32.xlu1 %v9487_v25, %s7106_s25 }
 0x4a3   :  { %v2387_v19 = vmax.f32 %v2112_v2, 0.0 }
 0x4a5   :  { %v9717_v7 = vpack.c.bf16 %v2387_v19, %v2386_v56 }
 0x4a6   :  { %2565 = vrot.lane.b32.xlu1 %v9617_v46, %s7104_s26 }
 0x4aa   :  { %2573 = vrot.lane.b32.xlu1 %v2569_v26, %s7105_s20 }
 0x4ac   :  { %v2292_v42 = vpop.f32.mrb[84].mxu1 }
 0x4ad   :  { %v2293_v50 = vadd.f32 %v9394_v3, %v2292_v42  ;;  %v6746_v43 = vpop.f32.mrb[85].mxu1 }
 0x4ae   :  { %2597 = vrot.lane.b32.xlu1 %v2596_v37, %s7104_s26  ;;  %v2295_v60 = vpop.f32.mrb[86].mxu1 }
 0x4af   :  { %v2296_v25 = vadd.f32 %v9394_v3, %v2295_v60  ;;  %v6747_v16 = vpop.f32.mrb[87].mxu1  ;;  %v2432_v61 = vmax.f32 %v2293_v50, 0.0 }
 0x4b1   :  { %v2433_v6 = vmax.f32 %v2296_v25, 0.0 }
 0x4b3   :  { %v2478_v39 = vpack.c.bf16 %v2433_v6, %v2432_v61 }
 0x4b5   :  { %v2604_v46 = vrot.slane %v2478_v39, 6 }
 0x4b7   :  { %v2605_v13 = vsel %vm346_vm2, %v2603_v15, %v2604_v46 }
 0x4b8   :  { %2608 = vrot.lane.b32.xlu1 %v2605_v13, %s7105_s20 }
 0x4ba   :  { %v2116_v14 = vpop.f32.mrb[40].mxu0 }
 0x4bb   :  { %v2117_v26 = vadd.f32 %v9394_v3, %v2116_v14  ;;  %v6658_v55 = vpop.f32.mrb[41].mxu0 }
 0x4bc   :  { %v2119_v24 = vpop.f32.mrb[42].mxu0 }
 0x4bd   :  { %v2120_v31 = vadd.f32 %v9394_v3, %v2119_v24  ;;  %v6659_v38 = vpop.f32.mrb[43].mxu0  ;;  %v2388_v62 = vmax.f32 %v2117_v26, 0.0 }
 0x4bf   :  { %v2389_v9 = vmax.f32 %v2120_v31, 0.0 }
 0x4c1   :  { %v9732_v54 = vpack.c.bf16 %v2389_v9, %v2388_v62 }
 0x4c3   :  { %v2493_v47 = vrot.slane %v9732_v54, 5 }
 0x4c5   :  { %v2495_v12 = vsel %vm392_vm7, %v2493_v47, %v2494_v1 }
 0x4c6   :  { %2498 = vrot.lane.b32.xlu0 %v2495_v12, %s7104_s26 }
 0x4c9   :  { %v540_v49 = vpop.permute.xlu1 %539 }
 0x4ca   :  { %2506 = vrot.lane.b32.xlu0 %v9457_v51, %s7105_s20 }
 0x4ce   :  { %2517 = vrot.lane.b32.xlu0 %v9476_v20, %s7106_s25 }
 0x4cf   :  { %v2300_v57 = vpop.f32.mrb[88].mxu1 }
 0x4d0   :  { %v2301_v0 = vadd.f32 %v9394_v3, %v2300_v57  ;;  %v6750_v21 = vpop.f32.mrb[89].mxu1 }
 0x4d1   :  { %v2303_v41 = vpop.f32.mrb[90].mxu1 }
 0x4d2   :  { %v2304_v63 = vadd.f32 %v9394_v3, %v2303_v41  ;;  %v6751_v35 = vpop.f32.mrb[91].mxu1  ;;  %2534 = vrot.lane.b32.xlu0 %v2530_v4, %s7104_s26  ;;  %v2434_v33 = vmax.f32 %v2301_v0, 0.0  ;;  %v2558_v3 = vrot.slane %v9589_v59, 5 }
 0x4d4   :  { %v2435_v1 = vmax.f32 %v2304_v63, 0.0  ;;  %v1409_v30 = vpop.permute.xlu0 %1408  ;;  %v2560_v36 = vsel %vm392_vm7, %v2558_v3, %v2559_v22  ;;  %v9777_v22 = vld [vmem:[%s11325_s3] ss:$0 sm:$0xff] }
 0x4d6   :  { %v2479_v37 = vpack.c.bf16 %v2435_v1, %v2434_v33  ;;  %2545 = vrot.lane.b32.xlu0 %v9556_v27, %s7105_s20  ;;  %v1746_v27 = vsel %vm1658_vm9, %v540_v49, %v1409_v30 }
 0x4d8   :  { %v2606_v51 = vrot.slane %v2479_v37, 6  ;;  %v1491_v4 = vpop.permute.xlu1 %1490  ;;  %v2613_v25 = vrot.slane %v2479_v37, 3 }
 0x4d9   :  { %v1818_v44 = vsel %vm1750_vm11, %v1746_v27, %v1491_v4 }
 0x4da   :  { %2553 = vrot.lane.b32.xlu0 %v2549_v18, %s7106_s25  ;;  %v2607_v20 = vsel %vm346_vm2, %v2604_v46, %v2606_v51 }
 0x4de   :  { %2563 = vrot.lane.b32.xlu0 %v2560_v36, %s7104_s26 }
 0x4e0   :  { %v1573_v52 = vpop.permute.xlu0 %1572 }
 0x4e1   :  { %v1889_v18 = vsel %vm1821_vm10, %v1818_v44, %v1573_v52 }
 0x4e2   :  { %2571 = vrot.lane.b32.xlu0 %v9631_v5, %s7105_s20 }
 0x4e4   :  { %v1655_v10 = vpop.permute.xlu1 %1654 }
 0x4e5   :  { %v1960_v2 = vsel %vm1892_vm13, %v1889_v18, %v1655_v10 }
 0x4e6   :  { %6785 = vmatmul.mubr.msk.bf16.gmra.mrb[124].mxu1 %vm1998_vm12, %v1960_v2  ;;  %2582 = vrot.lane.b32.xlu0 %v9641_v32, %s7106_s25 }
 0x4e7   :  { %6788 = vmatprep.mubr.msk.bf16.mxu1 %vm7101_vm8, %v11668_v58 }
 0x4ea   :  { %2599 = vrot.lane.b32.xlu0 %v2595_v34, %s7104_s26 }
 0x4ee   :  { %2610 = vrot.lane.b32.xlu0 %v2607_v20, %s7105_s20 }
 0x4f0   :  { %v542_v56 = vpop.permute.xlu0 %541 }
 0x4f2   :  { %v2308_v28 = vpop.f32.mrb[92].mxu1 }
 0x4f3   :  { %v2309_v5 = vadd.f32 %v9777_v22, %v2308_v28  ;;  %v6754_v48 = vpop.f32.mrb[93].mxu1  ;;  %v1411_v40 = vpop.permute.xlu1 %1410 }
 0x4f4   :  { %v2311_v32 = vpop.f32.mrb[94].mxu1  ;;  %v1749_v16 = vsel %vm1658_vm9, %v542_v56, %v1411_v40  ;;  %vm2627_vm9 = vcmask 523264  }
 0x4f5   :  { %v2312_v19 = vadd.f32 %v9777_v22, %v2311_v32  ;;  %v6755_v42 = vpop.f32.mrb[95].mxu1  ;;  %v2436_v50 = vmax.f32 %v2309_v5, 0.0 }
 0x4f7   :  { %v2437_v43 = vmax.f32 %v2312_v19, 0.0 }
 0x4f8   :  { %v1493_v34 = vpop.permute.xlu0 %1492 }
 0x4f9   :  { %v2480_v60 = vpack.c.bf16 %v2437_v43, %v2436_v50  ;;  %v1820_v39 = vsel %vm1750_vm11, %v1749_v16, %v1493_v34  ;;  %vm2863_vm11 = vcmask 211968  }
 0x4fb   :  { %v2614_v61 = vrot.slane %v2480_v60, 3  ;;  %v2316_v6 = vpop.f32.mrb[96].mxu1 }
 0x4fc   :  { %v2317_v15 = vadd.f32 %v9777_v22, %v2316_v6  ;;  %v1575_v46 = vpop.permute.xlu1 %1574  ;;  %v6758_v13 = vpop.f32.mrb[97].mxu1 }
 0x4fd   :  { %v1891_v14 = vsel %vm1821_vm10, %v1820_v39, %v1575_v46  ;;  %v2319_v26 = vpop.f32.mrb[98].mxu1  ;;  %v1657_v55 = vpop.permute.xlu0 %1656  ;;  %2618 = vrot.lane.b32.xlu0 %v2614_v61, %s7106_s25  ;;  %v2615_v24 = vsel %vm188_vm0, %v2613_v25, %v2614_v61  ;;  %vm2632_vm10 = vcmask 785408  }
 0x4fe   :  { %v2320_v31 = vadd.f32 %v9777_v22, %v2319_v26  ;;  %v1962_v38 = vsel %vm1892_vm13, %v1891_v14, %v1657_v55  ;;  %v6759_v62 = vpop.f32.mrb[99].mxu1  ;;  %2616 = vrot.lane.b32.xlu1 %v2615_v24, %s7106_s25  ;;  %v2438_v9 = vmax.f32 %v2317_v15, 0.0 }
 0x4ff   :  { %6789 = vmatmul.mubr.msk.bf16.gmra.mrb[128].mxu1 %vm1998_vm12, %v1962_v38 }
 0x500   :  { %v2439_v47 = vmax.f32 %v2320_v31, 0.0  ;;  %v2533_v12 = vpop.permute.xlu1 %2532 }
 0x502   :  { %v9791_v57 = vpack.c.bf16 %v2439_v47, %v2438_v9  ;;  %2584 = vrot.lane.b32.xlu1 %v9653_v23, %s7106_s25  ;;  %v2640_v23 = vsel %vm2620_vm1, %v9499_v8, %v2533_v12 }
 0x504   :  { %v2544_v0 = vpop.permute.xlu1 %2543 }
 0x505   :  { %v2645_v36 = vsel %vm2627_vm9, %v2640_v23, %v2544_v0 }
 0x506   :  { %v2324_v21 = vpop.f32.mrb[100].mxu1 }
 0x507   :  { %v2325_v41 = vadd.f32 %v9777_v22, %v2324_v21  ;;  %v6762_v63 = vpop.f32.mrb[101].mxu1 }
 0x508   :  { %v9796_v35 = vpop.permute.xlu1 %2500  ;;  %v2327_v33 = vpop.f32.mrb[102].mxu1 }
 0x509   :  { %v2328_v1 = vadd.f32 %v9777_v22, %v2327_v33  ;;  %v6763_v37 = vpop.f32.mrb[103].mxu1  ;;  %v2440_v51 = vmax.f32 %v2325_v41, 0.0 }
 0x50b   :  { %v2441_v20 = vmax.f32 %v2328_v1, 0.0 }
 0x50c   :  { %v9799_v3 = vpop.permute.xlu1 %2508 }
 0x50d   :  { %v9801_v49 = vpack.c.bf16 %v2441_v20, %v2440_v51 }
 0x50f   :  { %v2332_v30 = vpop.f32.mrb[104].mxu1  ;;  %v2686_v56 = vrot.slane %v9801_v49, 5 }
 0x510   :  { %v2333_v4 = vadd.f32 %v9777_v22, %v2332_v30  ;;  %v2552_v52 = vpop.permute.xlu1 %2551  ;;  %v6766_v27 = vpop.f32.mrb[105].mxu1 }
 0x511   :  { %v2335_v44 = vpop.f32.mrb[106].mxu1  ;;  %v2649_v18 = vsel %vm2632_vm10, %v2645_v36, %v2552_v52 }
 0x512   :  { %v2336_v10 = vadd.f32 %v9777_v22, %v2335_v44  ;;  %2889 = vmatprep.subr.bf16.mxu0 %v2649_v18  ;;  %v6767_v2 = vpop.f32.mrb[107].mxu1  ;;  %v2442_v28 = vmax.f32 %v2333_v4, 0.0 }
 0x513   :  { %v2626_v2 = vsel %vm2620_vm1, %v9732_v54, %v9796_v35  ;;  %v9844_v54 = vld [vmem:[%s11326_s4] sm:$0xff]   ;;  %v9852_v35 = vld [vmem:[%s11326_s4 + $0x8] sm:$0xff]  }
 0x514   :  { %v2443_v5 = vmax.f32 %v2336_v10, 0.0  ;;  %v2520_v18 = vpop.permute.xlu1 %2519 }
 0x516   :  { %v2483_v48 = vpack.c.bf16 %v2443_v5, %v2442_v28  ;;  %v2631_v28 = vsel %vm2627_vm9, %v2626_v2, %v9799_v3 }
 0x517   :  { %v2637_v5 = vsel %vm2632_vm10, %v2631_v28, %v2520_v18 }
 0x518   :  { %v2687_v8 = vrot.slane %v2483_v48, 5 }
 0x51a   :  { %v2340_v32 = vpop.f32.mrb[108].mxu1  ;;  %v2688_v19 = vsel %vm392_vm7, %v2686_v56, %v2687_v8 }
 0x51b   :  { %v2341_v42 = vadd.f32 %v9777_v22, %v2340_v32  ;;  %v6770_v50 = vpop.f32.mrb[109].mxu1  ;;  %2691 = vrot.lane.b32.xlu1 %v2688_v19, %s7104_s26  ;;  %v2876_v19 = vsel %vm188_vm0, %v2637_v5, 0 }
 0x51c   :  { %v2343_v43 = vpop.f32.mrb[110].mxu1 }
 0x51d   :  { %v2344_v40 = vadd.f32 %v9777_v22, %v2343_v43  ;;  %v6771_v34 = vpop.f32.mrb[111].mxu1  ;;  %v2444_v60 = vmax.f32 %v2341_v42, 0.0 }
 0x51f   :  { %v2445_v25 = vmax.f32 %v2344_v40, 0.0  ;;  %v2566_v40 = vpop.permute.xlu1 %2565 }
 0x521   :  { %v2484_v16 = vpack.c.bf16 %v2445_v25, %v2444_v60 }
 0x523   :  { %v2689_v61 = vrot.slane %v2484_v16, 5  ;;  %v2348_v6 = vpop.f32.mrb[112].mxu1  ;;  %v2696_v38 = vrot.slane %v2484_v16, 2  ;;  %v9862_v16 = vld [vmem:[%s11326_s4 + $0x10] sm:$0xff]  }
 0x524   :  { %v2349_v39 = vadd.f32 %v9777_v22, %v2348_v6  ;;  %v6774_v15 = vpop.f32.mrb[113].mxu1 }
 0x525   :  { %v2351_v46 = vpop.f32.mrb[114].mxu1  ;;  %v2690_v13 = vsel %vm392_vm7, %v2687_v8, %v2689_v61 }
 0x526   :  { %v2352_v14 = vadd.f32 %v9777_v22, %v2351_v46  ;;  %v6775_v26 = vpop.f32.mrb[115].mxu1  ;;  %2693 = vrot.lane.b32.xlu0 %v2690_v13, %s7104_s26  ;;  %v2446_v55 = vmax.f32 %v2349_v39, 0.0  ;;  %v2574_v46 = vpop.permute.xlu1 %2573 }
 0x528   :  { %v2447_v24 = vmax.f32 %v2352_v14, 0.0 }
 0x52a   :  { %v2485_v31 = vpack.c.bf16 %v2447_v24, %v2446_v55  ;;  %v9872_v55 = vld [vmem:[%s11326_s4 + $0x18] ss:$0 sps:$4 sm:$0x11]   ;;  %v2598_v24 = vpop.permute.xlu1 %2597 }
 0x52c   :  { %v2697_v62 = vrot.slane %v2485_v31, 2  ;;  %v2705_v27 = vrot.slane %v2485_v31, 7 }
 0x52e   :  { %v2698_v9 = vsel %vm382_vm4, %v2696_v38, %v2697_v62  ;;  %v2609_v31 = vpop.permute.xlu1 %2608 }
 0x52f   :  { %2699 = vrot.lane.b32.xlu0 %v2698_v9, %s7105_s20 }
 0x538   :  { %v2499_v47 = vpop.permute.xlu0 %2498 }
 0x539   :  { %v2623_v63 = vsel %vm2620_vm1, %v9717_v7, %v2499_v47 }
 0x53c   :  { %v2507_v12 = vpop.permute.xlu0 %2506 }
 0x53d   :  { %v2356_v0 = vpop.f32.mrb[116].mxu1  ;;  %v2629_v1 = vsel %vm2627_vm9, %v2623_v63, %v2507_v12 }
 0x53e   :  { %v2357_v21 = vadd.f32 %v9777_v22, %v2356_v0  ;;  %v6778_v41 = vpop.f32.mrb[117].mxu1 }
 0x53f   :  { %v2359_v33 = vpop.f32.mrb[118].mxu1 }
 0x540   :  { %v2360_v37 = vadd.f32 %v9777_v22, %v2359_v33  ;;  %v6779_v51 = vpop.f32.mrb[119].mxu1  ;;  %v2518_v20 = vpop.permute.xlu0 %2517  ;;  %v2448_v30 = vmax.f32 %v2357_v21, 0.0 }
 0x541   :  { %v2634_v23 = vsel %vm2632_vm10, %v2629_v1, %v2518_v20 }
 0x542   :  { %v2449_v36 = vmax.f32 %v2360_v37, 0.0  ;;  %2890 = vmatpush1.bf16.msra.mxu0 %v2634_v23 }
 0x544   :  { %v2486_v4 = vpack.c.bf16 %v2449_v36, %v2448_v30  ;;  %v2535_v52 = vpop.permute.xlu0 %2534 }
 0x545   :  { %v2643_v48 = vsel %vm2620_vm1, %v9518_v45, %v2535_v52 }
 0x546   :  { %v2706_v44 = vrot.slane %v2486_v4, 7 }
 0x548   :  { %v2546_v10 = vpop.permute.xlu0 %2545  ;;  %v2707_v7 = vsel %vm374_vm6, %v2705_v27, %v2706_v44 }
 0x549   :  { %2710 = vrot.lane.b32.xlu1 %v2707_v7, %s7106_s25  ;;  %v2647_v56 = vsel %vm2627_vm9, %v2643_v48, %v2546_v10 }
 0x54c   :  { %v2554_v8 = vpop.permute.xlu0 %2553 }
 0x54d   :  { %v2652_v32 = vsel %vm2632_vm10, %v2647_v56, %v2554_v8  ;;  %2701 = vrot.lane.b32.xlu1 %v2697_v62, %s7105_s20  ;;  %v2670_v62 = vsel %vm2620_vm1, %v9669_v17, %v2598_v24  ;;  %v2658_v17 = vsel %vm2620_vm1, %v9589_v59, %v2566_v40 }
 0x54e   :  { %6105 = vmatprep.subr.msk.bf16.mxu0 %vm188_vm0, %v2652_v32  ;;  %v2675_v9 = vsel %vm2627_vm9, %v2670_v62, %v2609_v31 }
 0x54f   :  { %2892 = vmatpush1.bf16.msra.mxu0 %v2876_v19 }
 0x550   :  { %v2564_v45 = vpop.permute.xlu0 %2563 }
 0x551   :  { %v2655_v47 = vsel %vm2620_vm1, %v9578_v11, %v2564_v45  ;;  %v2662_v11 = vsel %vm2627_vm9, %v2658_v17, %v2574_v46 }
 0x552   :  { %6106 = vmatmul.mubr.msk.bf16.vlgmr.msra.gmra.mrb[44].mxu0 %vm2863_vm11, %v9844_v54 }
 0x553   :  { %2931 = vmatprep.mubr.bf16.mxu0 %v11785_v53 }
 0x554   :  { %v2572_v3 = vpop.permute.xlu0 %2571 }
 0x555   :  { %v2660_v21 = vsel %vm2627_vm9, %v2655_v47, %v2572_v3 }
 0x558   :  { %v2583_v39 = vpop.permute.xlu0 %2582 }
 0x559   :  { %v2664_v33 = vsel %vm2632_vm10, %v2660_v21, %v2583_v39 }
 0x55a   :  { %v2364_v42 = vpop.f32.mrb[120].mxu1  ;;  %6107 = vmatmul.mubr.msk.bf16.gmra.mrb[48].mxu0 %vm2863_vm11, %v9852_v35 }
 0x55b   :  { %v2365_v50 = vadd.f32 %v9777_v22, %v2364_v42  ;;  %v6782_v43 = vpop.f32.mrb[121].mxu1  ;;  %2941 = vmatprep.mubr.bf16.mxu0 %v11785_v53 }
 0x55c   :  { %v2367_v34 = vpop.f32.mrb[122].mxu1  ;;  %v2600_v26 = vpop.permute.xlu0 %2599 }
 0x55d   :  { %v2368_v60 = vadd.f32 %v9777_v22, %v2367_v34  ;;  %v6783_v25 = vpop.f32.mrb[123].mxu1  ;;  %v2450_v61 = vmax.f32 %v2365_v50, 0.0  ;;  %v2673_v41 = vsel %vm2620_vm1, %v9687_v29, %v2600_v26 }
 0x55f   :  { %v2451_v6 = vmax.f32 %v2368_v60, 0.0 }
 0x560   :  { %v2611_v38 = vpop.permute.xlu0 %2610 }
 0x561   :  { %v2487_v15 = vpack.c.bf16 %v2451_v6, %v2450_v61  ;;  %v2677_v1 = vsel %vm2627_vm9, %v2673_v41, %v2611_v38 }
 0x562   :  { %6108 = vmatmul.mubr.msk.bf16.gmra.mrb[52].mxu0 %vm2863_vm11, %v9862_v16 }
 0x563   :  { %v2708_v13 = vrot.slane %v2487_v15, 7  ;;  %2951 = vmatprep.mubr.bf16.mxu0 %v11785_v53  ;;  %v2716_v28 = vrot.slane %v2487_v15, 4 }
 0x565   :  { %v2709_v14 = vsel %vm374_vm6, %v2706_v44, %v2708_v13 }
 0x566   :  { %2712 = vrot.lane.b32.xlu0 %v2709_v14, %s7106_s25 }
 0x56a   :  { %6109 = vmatmul.mubr.msk.bf16.gmra.mrb[56].mxu0 %vm2863_vm11, %v9872_v55 }
 0x56b   :  { %2992 = vmatprep.mubr.bf16.mxu0 %v11785_v53 }
 0x56f   :  { %v2619_v12 = vpop.permute.xlu0 %2618 }
 0x570   :  { %v2617_v0 = vpop.permute.xlu1 %2616  ;;  %v2682_v37 = vsel %vm2632_vm10, %v2677_v1, %v2619_v12 }
 0x571   :  { %v2679_v63 = vsel %vm2632_vm10, %v2675_v9, %v2617_v0 }
 0x572   :  { %2960 = vmatprep.subr.bf16.mxu0 %v2679_v63 }
 0x573   :  { %2961 = vmatpush1.bf16.msra.mxu0 %v2664_v33 }
 0x574   :  { %v2585_v51 = vpop.permute.xlu1 %2584  ;;  %6110 = vmatprep.subr.msk.bf16.mxu0 %vm188_vm0, %v2682_v37 }
 0x575   :  { %v2667_v29 = vsel %vm2632_vm10, %v2662_v11, %v2585_v51 }
 0x576   :  { %v2880_v20 = vsel %vm188_vm0, %v2667_v29, 0 }
 0x577   :  { %2963 = vmatpush1.bf16.msra.mxu0 %v2880_v20 }
 0x57a   :  { %6111 = vmatmul.mubr.msk.bf16.vlgmr.msra.gmra.mrb[60].mxu0 %vm2863_vm11, %v9844_v54 }
 0x57b   :  { %3002 = vmatprep.mubr.bf16.mxu0 %v11785_v53 }
 0x582   :  { %6112 = vmatmul.mubr.msk.bf16.gmra.mrb[64].mxu0 %vm2863_vm11, %v9852_v35 }
 0x583   :  { %3012 = vmatprep.mubr.bf16.mxu0 %v11785_v53 }
 0x58a   :  { %6113 = vmatmul.mubr.msk.bf16.gmra.mrb[68].mxu0 %vm2863_vm11, %v9862_v16 }
 0x58b   :  { %3022 = vmatprep.mubr.bf16.mxu0 %v11785_v53 }
 0x58d   :  { %v2692_v44 = vpop.permute.xlu1 %2691 }
 0x58e   :  { %v2724_v56 = vsel %vm2620_vm1, %v9791_v57, %v2692_v44 }
 0x592   :  { %6114 = vmatmul.mubr.msk.bf16.gmra.mrb[72].mxu0 %vm2863_vm11, %v9872_v55 }
 0x593   :  { %3063 = vmatprep.mubr.bf16.mxu0 %v11785_v53 }
 0x598   :  { %v2694_v27 = vpop.permute.xlu0 %2693 }
 0x599   :  { %v2727_v60 = vsel %vm2620_vm1, %v9801_v49, %v2694_v27 }
 0x5a1   :  { %v2700_v2 = vpop.permute.xlu0 %2699 }
 0x5a2   :  { %v2729_v8 = vsel %vm2627_vm9, %v2724_v56, %v2700_v2 }
 0x5b9   :  { %v2372_v59 = vpop.f32.mrb[124].mxu1 }
 0x5ba   :  { %v2373_v23 = vadd.f32 %v9777_v22, %v2372_v59  ;;  %v6786_v30 = vpop.f32.mrb[125].mxu1 }
 0x5bb   :  { %v2375_v36 = vpop.f32.mrb[126].mxu1  ;;  %v2711_v48 = vpop.permute.xlu1 %2710 }
 0x5bc   :  { %v2376_v4 = vadd.f32 %v9777_v22, %v2375_v36  ;;  %v6787_v52 = vpop.f32.mrb[127].mxu1  ;;  %v2452_v18 = vmax.f32 %v2373_v23, 0.0  ;;  %v2733_v19 = vsel %vm2632_vm10, %v2729_v8, %v2711_v48 }
 0x5be   :  { %v2453_v10 = vmax.f32 %v2376_v4, 0.0 }
 0x5bf   :  { %v2702_v43 = vpop.permute.xlu1 %2701 }
 0x5c0   :  { %v2488_v7 = vpack.c.bf16 %v2453_v10, %v2452_v18  ;;  %v2731_v25 = vsel %vm2627_vm9, %v2727_v60, %v2702_v43 }
 0x5c2   :  { %v2717_v5 = vrot.slane %v2488_v7, 4 }
 0x5c4   :  { %v2718_v32 = vsel %vm364_vm5, %v2716_v28, %v2717_v5 }
 0x5c5   :  { %3031 = vmatprep.subr.bf16.mxu0 %v2718_v32 }
 0x5c6   :  { %3032 = vmatpush1.bf16.msra.mxu0 %v2733_v19 }
 0x5d2   :  { %v2380_v45 = vpop.f32.mrb[128].mxu1 }
 0x5d3   :  { %v2381_v3 = vadd.f32 %v9777_v22, %v2380_v45  ;;  %v6790_v42 = vpop.f32.mrb[129].mxu1 }
 0x5d4   :  { %v2383_v50 = vpop.f32.mrb[130].mxu1 }
 0x5d5   :  { %v2454_v40 = vmax.f32 %v2381_v3, 0.0  ;;  %v6791_v34 = vpop.f32.mrb[131].mxu1 }
 0x5d7   :  { %v2489_v57 = vpack.c.bf16 %v2454_v40, %v2454_v40 }
 0x5d8   :  { %v2713_v61 = vpop.permute.xlu0 %2712 }
 0x5d9   :  { %v2719_v6 = vrot.slane %v2489_v57, 4  ;;  %v2736_v39 = vsel %vm2632_vm10, %v2731_v25, %v2713_v61 }
 0x5da   :  { %v2884_v46 = vsel %vm188_vm0, %v2736_v39, 0 }
 0x5db   :  { %v2720_v15 = vsel %vm364_vm5, %v2717_v5, %v2719_v6 }
 0x5dc   :  { %6115 = vmatprep.subr.msk.bf16.mxu0 %vm188_vm0, %v2720_v15 }
 0x5dd   :  { %3034 = vmatpush1.bf16.msra.mxu0 %v2884_v46 }
 0x5e0   :  { %6116 = vmatmul.mubr.msk.bf16.vlgmr.msra.gmra.mrb[76].mxu0 %vm2863_vm11, %v9844_v54 }
 0x5e1   :  { %3073 = vmatprep.mubr.bf16.mxu0 %v11785_v53 }
 0x5e8   :  { %6117 = vmatmul.mubr.msk.bf16.gmra.mrb[80].mxu0 %vm2863_vm11, %v9852_v35 }
 0x5e9   :  { %3083 = vmatprep.mubr.bf16.mxu0 %v11785_v53 }
 0x5f0   :  { %6118 = vmatmul.mubr.msk.bf16.gmra.mrb[84].mxu0 %vm2863_vm11, %v9862_v16 }
 0x5f1   :  { %3093 = vmatprep.mubr.bf16.mxu0 %v11785_v53 }
 0x5f8   :  { %6119 = vmatmul.mubr.msk.bf16.gmra.mrb[88].mxu0 %vm2863_vm11, %v9872_v55 }
 0x625   :  { %v2923_v22 = vpop.f32.mrb[44].mxu0 }
 0x626   :  { %v2925_v49 = vpop.f32.mrb[45].mxu0 }
 0x627   :  { %v2927_v13 = vpop.f32.mrb[46].mxu0 }
 0x628   :  { %v9933_v14 = vpack.c.bf16 %v2927_v13, %v2923_v22  ;;  %v2929_v54 = vpop.f32.mrb[47].mxu0 }
 0x629   :  { %v9935_v26 = vpack.c.bf16 %v2929_v54, %v2925_v49 }
 0x62a   :  { %3209 = vrot.lane.b32.xlu1 %v9933_v14, %s7105_s20 }
 0x62b   :  { %3211 = vrot.lane.b32.xlu0 %v9935_v26, %s7105_s20  ;;  %v9948_v62 = vrot.slane %v9935_v26, 6 }
 0x62d   :  { %v2933_v35 = vpop.f32.mrb[48].mxu0 }
 0x62e   :  { %v2935_v16 = vpop.f32.mrb[49].mxu0 }
 0x62f   :  { %v2937_v24 = vpop.f32.mrb[50].mxu0 }
 0x630   :  { %v9941_v31 = vpack.c.bf16 %v2937_v24, %v2933_v35  ;;  %v2939_v55 = vpop.f32.mrb[51].mxu0 }
 0x631   :  { %v9943_v38 = vpack.c.bf16 %v2939_v55, %v2935_v16 }
 0x632   :  { %3213 = vrot.lane.b32.xlu1 %v9941_v31, %s7105_s20  ;;  %v3371_v41 = vrot.slane %v9941_v31, 7  ;;  %v11460_v61 = vrot.slane %v9941_v31, 5  ;;  %v11457_v15 = vrot.slane %v9941_v31, 2 }
 0x633   :  { %3215 = vrot.lane.b32.xlu0 %v9943_v38, %s7105_s20  ;;  %v3225_v9 = vrot.slane %v9943_v38, 6  ;;  %v10032_v35 = vrot.slane %v9943_v38, 5 }
 0x635   :  { %v2943_v47 = vpop.f32.mrb[52].mxu0  ;;  %v3226_v21 = vsel %vm346_vm2, %v9948_v62, %v3225_v9 }
 0x636   :  { %v2945_v12 = vpop.f32.mrb[53].mxu0  ;;  %3229 = vrot.lane.b32.xlu1 %v9948_v62, %s7105_s20 }
 0x637   :  { %v2947_v0 = vpop.f32.mrb[54].mxu0 }
 0x638   :  { %v9958_v63 = vpack.c.bf16 %v2947_v0, %v2943_v47  ;;  %v2949_v33 = vpop.f32.mrb[55].mxu0  ;;  %v3220_v0 = vrot.slane %v9943_v38, 3 }
 0x639   :  { %v9960_v1 = vpack.c.bf16 %v2949_v33, %v2945_v12  ;;  %v6895_v33 = vld [vmem:[%s11327_s5] sm:$0xff]  }
 0x63a   :  { %v9963_v17 = vrot.slane %v9958_v63, 7  ;;  %3233 = vrot.lane.b32.xlu1 %v3226_v21, %s7105_s20  ;;  %v3481_v51 = vrot.slane %v9958_v63, 4  ;;  %v3377_v39 = vrot.slane %v9958_v63, 2  ;;  %v3128_v21 = vrot.slane %v9933_v14, 3  ;;  %v6894_v63 = vld [vmem:[%s11327_s5 + $0x40] sm:$0xff]  }
 0x63b   :  { %6339 = vmatprep.subr.bf16.mxu0 %v6894_v63 }
 0x63c   :  { %v9968_v37 = vsel %vm374_vm6, %v3371_v41, %v9963_v17  ;;  %v3378_v16 = vsel %vm382_vm4, %v11457_v15, %v3377_v39  ;;  %v6893_v41 = vld [vmem:[%s11327_s5 + $0x180] sm:$0xff]   ;;  %6340 = vmatpush3.bf16.msra.mxu0 %v6895_v33 }
 0x63d   :  { %v2953_v11 = vpop.f32.mrb[56].mxu0  ;;  %6792 = vmatprep.subr.bf16.mxu1 %v6893_v41 }
 0x63e   :  { %v3120_v29 = vpack.c.bf16 %v2953_v11, %v2953_v11  ;;  %v9971_v20 = vpop.f32.mrb[57].mxu0  ;;  %v6896_v11 = vld [vmem:[%s11327_s5 + $0x48] sm:$0xff]   ;;  %6793 = vmatpush3.bf16.msra.mxu1 %v6893_v41 }
 0x63f   :  { %v2957_v59 = vpop.f32.mrb[58].mxu0  ;;  %6341 = vmatprep.subr.bf16.mxu0 %v6896_v11  ;;  %v6904_v41 = vld [vmem:[%s11327_s5 + $0x68] sm:$0xff]  }
 0x640   :  { %v3482_v23 = vrot.slane %v3120_v29, 4  ;;  %v3487_v30 = vrot.slane %v3120_v29, 7  ;;  %v2958_v36 = vpop.f32.mrb[59].mxu0  ;;  %v6897_v29 = vld [vmem:[%s11327_s5 + $0x8] sm:$0xff]   ;;  %v6898_v59 = vld [vmem:[%s11327_s5 + $0x50] sm:$0xff]  }
 0x641   :  { %6342 = vmatpush3.bf16.msra.mxu0 %v6897_v29 }
 0x642   :  { %v9975_v4 = vsel %vm374_vm6, %v9963_v17, %v3487_v30  ;;  %v9978_v52 = vsel %vm364_vm5, %v3481_v51, %v3482_v23  ;;  %v6899_v30 = vld [vmem:[%s11327_s5 + $0x10] sm:$0xff]   ;;  %6343 = vmatprep.subr.bf16.mxu0 %v6898_v59  ;;  %v6905_v59 = vld [vmem:[%s11327_s5 + $0x28] sm:$0xff]  }
 0x643   :  { %11795 = vst [vmem:[#allocation17_spill] sm:$0xff] %v9978_v52 }
 0x645   :  { %6344 = vmatpush3.bf16.msra.mxu0 %v6899_v30 }
 0x64d   :  { %v2994_v27 = vpop.f32.mrb[60].mxu0 }
 0x64e   :  { %v2996_v44 = vpop.f32.mrb[61].mxu0 }
 0x64f   :  { %v2998_v18 = vpop.f32.mrb[62].mxu0 }
 0x650   :  { %v9980_v10 = vpack.c.bf16 %v2998_v18, %v2994_v27  ;;  %v3000_v7 = vpop.f32.mrb[63].mxu0  ;;  %v3206_v18 = vrot.slane %v9935_v26, 5 }
 0x651   :  { %v9982_v2 = vpack.c.bf16 %v3000_v7, %v2996_v44 }
 0x652   :  { %v9985_v28 = vrot.slane %v9980_v10, 6  ;;  %v9992_v19 = vrot.slane %v9980_v10, 4  ;;  %v11458_v51 = vrot.slane %v9980_v10, 1  ;;  %v3222_v30 = vrot.slane %v9980_v10, 3 }
 0x653   :  { %v10001_v50 = vrot.slane %v9982_v2, 4  ;;  %v10028_v13 = vrot.slane %v9982_v2, 2 }
 0x654   :  { %3231 = vrot.lane.b32.xlu0 %v9985_v28, %s7105_s20 }
 0x655   :  { %v3004_v5 = vpop.f32.mrb[64].mxu0 }
 0x656   :  { %v3006_v48 = vpop.f32.mrb[65].mxu0 }
 0x657   :  { %v3008_v56 = vpop.f32.mrb[66].mxu0 }
 0x658   :  { %v9989_v8 = vpack.c.bf16 %v3008_v56, %v3004_v5  ;;  %v3010_v32 = vpop.f32.mrb[67].mxu0  ;;  %v3208_v5 = vsel %vm392_vm7, %v3206_v18, %v10032_v35  ;;  %v11461_v18 = vrot.slane %v9935_v26, 3 }
 0x659   :  { %v9994_v45 = vpack.c.bf16 %v3010_v32, %v3006_v48 }
 0x65a   :  { %v3245_v3 = vrot.slane %v9989_v8, 4  ;;  %v9998_v42 = vrot.slane %v9989_v8, 6 }
 0x65b   :  { %v10004_v43 = vrot.slane %v9994_v45, 4  ;;  %v3260_v54 = vrot.slane %v9994_v45, 2  ;;  %v10081_v23 = vrot.slane %v9994_v45, 1  ;;  %v10087_v36 = vrot.slane %v9994_v45, 6 }
 0x65c   :  { %v3246_v40 = vsel %vm364_vm5, %v9992_v19, %v3245_v3  ;;  %v3228_v34 = vsel %vm346_vm2, %v9985_v28, %v9998_v42 }
 0x65d   :  { %3249 = vrot.lane.b32.xlu1 %v3246_v40, %s7105_s20  ;;  %3235 = vrot.lane.b32.xlu0 %v3228_v34, %s7105_s20  ;;  %v3014_v60 = vpop.f32.mrb[68].mxu0  ;;  %v3248_v57 = vsel %vm364_vm5, %v10001_v50, %v10004_v43  ;;  %v3261_v55 = vsel %vm382_vm4, %v10028_v13, %v3260_v54 }
 0x65e   :  { %v3016_v25 = vpop.f32.mrb[69].mxu0 }
 0x65f   :  { %v3018_v6 = vpop.f32.mrb[70].mxu0 }
 0x660   :  { %v10019_v46 = vpack.c.bf16 %v3018_v6, %v3014_v60  ;;  %v3020_v22 = vpop.f32.mrb[71].mxu0  ;;  %v6900_v60 = vld [vmem:[%s11327_s5 + $0x58] sm:$0xff]  }
 0x661   :  { %3316 = vrot.lane.b32.xlu1 %v11460_v61, %s7105_s20  ;;  %3251 = vrot.lane.b32.xlu0 %v3248_v57, %s7105_s20  ;;  %v10025_v49 = vpack.c.bf16 %v3020_v22, %v3016_v25  ;;  %v6901_v25 = vld [vmem:[%s11327_s5 + $0x18] sm:$0xff]  }
 0x662   :  { %6345 = vmatprep.subr.bf16.mxu0 %v6900_v60  ;;  %v6906_v60 = vld [vmem:[%s11327_s5 + $0x70] sm:$0xff]  }
 0x663   :  { %v10090_v27 = vrot.slane %v10025_v49, 6  ;;  %6346 = vmatpush3.bf16.msra.mxu0 %v6901_v25 }
 0x665   :  { %3381 = vrot.lane.b32.xlu1 %v3378_v16, %s7105_s20  ;;  %3318 = vrot.lane.b32.xlu0 %v10032_v35, %s7105_s20  ;;  %v10040_v24 = vpop.f32.mrb[72].mxu0  ;;  %11796 = vst [vmem:[#allocation37_spill] sm:$0xff] %v10090_v27  ;;  %v3414_v44 = vsel %vm346_vm2, %v10087_v36, %v10090_v27  ;;  %v6903_v16 = vld [vmem:[%s11327_s5 + $0x20] sm:$0xff]  }
 0x666   :  { %v10044_v9 = vpop.f32.mrb[73].mxu0 }
 0x667   :  { %v3028_v47 = vpop.f32.mrb[74].mxu0 }
 0x668   :  { %v3029_v12 = vpop.f32.mrb[75].mxu0 }
 0x669   :  { %3264 = vrot.lane.b32.xlu1 %v3261_v55, %s7105_s20 }
 0x66d   :  { %3321 = vrot.lane.b32.xlu1 %v3220_v0, %s7105_s20 }
 0x671   :  { %3385 = vrot.lane.b32.xlu1 %v3377_v39, %s7105_s20  ;;  %v6902_v39 = vld [vmem:[%s11327_s5 + $0x60] sm:$0xff]  }
 0x672   :  { %6347 = vmatprep.subr.bf16.mxu0 %v6902_v39 }
 0x673   :  { %6348 = vmatpush3.bf16.msra.mxu0 %v6903_v16 }
 0x674   :  { %6349 = vmatprep.subr.bf16.mxu0 %v6904_v41 }
 0x675   :  { %3397 = vrot.lane.b32.xlu1 %v9989_v8, %s7105_s20 }
 0x677   :  { %6350 = vmatpush3.bf16.msra.mxu0 %v6905_v59 }
 0x678   :  { %6351 = vmatprep.subr.bf16.mxu0 %v6906_v60 }
 0x679   :  { %3130 = vrot.lane.b32.xlu1 %v3128_v21, %s7105_s20 }
 0x67d   :  { %3399 = vrot.lane.b32.xlu1 %v9960_v1, %s7105_s20 }
 0x681   :  { %3143 = vrot.lane.b32.xlu1 %v11458_v51, %s7105_s20 }
 0x685   :  { %3329 = vrot.lane.b32.xlu1 %v10081_v23, %s7105_s20 }
 0x689   :  { %3417 = vrot.lane.b32.xlu1 %v3414_v44, %s7105_s20  ;;  %v10143_v44 = vrot.slane %v9989_v8, 3 }
 0x68b   :  { %v3224_v39 = vsel %vm188_vm0, %v3222_v30, %v10143_v44 }
 0x69c   :  { %v10120_v22 = vpop.permute.xlu1 %3209 }
 0x69d   :  { %v10099_v7 = vpop.permute.xlu0 %3211 }
 0x69e   :  { %v10105_v48 = vsel %vm188_vm0, %v3208_v5, %v10099_v7 }
 0x6a4   :  { %v3214_v63 = vpop.permute.xlu1 %3213 }
 0x6a5   :  { %v10132_v33 = vpop.permute.xlu0 %3215 }
 0x6b3   :  { %v3065_v56 = vpop.f32.mrb[76].mxu0 }
 0x6b4   :  { %v3067_v32 = vpop.f32.mrb[77].mxu0 }
 0x6b5   :  { %v3069_v3 = vpop.f32.mrb[78].mxu0 }
 0x6b6   :  { %v10107_v40 = vpack.c.bf16 %v3069_v3, %v3065_v56  ;;  %v3071_v34 = vpop.f32.mrb[79].mxu0  ;;  %v11459_v56 = vrot.slane %v9943_v38, 2  ;;  %v3218_v3 = vsel %vm2627_vm9, %v3214_v63, %v10132_v33 }
 0x6b7   :  { %v10112_v57 = vpack.c.bf16 %v3071_v34, %v3067_v32  ;;  %v10152_v32 = vrot.slane %v9960_v1, 2 }
 0x6b8   :  { %v10135_v11 = vrot.slane %v10107_v40, 2 }
 0x6b9   :  { %11797 = vst [vmem:[#allocation43_spill] sm:$0xff] %v10152_v32  ;;  %v3380_v30 = vsel %vm382_vm4, %v11459_v56, %v10152_v32 }
 0x6bb   :  { %v3075_v6 = vpop.f32.mrb[80].mxu0 }
 0x6bc   :  { %v3077_v54 = vpop.f32.mrb[81].mxu0 }
 0x6bd   :  { %v3079_v55 = vpop.f32.mrb[82].mxu0 }
 0x6be   :  { %v10125_v47 = vpack.c.bf16 %v3079_v55, %v3075_v6  ;;  %v3081_v12 = vpop.f32.mrb[83].mxu0  ;;  %v6907_v6 = vld [vmem:[%s11327_s5 + $0x30] sm:$0xff]   ;;  %v3221_v55 = vsel %vm188_vm0, %v11461_v18, %v3220_v0 }
 0x6bf   :  { %v10127_v21 = vpack.c.bf16 %v3081_v12, %v3077_v54  ;;  %v3230_v54 = vpop.permute.xlu1 %3229  ;;  %v3287_v12 = vsel %vm346_vm2, %v10132_v33, %v3224_v39  ;;  %6352 = vmatpush3.bf16.msra.mxu0 %v6907_v6 }
 0x6c0   :  { %v11456_v29 = vrot.slane %v10125_v47, 2 }
 0x6c2   :  { %v3263_v5 = vsel %vm382_vm4, %v10135_v11, %v11456_v29 }
 0x6c3   :  { %3266 = vrot.lane.b32.xlu0 %v3263_v5, %s7105_s20  ;;  %v3085_v34 = vpop.f32.mrb[84].mxu0  ;;  %v3284_v5 = vsel %vm346_vm2, %v3218_v3, %v3221_v55  ;;  %v6909_v3 = vld [vmem:[%s11327_s5 + $0x38] sm:$0xff]   ;;  %v3438_v55 = vrot.slane %v10127_v21, 7 }
 0x6c4   :  { %v3087_v25 = vpop.f32.mrb[85].mxu0 }
 0x6c5   :  { %v3089_v16 = vpop.f32.mrb[86].mxu0 }
 0x6c6   :  { %v10172_v41 = vpack.c.bf16 %v3089_v16, %v3085_v34  ;;  %v3232_v63 = vpop.permute.xlu0 %3231  ;;  %v3091_v59 = vpop.f32.mrb[87].mxu0  ;;  %v10185_v34 = vrot.slane %v10125_v47, 7  ;;  %v6908_v16 = vld [vmem:[%s11327_s5 + $0x78] sm:$0xff]  }
 0x6c7   :  { %v3237_v29 = vsel %vm2627_vm9, %v3230_v54, %v3232_v63  ;;  %v10181_v0 = vsel %vm354_vm3, %v3287_v12, %v3232_v63  ;;  %v3119_v60 = vpack.c.bf16 %v3091_v59, %v3087_v25  ;;  %3383 = vrot.lane.b32.xlu0 %v3380_v30, %s7105_s20  ;;  %v3423_v54 = vrot.slane %v10125_v47, 1  ;;  %6353 = vmatprep.subr.bf16.mxu0 %v6908_v16  ;;  %v10209_v59 = vpop.permute.xlu1 %3233 }
 0x6c8   :  { %11798 = vst [vmem:[#allocation54_spill] sm:$0xff] %v10172_v41  ;;  %v3289_v39 = vsel %vm354_vm3, %v3284_v5, %v3237_v29  ;;  %v10195_v6 = vrot.slane %v10172_v41, 1  ;;  %v3436_v25 = vrot.slane %v10172_v41, 7  ;;  %v11466_v30 = vrot.slane %v9994_v45, 7  ;;  %6354 = vmatpush3.bf16.msra.mxu0 %v6909_v3 }
 0x6c9   :  { %v3439_v12 = vrot.slane %v3119_v60, 7  ;;  %3610 = vrot.lane.b32.xlu1 %v3289_v39, %s7104_s26  ;;  %v3242_v5 = vrot.slane %v9982_v2, 1  ;;  %v3426_v16 = vrot.slane %v10025_v49, 4  ;;  %v3549_v56 = vrot.slane %v3119_v60, 4 }
 0x6ca   :  { %11799 = vst [vmem:[#allocation42_spill] sm:$0xff] %v10195_v6  ;;  %v10203_v29 = vsel %vm374_vm6, %v10185_v34, %v3436_v25  ;;  %v10207_v63 = vsel %vm354_vm3, %v3423_v54, %v10195_v6  ;;  %v3428_v60 = vrot.slane %v10172_v41, 4 }
 0x6cb   :  { %3323 = vrot.lane.b32.xlu0 %v10143_v44, %s7105_s20  ;;  %v3095_v15 = vpop.f32.mrb[88].mxu0  ;;  %v10216_v39 = vsel %vm374_vm6, %v3438_v55, %v3439_v12  ;;  %v3244_v12 = vsel %vm354_vm3, %v3242_v5, %v10081_v23 }
 0x6cc   :  { %11800 = vst [vmem:[#allocation7_spill] sm:$0xff] %v10216_v39  ;;  %v3124_v25 = vpack.c.bf16 %v3095_v15, %v3095_v15  ;;  %v3097_v51 = vpop.f32.mrb[89].mxu0 }
 0x6cd   :  { %3333 = vrot.lane.b32.xlu1 %v11466_v30, %s7105_s20  ;;  %v3125_v61 = vpack.c.bf16 %v3097_v51, %v3097_v51  ;;  %v3099_v18 = vpop.f32.mrb[90].mxu0  ;;  %v3427_v51 = vsel %vm364_vm5, %v10004_v43, %v3426_v16  ;;  %v3240_v30 = vrot.slane %v9989_v8, 1 }
 0x6ce   :  { %v3535_v58 = vrot.slane %v3124_v25, 6  ;;  %v3539_v53 = vrot.slane %v3124_v25, 1  ;;  %v3547_v27 = vrot.slane %v3124_v25, 4  ;;  %v3100_v3 = vpop.f32.mrb[91].mxu0  ;;  %v11802_v25 = vrot.slane %v10172_v41, 6 }
 0x6cf   :  { %v3250_v52 = vpop.permute.xlu1 %3249  ;;  %v3236_v55 = vpop.permute.xlu0 %3235  ;;  %3387 = vrot.lane.b32.xlu0 %v10152_v32, %s7105_s20  ;;  %v3550_v15 = vrot.slane %v3125_v61, 4  ;;  %v3203_v3 = vrot.slane %v9933_v14, 5  ;;  %v11809_v41 = vrot.slane %v9980_v10, 1 }
 0x6d0   :  { %v10229_v54 = vsel %vm364_vm5, %v3236_v55, %v3244_v12  ;;  %v10235_v18 = vsel %vm354_vm3, %v10195_v6, %v3539_v53  ;;  %v10240_v5 = vsel %vm346_vm2, %v11802_v25, %v3535_v58  ;;  %v10248_v12 = vsel %vm364_vm5, %v3428_v60, %v3547_v27 }
 0x6d1   :  { %11801 = vst [vmem:[#allocation26_spill] sm:$0xff] %v10235_v18  ;;  %11803 = vst [vmem:[#allocation83_spill] sm:$0xff] %v10240_v5  ;;  %3430 = vrot.lane.b32.xlu1 %v3427_v51, %s7105_s20  ;;  %v10245_v61 = vsel %vm364_vm5, %v3549_v56, %v3550_v15  ;;  %v3217_v53 = vsel %vm2627_vm9, %v10120_v22, %v10099_v7  ;;  %v11806_v25 = vrot.slane %v9935_v26, 3  ;;  %v3150_v56 = vrot.slane %v9982_v2, 7 }
 0x6d2   :  { %11804 = vst [vmem:[#allocation87_spill] sm:$0xff] %v10245_v61  ;;  %11805 = vst [vmem:[#allocation99_spill] sm:$0xff] %v10248_v12  ;;  %v11807_v7 = vrot.slane %v9941_v31, 5 }
 0x6d3   :  { %v10253_v16 = vpop.permute.xlu1 %3316  ;;  %v10256_v58 = vpop.permute.xlu0 %3251  ;;  %3132 = vrot.lane.b32.xlu0 %v11806_v25, %s7105_s20 }
 0x6d4   :  { %v3253_v27 = vsel %vm2627_vm9, %v3250_v52, %v10256_v58  ;;  %v3205_v22 = vsel %vm392_vm7, %v3203_v3, %v11807_v7  ;;  %v3159_v52 = vrot.slane %v9982_v2, 5  ;;  %v3139_v3 = vrot.slane %v9935_v26, 1 }
 0x6d5   :  { %v3300_v15 = vsel %vm374_vm6, %v3240_v30, %v3253_v27  ;;  %3153 = vrot.lane.b32.xlu1 %v3150_v56, %s7105_s20  ;;  %v3278_v51 = vsel %vm188_vm0, %v3205_v22, %v3217_v53  ;;  %v3271_v27 = vrot.slane %v10125_v47, 5  ;;  %v3160_v53 = vrot.slane %v10107_v40, 5 }
 0x6d6   :  { %v3305_v25 = vsel %vm382_vm4, %v3300_v15, %v3150_v56  ;;  %v11808_v2 = vrot.slane %v9943_v38, 2 }
 0x6d7   :  { %v3382_v12 = vpop.permute.xlu1 %3381  ;;  %3606 = vrot.lane.b32.xlu0 %v3278_v51, %s7104_s26  ;;  %v3272_v15 = vsel %vm392_vm7, %v3160_v53, %v3271_v27  ;;  %v3319_v22 = vpop.permute.xlu0 %3318  ;;  %v3411_v51 = vrot.slane %v10019_v46, 6  ;;  %v3238_v27 = vsel %vm2627_vm9, %v10209_v59, %v3236_v55 }
 0x6d9   :  { %3618 = vrot.lane.b32.xlu1 %v3305_v25, %s7104_s26  ;;  %v3412_v5 = vsel %vm346_vm2, %v9998_v42, %v3411_v51  ;;  %v10306_v51 = vrot.slane %v10125_v47, 4 }
 0x6db   :  { %v3265_v61 = vpop.permute.xlu1 %3264  ;;  %3401 = vrot.lane.b32.xlu0 %v10019_v46, %s7105_s20  ;;  %v3429_v59 = vsel %vm364_vm5, %v10306_v51, %v3428_v60 }
 0x6dd   :  { %3161 = vrot.lane.b32.xlu1 %v3159_v52, %s7105_s20  ;;  %v3344_v52 = vsel %vm188_vm0, %v11808_v2, %v3319_v22  ;;  %v3241_v2 = vsel %vm354_vm3, %v11809_v41, %v3240_v30  ;;  %v10318_v41 = vrot.slane %v10025_v49, 3 }
 0x6df   :  { %v3322_v7 = vpop.permute.xlu1 %3321  ;;  %3141 = vrot.lane.b32.xlu0 %v3139_v3, %s7105_s20 }
 0x6e1   :  { %3626 = vrot.lane.b32.xlu1 %v3272_v15, %s7104_s26 }
 0x6e3   :  { %v3386_v25 = vpop.permute.xlu1 %3385  ;;  %3327 = vrot.lane.b32.xlu0 %v3240_v30, %s7105_s20 }
 0x6e5   :  { %3649 = vrot.lane.b32.xlu1 %v3344_v52, %s7105_s20  ;;  %v3294_v52 = vsel %vm364_vm5, %v3238_v27, %v3241_v2  ;;  %v6917_v2 = vld [vmem:[%s11327_s5 + $0x188] sm:$0xff]  }
 0x6e6   :  { %6794 = vmatprep.subr.bf16.mxu1 %v6917_v2 }
 0x6e7   :  { %v10291_v3 = vpop.permute.xlu1 %3397  ;;  %3415 = vrot.lane.b32.xlu0 %v3412_v5, %s7105_s20  ;;  %v3149_v5 = vrot.slane %v9980_v10, 7  ;;  %v6910_v10 = vld [vmem:[%s11327_s5 + $0xc0] sm:$0xff]   ;;  %6795 = vmatpush3.bf16.msra.mxu1 %v6917_v2 }
 0x6e8   :  { %6391 = vmatprep.subr.bf16.mxu0 %v6910_v10 }
 0x6eb   :  { %v3131_v15 = vpop.permute.xlu1 %3130  ;;  %3335 = vrot.lane.b32.xlu0 %v10185_v34, %s7105_s20 }
 0x6ef   :  { %v10302_v32 = vpop.permute.xlu1 %3399  ;;  %3614 = vrot.lane.b32.xlu0 %v3294_v52, %s7104_s26 }
 0x6f3   :  { %v10310_v55 = vpop.permute.xlu1 %3143  ;;  %3432 = vrot.lane.b32.xlu0 %v3429_v59, %s7105_s20  ;;  %v11810_v59 = vrot.slane %v9994_v45, 7 }
 0x6f7   :  { %v10314_v39 = vpop.permute.xlu1 %3329  ;;  %3151 = vrot.lane.b32.xlu0 %v3149_v5, %s7105_s20 }
 0x6fb   :  { %v10320_v30 = vpop.permute.xlu1 %3417  ;;  %3163 = vrot.lane.b32.xlu0 %v3160_v53, %s7105_s20 }
 0x6fc   :  { %v3468_v60 = vsel %vm374_vm6, %v10318_v41, %v10320_v30 }
 0x6fd   :  { %v10328_v27 = vsel %vm382_vm4, %v3468_v60, %v10207_v63  ;;  %v3257_v63 = vsel %vm374_vm6, %v3150_v56, %v11810_v59  ;;  %v3320_v60 = vsel %vm2627_vm9, %v10253_v16, %v3319_v22  ;;  %v3348_v16 = vsel %vm346_vm2, %v3319_v22, %v9989_v8 }
 0x6fe   :  { %v10362_v59 = vrot.slane %v9960_v1, 5 }
 0x735   :  { %v10336_v53 = vpop.permute.xlu0 %3266 }
 0x736   :  { %v3268_v52 = vsel %vm2627_vm9, %v3265_v61, %v10336_v53  ;;  %v11811_v61 = vrot.slane %v9941_v31, 2 }
 0x737   :  { %v3310_v5 = vsel %vm392_vm7, %v3257_v63, %v3268_v52 }
 0x738   :  { %3622 = vrot.lane.b32.xlu0 %v3310_v5, %s7104_s26  ;;  %v3341_v6 = vsel %vm188_vm0, %v11811_v61, %v3320_v60 }
 0x739   :  { %v10347_v10 = vpop.permute.xlu0 %3383 }
 0x73a   :  { %v3389_v2 = vsel %vm2627_vm9, %v3382_v12, %v10347_v10 }
 0x73b   :  { %v3443_v18 = vsel %vm188_vm0, %v9968_v37, %v3389_v2  ;;  %v3393_v37 = vsel %vm392_vm7, %v10032_v35, %v10362_v59 }
 0x73c   :  { %3687 = vrot.lane.b32.xlu1 %v3443_v18, %s7106_s25  ;;  %3647 = vrot.lane.b32.xlu0 %v3341_v6, %s7105_s20  ;;  %v3346_v18 = vsel %vm346_vm2, %v3320_v60, %v9943_v38  ;;  %v10392_v60 = vpop.permute.xlu1 %3610 }
 0x73d   :  { %v3324_v56 = vpop.permute.xlu0 %3323 }
 0x73e   :  { %v3352_v52 = vsel %vm354_vm3, %v3348_v16, %v3324_v56  ;;  %v3325_v12 = vsel %vm2627_vm9, %v3322_v7, %v3324_v56  ;;  %v3403_v7 = vsel %vm2627_vm9, %v10132_v33, %v10291_v3  ;;  %v3356_v33 = vsel %vm364_vm5, %v3324_v56, %v10087_v36 }
 0x73f   :  { %v10407_v16 = vrot.slane %v10019_v46, 3 }
 0x740   :  { %3653 = vrot.lane.b32.xlu1 %v3352_v52, %s7105_s20  ;;  %3608 = vrot.lane.b32.xlu0 %v10105_v48, %s7104_s26  ;;  %v3350_v48 = vsel %vm354_vm3, %v3346_v18, %v3325_v12  ;;  %v3354_v52 = vsel %vm364_vm5, %v3325_v12, %v9998_v42  ;;  %v6913_v18 = vld [vmem:[%s11327_s5 + $0x88] sm:$0xff]  }
 0x741   :  { %v10368_v31 = vpop.permute.xlu0 %3387  ;;  %v3407_v12 = vsel %vm188_vm0, %v10143_v44, %v10407_v16  ;;  %v6915_v44 = vld [vmem:[%s11327_s5 + $0x90] sm:$0xff]  }
 0x742   :  { %v3390_v6 = vsel %vm2627_vm9, %v3386_v25, %v10368_v31 }
 0x743   :  { %v3449_v22 = vsel %vm346_vm2, %v3390_v6, %v3393_v37 }
 0x744   :  { %3651 = vrot.lane.b32.xlu0 %v3350_v48, %s7105_s20  ;;  %v3454_v63 = vsel %vm354_vm3, %v3449_v22, %v3403_v7  ;;  %v6914_v7 = vld [vmem:[%s11327_s5 + $0xd0] sm:$0xff]   ;;  %v3334_v22 = vpop.permute.xlu1 %3333 }
 0x745   :  { %3691 = vrot.lane.b32.xlu1 %v3454_v63, %s7106_s25  ;;  %v3133_v35 = vpop.permute.xlu0 %3132  ;;  %v3360_v63 = vsel %vm374_vm6, %v10087_v36, %v10314_v39  ;;  %v6916_v36 = vld [vmem:[%s11327_s5 + $0xd8] sm:$0xff]  }
 0x746   :  { %v3176_v25 = vsel %vm346_vm2, %v3133_v35, %v9985_v28  ;;  %v3135_v5 = vsel %vm2627_vm9, %v3131_v15, %v3133_v35  ;;  %v3172_v2 = vsel %vm188_vm0, %v9935_v26, %v3133_v35  ;;  %v6911_v15 = vld [vmem:[%s11327_s5 + $0x80] sm:$0xff]   ;;  %v6912_v26 = vld [vmem:[%s11327_s5 + $0xc8] sm:$0xff]  }
 0x747   :  { %v3181_v28 = vsel %vm354_vm3, %v3176_v25, %v10310_v55  ;;  %v3168_v56 = vsel %vm188_vm0, %v9933_v14, %v3135_v5  ;;  %v3174_v25 = vsel %vm346_vm2, %v3135_v5, %v9948_v62  ;;  %v6918_v62 = vld [vmem:[%s11327_s5 + $0x98] sm:$0xff]  }
 0x748   :  { %3612 = vrot.lane.b32.xlu0 %v10181_v0, %s7104_s26  ;;  %v3728_v37 = vsel %vm2620_vm1, %v3181_v28, %v10392_v60 }
 0x749   :  { %3657 = vrot.lane.b32.xlu1 %v3356_v33, %s7105_s20  ;;  %v10397_v61 = vpop.permute.xlu0 %3606 }
 0x74a   :  { %v3725_v0 = vsel %vm2620_vm1, %v3172_v2, %v10397_v61  ;;  %v3431_v2 = vpop.permute.xlu1 %3430 }
 0x74b   :  { %4142 = vmatprep.mubr.bf16.mxu0 %v3725_v0 }
 0x74c   :  { %4143 = vmatmul.mubr.bf16.vlgmr.msra.gmra.mrb[92].mxu0 %v3168_v56  ;;  %3655 = vrot.lane.b32.xlu0 %v3354_v52, %s7105_s20  ;;  %v3303_v52 = vsel %vm374_vm6, %v10081_v23, %v10256_v58 }
 0x74d   :  { %4150 = vmatprep.mubr.bf16.mxu0 %v3728_v37  ;;  %v10419_v6 = vpop.permute.xlu0 %3401  ;;  %6392 = vmatpush3.bf16.msra.mxu0 %v6911_v15  ;;  %v6919_v15 = vld [vmem:[%s11327_s5 + $0xe0] sm:$0xff]  }
 0x74e   :  { %v3404_v14 = vsel %vm2627_vm9, %v10302_v32, %v10419_v6  ;;  %6393 = vmatprep.subr.bf16.mxu0 %v6912_v26  ;;  %v10465_v26 = vrot.slane %v10025_v49, 1 }
 0x74f   :  { %v3459_v48 = vsel %vm364_vm5, %v3404_v14, %v3407_v12  ;;  %v3154_v14 = vpop.permute.xlu1 %3153 }
 0x750   :  { %3695 = vrot.lane.b32.xlu1 %v3459_v48, %s7106_s25  ;;  %3616 = vrot.lane.b32.xlu0 %v10229_v54, %s7104_s26  ;;  %v3364_v54 = vsel %vm382_vm4, %v3360_v63, %v10306_v51  ;;  %v3422_v58 = vsel %vm354_vm3, %v10081_v23, %v10465_v26  ;;  %v6922_v23 = vld [vmem:[%s11327_s5 + $0xa8] sm:$0xff]  }
 0x751   :  { %v3142_v32 = vpop.permute.xlu0 %3141  ;;  %6394 = vmatpush3.bf16.msra.mxu0 %v6913_v18 }
 0x752   :  { %v3145_v35 = vsel %vm2627_vm9, %v3142_v32, %v10310_v55  ;;  %6395 = vmatprep.subr.bf16.mxu0 %v6914_v7  ;;  %v6921_v7 = vld [vmem:[%s11327_s5 + $0xe8] sm:$0xff]  }
 0x753   :  { %v3178_v33 = vsel %vm354_vm3, %v3174_v25, %v3145_v35  ;;  %v6923_v25 = vld [vmem:[%s11327_s5 + $0xf0] sm:$0xff]  }
 0x754   :  { %3661 = vrot.lane.b32.xlu1 %v3364_v54, %s7105_s20  ;;  %4151 = vmatmul.mubr.bf16.gmra.mrb[96].mxu0 %v3178_v33  ;;  %v10507_v33 = vpop.permute.xlu1 %3618 }
 0x755   :  { %v3328_v28 = vpop.permute.xlu0 %3327  ;;  %6396 = vmatpush3.bf16.msra.mxu0 %v6915_v44 }
 0x756   :  { %v3331_v5 = vsel %vm2627_vm9, %v3328_v28, %v10314_v39  ;;  %6397 = vmatprep.subr.bf16.mxu0 %v6916_v36  ;;  %v3255_v39 = vrot.slane %v10107_v40, 7  ;;  %v3190_v36 = vsel %vm374_vm6, %v10001_v50, %v3154_v14 }
 0x757   :  { %v3358_v0 = vsel %vm374_vm6, %v9998_v42, %v3331_v5  ;;  %v6920_v42 = vld [vmem:[%s11327_s5 + $0xa0] sm:$0xff]   ;;  %v6925_v5 = vld [vmem:[%s11327_s5 + $0xf8] sm:$0xff]  }
 0x758   :  { %v3362_v56 = vsel %vm382_vm4, %v3358_v0, %v10004_v43 }
 0x759   :  { %v3416_v37 = vpop.permute.xlu0 %3415  ;;  %3659 = vrot.lane.b32.xlu0 %v3362_v56, %s7105_s20  ;;  %6398 = vmatpush3.bf16.msra.mxu0 %v6918_v62  ;;  %v3259_v62 = vsel %vm374_vm6, %v3255_v39, %v10185_v34  ;;  %v6926_v56 = vld [vmem:[%s11327_s5 + $0xb8] sm:$0xff]  }
 0x75a   :  { %v3419_v18 = vsel %vm2627_vm9, %v3416_v37, %v10320_v30  ;;  %6399 = vmatprep.subr.bf16.mxu0 %v6919_v15  ;;  %v3307_v30 = vsel %vm382_vm4, %v3303_v52, %v3255_v39  ;;  %v3313_v15 = vsel %vm392_vm7, %v3259_v62, %v10336_v53  ;;  %v6927_v52 = vld [vmem:[%s11327_s5 + $0x140] sm:$0xff]   ;;  %v3274_v37 = vrot.slane %v10127_v21, 5  ;;  %v3162_v62 = vpop.permute.xlu1 %3161 }
 0x75b   :  { %v3465_v12 = vsel %vm374_vm6, %v10407_v16, %v3419_v18  ;;  %v3273_v18 = vrot.slane %v10112_v57, 5 }
 0x75c   :  { %v3470_v48 = vsel %vm382_vm4, %v3465_v12, %v3422_v58 }
 0x75d   :  { %3699 = vrot.lane.b32.xlu1 %v3470_v48, %s7106_s25  ;;  %v3336_v63 = vpop.permute.xlu0 %3335  ;;  %3620 = vrot.lane.b32.xlu0 %v3307_v30, %s7104_s26  ;;  %v3374_v48 = vrot.slane %v9943_v38, 7 }
 0x75e   :  { %v3337_v32 = vsel %vm2627_vm9, %v3334_v22, %v3336_v63  ;;  %6400 = vmatpush3.bf16.msra.mxu0 %v6920_v42  ;;  %v3368_v54 = vsel %vm392_vm7, %v10306_v51, %v3336_v63  ;;  %v3186_v22 = vsel %vm364_vm5, %v10310_v55, %v10001_v50  ;;  %v6924_v51 = vld [vmem:[%s11327_s5 + $0xb0] sm:$0xff]   ;;  %v3183_v50 = vsel %vm364_vm5, %v3145_v35, %v9992_v19 }
 0x75f   :  { %v3366_v44 = vsel %vm392_vm7, %v10004_v43, %v3337_v32  ;;  %6401 = vmatprep.subr.bf16.mxu0 %v6921_v7  ;;  %v3195_v55 = vsel %vm382_vm4, %v3190_v36, %v10135_v11  ;;  %v3338_v42 = vrot.slane %v10127_v21, 2  ;;  %v3275_v7 = vsel %vm392_vm7, %v3273_v18, %v3274_v37 }
 0x760   :  { %v3734_v0 = vsel %vm2620_vm1, %v3195_v55, %v10507_v33  ;;  %v3375_v21 = vrot.slane %v9960_v1, 7  ;;  %v3395_v63 = vrot.slane %v10019_v46, 5 }
 0x761   :  { %3665 = vrot.lane.b32.xlu1 %v3368_v54, %s7105_s20  ;;  %v10510_v43 = vpop.permute.xlu0 %3614  ;;  %3663 = vrot.lane.b32.xlu0 %v3366_v44, %s7105_s20  ;;  %v10598_v44 = vpack.c.bf16 %v10044_v9, %v10044_v9 }
 0x762   :  { %v3731_v28 = vsel %vm2620_vm1, %v3186_v22, %v10510_v43  ;;  %6402 = vmatpush3.bf16.msra.mxu0 %v6922_v23 }
 0x763   :  { %4158 = vmatprep.mubr.bf16.mxu0 %v3731_v28  ;;  %6403 = vmatprep.subr.bf16.mxu0 %v6923_v25  ;;  %v3524_v9 = vrot.slane %v10598_v44, 3  ;;  %v3537_v22 = vrot.slane %v10598_v44, 1  ;;  %v11813_v28 = vld [vmem:[#allocation42_spill] sm:$0xff] }
 0x764   :  { %4159 = vmatmul.mubr.bf16.gmra.mrb[100].mxu0 %v3183_v50  ;;  %v10633_v50 = vpop.permute.xlu1 %3626 }
 0x765   :  { %4166 = vmatprep.mubr.bf16.mxu0 %v3734_v0  ;;  %3624 = vrot.lane.b32.xlu0 %v3313_v15, %s7104_s26  ;;  %v10532_v34 = vpop.permute.xlu0 %3432  ;;  %v3525_v54 = vsel %vm188_vm0, %v10318_v41, %v3524_v9 }
 0x766   :  { %v3434_v35 = vsel %vm2627_vm9, %v3431_v2, %v10532_v34  ;;  %6404 = vmatpush3.bf16.msra.mxu0 %v6924_v51  ;;  %v11812_v2 = vrot.slane %v10125_v47, 2  ;;  %v11814_v51 = vld [vmem:[#allocation26_spill] sm:$0xff] }
 0x767   :  { %v3475_v53 = vsel %vm392_vm7, %v10465_v26, %v3434_v35  ;;  %6405 = vmatprep.subr.bf16.mxu0 %v6925_v5  ;;  %v3741_v35 = vsel %vm2620_vm1, %v10112_v57, %v10633_v50 }
 0x768   :  { %3703 = vrot.lane.b32.xlu1 %v3475_v53, %s7106_s25  ;;  %v3650_v55 = vpop.permute.xlu1 %3649 }
 0x769   :  { %3667 = vrot.lane.b32.xlu0 %v11812_v2, %s7105_s20  ;;  %v3152_v39 = vpop.permute.xlu0 %3151 }
 0x76a   :  { %v3155_v12 = vsel %vm2627_vm9, %v3152_v39, %v3154_v14  ;;  %6406 = vmatpush3.bf16.msra.mxu0 %v6926_v56  ;;  %v10563_v14 = vpack.c.bf16 %v9971_v20, %v9971_v20  ;;  %v3394_v20 = vrot.slane %v9989_v8, 5 }
 0x76b   :  { %v3188_v58 = vsel %vm374_vm6, %v9992_v19, %v3155_v12  ;;  %6443 = vmatprep.subr.bf16.mxu0 %v6927_v52  ;;  %v3376_v19 = vsel %vm374_vm6, %v3374_v48, %v3375_v21  ;;  %v6928_v12 = vld [vmem:[%s11327_s5 + $0x100] sm:$0xff]   ;;  %v6931_v48 = vld [vmem:[%s11327_s5 + $0x150] sm:$0xff]  }
 0x76c   :  { %3669 = vrot.lane.b32.xlu1 %v3338_v42, %s7105_s20  ;;  %v3192_v47 = vsel %vm382_vm4, %v3188_v58, %v10028_v13  ;;  %v3446_v30 = vsel %vm188_vm0, %v3376_v19, %v10347_v10  ;;  %v3489_v38 = vrot.slane %v10563_v14, 7  ;;  %v3396_v10 = vsel %vm392_vm7, %v3394_v20, %v3395_v63  ;;  %v6933_v20 = vld [vmem:[%s11327_s5 + $0x158] sm:$0xff]  }
 0x76d   :  { %3628 = vrot.lane.b32.xlu0 %v3275_v7, %s7104_s26  ;;  %4167 = vmatmul.mubr.bf16.gmra.mrb[104].mxu0 %v3192_v47  ;;  %v3452_v32 = vsel %vm346_vm2, %v10368_v31, %v3396_v10  ;;  %v3507_v8 = vrot.slane %v10563_v14, 5 }
 0x76e   :  { %v3456_v23 = vsel %vm354_vm3, %v3452_v32, %v10291_v3  ;;  %v6934_v32 = vld [vmem:[%s11327_s5 + $0x118] sm:$0xff]  }
 0x76f   :  { %v3508_v31 = vsel %vm392_vm7, %v10362_v59, %v3507_v8  ;;  %v6935_v8 = vld [vmem:[%s11327_s5 + $0x160] sm:$0xff]  }
 0x770   :  { %3707 = vrot.lane.b32.xlu1 %v10203_v29, %s7106_s25  ;;  %v10583_v29 = vpack.c.bf16 %v10040_v24, %v10040_v24 }
 0x771   :  { %3491 = vrot.lane.b32.xlu0 %v9963_v17, %s7105_s20  ;;  %v3490_v17 = vsel %vm374_vm6, %v3375_v21, %v3489_v38  ;;  %v6932_v38 = vld [vmem:[%s11327_s5 + $0x110] sm:$0xff]  }
 0x772   :  { %v3509_v24 = vrot.slane %v10583_v29, 5  ;;  %v3522_v3 = vrot.slane %v10583_v29, 3 }
 0x774   :  { %3493 = vrot.lane.b32.xlu1 %v3375_v21, %s7105_s20 }
 0x775   :  { %3689 = vrot.lane.b32.xlu0 %v3446_v30, %s7106_s25 }
 0x778   :  { %3495 = vrot.lane.b32.xlu1 %v9975_v4, %s7105_s20  ;;  %v3408_v4 = vrot.slane %v9994_v45, 3  ;;  %v3510_v45 = vsel %vm392_vm7, %v3395_v63, %v3509_v24 }
 0x779   :  { %3497 = vrot.lane.b32.xlu0 %v3490_v17, %s7105_s20 }
 0x77a   :  { %v3410_v25 = vsel %vm188_vm0, %v3408_v4, %v10318_v41  ;;  %v11815_v41 = vld [vmem:[#allocation7_spill] sm:$0xff] }
 0x77b   :  { %v3462_v36 = vsel %vm364_vm5, %v10419_v6, %v3410_v25  ;;  %v3538_v6 = vsel %vm354_vm3, %v10465_v26, %v3537_v22  ;;  %v6937_v25 = vld [vmem:[%s11327_s5 + $0x168] sm:$0xff]  }
 0x77c   :  { %3511 = vrot.lane.b32.xlu1 %v10362_v59, %s7105_s20  ;;  %v3523_v59 = vsel %vm188_vm0, %v10407_v16, %v3522_v3  ;;  %v3478_v16 = vsel %vm392_vm7, %v11813_v28, %v10532_v34 }
 0x77d   :  { %3513 = vrot.lane.b32.xlu0 %v3395_v63, %s7105_s20 }
 0x780   :  { %3693 = vrot.lane.b32.xlu1 %v3456_v23, %s7106_s25  ;;  %v6936_v23 = vld [vmem:[%s11327_s5 + $0x120] sm:$0xff]  }
 0x781   :  { %3515 = vrot.lane.b32.xlu0 %v3508_v31, %s7105_s20 }
 0x784   :  { %3517 = vrot.lane.b32.xlu1 %v3510_v45, %s7105_s20 }
 0x785   :  { %3697 = vrot.lane.b32.xlu0 %v3462_v36, %s7106_s25 }
 0x788   :  { %3526 = vrot.lane.b32.xlu1 %v3523_v59, %s7105_s20  ;;  %v6939_v59 = vld [vmem:[%s11327_s5 + $0x170] sm:$0xff]  }
 0x789   :  { %3528 = vrot.lane.b32.xlu0 %v3525_v54, %s7105_s20 }
 0x78c   :  { %3701 = vrot.lane.b32.xlu1 %v10328_v27, %s7106_s25  ;;  %v3164_v27 = vpop.permute.xlu0 %3163 }
 0x78d   :  { %3541 = vrot.lane.b32.xlu0 %v3538_v6, %s7105_s20  ;;  %v3165_v26 = vsel %vm2627_vm9, %v3162_v62, %v3164_v27  ;;  %v3200_v5 = vsel %vm392_vm7, %v10135_v11, %v3164_v27  ;;  %v6940_v6 = vld [vmem:[%s11327_s5 + $0x130] sm:$0xff]  }
 0x78e   :  { %v3197_v34 = vsel %vm392_vm7, %v10028_v13, %v3165_v26 }
 0x790   :  { %3543 = vrot.lane.b32.xlu1 %v11814_v51, %s7105_s20 }
 0x791   :  { %3705 = vrot.lane.b32.xlu0 %v3478_v16, %s7106_s25  ;;  %v6941_v16 = vld [vmem:[%s11327_s5 + $0x178] sm:$0xff]  }
 0x794   :  { %3709 = vrot.lane.b32.xlu1 %v11815_v41, %s7106_s25 }
 0x7aa   :  { %v10638_v15 = vpop.permute.xlu0 %3622 }
 0x7ab   :  { %v3737_v0 = vsel %vm2620_vm1, %v3200_v5, %v10638_v15 }
 0x7ac   :  { %4174 = vmatprep.mubr.bf16.mxu0 %v3737_v0 }
 0x7ad   :  { %4175 = vmatmul.mubr.bf16.gmra.mrb[108].mxu0 %v3197_v34 }
 0x7ae   :  { %v10647_v56 = vpop.permute.xlu1 %3687  ;;  %4182 = vmatprep.mubr.bf16.mxu0 %v3741_v35  ;;  %v3648_v53 = vpop.permute.xlu0 %3647 }
 0x7af   :  { %v3671_v11 = vsel %vm2627_vm9, %v3648_v53, %v3650_v55 }
 0x7b0   :  { %v3769_v2 = vsel %vm2632_vm10, %v3671_v11, %v10647_v56 }
 0x7b2   :  { %v3654_v52 = vpop.permute.xlu1 %3653  ;;  %v3609_v37 = vpop.permute.xlu0 %3608 }
 0x7b3   :  { %v3631_v57 = vsel %vm2620_vm1, %v10397_v61, %v3609_v37  ;;  %v6930_v61 = vld [vmem:[%s11327_s5 + $0x108] sm:$0xff]   ;;  %v3484_v37 = vrot.slane %v9960_v1, 4 }
 0x7b4   :  { %v3745_v58 = vsel %vm2627_vm9, %v3631_v57, %v3648_v53  ;;  %v11816_v1 = vld [vmem:[#allocation17_spill] sm:$0xff] }
 0x7b5   :  { %4183 = vmatmul.mubr.bf16.gmra.mrb[112].mxu0 %v10107_v40  ;;  %v6929_v40 = vld [vmem:[%s11327_s5 + $0x148] sm:$0xff]  }
 0x7b6   :  { %4223 = vmatprep.mubr.bf16.mxu0 %v3769_v2  ;;  %v3652_v13 = vpop.permute.xlu0 %3651  ;;  %v3485_v2 = vrot.slane %v10563_v14, 4 }
 0x7b7   :  { %v10653_v39 = vpop.permute.xlu1 %3691  ;;  %v3672_v18 = vsel %vm2627_vm9, %v3652_v13, %v3654_v52 }
 0x7b8   :  { %v3773_v7 = vsel %vm2632_vm10, %v3672_v18, %v10653_v39 }
 0x7ba   :  { %v3613_v42 = vpop.permute.xlu0 %3612 }
 0x7bb   :  { %v3658_v47 = vpop.permute.xlu1 %3657  ;;  %v3632_v19 = vsel %vm2620_vm1, %v10392_v60, %v3613_v42  ;;  %v3486_v42 = vsel %vm364_vm5, %v3484_v37, %v3485_v2  ;;  %v11824_v2 = vld [vmem:[#allocation99_spill] sm:$0xff] }
 0x7bc   :  { %v3749_v17 = vsel %vm2627_vm9, %v3632_v19, %v3652_v13 }
 0x7bd   :  { %4224 = vmatmul.mubr.bf16.vlgmr.msra.gmra.mrb[116].mxu0 %v3745_v58 }
 0x7be   :  { %4231 = vmatprep.mubr.bf16.mxu0 %v3773_v7  ;;  %6444 = vmatpush3.bf16.msra.mxu0 %v6928_v12  ;;  %v3656_v21 = vpop.permute.xlu0 %3655 }
 0x7bf   :  { %6445 = vmatprep.subr.bf16.mxu0 %v6929_v40  ;;  %v3673_v63 = vsel %vm2627_vm9, %v3656_v21, %v3658_v47 }
 0x7c2   :  { %v10675_v30 = vpop.permute.xlu1 %3695  ;;  %6446 = vmatpush3.bf16.msra.mxu0 %v6930_v61  ;;  %v3617_v10 = vpop.permute.xlu0 %3616  ;;  %v3504_v61 = vrot.slane %v10019_v46, 2 }
 0x7c3   :  { %6447 = vmatprep.subr.bf16.mxu0 %v6931_v48  ;;  %v3777_v60 = vsel %vm2632_vm10, %v3673_v63, %v10675_v30  ;;  %v3633_v4 = vsel %vm2620_vm1, %v10510_v43, %v3617_v10  ;;  %v6938_v43 = vld [vmem:[%s11327_s5 + $0x128] sm:$0xff]   ;;  %v3505_v48 = vrot.slane %v10583_v29, 2 }
 0x7c4   :  { %v3753_v45 = vsel %vm2627_vm9, %v3633_v4, %v3656_v21  ;;  %v3502_v21 = vrot.slane %v10563_v14, 2 }
 0x7c5   :  { %4232 = vmatmul.mubr.bf16.gmra.mrb[120].mxu0 %v3749_v17  ;;  %v3506_v63 = vsel %vm382_vm4, %v3504_v61, %v3505_v48 }
 0x7c6   :  { %4239 = vmatprep.mubr.bf16.mxu0 %v3777_v60  ;;  %6448 = vmatpush3.bf16.msra.mxu0 %v6932_v38  ;;  %v3662_v24 = vpop.permute.xlu1 %3661 }
 0x7c7   :  { %6449 = vmatprep.subr.bf16.mxu0 %v6933_v20 }
 0x7ca   :  { %6450 = vmatpush3.bf16.msra.mxu0 %v6934_v32  ;;  %v11817_v32 = vld [vmem:[#allocation43_spill] sm:$0xff] }
 0x7cb   :  { %v3660_v31 = vpop.permute.xlu0 %3659  ;;  %6451 = vmatprep.subr.bf16.mxu0 %v6935_v8  ;;  %v3503_v8 = vsel %vm382_vm4, %v11817_v32, %v3502_v21 }
 0x7cc   :  { %v3674_v3 = vsel %vm2627_vm9, %v3660_v31, %v3662_v24 }
 0x7cd   :  { %4240 = vmatmul.mubr.bf16.gmra.mrb[124].mxu0 %v3753_v45 }
 0x7ce   :  { %6452 = vmatpush3.bf16.msra.mxu0 %v6936_v23 }
 0x7cf   :  { %v10706_v36 = vpop.permute.xlu1 %3699  ;;  %v3621_v9 = vpop.permute.xlu0 %3620  ;;  %6453 = vmatprep.subr.bf16.mxu0 %v6937_v25 }
 0x7d0   :  { %v3781_v54 = vsel %vm2632_vm10, %v3674_v3, %v10706_v36  ;;  %v3634_v22 = vsel %vm2620_vm1, %v10507_v33, %v3621_v9  ;;  %v6942_v33 = vld [vmem:[%s11327_s5 + $0x138] sm:$0xff]  }
 0x7d1   :  { %4247 = vmatprep.mubr.bf16.mxu0 %v3781_v54  ;;  %v3757_v51 = vsel %vm2627_vm9, %v3634_v22, %v3660_v31 }
 0x7d2   :  { %6454 = vmatpush3.bf16.msra.mxu0 %v6938_v43 }
 0x7d3   :  { %v3664_v28 = vpop.permute.xlu0 %3663  ;;  %6455 = vmatprep.subr.bf16.mxu0 %v6939_v59  ;;  %v3666_v41 = vpop.permute.xlu1 %3665 }
 0x7d4   :  { %v3675_v26 = vsel %vm2627_vm9, %v3664_v28, %v3666_v41 }
 0x7d5   :  { %4248 = vmatmul.mubr.bf16.gmra.mrb[128].mxu0 %v3757_v51 }
 0x7d6   :  { %6456 = vmatpush3.bf16.msra.mxu0 %v6940_v6 }
 0x7d7   :  { %v3625_v62 = vpop.permute.xlu0 %3624  ;;  %6457 = vmatprep.subr.bf16.mxu0 %v6941_v16  ;;  %v11818_v16 = vld [vmem:[#allocation54_spill] sm:$0xff] }
 0x7d8   :  { %v3635_v27 = vsel %vm2620_vm1, %v10638_v15, %v3625_v62 }
 0x7d9   :  { %v3761_v34 = vsel %vm2627_vm9, %v3635_v27, %v3664_v28  ;;  %v3533_v27 = vrot.slane %v10598_v44, 6 }
 0x7da   :  { %v10728_v55 = vpop.permute.xlu1 %3703  ;;  %6458 = vmatpush3.bf16.msra.mxu0 %v6942_v33  ;;  %v11820_v33 = vld [vmem:[#allocation37_spill] sm:$0xff] }
 0x7db   :  { %v3668_v5 = vpop.permute.xlu0 %3667  ;;  %v3785_v0 = vsel %vm2632_vm10, %v3675_v26, %v10728_v55 }
 0x7dc   :  { %4255 = vmatprep.mubr.bf16.mxu0 %v3785_v0  ;;  %v11821_v0 = vld [vmem:[#allocation83_spill] sm:$0xff] }
 0x7dd   :  { %4256 = vmatmul.mubr.bf16.gmra.mrb[132].mxu0 %v3761_v34 }
 0x7de   :  { %v3670_v35 = vpop.permute.xlu1 %3669 }
 0x7df   :  { %v3629_v53 = vpop.permute.xlu0 %3628  ;;  %v3676_v15 = vsel %vm2627_vm9, %v3668_v5, %v3670_v35  ;;  %v3534_v35 = vsel %vm346_vm2, %v11820_v33, %v3533_v27 }
 0x7e0   :  { %v3636_v11 = vsel %vm2620_vm1, %v10633_v50, %v3629_v53 }
 0x7e1   :  { %v3765_v18 = vsel %vm2627_vm9, %v3636_v11, %v3668_v5  ;;  %v11823_v11 = vmov 0  }
 0x7e2   :  { %v10736_v52 = vpop.permute.xlu1 %3707 }
 0x7e3   :  { %v3492_v13 = vpop.permute.xlu0 %3491  ;;  %v3789_v57 = vsel %vm2632_vm10, %v3676_v15, %v10736_v52 }
 0x7e4   :  { %4263 = vmatprep.mubr.bf16.mxu0 %v3789_v57 }
 0x7e5   :  { %4264 = vmatmul.mubr.bf16.gmra.mrb[136].mxu0 %v3765_v18 }
 0x7e6   :  { %v3494_v12 = vpop.permute.xlu1 %3493 }
 0x7e7   :  { %v3499_v50 = vsel %vm2627_vm9, %v3492_v13, %v3494_v12  ;;  %v3559_v40 = vsel %vm188_vm0, %v3486_v42, %v3494_v12  ;;  %v3690_v58 = vpop.permute.xlu0 %3689 }
 0x7e8   :  { %6796 = vmatprep.mubr.msk.bf16.mxu1 %vm2620_vm1, %v3559_v40  ;;  %v3555_v7 = vsel %vm188_vm0, %v11816_v1, %v3499_v50  ;;  %v3712_v38 = vsel %vm2632_vm10, %v10647_v56, %v3690_v58 }
 0x7e9   :  { %4304 = vmatprep.mubr.bf16.mxu0 %v3555_v7 }
 0x7ea   :  { %v3496_v47 = vpop.permute.xlu1 %3495 }
 0x7eb   :  { %v3498_v19 = vpop.permute.xlu0 %3497 }
 0x7ec   :  { %v3500_v20 = vsel %vm2627_vm9, %v3496_v47, %v3498_v19  ;;  %v3565_v60 = vsel %vm346_vm2, %v3498_v19, %v3506_v63 }
 0x7ed   :  { %4305 = vmatmul.mubr.bf16.vlgmr.msra.gmra.mrb[140].mxu0 %v3712_v38  ;;  %v3562_v23 = vsel %vm346_vm2, %v3500_v20, %v3503_v8 }
 0x7ee   :  { %v3512_v17 = vpop.permute.xlu1 %3511 }
 0x7ef   :  { %v3514_v10 = vpop.permute.xlu0 %3513 }
 0x7f0   :  { %v3519_v4 = vsel %vm2627_vm9, %v3512_v17, %v3514_v10  ;;  %v3570_v14 = vsel %vm354_vm3, %v3565_v60, %v3514_v10 }
 0x7f1   :  { %6797 = vmatmul.mubr.msk.bf16.vlgmr.msra.gmra.mrb[132].mxu1 %vm2620_vm1, %v3570_v14  ;;  %v3567_v56 = vsel %vm354_vm3, %v3562_v23, %v3519_v4  ;;  %vm4700_vm3 = vcmask 80896  }
 0x7f2   :  { %v3694_v24 = vpop.permute.xlu1 %3693  ;;  %4312 = vmatprep.mubr.bf16.mxu0 %v3567_v56 }
 0x7f3   :  { %v3516_v31 = vpop.permute.xlu0 %3515  ;;  %v3713_v25 = vsel %vm2632_vm10, %v10653_v39, %v3694_v24 }
 0x7f5   :  { %4313 = vmatmul.mubr.bf16.gmra.mrb[144].mxu0 %v3713_v25 }
 0x7f6   :  { %v3518_v45 = vpop.permute.xlu1 %3517 }
 0x7f7   :  { %v3520_v43 = vsel %vm2627_vm9, %v3516_v31, %v3518_v45  ;;  %v3577_v3 = vsel %vm364_vm5, %v3518_v45, %v10025_v49  ;;  %v3698_v9 = vpop.permute.xlu0 %3697  ;;  %v11819_v49 = vrot.slane %v11818_v16, 6 }
 0x7f8   :  { %6800 = vmatprep.mubr.msk.bf16.mxu1 %vm2620_vm1, %v3577_v3  ;;  %v3573_v59 = vsel %vm364_vm5, %v3520_v43, %v10019_v46  ;;  %v3714_v28 = vsel %vm2632_vm10, %v10675_v30, %v3698_v9 }
 0x7f9   :  { %4320 = vmatprep.mubr.bf16.mxu0 %v3573_v59 }
 0x7fa   :  { %v3527_v54 = vpop.permute.xlu1 %3526 }
 0x7fb   :  { %v3529_v22 = vpop.permute.xlu0 %3528 }
 0x7fc   :  { %v3530_v6 = vsel %vm2627_vm9, %v3527_v54, %v3529_v22  ;;  %v3583_v39 = vsel %vm374_vm6, %v10598_v44, %v3529_v22  ;;  %v11822_v44 = vld [vmem:[#allocation87_spill] sm:$0xff]  ;;  %v6120_v54 = vld [vmem:[%s11328_s6] ss:$0 sm:$0xff] }
 0x7fd   :  { %4321 = vmatmul.mubr.bf16.gmra.mrb[148].mxu0 %v3714_v28  ;;  %v3588_v51 = vsel %vm382_vm4, %v3583_v39, %v11819_v49  ;;  %v3580_v41 = vsel %vm374_vm6, %v10583_v29, %v3530_v6 }
 0x7fe   :  { %6801 = vmatmul.mubr.msk.bf16.gmra.mrb[136].mxu1 %vm2620_vm1, %v3588_v51  ;;  %v3702_v46 = vpop.permute.xlu1 %3701  ;;  %v3585_v62 = vsel %vm382_vm4, %v3580_v41, %v11820_v33 }
 0x7ff   :  { %4328 = vmatprep.mubr.bf16.mxu0 %v3585_v62  ;;  %v3542_v26 = vpop.permute.xlu0 %3541  ;;  %v3715_v29 = vsel %vm2632_vm10, %v10706_v36, %v3702_v46 }
 0x802   :  { %v3544_v5 = vpop.permute.xlu1 %3543 }
 0x803   :  { %v3545_v30 = vsel %vm2627_vm9, %v3542_v26, %v3544_v5  ;;  %v3595_v34 = vsel %vm392_vm7, %v11821_v0, %v3544_v5  ;;  %v3706_v15 = vpop.permute.xlu0 %3705 }
 0x804   :  { %6804 = vmatprep.mubr.msk.bf16.mxu1 %vm2620_vm1, %v3595_v34  ;;  %v3591_v53 = vsel %vm392_vm7, %v3534_v35, %v3545_v30  ;;  %v3716_v37 = vsel %vm2632_vm10, %v10728_v55, %v3706_v15 }
 0x805   :  { %4329 = vmatmul.mubr.bf16.gmra.mrb[152].mxu0 %v3715_v29 }
 0x806   :  { %4336 = vmatprep.mubr.bf16.mxu0 %v3591_v53  ;;  %6805 = vmatmul.mubr.msk.bf16.gmra.mrb[140].mxu1 %vm2620_vm1, %v11822_v44  ;;  %v3710_v13 = vpop.permute.xlu1 %3709 }
 0x807   :  { %4747 = vmatprep.mubr.bf16.mxu1 %v11823_v11  ;;  %v3717_v36 = vsel %vm2632_vm10, %v10736_v52, %v3710_v13 }
 0x80d   :  { %4337 = vmatmul.mubr.bf16.gmra.mrb[156].mxu0 %v3716_v37 }
 0x80e   :  { %4344 = vmatprep.mubr.bf16.mxu0 %v11824_v2 }
 0x815   :  { %4345 = vmatmul.mubr.bf16.gmra.mrb[160].mxu0 %v3717_v36 }
 0x816   :  { %4790 = vmatprep.mubr.bf16.mxu0 %v11823_v11 }
 0x81f   :  { %v6355_v57 = vpop.f32.mrb[92].mxu0 }
 0x820   :  { %v6356_v18 = vpop.f32.mrb[93].mxu0 }
 0x821   :  { %v6357_v42 = vadd.f32 %v6356_v18, %v6355_v57  ;;  %v6358_v12 = vpop.f32.mrb[94].mxu0 }
 0x822   :  { %v6359_v50 = vpop.f32.mrb[95].mxu0 }
 0x823   :  { %v6360_v40 = vadd.f32 %v6359_v50, %v6358_v12  ;;  %v4145_v39 = vadd.f32 %v6357_v42, %v6120_v54 }
 0x825   :  { %v4148_v51 = vadd.f32 %v6360_v40, %v6120_v54 }
 0x827   :  { %v6361_v58 = vpop.f32.mrb[96].mxu0 }
 0x828   :  { %v6362_v1 = vpop.f32.mrb[97].mxu0 }
 0x829   :  { %v6363_v7 = vadd.f32 %v6362_v1, %v6361_v58  ;;  %v6364_v55 = vpop.f32.mrb[98].mxu0 }
 0x82a   :  { %v6365_v47 = vpop.f32.mrb[99].mxu0 }
 0x82b   :  { %v6366_v61 = vadd.f32 %v6365_v47, %v6364_v55  ;;  %v4153_v26 = vadd.f32 %v6363_v7, %v6120_v54 }
 0x82d   :  { %v4156_v34 = vadd.f32 %v6366_v61, %v6120_v54 }
 0x837   :  { %v6367_v48 = vpop.f32.mrb[100].mxu0 }
 0x838   :  { %v6368_v21 = vpop.f32.mrb[101].mxu0 }
 0x839   :  { %v6369_v19 = vadd.f32 %v6368_v21, %v6367_v48  ;;  %v6370_v38 = vpop.f32.mrb[102].mxu0 }
 0x83a   :  { %v6371_v52 = vpop.f32.mrb[103].mxu0 }
 0x83b   :  { %v6372_v20 = vadd.f32 %v6371_v52, %v6370_v38  ;;  %v4161_v37 = vadd.f32 %v6369_v19, %v6120_v54 }
 0x83d   :  { %v4164_v57 = vadd.f32 %v6372_v20, %v6120_v54 }
 0x840   :  { %v6373_v63 = vpop.f32.mrb[104].mxu0 }
 0x841   :  { %v6374_v17 = vpop.f32.mrb[105].mxu0 }
 0x842   :  { %v6375_v60 = vadd.f32 %v6374_v17, %v6373_v63  ;;  %v6376_v10 = vpop.f32.mrb[106].mxu0 }
 0x843   :  { %v6377_v32 = vpop.f32.mrb[107].mxu0 }
 0x844   :  { %v6378_v8 = vadd.f32 %v6377_v32, %v6376_v10  ;;  %v4169_v58 = vadd.f32 %v6375_v60, %v6120_v54 }
 0x846   :  { %v4172_v47 = vadd.f32 %v6378_v8, %v6120_v54 }
 0x880   :  { %v6379_v4 = vpop.f32.mrb[108].mxu0 }
 0x881   :  { %v6380_v14 = vpop.f32.mrb[109].mxu0 }
 0x882   :  { %v6381_v23 = vadd.f32 %v6380_v14, %v6379_v4  ;;  %v6382_v56 = vpop.f32.mrb[110].mxu0 }
 0x883   :  { %v6383_v24 = vpop.f32.mrb[111].mxu0 }
 0x884   :  { %v6384_v31 = vadd.f32 %v6383_v24, %v6382_v56  ;;  %v4177_v52 = vadd.f32 %v6381_v23, %v6120_v54 }
 0x886   :  { %v4180_v10 = vadd.f32 %v6384_v31, %v6120_v54 }
 0x888   :  { %v6385_v25 = vpop.f32.mrb[112].mxu0 }
 0x889   :  { %v6386_v45 = vpop.f32.mrb[113].mxu0 }
 0x88a   :  { %v6387_v43 = vadd.f32 %v6386_v45, %v6385_v25  ;;  %v6388_v3 = vpop.f32.mrb[114].mxu0 }
 0x88b   :  { %v6389_v9 = vpop.f32.mrb[115].mxu0 }
 0x88c   :  { %v6390_v59 = vadd.f32 %v6389_v9, %v6388_v3  ;;  %v4185_v8 = vadd.f32 %v6387_v43, %v6120_v54 }
 0x88e   :  { %v4188_v3 = vadd.f32 %v6390_v59, %v6120_v54 }
 0x890   :  { %v6407_v22 = vpop.f32.mrb[116].mxu0 }
 0x891   :  { %v6408_v6 = vpop.f32.mrb[117].mxu0 }
 0x892   :  { %v6409_v28 = vadd.f32 %v6408_v6, %v6407_v22  ;;  %v6410_v16 = vpop.f32.mrb[118].mxu0 }
 0x893   :  { %v6411_v49 = vpop.f32.mrb[119].mxu0 }
 0x894   :  { %v4226_v41 = vadd.f32 %v6409_v28, %v4145_v39  ;;  %v6412_v46 = vadd.f32 %v6411_v49, %v6410_v16 }
 0x896   :  { %v4229_v33 = vadd.f32 %v6412_v46, %v4148_v51 }
 0x898   :  { %v6413_v62 = vpop.f32.mrb[120].mxu0 }
 0x899   :  { %v6414_v27 = vpop.f32.mrb[121].mxu0 }
 0x89a   :  { %v6415_v5 = vadd.f32 %v6414_v27, %v6413_v62  ;;  %v6416_v30 = vpop.f32.mrb[122].mxu0 }
 0x89b   :  { %v6417_v0 = vpop.f32.mrb[123].mxu0 }
 0x89c   :  { %v10807_v35 = vadd.f32 %v6415_v5, %v4153_v26  ;;  %v6418_v29 = vadd.f32 %v6417_v0, %v6416_v30 }
 0x89e   :  { %v10809_v53 = vadd.f32 %v6418_v29, %v4156_v34 }
 0x8a0   :  { %v6419_v44 = vpop.f32.mrb[124].mxu0 }
 0x8a1   :  { %v6420_v15 = vpop.f32.mrb[125].mxu0 }
 0x8a2   :  { %v6421_v2 = vadd.f32 %v6420_v15, %v6419_v44  ;;  %v6422_v13 = vpop.f32.mrb[126].mxu0 }
 0x8a3   :  { %v6423_v36 = vpop.f32.mrb[127].mxu0 }
 0x8a4   :  { %v10811_v18 = vadd.f32 %v6421_v2, %v4161_v37  ;;  %v6424_v42 = vadd.f32 %v6423_v36, %v6422_v13 }
 0x8a6   :  { %v10813_v12 = vadd.f32 %v6424_v42, %v4164_v57 }
 0x8a8   :  { %v6425_v50 = vpop.f32.mrb[128].mxu0 }
 0x8a9   :  { %v6426_v40 = vpop.f32.mrb[129].mxu0 }
 0x8aa   :  { %v6427_v1 = vadd.f32 %v6426_v40, %v6425_v50  ;;  %v6428_v7 = vpop.f32.mrb[130].mxu0 }
 0x8ab   :  { %v6429_v55 = vpop.f32.mrb[131].mxu0 }
 0x8ac   :  { %v10815_v61 = vadd.f32 %v6427_v1, %v4169_v58  ;;  %v6430_v48 = vadd.f32 %v6429_v55, %v6428_v7 }
 0x8ae   :  { %v10817_v21 = vadd.f32 %v6430_v48, %v4172_v47 }
 0x8b0   :  { %v6431_v19 = vpop.f32.mrb[132].mxu0 }
 0x8b1   :  { %v6432_v38 = vpop.f32.mrb[133].mxu0 }
 0x8b2   :  { %v6433_v20 = vadd.f32 %v6432_v38, %v6431_v19  ;;  %v6434_v63 = vpop.f32.mrb[134].mxu0 }
 0x8b3   :  { %v6435_v17 = vpop.f32.mrb[135].mxu0 }
 0x8b4   :  { %v10819_v32 = vadd.f32 %v6433_v20, %v4177_v52  ;;  %v6436_v4 = vadd.f32 %v6435_v17, %v6434_v63 }
 0x8b6   :  { %v10821_v60 = vadd.f32 %v6436_v4, %v4180_v10 }
 0x8b8   :  { %v6437_v14 = vpop.f32.mrb[136].mxu0 }
 0x8b9   :  { %v6438_v56 = vpop.f32.mrb[137].mxu0 }
 0x8ba   :  { %v6439_v24 = vadd.f32 %v6438_v56, %v6437_v14  ;;  %v6440_v25 = vpop.f32.mrb[138].mxu0 }
 0x8bb   :  { %v6441_v45 = vpop.f32.mrb[139].mxu0 }
 0x8bc   :  { %v10823_v9 = vadd.f32 %v6439_v24, %v4185_v8  ;;  %v6442_v22 = vadd.f32 %v6441_v45, %v6440_v25 }
 0x8be   :  { %v10825_v23 = vadd.f32 %v6442_v22, %v4188_v3 }
 0x8c0   :  { %v6459_v6 = vpop.f32.mrb[140].mxu0 }
 0x8c1   :  { %v6460_v39 = vpop.f32.mrb[141].mxu0 }
 0x8c2   :  { %v6461_v31 = vadd.f32 %v6460_v39, %v6459_v6  ;;  %v6462_v28 = vpop.f32.mrb[142].mxu0 }
 0x8c3   :  { %v6463_v16 = vpop.f32.mrb[143].mxu0 }
 0x8c4   :  { %v6464_v49 = vadd.f32 %v6463_v16, %v6462_v28  ;;  %v6798_v51 = vpop.f32.mrb[132].mxu1  ;;  %v4307_v46 = vadd.f32 %v6461_v31, %v4226_v41 }
 0x8c5   :  { %v4387_v62 = vpop.f32.mrb[133].mxu1 }
 0x8c6   :  { %v4388_v27 = vadd.f32 %v4387_v62, %v4307_v46  ;;  %v6799_v43 = vpop.f32.mrb[134].mxu1  ;;  %v4310_v26 = vadd.f32 %v6464_v49, %v4229_v33 }
 0x8c7   :  { %v4390_v5 = vpop.f32.mrb[135].mxu1 }
 0x8c8   :  { %v4391_v30 = vadd.f32 %v4390_v5, %v4310_v26  ;;  %v6465_v59 = vpop.f32.mrb[144].mxu0  ;;  %v4434_v0 = vmax.f32 %v4388_v27, 0.0 }
 0x8c9   :  { %v6466_v54 = vpop.f32.mrb[145].mxu0 }
 0x8ca   :  { %v4435_v34 = vmax.f32 %v4391_v30, 0.0  ;;  %v6467_v29 = vadd.f32 %v6466_v54, %v6465_v59  ;;  %v6468_v44 = vpop.f32.mrb[146].mxu0 }
 0x8cb   :  { %v6469_v15 = vpop.f32.mrb[147].mxu0 }
 0x8cc   :  { %v10827_v37 = vpack.c.bf16 %v4435_v34, %v4434_v0  ;;  %v4315_v2 = vadd.f32 %v6467_v29, %v10807_v35  ;;  %v6470_v13 = vadd.f32 %v6469_v15, %v6468_v44 }
 0x8ce   :  { %v4396_v36 = vadd.f32 %v6798_v51, %v4315_v2  ;;  %v4318_v41 = vadd.f32 %v6470_v13, %v10809_v53  ;;  %v4454_v20 = vrot.slane %v10827_v37, 5 }
 0x8d0   :  { %v4399_v57 = vadd.f32 %v6799_v43, %v4318_v41  ;;  %v6471_v42 = vpop.f32.mrb[148].mxu0  ;;  %v4436_v40 = vmax.f32 %v4396_v36, 0.0 }
 0x8d1   :  { %v6472_v33 = vpop.f32.mrb[149].mxu0  ;;  %v6802_v50 = vpop.f32.mrb[136].mxu1 }
 0x8d2   :  { %v4437_v58 = vmax.f32 %v4399_v57, 0.0  ;;  %v6473_v1 = vadd.f32 %v6472_v33, %v6471_v42  ;;  %v6474_v7 = vpop.f32.mrb[150].mxu0  ;;  %v4403_v55 = vpop.f32.mrb[137].mxu1 }
 0x8d3   :  { %v6475_v47 = vpop.f32.mrb[151].mxu0  ;;  %v6803_v48 = vpop.f32.mrb[138].mxu1 }
 0x8d4   :  { %v10831_v19 = vpack.c.bf16 %v4437_v58, %v4436_v40  ;;  %v4323_v38 = vadd.f32 %v6473_v1, %v10811_v18  ;;  %v6476_v35 = vadd.f32 %v6475_v47, %v6474_v7  ;;  %v4406_v52 = vpop.f32.mrb[139].mxu1 }
 0x8d6   :  { %v4404_v53 = vadd.f32 %v4403_v55, %v4323_v38  ;;  %v4326_v63 = vadd.f32 %v6476_v35, %v10813_v12  ;;  %v4455_v17 = vrot.slane %v10831_v19, 5  ;;  %v4461_v46 = vrot.slane %v10831_v19, 7 }
 0x8d8   :  { %v4407_v10 = vadd.f32 %v4406_v52, %v4326_v63  ;;  %v6477_v4 = vpop.f32.mrb[152].mxu0  ;;  %v4456_v14 = vsel %vm392_vm7, %v4454_v20, %v4455_v17  ;;  %v4438_v24 = vmax.f32 %v4404_v53, 0.0 }
 0x8d9   :  { %v6478_v56 = vpop.f32.mrb[153].mxu0  ;;  %v6806_v8 = vpop.f32.mrb[140].mxu1  ;;  %4457 = vrot.lane.b32.xlu0 %v4456_v14, %s7105_s20 }
 0x8da   :  { %v4439_v25 = vmax.f32 %v4407_v10, 0.0  ;;  %v6479_v18 = vadd.f32 %v6478_v56, %v6477_v4  ;;  %v6480_v45 = vpop.f32.mrb[154].mxu0  ;;  %v4419_v3 = vpop.f32.mrb[141].mxu1 }
 0x8db   :  { %v6481_v22 = vpop.f32.mrb[155].mxu0  ;;  %v6807_v6 = vpop.f32.mrb[142].mxu1 }
 0x8dc   :  { %v4448_v39 = vpack.c.bf16 %v4439_v25, %v4438_v24  ;;  %v4331_v12 = vadd.f32 %v6479_v18, %v10815_v61  ;;  %v6482_v31 = vadd.f32 %v6481_v22, %v6480_v45  ;;  %v4422_v28 = vpop.f32.mrb[143].mxu1  ;;  %v11825_v24 = vmov 0.0   ;;  %v6944_v22 = vld [vmem:[%s11330_s8 + $0x40] sm:$0xff]  }
 0x8de   :  { %v4462_v16 = vrot.slane %v4448_v39, 7  ;;  %v4412_v49 = vadd.f32 %v6802_v50, %v4331_v12  ;;  %v4334_v51 = vadd.f32 %v6482_v31, %v10817_v21  ;;  %v4467_v44 = vrot.slane %v4448_v39, 4  ;;  %v6946_v39 = vld [vmem:[%s11330_s8 + $0x48] sm:$0xff]   ;;  %v6948_v31 = vld [vmem:[%s11330_s8 + $0x50] sm:$0xff]  }
 0x8df   :  { %v6947_v12 = vld [vmem:[%s11330_s8 + $0x8] sm:$0xff]  }
 0x8e0   :  { %v4415_v62 = vadd.f32 %v6803_v48, %v4334_v51  ;;  %v6483_v27 = vpop.f32.mrb[156].mxu0  ;;  %v4463_v43 = vsel %vm374_vm6, %v4461_v46, %v4462_v16  ;;  %v4440_v5 = vmax.f32 %v4412_v49, 0.0  ;;  %v6950_v16 = vld [vmem:[%s11330_s8 + $0x58] sm:$0xff]   ;;  %v6952_v51 = vld [vmem:[%s11330_s8 + $0x60] sm:$0xff]  }
 0x8e1   :  { %v6484_v26 = vpop.f32.mrb[157].mxu0  ;;  %4464 = vrot.lane.b32.xlu1 %v4463_v43, %s7105_s20  ;;  %v6951_v49 = vld [vmem:[%s11330_s8 + $0x18] sm:$0xff]   ;;  %v6953_v46 = vld [vmem:[%s11330_s8 + $0x20] sm:$0xff]   ;;  %v6956_v43 = vld [vmem:[%s11330_s8 + $0x70] sm:$0xff]  }
 0x8e2   :  { %v4441_v30 = vmax.f32 %v4415_v62, 0.0  ;;  %v6485_v59 = vadd.f32 %v6484_v26, %v6483_v27  ;;  %v6486_v54 = vpop.f32.mrb[158].mxu0  ;;  %v6954_v62 = vld [vmem:[%s11330_s8 + $0x68] sm:$0xff]   ;;  %v6957_v26 = vld [vmem:[%s11330_s8 + $0x30] sm:$0xff]  }
 0x8e3   :  { %v6487_v61 = vpop.f32.mrb[159].mxu0  ;;  %v6955_v27 = vld [vmem:[%s11330_s8 + $0x28] sm:$0xff]  }
 0x8e4   :  { %v4449_v0 = vpack.c.bf16 %v4441_v30, %v4440_v5  ;;  %v4339_v34 = vadd.f32 %v6485_v59, %v10819_v32  ;;  %v6488_v29 = vadd.f32 %v6487_v61, %v6486_v54  ;;  %v6958_v5 = vld [vmem:[%s11330_s8 + $0x78] sm:$0xff]   ;;  %v6960_v59 = vld [vmem:[%s11330_s8 + $0xc0] sm:$0xff]  }
 0x8e5   :  { %v6959_v30 = vld [vmem:[%s11330_s8 + $0x38] sm:$0xff]   ;;  %v6961_v54 = vld [vmem:[%s11330_s8 + $0x80] sm:$0xff]  }
 0x8e6   :  { %v4420_v21 = vadd.f32 %v4419_v3, %v4339_v34  ;;  %v4342_v15 = vadd.f32 %v6488_v29, %v10821_v60  ;;  %v4470_v2 = vrot.slane %v4449_v0, 1  ;;  %v4468_v13 = vrot.slane %v4449_v0, 4  ;;  %v6962_v61 = vld [vmem:[%s11330_s8 + $0x140] sm:$0xff]   ;;  %v6965_v34 = vld [vmem:[%s11330_s8 + $0x88] sm:$0xff]   ;;  %v6968_v29 = vld [vmem:[%s11330_s8 + $0xd0] sm:$0xff]  }
 0x8e7   :  { %v4474_v47 = vrot.slane %v4449_v0, 6  ;;  %v6964_v0 = vld [vmem:[%s11330_s8 + $0xc8] sm:$0xff]  }
 0x8e8   :  { %v4423_v36 = vadd.f32 %v4422_v28, %v4342_v15  ;;  %v6489_v41 = vpop.f32.mrb[160].mxu0  ;;  %4471 = vrot.lane.b32.xlu0 %v4470_v2, %s7105_s20  ;;  %v4469_v57 = vsel %vm364_vm5, %v4467_v44, %v4468_v13  ;;  %v4442_v33 = vmax.f32 %v4420_v21, 0.0  ;;  %v6949_v28 = vld [vmem:[%s11330_s8 + $0x10] sm:$0xff]   ;;  %v6972_v21 = vld [vmem:[%s11330_s8 + $0xd8] sm:$0xff]   ;;  %v6976_v2 = vld [vmem:[%s11330_s8 + $0xe0] sm:$0xff]  }
 0x8e9   :  { %v6490_v42 = vpop.f32.mrb[161].mxu0  ;;  %v6969_v44 = vld [vmem:[%s11330_s8 + $0x90] sm:$0xff]   ;;  %v6973_v15 = vld [vmem:[%s11330_s8 + $0x98] sm:$0xff]   ;;  %v6977_v13 = vld [vmem:[%s11330_s8 + $0xa0] sm:$0xff]  }
 0x8ea   :  { %v4443_v50 = vmax.f32 %v4423_v36, 0.0  ;;  %v6491_v40 = vadd.f32 %v6490_v42, %v6489_v41  ;;  %v6492_v58 = vpop.f32.mrb[162].mxu0  ;;  %v6980_v36 = vld [vmem:[%s11330_s8 + $0xe8] sm:$0xff]   ;;  %v6985_v42 = vld [vmem:[%s11330_s8 + $0xb0] sm:$0xff]  }
 0x8eb   :  { %v6493_v1 = vpop.f32.mrb[163].mxu0  ;;  %v6981_v41 = vld [vmem:[%s11330_s8 + $0xa8] sm:$0xff]  }
 0x8ec   :  { %v4450_v32 = vpack.c.bf16 %v4443_v50, %v4442_v33  ;;  %v4347_v7 = vadd.f32 %v6491_v40, %v10823_v9  ;;  %v6494_v55 = vadd.f32 %v6493_v1, %v6492_v58  ;;  %v4459_v9 = vrot.slane %v10831_v19, 2  ;;  %v6988_v33 = vld [vmem:[%s11330_s8 + $0xf8] sm:$0xff]  }
 0x8ed   :  { %v6989_v50 = vld [vmem:[%s11330_s8 + $0xb8] sm:$0xff]  }
 0x8ee   :  { %v4428_v60 = vadd.f32 %v6806_v8, %v4347_v7  ;;  %v4350_v48 = vadd.f32 %v6494_v55, %v10825_v23  ;;  %v4477_v38 = vrot.slane %v4450_v32, 3  ;;  %v4475_v35 = vrot.slane %v4450_v32, 6  ;;  %v6943_v8 = vld [vmem:[%s11329_s7] sm:$0x1f]   ;;  %s7107_s7 = smov [#allocation2]  }
 0x8ef   :  { %s6025_s18 = sshll.u32 %s7107_s7, 4  ;;  %s6026_s18 = int_to_ptr.vmem [resolvable:$true] %s6025_s18 }
 0x8f0   :  { %v4431_v52 = vadd.f32 %v6807_v6, %v4350_v48  ;;  %4478 = vrot.lane.b32.xlu1 %v4477_v38, %s7105_s20  ;;  %v4476_v20 = vsel %vm346_vm2, %v4474_v47, %v4475_v35  ;;  %v4444_v53 = vmax.f32 %v4428_v60, 0.0  ;;  %v6945_v6 = vld [vmem:[%s11330_s8] sm:$0xff]   ;;  %s7057_s1 = scalar_lea.vmem %s6026_s18, 32  ;;  %p7062_p1 = scmp.lt.s32.totalorder %s6026_s18, %s6026_s18 }
 0x8f1   :  { %p7058_p0 = scmp.ne.s32.totalorder %s6026_s18, %s7057_s1  ;;  %p7063_p2 = scmp.lt.s32.totalorder %s7057_s1, %s7057_s1 }
 0x8f2   :  { %v4445_v63 = vmax.f32 %v4431_v52, 0.0 }
 0x8f3   :  { %p7064_p3 = por %p7063_p2, %p7062_p1 }
 0x8f4   :  { %v4451_v17 = vpack.c.bf16 %v4445_v63, %v4444_v53 }
 0x8f5   :  { %p7065_p4 = pnand %p7064_p3, %p7058_p0 }
 0x94b   :  { %v4458_v10 = vpop.permute.xlu0 %4457 }
 0x94c   :  { %v4482_v4 = vsel %vm2627_vm9, %v10827_v37, %v4458_v10  ;;  %v4713_v37 = vsel %vm188_vm0, %v4451_v17, 0 }
 0x94d   :  { %v4704_v23 = vsel %vm188_vm0, %v4482_v4, 0 }
 0x953   :  { %v4465_v14 = vpop.permute.xlu1 %4464 }
 0x954   :  { %v4485_v56 = vsel %vm2627_vm9, %v4459_v9, %v4465_v14 }
 0x955   :  { %6178 = vmatprep.subr.msk.bf16.mxu1 %vm188_vm0, %v4485_v56 }
 0x956   :  { %4716 = vmatpush1.bf16.msra.mxu1 %v4704_v23 }
 0x957   :  { %6808 = vmatprep.subr.bf16.mxu1 %v11825_v24 }
 0x959   :  { %6179 = vmatmul.mubr.msk.bf16.vlgmr.msra.gmra.mrb[144].mxu1 %vm4700_vm3, %v6943_v8 }
 0x95a   :  { %6809 = vmatpush3.bf16.msra.mxu1 %v4713_v37  ;;  %6810 = vmatprep.mubr.msk.bf16.mxu1 %vm7101_vm8, %v11825_v24  ;;  %v4472_v19 = vpop.permute.xlu0 %4471 }
 0x95b   :  { %v4488_v25 = vsel %vm2627_vm9, %v4469_v57, %v4472_v19  ;;  %6527 = vmatprep.subr.bf16.mxu1 %v6960_v59  ;;  %v6984_v57 = vld [vmem:[%s11330_s8 + $0xf0] sm:$0xff]   ;;  %v6992_v19 = vld [vmem:[%s11330_s8 + $0x1c0] sm:$0xff]  }
 0x95c   :  { %v4708_v3 = vsel %vm188_vm0, %v4488_v25, 0 }
 0x961   :  { %6811 = vmatmul.mubr.msk.bf16.vlgmr.msra.gmra.mrb[148].mxu1 %vm4700_vm3, %v6943_v8 }
 0x962   :  { %v4479_v18 = vpop.permute.xlu1 %4478  ;;  %6528 = vmatpush3.bf16.msra.mxu1 %v6961_v54 }
 0x963   :  { %v4491_v45 = vsel %vm2627_vm9, %v4476_v20, %v4479_v18  ;;  %6529 = vmatprep.subr.bf16.mxu1 %v6964_v0 }
 0x964   :  { %6180 = vmatprep.subr.msk.bf16.mxu0 %vm188_vm0, %v4491_v45 }
 0x965   :  { %4759 = vmatpush1.bf16.msra.mxu0 %v4708_v3 }
 0x966   :  { %6505 = vmatprep.subr.bf16.mxu0 %v6944_v22  ;;  %6530 = vmatpush3.bf16.msra.mxu1 %v6965_v34 }
 0x967   :  { %6531 = vmatprep.subr.bf16.mxu1 %v6968_v29 }
 0x968   :  { %6181 = vmatmul.mubr.msk.bf16.vlgmr.msra.gmra.mrb[164].mxu0 %vm4700_vm3, %v6943_v8 }
 0x969   :  { %6506 = vmatpush3.bf16.msra.mxu0 %v6945_v6 }
 0x96a   :  { %6507 = vmatprep.subr.bf16.mxu0 %v6946_v39  ;;  %6532 = vmatpush3.bf16.msra.mxu1 %v6969_v44 }
 0x96b   :  { %6533 = vmatprep.subr.bf16.mxu1 %v6972_v21 }
 0x96d   :  { %6508 = vmatpush3.bf16.msra.mxu0 %v6947_v12 }
 0x96e   :  { %6509 = vmatprep.subr.bf16.mxu0 %v6948_v31  ;;  %6534 = vmatpush3.bf16.msra.mxu1 %v6973_v15 }
 0x96f   :  { %6535 = vmatprep.subr.bf16.mxu1 %v6976_v2 }
 0x971   :  { %6510 = vmatpush3.bf16.msra.mxu0 %v6949_v28 }
 0x972   :  { %6511 = vmatprep.subr.bf16.mxu0 %v6950_v16  ;;  %6536 = vmatpush3.bf16.msra.mxu1 %v6977_v13 }
 0x973   :  { %6537 = vmatprep.subr.bf16.mxu1 %v6980_v36 }
 0x975   :  { %6512 = vmatpush3.bf16.msra.mxu0 %v6951_v49 }
 0x976   :  { %6513 = vmatprep.subr.bf16.mxu0 %v6952_v51  ;;  %6538 = vmatpush3.bf16.msra.mxu1 %v6981_v41  ;;  %v6963_v41 = vld [vmem:[%s11330_s8 + $0x100] sm:$0xff]  }
 0x977   :  { %6539 = vmatprep.subr.bf16.mxu1 %v6984_v57 }
 0x979   :  { %6514 = vmatpush3.bf16.msra.mxu0 %v6953_v46 }
 0x97a   :  { %6515 = vmatprep.subr.bf16.mxu0 %v6954_v62  ;;  %6540 = vmatpush3.bf16.msra.mxu1 %v6985_v42 }
 0x97b   :  { %6541 = vmatprep.subr.bf16.mxu1 %v6988_v33 }
 0x97d   :  { %6516 = vmatpush3.bf16.msra.mxu0 %v6955_v27 }
 0x97e   :  { %6517 = vmatprep.subr.bf16.mxu0 %v6956_v43  ;;  %6542 = vmatpush3.bf16.msra.mxu1 %v6989_v50 }
 0x97f   :  { %6571 = vmatprep.subr.bf16.mxu1 %v6992_v19  ;;  %v6991_v19 = vld [vmem:[%s11330_s8 + $0x138] sm:$0xff]  }
 0x981   :  { %6518 = vmatpush3.bf16.msra.mxu0 %v6957_v26 }
 0x982   :  { %6519 = vmatprep.subr.bf16.mxu0 %v6958_v5 }
 0x985   :  { %6520 = vmatpush3.bf16.msra.mxu0 %v6959_v30 }
 0x986   :  { %6549 = vmatprep.subr.bf16.mxu0 %v6962_v61 }
 0xa2c   :  { %v4749_v40 = vpop.f32.mrb[144].mxu1 }
 0xa2d   :  { %v4751_v58 = vpop.f32.mrb[145].mxu1 }
 0xa2e   :  { %v4753_v1 = vpop.f32.mrb[146].mxu1 }
 0xa2f   :  { %v4842_v32 = vpack.c.bf16 %v4753_v1, %v4749_v40  ;;  %v4755_v7 = vpop.f32.mrb[147].mxu1 }
 0xa30   :  { %v10968_v55 = vpack.c.bf16 %v4755_v7, %v4751_v58  ;;  %v6966_v58 = vld [vmem:[%s11330_s8 + $0x148] sm:$0xff]  }
 0xa31   :  { %v4875_v47 = vrot.slane %v4842_v32, 1  ;;  %v4907_v60 = vrot.slane %v4842_v32, 3  ;;  %v4890_v48 = vrot.slane %v4842_v32, 2  ;;  %v4923_v38 = vrot.slane %v4842_v32, 4 }
 0xa32   :  { %v4876_v35 = vrot.slane %v10968_v55, 1  ;;  %v4891_v52 = vrot.slane %v10968_v55, 2  ;;  %v4908_v20 = vrot.slane %v10968_v55, 3  ;;  %v4850_v53 = vrot.slane %v10968_v55, 7 }
 0xa33   :  { %v4880_v63 = vsel %vm374_vm6, %v4875_v47, %v10968_v55  ;;  %v4924_v39 = vrot.slane %v10968_v55, 4 }
 0xa34   :  { %v4835_v17 = vpop.f32.mrb[148].mxu1  ;;  %v4913_v10 = vsel %vm374_vm6, %v4907_v60, %v4891_v52  ;;  %v4859_v4 = vsel %vm374_vm6, %v4842_v32, %v4850_v53  ;;  %v4895_v9 = vsel %vm374_vm6, %v4890_v48, %v4876_v35  ;;  %v4929_v14 = vsel %vm374_vm6, %v4923_v38, %v4908_v20 }
 0xa35   :  { %v6812_v56 = vpop.f32.mrb[149].mxu1 }
 0xa36   :  { %v4838_v23 = vpop.f32.mrb[150].mxu1  ;;  %v6983_v56 = vld [vmem:[%s11330_s8 + $0x128] sm:$0xff]  }
 0xa37   :  { %v10980_v8 = vpack.c.bf16 %v4838_v23, %v4835_v17  ;;  %v6813_v37 = vpop.f32.mrb[151].mxu1  ;;  %v6974_v17 = vld [vmem:[%s11330_s8 + $0x158] sm:$0xff]   ;;  %v6986_v23 = vld [vmem:[%s11330_s8 + $0x170] sm:$0xff]  }
 0xa38   :  { %v6990_v37 = vld [vmem:[%s11330_s8 + $0x178] sm:$0xff]  }
 0xa39   :  { %v4878_v6 = vrot.slane %v10980_v8, 7  ;;  %v4911_v31 = vrot.slane %v10980_v8, 1  ;;  %v4856_v28 = vrot.slane %v10980_v8, 6  ;;  %v4927_v16 = vrot.slane %v10980_v8, 2 }
 0xa3b   :  { %v4792_v25 = vpop.f32.mrb[164].mxu0 }
 0xa3c   :  { %v4794_v18 = vpop.f32.mrb[165].mxu0 }
 0xa3d   :  { %v4796_v45 = vpop.f32.mrb[166].mxu0 }
 0xa3e   :  { %v4844_v3 = vpack.c.bf16 %v4796_v45, %v4792_v25  ;;  %v4798_v22 = vpop.f32.mrb[167].mxu0  ;;  %v6994_v25 = vld [vmem:[%s11330_s8 + $0x240] sm:$0xff]  }
 0xa3f   :  { %v4845_v12 = vpack.c.bf16 %v4798_v22, %v4794_v18 }
 0xa40   :  { %v4851_v49 = vrot.slane %v4844_v3, 7  ;;  %v4882_v51 = vsel %vm374_vm6, %v4876_v35, %v4844_v3  ;;  %v4877_v46 = vrot.slane %v4844_v3, 1  ;;  %v4892_v62 = vrot.slane %v4844_v3, 2  ;;  %v6967_v35 = vld [vmem:[%s11330_s8 + $0x108] sm:$0xff]  }
 0xa41   :  { %v4852_v27 = vrot.slane %v4845_v12, 7  ;;  %v4893_v43 = vrot.slane %v4845_v12, 1  ;;  %v4909_v26 = vrot.slane %v4844_v3, 3  ;;  %v4910_v5 = vrot.slane %v4845_v12, 2 }
 0xa42   :  { %v4886_v30 = vsel %vm346_vm2, %v4880_v63, %v4851_v49  ;;  %v4885_v59 = vsel %vm374_vm6, %v4877_v46, %v4845_v12  ;;  %v4919_v54 = vsel %vm346_vm2, %v4913_v10, %v4877_v46  ;;  %v4915_v61 = vsel %vm374_vm6, %v4908_v20, %v4892_v62  ;;  %v6970_v20 = vld [vmem:[%s11330_s8 + $0x150] sm:$0xff]   ;;  %v6975_v10 = vld [vmem:[%s11330_s8 + $0x118] sm:$0xff]  }
 0xa43   :  { %4944 = vrot.lane.b32.xlu0 %v4886_v30, %s7105_s20  ;;  %v4887_v0 = vsel %vm346_vm2, %v4882_v51, %v4852_v27  ;;  %v4889_v34 = vsel %vm346_vm2, %v4885_v59, %v4878_v6  ;;  %v4920_v29 = vsel %vm346_vm2, %v4915_v61, %v4893_v43  ;;  %v4918_v44 = vsel %vm374_vm6, %v4909_v26, %v4910_v5  ;;  %v6971_v63 = vld [vmem:[%s11330_s8 + $0x110] sm:$0xff]   ;;  %v6996_v6 = vld [vmem:[%s11330_s8 + $0x1c8] sm:$0xff]   ;;  %v7004_v59 = vld [vmem:[%s11330_s8 + $0x1d8] sm:$0xff]  }
 0xa44   :  { %4946 = vrot.lane.b32.xlu1 %v4887_v0, %s7105_s20  ;;  %v4922_v21 = vsel %vm346_vm2, %v4918_v44, %v4911_v31  ;;  %v4855_v15 = vrot.slane %v4845_v12, 6  ;;  %v4862_v2 = vsel %vm374_vm6, %v10968_v55, %v4851_v49  ;;  %v4854_v13 = vrot.slane %v4844_v3, 6  ;;  %v6997_v51 = vld [vmem:[%s11330_s8 + $0x188] sm:$0xff]   ;;  %v7003_v61 = vld [vmem:[%s11330_s8 + $0x210] sm:$0xff]   ;;  %v7006_v0 = vld [vmem:[%s11330_s8 + $0x258] sm:$0xff]  }
 0xa45   :  { %v4901_v36 = vsel %vm346_vm2, %v4895_v9, %v4844_v3  ;;  %v4865_v57 = vsel %vm374_vm6, %v4844_v3, %v4852_v27  ;;  %v4900_v42 = vsel %vm374_vm6, %v4892_v62, %v4893_v43  ;;  %v4897_v33 = vsel %vm374_vm6, %v4891_v52, %v4877_v46  ;;  %v6979_v9 = vld [vmem:[%s11330_s8 + $0x120] sm:$0xff]   ;;  %v6999_v27 = vld [vmem:[%s11330_s8 + $0x208] sm:$0xff]   ;;  %v7002_v43 = vld [vmem:[%s11330_s8 + $0x250] sm:$0xff]  }
 0xa46   :  { %v4870_v50 = vsel %vm346_vm2, %v4862_v2, %v4855_v15  ;;  %v4867_v40 = vsel %vm346_vm2, %v4859_v4, %v4854_v13  ;;  %v4873_v1 = vsel %vm346_vm2, %v4865_v57, %v4856_v28  ;;  %v11019_v32 = vsel %vm346_vm2, %v4900_v42, %v10980_v8  ;;  %v6978_v4 = vld [vmem:[%s11330_s8 + $0x160] sm:$0xff]   ;;  %v6987_v8 = vld [vmem:[%s11330_s8 + $0x130] sm:$0xff]   ;;  %v6998_v28 = vld [vmem:[%s11330_s8 + $0x248] sm:$0xff]  }
 0xa47   :  { %4948 = vrot.lane.b32.xlu0 %v4889_v34, %s7105_s20  ;;  %5613 = vmatprep.mubr.bf16.mxu0 %v4870_v50  ;;  %v11023_v7 = vsel %vm346_vm2, %v4897_v33, %v4845_v12  ;;  %v4931_v55 = vsel %vm374_vm6, %v4924_v39, %v4909_v26  ;;  %v4925_v47 = vrot.slane %v4844_v3, 4  ;;  %v4926_v60 = vrot.slane %v4845_v12, 3  ;;  %v6993_v3 = vld [vmem:[%s11330_s8 + $0x180] sm:$0xff]   ;;  %v7005_v34 = vld [vmem:[%s11330_s8 + $0x198] sm:$0xff]   ;;  %v7012_v2 = vld [vmem:[%s11330_s8 + $0x1e8] sm:$0xff]  }
 0xa48   :  { %4957 = vrot.lane.b32.xlu1 %v4919_v54, %s7105_s20  ;;  %5614 = vmatmul.mubr.bf16.vlgmr.msra.gmra.mrb[168].mxu0 %v4867_v40  ;;  %v11028_v48 = vsel %vm346_vm2, %v4931_v55, %v4910_v5  ;;  %v11031_v38 = vsel %vm346_vm2, %v4929_v14, %v4892_v62  ;;  %v6982_v14 = vld [vmem:[%s11330_s8 + $0x168] sm:$0xff]   ;;  %v6995_v12 = vld [vmem:[%s11330_s8 + $0x200] sm:$0xff]   ;;  %v7000_v62 = vld [vmem:[%s11330_s8 + $0x1d0] sm:$0xff]  }
 0xa49   :  { %5693 = vmatprep.mubr.bf16.mxu0 %v4901_v36  ;;  %6550 = vmatpush3.bf16.msra.mxu0 %v6963_v41  ;;  %v4934_v52 = vsel %vm374_vm6, %v4925_v47, %v4926_v60  ;;  %v7001_v5 = vld [vmem:[%s11330_s8 + $0x190] sm:$0xff]   ;;  %v7007_v44 = vld [vmem:[%s11330_s8 + $0x218] sm:$0xff]   ;;  %v7009_v15 = vld [vmem:[%s11330_s8 + $0x1a0] sm:$0xff]  }
 0xa4a   :  { %6551 = vmatprep.subr.bf16.mxu0 %v6966_v58  ;;  %v11041_v53 = vsel %vm346_vm2, %v4934_v52, %v4927_v16  ;;  %v7011_v13 = vld [vmem:[%s11330_s8 + $0x220] sm:$0xff]   ;;  %v7014_v36 = vld [vmem:[%s11330_s8 + $0x268] sm:$0xff]   ;;  %v7016_v57 = vld [vmem:[%s11330_s8 + $0x1f0] sm:$0xff]  }
 0xa4b   :  { %4959 = vrot.lane.b32.xlu0 %v4920_v29, %s7105_s20  ;;  %v7008_v29 = vld [vmem:[%s11330_s8 + $0x1e0] sm:$0xff]   ;;  %v7013_v41 = vld [vmem:[%s11330_s8 + $0x1a8] sm:$0xff]   ;;  %v7018_v33 = vld [vmem:[%s11330_s8 + $0x270] sm:$0xff]  }
 0xa4c   :  { %4961 = vrot.lane.b32.xlu1 %v4922_v21, %s7105_s20  ;;  %v7010_v21 = vld [vmem:[%s11330_s8 + $0x260] sm:$0xff]   ;;  %v7015_v42 = vld [vmem:[%s11330_s8 + $0x228] sm:$0xff]   ;;  %v7017_v50 = vld [vmem:[%s11330_s8 + $0x1b0] sm:$0xff]  }
 0xa4d   :  { %6552 = vmatpush3.bf16.msra.mxu0 %v6967_v35  ;;  %v7020_v40 = vld [vmem:[%s11330_s8 + $0x1f8] sm:$0xff]   ;;  %v7019_v58 = vld [vmem:[%s11330_s8 + $0x230] sm:$0xff]   ;;  %v7024_v55 = vld [vmem:[%s11330_s8 + $0x2c0] sm:$0xff]  }
 0xa4e   :  { %6553 = vmatprep.subr.bf16.mxu0 %v6970_v20  ;;  %v7023_v47 = vld [vmem:[%s11330_s8 + $0x238] sm:$0xff]   ;;  %v7025_v60 = vld [vmem:[%s11330_s8 + $0x280] sm:$0xff]   ;;  %v7027_v35 = vld [vmem:[%s11330_s8 + $0x2c8] sm:$0xff]  }
 0xa4f   :  { %v7026_v52 = vld [vmem:[%s11330_s8 + $0x300] sm:$0xff]  }
 0xa51   :  { %6554 = vmatpush3.bf16.msra.mxu0 %v6971_v63  ;;  %v7028_v63 = vld [vmem:[%s11330_s8 + $0x288] sm:$0xff]  }
 0xa52   :  { %6555 = vmatprep.subr.bf16.mxu0 %v6974_v17  ;;  %v7030_v17 = vld [vmem:[%s11330_s8 + $0x2d0] sm:$0xff]  }
 0xa55   :  { %6556 = vmatpush3.bf16.msra.mxu0 %v6975_v10  ;;  %v7033_v10 = vld [vmem:[%s11330_s8 + $0x2d8] sm:$0xff]  }
 0xa56   :  { %6557 = vmatprep.subr.bf16.mxu0 %v6978_v4  ;;  %v7032_v4 = vld [vmem:[%s11330_s8 + $0x310] sm:$0xff]  }
 0xa59   :  { %6558 = vmatpush3.bf16.msra.mxu0 %v6979_v9  ;;  %v7034_v9 = vld [vmem:[%s11330_s8 + $0x298] sm:$0xff]  }
 0xa5a   :  { %6559 = vmatprep.subr.bf16.mxu0 %v6982_v14  ;;  %v7036_v14 = vld [vmem:[%s11330_s8 + $0x2e0] sm:$0xff]  }
 0xa5d   :  { %6560 = vmatpush3.bf16.msra.mxu0 %v6983_v56  ;;  %v7035_v56 = vld [vmem:[%s11330_s8 + $0x318] sm:$0xff]  }
 0xa5e   :  { %6561 = vmatprep.subr.bf16.mxu0 %v6986_v23  ;;  %v7037_v23 = vld [vmem:[%s11330_s8 + $0x2a0] sm:$0xff]  }
 0xa61   :  { %6562 = vmatpush3.bf16.msra.mxu0 %v6987_v8  ;;  %v7038_v8 = vld [vmem:[%s11330_s8 + $0x2e8] sm:$0xff]  }
 0xa62   :  { %6563 = vmatprep.subr.bf16.mxu0 %v6990_v37  ;;  %v7039_v37 = vld [vmem:[%s11330_s8 + $0x2a8] sm:$0xff]  }
 0xa65   :  { %6564 = vmatpush3.bf16.msra.mxu0 %v6991_v19  ;;  %v7041_v19 = vld [vmem:[%s11330_s8 + $0x2b0] sm:$0xff]  }
 0xa66   :  { %6593 = vmatprep.subr.bf16.mxu0 %v6994_v25  ;;  %v7042_v25 = vld [vmem:[%s11330_s8 + $0x2f8] sm:$0xff]  }
 0xab5   :  { %v4945_v18 = vpop.permute.xlu0 %4944 }
 0xab6   :  { %v4947_v45 = vpop.permute.xlu1 %4946  ;;  %v4968_v39 = vsel %vm2627_vm9, %v4873_v1, %v4945_v18  ;;  %v7022_v1 = vld [vmem:[%s11330_s8 + $0x278] sm:$0xff]  }
 0xab7   :  { %v4950_v22 = vsel %vm2627_vm9, %v4945_v18, %v4947_v45 }
 0xab8   :  { %5653 = vmatprep.mubr.bf16.mxu1 %v4950_v22 }
 0xab9   :  { %v4949_v31 = vpop.permute.xlu0 %4948  ;;  %5654 = vmatmul.mubr.bf16.vlgmr.msra.gmra.mrb[152].mxu1 %v4968_v39  ;;  %v7044_v39 = vld [vmem:[%s11332_s10] sm:$0xff]  }
 0xaba   :  { %v4951_v16 = vsel %vm2627_vm9, %v4947_v45, %v4949_v31  ;;  %6572 = vmatpush3.bf16.msra.mxu1 %v6993_v3  ;;  %v11096_v49 = vpop.permute.xlu1 %4957  ;;  %v7047_v31 = vld [vmem:[%s11332_s10 + $0x18] sm:$0xff]  }
 0xabb   :  { %5694 = vmatmul.mubr.bf16.vlgmr.msra.gmra.mrb[172].mxu0 %v4951_v16  ;;  %6573 = vmatprep.subr.bf16.mxu1 %v6996_v6  ;;  %v4971_v46 = vsel %vm2627_vm9, %v11019_v32, %v11096_v49  ;;  %v7021_v32 = vld [vmem:[%s11330_s8 + $0x1b8] sm:$0xff]   ;;  %v7049_v16 = vld [vmem:[%s11332_s10 + $0x28] sm:$0xff]  }
 0xabc   :  { %6594 = vmatpush3.bf16.msra.mxu0 %v6995_v12  ;;  %5733 = vmatprep.mubr.bf16.mxu1 %v4971_v46  ;;  %v7045_v12 = vld [vmem:[%s11332_s10 + $0x8] sm:$0xff]   ;;  %v7052_v46 = vld [vmem:[%s11332_s10 + $0x40] sm:$0xff]  }
 0xabd   :  { %6595 = vmatprep.subr.bf16.mxu0 %v6998_v28  ;;  %v4960_v26 = vpop.permute.xlu0 %4959  ;;  %v7048_v28 = vld [vmem:[%s11332_s10 + $0x20] sm:$0xff]  }
 0xabe   :  { %6574 = vmatpush3.bf16.msra.mxu1 %v6997_v51  ;;  %v4962_v30 = vpop.permute.xlu1 %4961  ;;  %v4963_v20 = vsel %vm2627_vm9, %v11096_v49, %v4960_v26  ;;  %v7050_v49 = vld [vmem:[%s11332_s10 + $0x30] sm:$0xff]   ;;  %v7051_v51 = vld [vmem:[%s11332_s10 + $0x38] sm:$0xff]  }
 0xabf   :  { %6575 = vmatprep.subr.bf16.mxu1 %v7000_v62  ;;  %v4964_v54 = vsel %vm2627_vm9, %v4960_v26, %v4962_v30  ;;  %v7053_v62 = vld [vmem:[%s11332_s10 + $0x48] sm:$0xff]   ;;  %v6183_v26 = vld [vmem:[%s11331_s9] ss:$0 sm:$0xff] }
 0xac0   :  { %6596 = vmatpush3.bf16.msra.mxu0 %v6999_v27  ;;  %5773 = vmatprep.mubr.bf16.mxu0 %v4964_v54  ;;  %v7054_v27 = vld [vmem:[%s11332_s10 + $0x50] sm:$0xff]  }
 0xac1   :  { %6597 = vmatprep.subr.bf16.mxu0 %v7002_v43  ;;  %v7055_v43 = vld [vmem:[%s11332_s10 + $0x58] sm:$0xff]  }
 0xac2   :  { %6576 = vmatpush3.bf16.msra.mxu1 %v7001_v5 }
 0xac3   :  { %6577 = vmatprep.subr.bf16.mxu1 %v7004_v59 }
 0xac4   :  { %6598 = vmatpush3.bf16.msra.mxu0 %v7003_v61 }
 0xac5   :  { %6599 = vmatprep.subr.bf16.mxu0 %v7006_v0 }
 0xac6   :  { %6578 = vmatpush3.bf16.msra.mxu1 %v7005_v34 }
 0xac7   :  { %6579 = vmatprep.subr.bf16.mxu1 %v7008_v29 }
 0xac8   :  { %6600 = vmatpush3.bf16.msra.mxu0 %v7007_v44 }
 0xac9   :  { %6601 = vmatprep.subr.bf16.mxu0 %v7010_v21 }
 0xaca   :  { %6580 = vmatpush3.bf16.msra.mxu1 %v7009_v15 }
 0xacb   :  { %6581 = vmatprep.subr.bf16.mxu1 %v7012_v2 }
 0xacc   :  { %6602 = vmatpush3.bf16.msra.mxu0 %v7011_v13 }
 0xacd   :  { %6603 = vmatprep.subr.bf16.mxu0 %v7014_v36 }
 0xace   :  { %6582 = vmatpush3.bf16.msra.mxu1 %v7013_v41 }
 0xacf   :  { %6583 = vmatprep.subr.bf16.mxu1 %v7016_v57 }
 0xad0   :  { %6604 = vmatpush3.bf16.msra.mxu0 %v7015_v42 }
 0xad1   :  { %6605 = vmatprep.subr.bf16.mxu0 %v7018_v33 }
 0xad2   :  { %6584 = vmatpush3.bf16.msra.mxu1 %v7017_v50 }
 0xad3   :  { %6585 = vmatprep.subr.bf16.mxu1 %v7020_v40 }
 0xad4   :  { %6606 = vmatpush3.bf16.msra.mxu0 %v7019_v58 }
 0xad5   :  { %6607 = vmatprep.subr.bf16.mxu0 %v7022_v1 }
 0xad6   :  { %6586 = vmatpush3.bf16.msra.mxu1 %v7021_v32 }
 0xad7   :  { %6615 = vmatprep.subr.bf16.mxu1 %v7024_v55 }
 0xad8   :  { %6608 = vmatpush3.bf16.msra.mxu0 %v7023_v47 }
 0xad9   :  { %5734 = vmatmul.mubr.bf16.vlgmr.msra.gmra.mrb[156].mxu1 %v11023_v7  ;;  %6814 = vmatprep.subr.bf16.mxu0 %v11825_v24  ;;  %v7029_v7 = vld [vmem:[%s11330_s8 + $0x308] sm:$0xff]  }
 0xada   :  { %6616 = vmatpush3.bf16.msra.mxu1 %v7025_v60  ;;  %5813 = vmatprep.mubr.bf16.mxu1 %v11028_v48  ;;  %v7031_v48 = vld [vmem:[%s11330_s8 + $0x290] sm:$0xff]  }
 0xadb   :  { %5774 = vmatmul.mubr.bf16.vlgmr.msra.gmra.mrb[176].mxu0 %v4963_v20  ;;  %6617 = vmatprep.subr.bf16.mxu1 %v7027_v35 }
 0xadc   :  { %6815 = vmatpush3.bf16.msra.mxu0 %v7026_v52  ;;  %6822 = vmatprep.mubr.msk.bf16.mxu0 %vm7101_vm8, %v11825_v24 }
 0xadd   :  { %6816 = vmatprep.subr.bf16.mxu0 %v11825_v24 }
 0xade   :  { %6618 = vmatpush3.bf16.msra.mxu1 %v7028_v63 }
 0xadf   :  { %6619 = vmatprep.subr.bf16.mxu1 %v7030_v17 }
 0xae0   :  { %6817 = vmatpush3.bf16.msra.mxu0 %v7029_v7 }
 0xae1   :  { %6818 = vmatprep.subr.bf16.mxu0 %v11825_v24 }
 0xae2   :  { %6620 = vmatpush3.bf16.msra.mxu1 %v7031_v48 }
 0xae3   :  { %6621 = vmatprep.subr.bf16.mxu1 %v7033_v10 }
 0xae4   :  { %6819 = vmatpush3.bf16.msra.mxu0 %v7032_v4 }
 0xae5   :  { %6820 = vmatprep.subr.bf16.mxu0 %v11825_v24  ;;  %v7040_v24 = vld [vmem:[%s11330_s8 + $0x2f0] sm:$0xff]  }
 0xae6   :  { %6622 = vmatpush3.bf16.msra.mxu1 %v7034_v9 }
 0xae7   :  { %6623 = vmatprep.subr.bf16.mxu1 %v7036_v14 }
 0xae8   :  { %6821 = vmatpush3.bf16.msra.mxu0 %v7035_v56 }
 0xaea   :  { %6624 = vmatpush3.bf16.msra.mxu1 %v7037_v23 }
 0xaeb   :  { %6823 = vmatmul.mubr.msk.bf16.vlgmr.msra.gmra.mrb[180].mxu0 %vm2627_vm9, %v11041_v53  ;;  %6625 = vmatprep.subr.bf16.mxu1 %v7038_v8  ;;  %v7043_v53 = vld [vmem:[%s11330_s8 + $0x2b8] sm:$0xff]  }
 0xaee   :  { %6626 = vmatpush3.bf16.msra.mxu1 %v7039_v37 }
 0xaef   :  { %6627 = vmatprep.subr.bf16.mxu1 %v7040_v24  ;;  %v6285_v24 = vld [vmem:[%s11333_s11] ss:$0 sm:$0xff] }
 0xaf2   :  { %6628 = vmatpush3.bf16.msra.mxu1 %v7041_v19 }
 0xaf3   :  { %6629 = vmatprep.subr.bf16.mxu1 %v7042_v25 }
 0xaf6   :  { %6630 = vmatpush3.bf16.msra.mxu1 %v7043_v53 }
 0xaf7   :  { %5978 = vmatprep.subr.bf16.mxu1 %v11823_v11 }
 0xaf9   :  { %5814 = vmatmul.mubr.bf16.vlgmr.msra.gmra.mrb[160].mxu1 %v11031_v38  ;;  %v7046_v38 = vld [vmem:[%s11332_s10 + $0x10] sm:$0xff]  }
 0xafa   :  { %5979 = vmatpush1.bf16.msra.mxu1 %v7044_v39 }
 0xafb   :  { %5980 = vmatprep.subr.bf16.mxu1 %v11823_v11 }
 0xafe   :  { %5981 = vmatpush1.bf16.msra.mxu1 %v7045_v12 }
 0xaff   :  { %5982 = vmatprep.subr.bf16.mxu1 %v11823_v11 }
 0xb02   :  { %5983 = vmatpush1.bf16.msra.mxu1 %v7046_v38 }
 0xb03   :  { %5984 = vmatprep.subr.bf16.mxu1 %v11823_v11 }
 0xb06   :  { %5985 = vmatpush1.bf16.msra.mxu1 %v7047_v31 }
 0xb07   :  { %5986 = vmatprep.subr.bf16.mxu1 %v11823_v11 }
 0xb0a   :  { %5987 = vmatpush1.bf16.msra.mxu1 %v7048_v28 }
 0xb0b   :  { %5988 = vmatprep.subr.bf16.mxu1 %v11823_v11 }
 0xb0e   :  { %5989 = vmatpush1.bf16.msra.mxu1 %v7049_v16 }
 0xb0f   :  { %5990 = vmatprep.subr.bf16.mxu1 %v11823_v11 }
 0xb12   :  { %5991 = vmatpush1.bf16.msra.mxu1 %v7050_v49 }
 0xb13   :  { %5992 = vmatprep.subr.bf16.mxu1 %v11823_v11 }
 0xb16   :  { %5993 = vmatpush1.bf16.msra.mxu1 %v7051_v51 }
 0xb17   :  { %5994 = vmatprep.subr.bf16.mxu1 %v11823_v11 }
 0xb1a   :  { %5995 = vmatpush1.bf16.msra.mxu1 %v7052_v46 }
 0xb1b   :  { %v6521_v18 = vpop.f32.mrb[168].mxu0  ;;  %5996 = vmatprep.subr.bf16.mxu1 %v11823_v11 }
 0xb1c   :  { %v6522_v45 = vpop.f32.mrb[169].mxu0 }
 0xb1d   :  { %v6523_v3 = vadd.f32 %v6522_v45, %v6521_v18  ;;  %v6524_v22 = vpop.f32.mrb[170].mxu0 }
 0xb1e   :  { %v6525_v6 = vpop.f32.mrb[171].mxu0  ;;  %5997 = vmatpush1.bf16.msra.mxu1 %v7053_v62 }
 0xb1f   :  { %5998 = vmatprep.subr.bf16.mxu1 %v11823_v11  ;;  %v5616_v59 = vadd.f32 %v6523_v3, %v6183_v26 }
 0xb22   :  { %5999 = vmatpush1.bf16.msra.mxu1 %v7054_v27 }
 0xb23   :  { %6000 = vmatprep.subr.bf16.mxu1 %v11823_v11 }
 0xb26   :  { %6001 = vmatpush1.bf16.msra.mxu1 %v7055_v43 }
 0xb8c   :  { %v6543_v5 = vpop.f32.mrb[152].mxu1 }
 0xb8d   :  { %v6544_v30 = vpop.f32.mrb[153].mxu1 }
 0xb8e   :  { %v6545_v54 = vadd.f32 %v6544_v30, %v6543_v5  ;;  %v6546_v61 = vpop.f32.mrb[154].mxu1  ;;  %v6565_v0 = vpop.f32.mrb[172].mxu0 }
 0xb8f   :  { %v6547_v34 = vpop.f32.mrb[155].mxu1  ;;  %v6566_v29 = vpop.f32.mrb[173].mxu0 }
 0xb90   :  { %v5656_v44 = vadd.f32 %v6545_v54, %v5616_v59  ;;  %v6567_v21 = vadd.f32 %v6566_v29, %v6565_v0  ;;  %v6568_v15 = vpop.f32.mrb[174].mxu0 }
 0xb91   :  { %v6569_v2 = vpop.f32.mrb[175].mxu0 }
 0xb92   :  { %v5696_v13 = vadd.f32 %v6567_v21, %v5656_v44 }
 0xbac   :  { %v6587_v36 = vpop.f32.mrb[156].mxu1 }
 0xbad   :  { %v6588_v11 = vpop.f32.mrb[157].mxu1 }
 0xbae   :  { %v6589_v41 = vadd.f32 %v6588_v11, %v6587_v36  ;;  %v6590_v57 = vpop.f32.mrb[158].mxu1  ;;  %v6609_v42 = vpop.f32.mrb[176].mxu0 }
 0xbaf   :  { %v6591_v33 = vpop.f32.mrb[159].mxu1  ;;  %v6610_v50 = vpop.f32.mrb[177].mxu0 }
 0xbb0   :  { %v5736_v40 = vadd.f32 %v6589_v41, %v5696_v13  ;;  %v6611_v58 = vadd.f32 %v6610_v50, %v6609_v42  ;;  %v6612_v1 = vpop.f32.mrb[178].mxu0 }
 0xbb1   :  { %v6613_v32 = vpop.f32.mrb[179].mxu0 }
 0xbb2   :  { %v5776_v55 = vadd.f32 %v6611_v58, %v5736_v40 }
 0xbbe   :  { %v5855_v47 = vpop.f32.mrb[180].mxu0 }
 0xbbf   :  { %v6824_v60 = vpop.f32.mrb[181].mxu0 }
 0xbc0   :  { %v5858_v35 = vpop.f32.mrb[182].mxu0 }
 0xbc1   :  { %v6825_v52 = vpop.f32.mrb[183].mxu0 }
 0xbcc   :  { %v6631_v20 = vpop.f32.mrb[160].mxu1 }
 0xbcd   :  { %v6632_v63 = vpop.f32.mrb[161].mxu1 }
 0xbce   :  { %v6633_v17 = vadd.f32 %v6632_v63, %v6631_v20  ;;  %v6634_v7 = vpop.f32.mrb[162].mxu1 }
 0xbcf   :  { %v6635_v48 = vpop.f32.mrb[163].mxu1 }
 0xbd0   :  { %v5816_v10 = vadd.f32 %v6633_v17, %v5776_v55 }
 0xbd2   :  { %v5856_v4 = vadd.f32 %v5855_v47, %v5816_v10 }
 0xbd4   :  { %v5861_v9 = vmax.f32 %v5856_v4, 0.0 }
 0xbd6   :  { %v5862_v14 = vpack.c.bf16 %v5861_v9, %v5861_v9 }
 0xbd8   :  { %v5867_v56 = vrot.slane %v5862_v14, 2  ;;  %v5864_v23 = vrot.slane %v5862_v14, 1 }
 0xbda   :  { %6298 = vmatprep.mubr.msk.bf16.mxu1 %vm2627_vm9, %v5867_v56  ;;  %5865 = vrot.lane.b32.xlu0 %v5864_v23, %s7105_s20 }
 0xc4c   :  { %v5866_v8 = vpop.permute.xlu0 %5865 }
 0xc4d   :  { %v5870_v37 = vsel %vm2627_vm9, %v5862_v14, %v5866_v8 }
 0xc4e   :  { %6011 = vmatmul.mubr.bf16.vlgmr.msra.gmra.mrb[164].mxu1 %v5870_v37 }
 0xd21   :  { %v6012_v19 = vpop.f32.mrb[164].mxu1 }
 0xd22   :  { %v6013_v25 = vadd.f32 %v6285_v24, %v6012_v19  ;;  %v6014_v53 = vpop.f32.mrb[165].mxu1 }
 0xd23   :  { %v6015_v18 = vpop.f32.mrb[166].mxu1 }
 0xd24   :  { %6018 = vst [vmem:[#allocation2] sm:$0x3] %v6013_v25  ;;  %v6016_v45 = vpop.f32.mrb[167].mxu1 }
 0xd25   :  { %7068 = shalt.err (!%p7065_p4)
}
 0xd26   :  { %s7069_s11 = scalar_lea.hbm %s11334_s12, 32 }
 0xd27   :  { %p7070_p5 = scmp.ne.s32.totalorder %s11334_s12, %s7069_s11  ;;  %p7073_p6 = scmp.lt.u32.totalorder %s7069_s11, %s11334_s12 }
 0xd29   :  { %p7075_p7 = pnand %p7073_p6, %p7070_p5 }
 0xd2b   :  { %7078 = shalt.err (!%p7075_p7)
}
 0xd2c   :  { %6028 = dma.vmem_to_hbm [thread:$0]  %s6026_s18, 32, %s11334_s12, [#allocation3]  }
 0xd2d   :  { %7079 = dma.done.wait [#allocation3], 32  }
 0xd2e   :  { %7080 = vsyncadd [#allocation3], 4294967264 }
 0xd2f   :  { %6032 = vsyncpa [#allocation3], 1 }

</bundles_post_ra>
